<compile_context>
chip_gen: v7x
topology: tpu7x:2x2x1
jax: 0.10.0
libtpu: 0.0.40
codegen_flags: <defaults>
</compile_context>

<pallas_src>
import jax
import jax.numpy as jnp
import numpy as np
from jax.experimental import pallas as pl
from jax.experimental.pallas import tpu as pltpu

GROUP_NUM = 4
IN_CHANNELS = 7                 # 3 xyz + 4 group channels (argmax over ch 3: -> group id)
LOCAL_CHANNELS = (32, 64, 128)  # scaled-down version of (64, 64, 64, 128, 1024)
GLOBAL_CHANNELS = (64, 32)      # scaled-down version of (512, 256)
REDUCTION = 8
EXC_HIDDEN = max(LOCAL_CHANNELS[-1] // REDUCTION, 4)

PARAM_ORDER = ["wl0", "bl0", "wl1", "bl1", "wl2", "bl2",
               "we0", "be0", "we1", "be1",
               "wg0", "bg0", "wg1", "bg1"]

_PARAM_SHAPES = {
    "wl0": (IN_CHANNELS, LOCAL_CHANNELS[0]),         "bl0": (1, LOCAL_CHANNELS[0]),
    "wl1": (LOCAL_CHANNELS[0], LOCAL_CHANNELS[1]),   "bl1": (1, LOCAL_CHANNELS[1]),
    "wl2": (LOCAL_CHANNELS[1], LOCAL_CHANNELS[2]),   "bl2": (1, LOCAL_CHANNELS[2]),
    "we0": (LOCAL_CHANNELS[2], EXC_HIDDEN),          "be0": (1, EXC_HIDDEN),
    "we1": (EXC_HIDDEN, LOCAL_CHANNELS[2]),          "be1": (1, LOCAL_CHANNELS[2]),
    "wg0": (LOCAL_CHANNELS[2], GLOBAL_CHANNELS[0]),  "bg0": (1, GLOBAL_CHANNELS[0]),
    "wg1": (GLOBAL_CHANNELS[0], GLOBAL_CHANNELS[1]), "bg1": (1, GLOBAL_CHANNELS[1]),
}
_BLOB_LANES = 128   # >= max cout; every param's lane dim fits one 128-lane tile


def _make_layout():
    layout, row = {}, 0
    for k in PARAM_ORDER:
        layout[k] = row
        row += -(-_PARAM_SHAPES[k][0] // 8) * 8   # 8-sublane-aligned slots
    return layout, row


_LAYOUT, _BLOB_ROWS = _make_layout()

# dot_general dims contracting dim 0 of BOTH operands (A^T @ B on the MXU).
_TN = (((0,), (0,)), ((), ()))
_HP = jax.lax.Precision.HIGHEST


# ----------------------------------------------------------------------------
# Pallas kernel: entire forward hot path in one VMEM-resident pass.
# ----------------------------------------------------------------------------
def pointnet_kernel(pts_ref, prm_ref, feat_ref, idx_ref):
    B, Cin, N = pts_ref.shape

    def param(name):
        r, c = _PARAM_SHAPES[name]
        r0 = _LAYOUT[name]
        return prm_ref[r0:r0 + r, 0:c]           # static slice = cheap view load

    # ---- first local layer + channel-major group mask, per batch ------------
    # points stay (C, N): the Conv1d(k=1) contracts the channel (sublane) axis
    # directly, so no data transpose is needed anywhere.
    wl0, bl0 = param("wl0"), param("bl0")
    sub_iota = jax.lax.broadcasted_iota(jnp.int32, (GROUP_NUM, N), 0)
    h0_parts, gm_parts = [], []
    for b in range(B):
        x_b = pts_ref[b]                                              # (Cin, N)
        h0_parts.append(
            jax.lax.dot_general(x_b, wl0, _TN, precision=_HP,
                                preferred_element_type=jnp.float32))  # (N, C1)
        xg = x_b[3:3 + GROUP_NUM, :]                                  # (4, N)
        chmax = jnp.max(xg, axis=0, keepdims=True)                    # (1, N)
        first = jnp.min(jnp.where(xg >= chmax, sub_iota, GROUP_NUM),
                        axis=0, keepdims=True)            # first-occurrence argmax
        gm_parts.append((sub_iota == first).astype(jnp.float32))      # (4, N)

    h = jnp.maximum(jnp.concatenate(h0_parts, axis=0) + bl0, 0.0)     # (BN, C1)
    gm = jnp.concatenate(gm_parts, axis=1)                            # (4, BN)

    # ---- remaining local layers (Conv1d k=1 + folded eval-BN + ReLU) --------
    for wk, bk in (("wl1", "bl1"), ("wl2", "bl2")):
        h = jnp.maximum(
            jnp.dot(h, param(wk), precision=_HP,
                    preferred_element_type=jnp.float32) + param(bk), 0.0)
    Cl = h.shape[-1]                                                  # (BN, Cl)

    # ---- squeeze: per-group mean over the whole batch ------------------------
    # counts via a lane reduce (free XLU slot) instead of a 2nd MXU contraction
    cnt = jnp.sum(gm, axis=1, keepdims=True)                          # (4, 1)
    gsum = jnp.dot(gm, h, precision=_HP,
                   preferred_element_type=jnp.float32)                # (4, Cl)
    z = gsum / jnp.maximum(cnt, 1.0)             # empty group -> 0 (matches torch)

    # ---- excitation: Linear -> ReLU -> Linear -> Sigmoid ---------------------
    e = jnp.maximum(
        jnp.dot(z, param("we0"), precision=_HP,
                preferred_element_type=jnp.float32) + param("be0"), 0.0)
    s = jax.nn.sigmoid(
        jnp.dot(e, param("we1"), precision=_HP,
                preferred_element_type=jnp.float32) + param("be1"))   # (4, Cl)

    # ---- fused: per-point rescale + global max-pool + first-index argmax -----
    # Single chunked pass; u1 and a (B, N, Cl) int32 iota never materialize.
    T = 32
    while N % T:
        T //= 2
    n_chunk = N // T
    chunk_iota = jax.lax.broadcasted_iota(jnp.int32, (T, Cl), 0)

    gmax_rows, idx_rows = [], []
    for b in range(B):
        gm_b = gm[:, b * N:(b + 1) * N]                               # (4, N)
        scale_b = jax.lax.dot_general(gm_b, s, _TN, precision=_HP,
                                      preferred_element_type=jnp.float32)  # (N, Cl)
        m = jnp.full((1, Cl), -jnp.inf, jnp.float32)
        ix = jnp.zeros((1, Cl), jnp.int32)
        for c in range(n_chunk):
            r0 = c * T
            u_c = h[b * N + r0:b * N + r0 + T, :] * scale_b[r0:r0 + T, :]  # (T, Cl)
            cm = jnp.max(u_c, axis=0, keepdims=True)                  # chunk max
            ci = jnp.min(jnp.where(u_c == cm, chunk_iota, T),
                         axis=0, keepdims=True) + r0                  # chunk first idx
            better = cm > m                 # strict > keeps earlier (first) index
            ix = jnp.where(better, ci, ix)
            m = jnp.where(better, cm, m)
        gmax_rows.append(m)
        idx_rows.append(ix)

    gmax = jnp.concatenate(gmax_rows, axis=0)                         # (B, Cl)
    idx_ref[...] = jnp.concatenate(idx_rows, axis=0).astype(jnp.int32)

    # ---- mlp_global: (Linear + folded eval-BN + ReLU) x 2 --------------------
    g = gmax
    for wk, bk in (("wg0", "bg0"), ("wg1", "bg1")):
        g = jnp.maximum(
            jnp.dot(g, param(wk), precision=_HP,
                    preferred_element_type=jnp.float32) + param(bk), 0.0)
    feat_ref[...] = g


# ----------------------------------------------------------------------------
# Wrapper: pack params into one blob, then a single no-grid pallas_call.
# ----------------------------------------------------------------------------
def pack_params(params):
    """Pack all 14 weight/bias tensors into one (rows, 128) f32 blob so the
    kernel gets a single parameter DMA instead of 14 tiny ones."""
    blob = jnp.zeros((_BLOB_ROWS, _BLOB_LANES), jnp.float32)
    for k in PARAM_ORDER:
        r, c = _PARAM_SHAPES[k]
        blob = blob.at[_LAYOUT[k]:_LAYOUT[k] + r, 0:c].set(
            jnp.asarray(params[k], jnp.float32).reshape(r, c))
    return blob


def pointnet_forward(points, params):
    B, C, N = points.shape
    assert C == IN_CHANNELS
    blob = pack_params(params)
    feat, idx = pl.pallas_call(
        pointnet_kernel,
        out_shape=(jax.ShapeDtypeStruct((B, GLOBAL_CHANNELS[-1]), jnp.float32),
                   jax.ShapeDtypeStruct((B, LOCAL_CHANNELS[-1]), jnp.int32)),
        # No grid: the whole (toy-sized) problem is one VMEM-resident block.
        # TODO(synk): for realistic PointNet sizes (N~2048, Cl=1024) switch to a
        # BN-tiled grid with dimension_semantics=("parallel", ...) and a
        # two-phase squeeze (partial gsum/cnt with pl.when init/finalize), plus
        # bf16 dots on v6e/v7x, to fit v7x's 64 MiB VMEM and use both cores.
        compiler_params=pltpu.CompilerParams(vmem_limit_bytes=32 * 1024 * 1024),
    )(points.astype(jnp.float32), blob)
    return {"feature": feat, "max_indices": idx}


# ----------------------------------------------------------------------------
# Deterministic parameter init (eval-mode BatchNorm folded into the weights).
# ----------------------------------------------------------------------------
def _folded_linear(key, cin, cout):
    kw, kg, kb, km, kv = jax.random.split(key, 5)
    w = jax.random.normal(kw, (cin, cout), jnp.float32) * jnp.sqrt(2.0 / cin)
    b = jnp.zeros((cout,), jnp.float32)                  # reset_parameters zeros biases
    gamma = jax.random.uniform(kg, (cout,), jnp.float32, 0.8, 1.2)
    beta = 0.05 * jax.random.normal(kb, (cout,), jnp.float32)
    mean = 0.05 * jax.random.normal(km, (cout,), jnp.float32)
    var = jax.random.uniform(kv, (cout,), jnp.float32, 0.8, 1.2)
    s = gamma / jnp.sqrt(var + 1e-5)
    return w * s[None, :], ((b - mean) * s + beta)[None, :]


def _plain_linear(key, cin, cout):
    w = jax.random.normal(key, (cin, cout), jnp.float32) * jnp.sqrt(1.0 / cin)
    b = jnp.zeros((1, cout), jnp.float32)
    return w, b


def init_params(key):
    keys = jax.random.split(key, 16)
    params, ki = {}, 0
    dims = (IN_CHANNELS,) + LOCAL_CHANNELS
    for li, (cin, cout) in enumerate(zip(dims[:-1], dims[1:])):
        params[f"wl{li}"], params[f"bl{li}"] = _folded_linear(keys[ki], cin, cout); ki += 1
    params["we0"], params["be0"] = _plain_linear(keys[ki], LOCAL_CHANNELS[-1], EXC_HIDDEN); ki += 1
    params["we1"], params["be1"] = _plain_linear(keys[ki], EXC_HIDDEN, LOCAL_CHANNELS[-1]); ki += 1
    gdims = (LOCAL_CHANNELS[-1],) + GLOBAL_CHANNELS
    for li, (cin, cout) in enumerate(zip(gdims[:-1], gdims[1:])):
        params[f"wg{li}"], params[f"bg{li}"] = _folded_linear(keys[ki], cin, cout); ki += 1
    return params


# ----------------------------------------------------------------------------
# Pure-JAX reference (same math, highest-precision dots) for verification.
# ----------------------------------------------------------------------------
def pointnet_reference(points, params):
    hp = jax.lax.Precision.HIGHEST
    B, C, N = points.shape
    x = jnp.transpose(points, (0, 2, 1)).astype(jnp.float32)
    gid = jnp.argmax(points[:, 3:, :], axis=1)
    gm = jax.nn.one_hot(gid, GROUP_NUM, dtype=jnp.float32).reshape(B * N, GROUP_NUM)
    h = x.reshape(B * N, C)
    for wk, bk in (("wl0", "bl0"), ("wl1", "bl1"), ("wl2", "bl2")):
        h = jnp.maximum(jnp.dot(h, params[wk], precision=hp) + params[bk], 0.0)
    cnt = jnp.sum(gm, axis=0)
    z = jnp.matmul(gm.T, h, precision=hp) / jnp.maximum(cnt, 1.0)[:, None]
    e = jnp.maximum(jnp.dot(z, params["we0"], precision=hp) + params["be0"], 0.0)
    s = jax.nn.sigmoid(jnp.dot(e, params["we1"], precision=hp) + params["be1"])
    u1 = (h * jnp.matmul(gm, s, precision=hp)).reshape(B, N, -1)
    gf = jnp.max(u1, axis=1)
    idx = jnp.argmax(u1, axis=1).astype(jnp.int32)
    g = jnp.maximum(jnp.dot(gf, params["wg0"], precision=hp) + params["bg0"], 0.0)
    g = jnp.maximum(jnp.dot(g, params["wg1"], precision=hp) + params["bg1"], 0.0)
    return {"feature": g, "max_indices": idx}


if __name__ == "__main__":
    key = jax.random.PRNGKey(0)
    kp, kx = jax.random.split(key)
    params = init_params(kp)

    B, N = 2, 128
    points = jax.random.normal(kx, (B, IN_CHANNELS, N), jnp.float32)

    out = pointnet_forward(points, params)
    jax.block_until_ready(out)

    ref = pointnet_reference(points, params)
    np.testing.assert_allclose(np.asarray(out["feature"]), np.asarray(ref["feature"]),
                               rtol=1e-3, atol=1e-3)
    assert out["feature"].shape == (B, GLOBAL_CHANNELS[-1])
    assert out["max_indices"].shape == (B, LOCAL_CHANNELS[-1])
    match = float(jnp.mean((out["max_indices"] == ref["max_indices"]).astype(jnp.float32)))
    assert match >= 0.99, f"max_indices agreement too low: {match:.4f}"
    print("KERNEL_OK")
</pallas_src>

<mosaic_0001>
module attributes {stable_mosaic.version = 11 : i64} {
  func.func @pointnet_kernel(%arg0: memref<2x7x128xf32, #tpu.memory_space<vmem>>, %arg1: memref<496x128xf32, #tpu.memory_space<vmem>>, %arg2: memref<2x32xf32, #tpu.memory_space<vmem>>, %arg3: memref<2x128xi32, #tpu.memory_space<vmem>>) attributes {dimension_semantics = [], scalar_prefetch = 0 : i64, scratch_operands = 0 : i64, tpu.core_type = #tpu.core_type<tc>} {
    %c0 = arith.constant 0 : index
    %c0_0 = arith.constant 0 : index
    %0 = vector.load %arg1[%c0, %c0_0] : memref<496x128xf32, #tpu.memory_space<vmem>>, vector<7x32xf32>
    %c8 = arith.constant 8 : index
    %c0_1 = arith.constant 0 : index
    %1 = vector.load %arg1[%c8, %c0_1] : memref<496x128xf32, #tpu.memory_space<vmem>>, vector<1x32xf32>
    %2 = tpu.iota {dimensions = array<i32: 0>} : vector<4x128xi32>
    %c0_2 = arith.constant 0 : index
    %c0_3 = arith.constant 0 : index
    %c0_4 = arith.constant 0 : index
    %3 = vector.load %arg0[%c0_2, %c0_3, %c0_4] : memref<2x7x128xf32, #tpu.memory_space<vmem>>, vector<1x7x128xf32>
    %4 = vector.shape_cast %3 : vector<1x7x128xf32> to vector<7x128xf32>
    %cst = arith.constant dense<0.000000e+00> : vector<128x32xf32>
    %5 = tpu.matmul %4, %0, %cst {dimension_numbers = #tpu.dot_dimension_numbers<[0], [0], [1], [1], [0, 1, 1, 1], [], []>, precision = #tpu.contract_precision<fp32>} : vector<7x128xf32>, vector<7x32xf32>, vector<128x32xf32> -> vector<128x32xf32>
    %6 = vector.extract_strided_slice %4 {offsets = [3, 0], sizes = [4, 128], strides = [1, 1]} : vector<7x128xf32> to vector<4x128xf32>
    %cst_5 = arith.constant dense<0xFF800000> : vector<128xf32>
    %7 = vector.multi_reduction <maximumf>, %6, %cst_5 [0] : vector<4x128xf32> to vector<128xf32>
    %8 = vector.shape_cast %7 : vector<128xf32> to vector<1x128xf32>
    %9 = vector.broadcast %8 : vector<1x128xf32> to vector<4x128xf32>
    %10 = arith.cmpf oge, %6, %9 : vector<4x128xf32>
    %c4_i32 = arith.constant 4 : i32
    %11 = vector.broadcast %c4_i32 : i32 to vector<4x128xi32>
    %12 = arith.select %10, %2, %11 : vector<4x128xi1>, vector<4x128xi32>
    %cst_6 = arith.constant dense<2147483647> : vector<128xi32>
    %13 = vector.multi_reduction <minsi>, %12, %cst_6 [0] : vector<4x128xi32> to vector<128xi32>
    %14 = vector.shape_cast %13 : vector<128xi32> to vector<1x128xi32>
    %15 = vector.broadcast %14 : vector<1x128xi32> to vector<4x128xi32>
    %16 = arith.cmpi eq, %2, %15 : vector<4x128xi32>
    %17 = arith.extui %16 : vector<4x128xi1> to vector<4x128xi32>
    %18 = arith.sitofp %17 : vector<4x128xi32> to vector<4x128xf32>
    %c1 = arith.constant 1 : index
    %c0_7 = arith.constant 0 : index
    %c0_8 = arith.constant 0 : index
    %19 = vector.load %arg0[%c1, %c0_7, %c0_8] : memref<2x7x128xf32, #tpu.memory_space<vmem>>, vector<1x7x128xf32>
    %20 = vector.shape_cast %19 : vector<1x7x128xf32> to vector<7x128xf32>
    %cst_9 = arith.constant dense<0.000000e+00> : vector<128x32xf32>
    %21 = tpu.matmul %20, %0, %cst_9 {dimension_numbers = #tpu.dot_dimension_numbers<[0], [0], [1], [1], [0, 1, 1, 1], [], []>, precision = #tpu.contract_precision<fp32>} : vector<7x128xf32>, vector<7x32xf32>, vector<128x32xf32> -> vector<128x32xf32>
    %22 = vector.extract_strided_slice %20 {offsets = [3, 0], sizes = [4, 128], strides = [1, 1]} : vector<7x128xf32> to vector<4x128xf32>
    %cst_10 = arith.constant dense<0xFF800000> : vector<128xf32>
    %23 = vector.multi_reduction <maximumf>, %22, %cst_10 [0] : vector<4x128xf32> to vector<128xf32>
    %24 = vector.shape_cast %23 : vector<128xf32> to vector<1x128xf32>
    %25 = vector.broadcast %24 : vector<1x128xf32> to vector<4x128xf32>
    %26 = arith.cmpf oge, %22, %25 : vector<4x128xf32>
    %c4_i32_11 = arith.constant 4 : i32
    %27 = vector.broadcast %c4_i32_11 : i32 to vector<4x128xi32>
    %28 = arith.select %26, %2, %27 : vector<4x128xi1>, vector<4x128xi32>
    %cst_12 = arith.constant dense<2147483647> : vector<128xi32>
    %29 = vector.multi_reduction <minsi>, %28, %cst_12 [0] : vector<4x128xi32> to vector<128xi32>
    %30 = vector.shape_cast %29 : vector<128xi32> to vector<1x128xi32>
    %31 = vector.broadcast %30 : vector<1x128xi32> to vector<4x128xi32>
    %32 = arith.cmpi eq, %2, %31 : vector<4x128xi32>
    %33 = arith.extui %32 : vector<4x128xi1> to vector<4x128xi32>
    %34 = arith.sitofp %33 : vector<4x128xi32> to vector<4x128xf32>
    %35 = tpu.concatenate %5, %21 in 0 : vector<128x32xf32>, vector<128x32xf32> -> vector<256x32xf32>
    %36 = vector.broadcast %1 : vector<1x32xf32> to vector<256x32xf32>
    %37 = arith.addf %35, %36 : vector<256x32xf32>
    %cst_13 = arith.constant 0.000000e+00 : f32
    %38 = vector.broadcast %cst_13 : f32 to vector<256x32xf32>
    %39 = arith.maximumf %37, %38 : vector<256x32xf32>
    %40 = tpu.concatenate %18, %34 in 1 : vector<4x128xf32>, vector<4x128xf32> -> vector<4x256xf32>
    %c16 = arith.constant 16 : index
    %c0_14 = arith.constant 0 : index
    %41 = vector.load %arg1[%c16, %c0_14] : memref<496x128xf32, #tpu.memory_space<vmem>>, vector<32x64xf32>
    %cst_15 = arith.constant dense<0.000000e+00> : vector<256x64xf32>
    %42 = tpu.matmul %39, %41, %cst_15 {dimension_numbers = #tpu.dot_dimension_numbers<[1], [0], [0], [1], [0, 0, 1, 1], [], []>, precision = #tpu.contract_precision<fp32>} : vector<256x32xf32>, vector<32x64xf32>, vector<256x64xf32> -> vector<256x64xf32>
    %c48 = arith.constant 48 : index
    %c0_16 = arith.constant 0 : index
    %43 = vector.load %arg1[%c48, %c0_16] : memref<496x128xf32, #tpu.memory_space<vmem>>, vector<1x64xf32>
    %44 = vector.broadcast %43 : vector<1x64xf32> to vector<256x64xf32>
    %45 = arith.addf %42, %44 : vector<256x64xf32>
    %cst_17 = arith.constant 0.000000e+00 : f32
    %46 = vector.broadcast %cst_17 : f32 to vector<256x64xf32>
    %47 = arith.maximumf %45, %46 : vector<256x64xf32>
    %c56 = arith.constant 56 : index
    %c0_18 = arith.constant 0 : index
    %48 = vector.load %arg1[%c56, %c0_18] : memref<496x128xf32, #tpu.memory_space<vmem>>, vector<64x128xf32>
    %cst_19 = arith.constant dense<0.000000e+00> : vector<256x128xf32>
    %49 = tpu.matmul %47, %48, %cst_19 {dimension_numbers = #tpu.dot_dimension_numbers<[1], [0], [0], [1], [0, 0, 1, 1], [], []>, precision = #tpu.contract_precision<fp32>} : vector<256x64xf32>, vector<64x128xf32>, vector<256x128xf32> -> vector<256x128xf32>
    %c120 = arith.constant 120 : index
    %c0_20 = arith.constant 0 : index
    %50 = vector.load %arg1[%c120, %c0_20] : memref<496x128xf32, #tpu.memory_space<vmem>>, vector<1x128xf32>
    %51 = vector.broadcast %50 : vector<1x128xf32> to vector<256x128xf32>
    %52 = arith.addf %49, %51 : vector<256x128xf32>
    %cst_21 = arith.constant 0.000000e+00 : f32
    %53 = vector.broadcast %cst_21 : f32 to vector<256x128xf32>
    %54 = arith.maximumf %52, %53 : vector<256x128xf32>
    %cst_22 = arith.constant dense<0.000000e+00> : vector<4xf32>
    %55 = vector.multi_reduction <add>, %40, %cst_22 [1] : vector<4x256xf32> to vector<4xf32>
    %56 = vector.shape_cast %55 : vector<4xf32> to vector<4x1xf32>
    %cst_23 = arith.constant dense<0.000000e+00> : vector<4x128xf32>
    %57 = tpu.matmul %40, %54, %cst_23 {dimension_numbers = #tpu.dot_dimension_numbers<[1], [0], [0], [1], [0, 0, 1, 1], [], []>, precision = #tpu.contract_precision<fp32>} : vector<4x256xf32>, vector<256x128xf32>, vector<4x128xf32> -> vector<4x128xf32>
    %cst_24 = arith.constant 1.000000e+00 : f32
    %58 = vector.broadcast %cst_24 : f32 to vector<4x1xf32>
    %59 = arith.maximumf %56, %58 : vector<4x1xf32>
    %60 = vector.broadcast %59 : vector<4x1xf32> to vector<4x128xf32>
    %61 = arith.divf %57, %60 : vector<4x128xf32>
    %c128 = arith.constant 128 : index
    %c0_25 = arith.constant 0 : index
    %62 = vector.load %arg1[%c128, %c0_25] : memref<496x128xf32, #tpu.memory_space<vmem>>, vector<128x16xf32>
    %cst_26 = arith.constant dense<0.000000e+00> : vector<4x16xf32>
    %63 = tpu.matmul %61, %62, %cst_26 {dimension_numbers = #tpu.dot_dimension_numbers<[1], [0], [0], [1], [0, 0, 1, 1], [], []>, precision = #tpu.contract_precision<fp32>} : vector<4x128xf32>, vector<128x16xf32>, vector<4x16xf32> -> vector<4x16xf32>
    %c256 = arith.constant 256 : index
    %c0_27 = arith.constant 0 : index
    %64 = vector.load %arg1[%c256, %c0_27] : memref<496x128xf32, #tpu.memory_space<vmem>>, vector<1x16xf32>
    %65 = vector.broadcast %64 : vector<1x16xf32> to vector<4x16xf32>
    %66 = arith.addf %63, %65 : vector<4x16xf32>
    %cst_28 = arith.constant 0.000000e+00 : f32
    %67 = vector.broadcast %cst_28 : f32 to vector<4x16xf32>
    %68 = arith.maximumf %66, %67 : vector<4x16xf32>
    %c264 = arith.constant 264 : index
    %c0_29 = arith.constant 0 : index
    %69 = vector.load %arg1[%c264, %c0_29] : memref<496x128xf32, #tpu.memory_space<vmem>>, vector<16x128xf32>
    %cst_30 = arith.constant dense<0.000000e+00> : vector<4x128xf32>
    %70 = tpu.matmul %68, %69, %cst_30 {dimension_numbers = #tpu.dot_dimension_numbers<[1], [0], [0], [1], [0, 0, 1, 1], [], []>, precision = #tpu.contract_precision<fp32>} : vector<4x16xf32>, vector<16x128xf32>, vector<4x128xf32> -> vector<4x128xf32>
    %c280 = arith.constant 280 : index
    %c0_31 = arith.constant 0 : index
    %71 = vector.load %arg1[%c280, %c0_31] : memref<496x128xf32, #tpu.memory_space<vmem>>, vector<1x128xf32>
    %72 = vector.broadcast %71 : vector<1x128xf32> to vector<4x128xf32>
    %73 = arith.addf %70, %72 : vector<4x128xf32>
    %74 = arith.negf %73 : vector<4x128xf32>
    %75 = math.exp %74 : vector<4x128xf32>
    %cst_32 = arith.constant 1.000000e+00 : f32
    %76 = vector.broadcast %cst_32 : f32 to vector<4x128xf32>
    %77 = arith.addf %76, %75 : vector<4x128xf32>
    %78 = arith.divf %76, %77 : vector<4x128xf32>
    %79 = tpu.iota {dimensions = array<i32: 0>} : vector<32x128xi32>
    %80 = vector.extract_strided_slice %40 {offsets = [0, 0], sizes = [4, 128], strides = [1, 1]} : vector<4x256xf32> to vector<4x128xf32>
    %cst_33 = arith.constant dense<0.000000e+00> : vector<128x128xf32>
    %81 = tpu.matmul %80, %78, %cst_33 {dimension_numbers = #tpu.dot_dimension_numbers<[0], [0], [1], [1], [0, 1, 1, 1], [], []>, precision = #tpu.contract_precision<fp32>} : vector<4x128xf32>, vector<4x128xf32>, vector<128x128xf32> -> vector<128x128xf32>
    %cst_34 = arith.constant 0xFF800000 : f32
    %82 = vector.broadcast %cst_34 : f32 to vector<1x128xf32>
    %c0_i32 = arith.constant 0 : i32
    %83 = vector.broadcast %c0_i32 : i32 to vector<1x128xi32>
    %84 = vector.extract_strided_slice %54 {offsets = [0, 0], sizes = [32, 128], strides = [1, 1]} : vector<256x128xf32> to vector<32x128xf32>
    %85 = vector.extract_strided_slice %81 {offsets = [0, 0], sizes = [32, 128], strides = [1, 1]} : vector<128x128xf32> to vector<32x128xf32>
    %86 = arith.mulf %84, %85 : vector<32x128xf32>
    %cst_35 = arith.constant dense<0xFF800000> : vector<128xf32>
    %87 = vector.multi_reduction <maximumf>, %86, %cst_35 [0] : vector<32x128xf32> to vector<128xf32>
    %88 = vector.shape_cast %87 : vector<128xf32> to vector<1x128xf32>
    %89 = vector.broadcast %88 : vector<1x128xf32> to vector<32x128xf32>
    %90 = arith.cmpf oeq, %86, %89 : vector<32x128xf32>
    %c32_i32 = arith.constant 32 : i32
    %91 = vector.broadcast %c32_i32 : i32 to vector<32x128xi32>
    %92 = arith.select %90, %79, %91 : vector<32x128xi1>, vector<32x128xi32>
    %cst_36 = arith.constant dense<2147483647> : vector<128xi32>
    %93 = vector.multi_reduction <minsi>, %92, %cst_36 [0] : vector<32x128xi32> to vector<128xi32>
    %94 = vector.shape_cast %93 : vector<128xi32> to vector<1x128xi32>
    %c0_i32_37 = arith.constant 0 : i32
    %95 = vector.broadcast %c0_i32_37 : i32 to vector<1x128xi32>
    %96 = arith.addi %94, %95 : vector<1x128xi32>
    %97 = arith.cmpf ogt, %88, %82 : vector<1x128xf32>
    %98 = arith.select %97, %96, %83 : vector<1x128xi1>, vector<1x128xi32>
    %99 = arith.select %97, %88, %82 : vector<1x128xi1>, vector<1x128xf32>
    %100 = vector.extract_strided_slice %54 {offsets = [32, 0], sizes = [32, 128], strides = [1, 1]} : vector<256x128xf32> to vector<32x128xf32>
    %101 = vector.extract_strided_slice %81 {offsets = [32, 0], sizes = [32, 128], strides = [1, 1]} : vector<128x128xf32> to vector<32x128xf32>
    %102 = arith.mulf %100, %101 : vector<32x128xf32>
    %cst_38 = arith.constant dense<0xFF800000> : vector<128xf32>
    %103 = vector.multi_reduction <maximumf>, %102, %cst_38 [0] : vector<32x128xf32> to vector<128xf32>
    %104 = vector.shape_cast %103 : vector<128xf32> to vector<1x128xf32>
    %105 = vector.broadcast %104 : vector<1x128xf32> to vector<32x128xf32>
    %106 = arith.cmpf oeq, %102, %105 : vector<32x128xf32>
    %c32_i32_39 = arith.constant 32 : i32
    %107 = vector.broadcast %c32_i32_39 : i32 to vector<32x128xi32>
    %108 = arith.select %106, %79, %107 : vector<32x128xi1>, vector<32x128xi32>
    %cst_40 = arith.constant dense<2147483647> : vector<128xi32>
    %109 = vector.multi_reduction <minsi>, %108, %cst_40 [0] : vector<32x128xi32> to vector<128xi32>
    %110 = vector.shape_cast %109 : vector<128xi32> to vector<1x128xi32>
    %c32_i32_41 = arith.constant 32 : i32
    %111 = vector.broadcast %c32_i32_41 : i32 to vector<1x128xi32>
    %112 = arith.addi %110, %111 : vector<1x128xi32>
    %113 = arith.cmpf ogt, %104, %99 : vector<1x128xf32>
    %114 = arith.select %113, %112, %98 : vector<1x128xi1>, vector<1x128xi32>
    %115 = arith.select %113, %104, %99 : vector<1x128xi1>, vector<1x128xf32>
    %116 = vector.extract_strided_slice %54 {offsets = [64, 0], sizes = [32, 128], strides = [1, 1]} : vector<256x128xf32> to vector<32x128xf32>
    %117 = vector.extract_strided_slice %81 {offsets = [64, 0], sizes = [32, 128], strides = [1, 1]} : vector<128x128xf32> to vector<32x128xf32>
    %118 = arith.mulf %116, %117 : vector<32x128xf32>
    %cst_42 = arith.constant dense<0xFF800000> : vector<128xf32>
    %119 = vector.multi_reduction <maximumf>, %118, %cst_42 [0] : vector<32x128xf32> to vector<128xf32>
    %120 = vector.shape_cast %119 : vector<128xf32> to vector<1x128xf32>
    %121 = vector.broadcast %120 : vector<1x128xf32> to vector<32x128xf32>
    %122 = arith.cmpf oeq, %118, %121 : vector<32x128xf32>
    %c32_i32_43 = arith.constant 32 : i32
    %123 = vector.broadcast %c32_i32_43 : i32 to vector<32x128xi32>
    %124 = arith.select %122, %79, %123 : vector<32x128xi1>, vector<32x128xi32>
    %cst_44 = arith.constant dense<2147483647> : vector<128xi32>
    %125 = vector.multi_reduction <minsi>, %124, %cst_44 [0] : vector<32x128xi32> to vector<128xi32>
    %126 = vector.shape_cast %125 : vector<128xi32> to vector<1x128xi32>
    %c64_i32 = arith.constant 64 : i32
    %127 = vector.broadcast %c64_i32 : i32 to vector<1x128xi32>
    %128 = arith.addi %126, %127 : vector<1x128xi32>
    %129 = arith.cmpf ogt, %120, %115 : vector<1x128xf32>
    %130 = arith.select %129, %128, %114 : vector<1x128xi1>, vector<1x128xi32>
    %131 = arith.select %129, %120, %115 : vector<1x128xi1>, vector<1x128xf32>
    %132 = vector.extract_strided_slice %54 {offsets = [96, 0], sizes = [32, 128], strides = [1, 1]} : vector<256x128xf32> to vector<32x128xf32>
    %133 = vector.extract_strided_slice %81 {offsets = [96, 0], sizes = [32, 128], strides = [1, 1]} : vector<128x128xf32> to vector<32x128xf32>
    %134 = arith.mulf %132, %133 : vector<32x128xf32>
    %cst_45 = arith.constant dense<0xFF800000> : vector<128xf32>
    %135 = vector.multi_reduction <maximumf>, %134, %cst_45 [0] : vector<32x128xf32> to vector<128xf32>
    %136 = vector.shape_cast %135 : vector<128xf32> to vector<1x128xf32>
    %137 = vector.broadcast %136 : vector<1x128xf32> to vector<32x128xf32>
    %138 = arith.cmpf oeq, %134, %137 : vector<32x128xf32>
    %c32_i32_46 = arith.constant 32 : i32
    %139 = vector.broadcast %c32_i32_46 : i32 to vector<32x128xi32>
    %140 = arith.select %138, %79, %139 : vector<32x128xi1>, vector<32x128xi32>
    %cst_47 = arith.constant dense<2147483647> : vector<128xi32>
    %141 = vector.multi_reduction <minsi>, %140, %cst_47 [0] : vector<32x128xi32> to vector<128xi32>
    %142 = vector.shape_cast %141 : vector<128xi32> to vector<1x128xi32>
    %c96_i32 = arith.constant 96 : i32
    %143 = vector.broadcast %c96_i32 : i32 to vector<1x128xi32>
    %144 = arith.addi %142, %143 : vector<1x128xi32>
    %145 = arith.cmpf ogt, %136, %131 : vector<1x128xf32>
    %146 = arith.select %145, %144, %130 : vector<1x128xi1>, vector<1x128xi32>
    %147 = arith.select %145, %136, %131 : vector<1x128xi1>, vector<1x128xf32>
    %148 = vector.extract_strided_slice %40 {offsets = [0, 128], sizes = [4, 128], strides = [1, 1]} : vector<4x256xf32> to vector<4x128xf32>
    %cst_48 = arith.constant dense<0.000000e+00> : vector<128x128xf32>
    %149 = tpu.matmul %148, %78, %cst_48 {dimension_numbers = #tpu.dot_dimension_numbers<[0], [0], [1], [1], [0, 1, 1, 1], [], []>, precision = #tpu.contract_precision<fp32>} : vector<4x128xf32>, vector<4x128xf32>, vector<128x128xf32> -> vector<128x128xf32>
    %cst_49 = arith.constant 0xFF800000 : f32
    %150 = vector.broadcast %cst_49 : f32 to vector<1x128xf32>
    %c0_i32_50 = arith.constant 0 : i32
    %151 = vector.broadcast %c0_i32_50 : i32 to vector<1x128xi32>
    %152 = vector.extract_strided_slice %54 {offsets = [128, 0], sizes = [32, 128], strides = [1, 1]} : vector<256x128xf32> to vector<32x128xf32>
    %153 = vector.extract_strided_slice %149 {offsets = [0, 0], sizes = [32, 128], strides = [1, 1]} : vector<128x128xf32> to vector<32x128xf32>
    %154 = arith.mulf %152, %153 : vector<32x128xf32>
    %cst_51 = arith.constant dense<0xFF800000> : vector<128xf32>
    %155 = vector.multi_reduction <maximumf>, %154, %cst_51 [0] : vector<32x128xf32> to vector<128xf32>
    %156 = vector.shape_cast %155 : vector<128xf32> to vector<1x128xf32>
    %157 = vector.broadcast %156 : vector<1x128xf32> to vector<32x128xf32>
    %158 = arith.cmpf oeq, %154, %157 : vector<32x128xf32>
    %c32_i32_52 = arith.constant 32 : i32
    %159 = vector.broadcast %c32_i32_52 : i32 to vector<32x128xi32>
    %160 = arith.select %158, %79, %159 : vector<32x128xi1>, vector<32x128xi32>
    %cst_53 = arith.constant dense<2147483647> : vector<128xi32>
    %161 = vector.multi_reduction <minsi>, %160, %cst_53 [0] : vector<32x128xi32> to vector<128xi32>
    %162 = vector.shape_cast %161 : vector<128xi32> to vector<1x128xi32>
    %c0_i32_54 = arith.constant 0 : i32
    %163 = vector.broadcast %c0_i32_54 : i32 to vector<1x128xi32>
    %164 = arith.addi %162, %163 : vector<1x128xi32>
    %165 = arith.cmpf ogt, %156, %150 : vector<1x128xf32>
    %166 = arith.select %165, %164, %151 : vector<1x128xi1>, vector<1x128xi32>
    %167 = arith.select %165, %156, %150 : vector<1x128xi1>, vector<1x128xf32>
    %168 = vector.extract_strided_slice %54 {offsets = [160, 0], sizes = [32, 128], strides = [1, 1]} : vector<256x128xf32> to vector<32x128xf32>
    %169 = vector.extract_strided_slice %149 {offsets = [32, 0], sizes = [32, 128], strides = [1, 1]} : vector<128x128xf32> to vector<32x128xf32>
    %170 = arith.mulf %168, %169 : vector<32x128xf32>
    %cst_55 = arith.constant dense<0xFF800000> : vector<128xf32>
    %171 = vector.multi_reduction <maximumf>, %170, %cst_55 [0] : vector<32x128xf32> to vector<128xf32>
    %172 = vector.shape_cast %171 : vector<128xf32> to vector<1x128xf32>
    %173 = vector.broadcast %172 : vector<1x128xf32> to vector<32x128xf32>
    %174 = arith.cmpf oeq, %170, %173 : vector<32x128xf32>
    %c32_i32_56 = arith.constant 32 : i32
    %175 = vector.broadcast %c32_i32_56 : i32 to vector<32x128xi32>
    %176 = arith.select %174, %79, %175 : vector<32x128xi1>, vector<32x128xi32>
    %cst_57 = arith.constant dense<2147483647> : vector<128xi32>
    %177 = vector.multi_reduction <minsi>, %176, %cst_57 [0] : vector<32x128xi32> to vector<128xi32>
    %178 = vector.shape_cast %177 : vector<128xi32> to vector<1x128xi32>
    %c32_i32_58 = arith.constant 32 : i32
    %179 = vector.broadcast %c32_i32_58 : i32 to vector<1x128xi32>
    %180 = arith.addi %178, %179 : vector<1x128xi32>
    %181 = arith.cmpf ogt, %172, %167 : vector<1x128xf32>
    %182 = arith.select %181, %180, %166 : vector<1x128xi1>, vector<1x128xi32>
    %183 = arith.select %181, %172, %167 : vector<1x128xi1>, vector<1x128xf32>
    %184 = vector.extract_strided_slice %54 {offsets = [192, 0], sizes = [32, 128], strides = [1, 1]} : vector<256x128xf32> to vector<32x128xf32>
    %185 = vector.extract_strided_slice %149 {offsets = [64, 0], sizes = [32, 128], strides = [1, 1]} : vector<128x128xf32> to vector<32x128xf32>
    %186 = arith.mulf %184, %185 : vector<32x128xf32>
    %cst_59 = arith.constant dense<0xFF800000> : vector<128xf32>
    %187 = vector.multi_reduction <maximumf>, %186, %cst_59 [0] : vector<32x128xf32> to vector<128xf32>
    %188 = vector.shape_cast %187 : vector<128xf32> to vector<1x128xf32>
    %189 = vector.broadcast %188 : vector<1x128xf32> to vector<32x128xf32>
    %190 = arith.cmpf oeq, %186, %189 : vector<32x128xf32>
    %c32_i32_60 = arith.constant 32 : i32
    %191 = vector.broadcast %c32_i32_60 : i32 to vector<32x128xi32>
    %192 = arith.select %190, %79, %191 : vector<32x128xi1>, vector<32x128xi32>
    %cst_61 = arith.constant dense<2147483647> : vector<128xi32>
    %193 = vector.multi_reduction <minsi>, %192, %cst_61 [0] : vector<32x128xi32> to vector<128xi32>
    %194 = vector.shape_cast %193 : vector<128xi32> to vector<1x128xi32>
    %c64_i32_62 = arith.constant 64 : i32
    %195 = vector.broadcast %c64_i32_62 : i32 to vector<1x128xi32>
    %196 = arith.addi %194, %195 : vector<1x128xi32>
    %197 = arith.cmpf ogt, %188, %183 : vector<1x128xf32>
    %198 = arith.select %197, %196, %182 : vector<1x128xi1>, vector<1x128xi32>
    %199 = arith.select %197, %188, %183 : vector<1x128xi1>, vector<1x128xf32>
    %200 = vector.extract_strided_slice %54 {offsets = [224, 0], sizes = [32, 128], strides = [1, 1]} : vector<256x128xf32> to vector<32x128xf32>
    %201 = vector.extract_strided_slice %149 {offsets = [96, 0], sizes = [32, 128], strides = [1, 1]} : vector<128x128xf32> to vector<32x128xf32>
    %202 = arith.mulf %200, %201 : vector<32x128xf32>
    %cst_63 = arith.constant dense<0xFF800000> : vector<128xf32>
    %203 = vector.multi_reduction <maximumf>, %202, %cst_63 [0] : vector<32x128xf32> to vector<128xf32>
    %204 = vector.shape_cast %203 : vector<128xf32> to vector<1x128xf32>
    %205 = vector.broadcast %204 : vector<1x128xf32> to vector<32x128xf32>
    %206 = arith.cmpf oeq, %202, %205 : vector<32x128xf32>
    %c32_i32_64 = arith.constant 32 : i32
    %207 = vector.broadcast %c32_i32_64 : i32 to vector<32x128xi32>
    %208 = arith.select %206, %79, %207 : vector<32x128xi1>, vector<32x128xi32>
    %cst_65 = arith.constant dense<2147483647> : vector<128xi32>
    %209 = vector.multi_reduction <minsi>, %208, %cst_65 [0] : vector<32x128xi32> to vector<128xi32>
    %210 = vector.shape_cast %209 : vector<128xi32> to vector<1x128xi32>
    %c96_i32_66 = arith.constant 96 : i32
    %211 = vector.broadcast %c96_i32_66 : i32 to vector<1x128xi32>
    %212 = arith.addi %210, %211 : vector<1x128xi32>
    %213 = arith.cmpf ogt, %204, %199 : vector<1x128xf32>
    %214 = arith.select %213, %212, %198 : vector<1x128xi1>, vector<1x128xi32>
    %215 = arith.select %213, %204, %199 : vector<1x128xi1>, vector<1x128xf32>
    %216 = tpu.concatenate %147, %215 in 0 : vector<1x128xf32>, vector<1x128xf32> -> vector<2x128xf32>
    %217 = tpu.concatenate %146, %214 in 0 : vector<1x128xi32>, vector<1x128xi32> -> vector<2x128xi32>
    %c0_67 = arith.constant 0 : index
    %c0_68 = arith.constant 0 : index
    %218 = vector.load %arg3[%c0_67, %c0_68] : memref<2x128xi32, #tpu.memory_space<vmem>>, vector<2x128xi32>
    tpu.vector_store %arg3[%c0_67, %c0_68], %217 {strides = array<i32>} : memref<2x128xi32, #tpu.memory_space<vmem>>, vector<2x128xi32>,
    %c288 = arith.constant 288 : index
    %c0_69 = arith.constant 0 : index
    %219 = vector.load %arg1[%c288, %c0_69] : memref<496x128xf32, #tpu.memory_space<vmem>>, vector<128x64xf32>
    %cst_70 = arith.constant dense<0.000000e+00> : vector<2x64xf32>
    %220 = tpu.matmul %216, %219, %cst_70 {dimension_numbers = #tpu.dot_dimension_numbers<[1], [0], [0], [1], [0, 0, 1, 1], [], []>, precision = #tpu.contract_precision<fp32>} : vector<2x128xf32>, vector<128x64xf32>, vector<2x64xf32> -> vector<2x64xf32>
    %c416 = arith.constant 416 : index
    %c0_71 = arith.constant 0 : index
    %221 = vector.load %arg1[%c416, %c0_71] : memref<496x128xf32, #tpu.memory_space<vmem>>, vector<1x64xf32>
    %222 = vector.broadcast %221 : vector<1x64xf32> to vector<2x64xf32>
    %223 = arith.addf %220, %222 : vector<2x64xf32>
    %cst_72 = arith.constant 0.000000e+00 : f32
    %224 = vector.broadcast %cst_72 : f32 to vector<2x64xf32>
    %225 = arith.maximumf %223, %224 : vector<2x64xf32>
    %c424 = arith.constant 424 : index
    %c0_73 = arith.constant 0 : index
    %226 = vector.load %arg1[%c424, %c0_73] : memref<496x128xf32, #tpu.memory_space<vmem>>, vector<64x32xf32>
    %cst_74 = arith.constant dense<0.000000e+00> : vector<2x32xf32>
    %227 = tpu.matmul %225, %226, %cst_74 {dimension_numbers = #tpu.dot_dimension_numbers<[1], [0], [0], [1], [0, 0, 1, 1], [], []>, precision = #tpu.contract_precision<fp32>} : vector<2x64xf32>, vector<64x32xf32>, vector<2x32xf32> -> vector<2x32xf32>
    %c488 = arith.constant 488 : index
    %c0_75 = arith.constant 0 : index
    %228 = vector.load %arg1[%c488, %c0_75] : memref<496x128xf32, #tpu.memory_space<vmem>>, vector<1x32xf32>
    %229 = vector.broadcast %228 : vector<1x32xf32> to vector<2x32xf32>
    %230 = arith.addf %227, %229 : vector<2x32xf32>
    %cst_76 = arith.constant 0.000000e+00 : f32
    %231 = vector.broadcast %cst_76 : f32 to vector<2x32xf32>
    %232 = arith.maximumf %230, %231 : vector<2x32xf32>
    %c0_77 = arith.constant 0 : index
    %c0_78 = arith.constant 0 : index
    %233 = vector.load %arg2[%c0_77, %c0_78] : memref<2x32xf32, #tpu.memory_space<vmem>>, vector<2x32xf32>
    tpu.vector_store %arg2[%c0_77, %c0_78], %232 {strides = array<i32>} : memref<2x32xf32, #tpu.memory_space<vmem>>, vector<2x32xf32>,
    return
  }
}

</mosaic_0001>

<bundles_post_ra>
// kernel: tpu_custom_call.1
= control target key start
LH: loop header
LB: loop body
LE: loop exit
PB: predicated region body
PF: predicated region fallthrough
CT: control target
= control target key end

     0   :  { %9 = vsyncpa [#allocation3], 0  ;;  %s21811_s0 = inlined_call_operand.vmem [shape: f32[2,7,128], index: 0, kind: input, shape index: {}]   ;;  %s21812_s1 = inlined_call_operand.hbm [shape: f32[496,128], index: 1, kind: input, shape index: {}]   ;;  %s21813_s2 = inlined_call_operand.hbm [shape: f32[2,32], index: 2, kind: output, shape index: {0}]   ;;  %s21814_s3 = inlined_call_operand.hbm [shape: s32[2,128], index: 3, kind: output, shape index: {1}]  }
   0x1   :  { %10 = vsyncpa [#allocation4], 0 }
   0x2   :  { %11 = vsyncpa [#allocation7], 0  ;;  %s17317_s12 = smov [#allocation2]   ;;  %s17245_s16 = scalar_lea.hbm %s21812_s1, 7936 }
   0x3   :  { %s19_s13 = sshll.u32 %s17317_s12, 4  ;;  %p17246_p0 = scmp.ne.s32.totalorder %s21812_s1, %s17245_s16  ;;  %s20_s13 = int_to_ptr.vmem [resolvable:$true] %s19_s13 }
   0x4   :  { %p17249_p1 = scmp.lt.u32.totalorder %s17245_s16, %s21812_s1 }
   0x6   :  { %p17251_p2 = pnand %p17249_p1, %p17246_p0 }
   0x8   :  { %17254 = shalt.err (!%p17251_p2)
}
   0x9   :  { %s17255_s21 = scalar_lea.vmem %s20_s13, 7936  ;;  %p17260_p4 = scmp.lt.s32.totalorder %s20_s13, %s20_s13 }
   0xa   :  { %p17256_p3 = scmp.ne.s32.totalorder %s20_s13, %s17255_s21  ;;  %p17261_p5 = scmp.lt.s32.totalorder %s17255_s21, %s17255_s21 }
   0xc   :  { %p17262_p6 = por %p17261_p5, %p17260_p4 }
   0xe   :  { %p17263_p7 = pnand %p17262_p6, %p17256_p3 }
  0x10   :  { %17266 = shalt.err (!%p17263_p7)
}
  0x11   :  { %s17318_s22 = smov 128   ;;  %s17319_s23 = smov 8  }
  0x12   :  { %25 = dma.hbm_to_vmem [thread:$0]  %s21812_s1, 7936, %s20_s13, [#allocation3], %s17318_s22, %s17318_s22, %s17319_s23  }
  0x13   :  { %17311 = dma.done.wait [#allocation3], 7936  }
  0x14   :  { %17312 = vsyncadd [#allocation3], 4294959360  ;;  %vm1210_vm0 = vcmask 1046531   ;;  %v33_v0 = vld [vmem:[%s21811_s0] sm:$0x7f]  ;;  %v31_v3 = vlaneseq  ;;  %vm115_vm1 = vcmask 1046528  }
  0x15   :  { %34 = vxpose.xlu0.b32.start.end [1/1] (short) %v33_v0, 128  ;;  %v1211_v1 = vsel %vm1210_vm0, %v33_v0, -inf  ;;  %v29_v10 = vld [vmem:[#allocation2] sm:$0x7f]  ;;  %v12395_v16 = vld [vmem:[%s21811_s0 + $0x8] sm:$0x7f]  ;;  %vm66_vm3 = vcmask 56320  }
  0x16   :  { %v1212_v2 = vrot.slane %v1211_v1, 4  ;;  %v17362_v6 = vshrl.u32 %v31_v3, 7  ;;  %v117_v12 = vsel %vm115_vm1, %v29_v10, 0  ;;  %vm2506_vm4 = vcmask 261120  }
  0x17   :  { %v17365_v13 = vand.u32 4294901760, %v117_v12  ;;  %vm22300_vm5 = vcmask 523264   ;;  %vm6465_vm15 = vcmask 1043456   ;;  %vm8006_vm1 = vcmask 130048  }
  0x18   :  { %v1213_v4 = vmax.f32 %v1211_v1, %v1212_v2  ;;  %22305 = vst [vmem:[#allocation11_spill] sm:$0xff] %v17362_v6  ;;  %v21815_v9 = vrot.slane %v17362_v6, 5 }
  0x19   :  { %13761 = vmatprep.subr.mxu0 %v17365_v13  ;;  %13917 = vmatprep.subr.mxu1 %v17365_v13  ;;  %v17380_v17 = vsub.f32 %v117_v12, %v17365_v13 }
  0x1a   :  { %v1214_v5 = vrot.slane %v1213_v4, 2  ;;  %13762 = vmatpush3.msra.mxu0 %v17365_v13  ;;  %13918 = vmatpush3.msra.mxu1 %v17365_v13 }
  0x1b   :  { %v17383_v18 = vand.u32 4294901760, %v17380_v17 }
  0x1c   :  { %v1215_v7 = vmax.f32 %v1213_v4, %v1214_v5 }
  0x1d   :  { %v349_v19 = vsub.f32 %v17380_v17, %v17383_v18 }
  0x1e   :  { %v1216_v8 = vrot.slane %v1215_v7, 1 }
  0x1f   :  { %v17387_v20 = vand.u32 4294901760, %v349_v19 }
  0x20   :  { %v1217_v11 = vmax.f32 %v1215_v7, %v1216_v8 }
  0x21   :  { %13787 = vmatprep.subr.mxu0 %v17387_v20  ;;  %13943 = vmatprep.subr.mxu1 %v17387_v20 }
  0x22   :  { %vm1218_vm2 = vcmp.ge.f32.partialorder %v33_v0, %v1217_v11 }
  0x23   :  { %v1220_v14 = vsel %vm1218_vm2, %v21815_v9, 4  ;;  %vm8510_vm2 = vcmask 31744  }
  0x24   :  { %v17372_v15 = vsel %vm1210_vm0, %v1220_v14, 2147483647 }
  0x25   :  { %22306 = vst [vmem:[#allocation12_spill] sm:$0xff] %v17372_v15 }
  0x52   :  { %1236 = vxpose.xlu0.b32.start.end [1/1] (short) %v12395_v16, 128 }
  0x95   :  { %v50_v21 = vpop.trf.xlu0 }
  0x96   :  { %v68_v22 = vsel %vm66_vm3, %v50_v21, 0 }
  0x97   :  { %v17392_v23 = vand.u32 4294901760, %v68_v22 }
  0x99   :  { %v17395_v24 = vsub.f32 %v68_v22, %v17392_v23  ;;  %v51_v25 = vpop.trf.xlu0 }
  0x9a   :  { %v71_v26 = vsel %vm66_vm3, %v51_v25, 0 }
  0x9b   :  { %v17398_v27 = vand.u32 4294901760, %v71_v26  ;;  %v21838_v28 = vand.u32 4294901760, %v17395_v24 }
  0x9d   :  { %v17402_v29 = vsub.f32 %v71_v26, %v17398_v27  ;;  %v52_v30 = vpop.trf.xlu0  ;;  %v188_v31 = vsub.f32 %v17395_v24, %v21838_v28 }
  0x9e   :  { %v74_v32 = vsel %vm66_vm3, %v52_v30, 0 }
  0x9f   :  { %v21836_v33 = vand.u32 4294901760, %v17402_v29  ;;  %v17409_v34 = vand.u32 4294901760, %v74_v32  ;;  %v189_v35 = vand.u32 4294901760, %v188_v31 }
  0xa1   :  { %v17412_v36 = vsub.f32 %v74_v32, %v17409_v34  ;;  %13763 = vmatprep.mubr.f32.mxu0 %v189_v35  ;;  %v53_v37 = vpop.trf.xlu0  ;;  %v198_v38 = vsub.f32 %v17402_v29, %v21836_v33 }
  0xa2   :  { %v77_v39 = vsel %vm66_vm3, %v53_v37, 0 }
  0xa3   :  { %v21835_v40 = vand.u32 4294901760, %v17412_v36  ;;  %v17419_v41 = vand.u32 4294901760, %v77_v39  ;;  %v199_v42 = vand.u32 4294901760, %v198_v38 }
  0xa5   :  { %v17422_v43 = vsub.f32 %v77_v39, %v17419_v41  ;;  %v54_v44 = vpop.trf.xlu0  ;;  %13764 = vmatmul.mubr.f32.vlgmr.msra.gmra.mrb[0].mxu0 %v199_v42  ;;  %v208_v45 = vsub.f32 %v17412_v36, %v21835_v40 }
  0xa6   :  { %v80_v46 = vsel %vm66_vm3, %v54_v44, 0  ;;  %13788 = vmatpush3.msra.mxu0 %v17387_v20 }
  0xa7   :  { %v21833_v47 = vand.u32 4294901760, %v17422_v43  ;;  %v17430_v48 = vand.u32 4294901760, %v80_v46  ;;  %v209_v49 = vand.u32 4294901760, %v208_v45  ;;  %13813 = vmatprep.subr.mxu0 %v17380_v17 }
  0xa9   :  { %v17434_v50 = vsub.f32 %v80_v46, %v17430_v48  ;;  %v55_v51 = vpop.trf.xlu0  ;;  %13766 = vmatprep.mubr.f32.mxu0 %v209_v49  ;;  %v218_v52 = vsub.f32 %v17422_v43, %v21833_v47 }
  0xaa   :  { %v83_v53 = vsel %vm66_vm3, %v55_v51, 0 }
  0xab   :  { %v21832_v54 = vand.u32 4294901760, %v17434_v50  ;;  %v17441_v55 = vand.u32 4294901760, %v83_v53  ;;  %v219_v56 = vand.u32 4294901760, %v218_v52 }
  0xad   :  { %v17444_v57 = vsub.f32 %v83_v53, %v17441_v55  ;;  %v56_v58 = vpop.trf.xlu0  ;;  %13767 = vmatmul.mubr.f32.gmra.mrb[2].mxu0 %v219_v56  ;;  %v228_v59 = vsub.f32 %v17434_v50, %v21832_v54 }
  0xae   :  { %v86_v60 = vsel %vm66_vm3, %v56_v58, 0 }
  0xaf   :  { %v21830_v61 = vand.u32 4294901760, %v17444_v57  ;;  %v17451_v62 = vand.u32 4294901760, %v86_v60  ;;  %v229_v63 = vand.u32 4294901760, %v228_v59 }
  0xb1   :  { %v17454_v0 = vsub.f32 %v86_v60, %v17451_v62  ;;  %v57_v1 = vpop.trf.xlu0  ;;  %13769 = vmatprep.mubr.f32.mxu0 %v229_v63  ;;  %v238_v2 = vsub.f32 %v17444_v57, %v21830_v61 }
  0xb2   :  { %v89_v3 = vsel %vm66_vm3, %v57_v1, 0 }
  0xb3   :  { %v21829_v4 = vand.u32 4294901760, %v17454_v0  ;;  %v17461_v5 = vand.u32 4294901760, %v89_v3  ;;  %v239_v7 = vand.u32 4294901760, %v238_v2 }
  0xb5   :  { %v17464_v8 = vsub.f32 %v89_v3, %v17461_v5  ;;  %v58_v10 = vpop.trf.xlu0  ;;  %13770 = vmatmul.mubr.f32.gmra.mrb[4].mxu0 %v239_v7  ;;  %v248_v11 = vsub.f32 %v17454_v0, %v21829_v4 }
  0xb6   :  { %v92_v12 = vsel %vm66_vm3, %v58_v10, 0 }
  0xb7   :  { %v21827_v14 = vand.u32 4294901760, %v17464_v8  ;;  %v17471_v16 = vand.u32 4294901760, %v92_v12  ;;  %v249_v19 = vand.u32 4294901760, %v248_v11 }
  0xb9   :  { %v17474_v21 = vsub.f32 %v92_v12, %v17471_v16  ;;  %v59_v22 = vpop.trf.xlu0  ;;  %13772 = vmatprep.mubr.f32.mxu0 %v249_v19  ;;  %v258_v25 = vsub.f32 %v17464_v8, %v21827_v14 }
  0xba   :  { %v95_v26 = vsel %vm66_vm3, %v59_v22, 0 }
  0xbb   :  { %v21826_v30 = vand.u32 4294901760, %v17474_v21  ;;  %v17481_v31 = vand.u32 4294901760, %v95_v26  ;;  %v259_v32 = vand.u32 4294901760, %v258_v25 }
  0xbd   :  { %v17484_v35 = vsub.f32 %v95_v26, %v17481_v31  ;;  %v60_v37 = vpop.trf.xlu0  ;;  %13773 = vmatmul.mubr.f32.gmra.mrb[6].mxu0 %v259_v32  ;;  %v268_v38 = vsub.f32 %v17474_v21, %v21826_v30 }
  0xbe   :  { %v98_v39 = vsel %vm66_vm3, %v60_v37, 0 }
  0xbf   :  { %v21824_v42 = vand.u32 4294901760, %v17484_v35  ;;  %v17491_v44 = vand.u32 4294901760, %v98_v39  ;;  %v269_v45 = vand.u32 4294901760, %v268_v38 }
  0xc1   :  { %22307 = vst [vmem:[#allocation13_spill] sm:$0xff] %v17491_v44  ;;  %v17494_v46 = vsub.f32 %v98_v39, %v17491_v44  ;;  %v61_v49 = vpop.trf.xlu0  ;;  %13775 = vmatprep.mubr.f32.mxu0 %v269_v45  ;;  %v278_v51 = vsub.f32 %v17484_v35, %v21824_v42 }
  0xc2   :  { %v101_v52 = vsel %vm66_vm3, %v61_v49, 0 }
  0xc3   :  { %v21823_v53 = vand.u32 4294901760, %v17494_v46  ;;  %v17501_v56 = vand.u32 4294901760, %v101_v52  ;;  %v279_v58 = vand.u32 4294901760, %v278_v51 }
  0xc5   :  { %22308 = vst [vmem:[#allocation14_spill] sm:$0xff] %v17501_v56  ;;  %v17504_v59 = vsub.f32 %v101_v52, %v17501_v56  ;;  %v62_v60 = vpop.trf.xlu0  ;;  %13776 = vmatmul.mubr.f32.gmra.mrb[8].mxu0 %v279_v58  ;;  %v288_v63 = vsub.f32 %v17494_v46, %v21823_v53 }
  0xc6   :  { %v104_v1 = vsel %vm66_vm3, %v62_v60, 0 }
  0xc7   :  { %v21821_v2 = vand.u32 4294901760, %v17504_v59  ;;  %v17511_v3 = vand.u32 4294901760, %v104_v1  ;;  %v289_v7 = vand.u32 4294901760, %v288_v63 }
  0xc9   :  { %22309 = vst [vmem:[#allocation15_spill] sm:$0xff] %v17511_v3  ;;  %v17514_v10 = vsub.f32 %v104_v1, %v17511_v3  ;;  %v63_v11 = vpop.trf.xlu0  ;;  %13778 = vmatprep.mubr.f32.mxu0 %v289_v7  ;;  %v298_v12 = vsub.f32 %v17504_v59, %v21821_v2 }
  0xca   :  { %v107_v19 = vsel %vm66_vm3, %v63_v11, 0 }
  0xcb   :  { %v21819_v22 = vand.u32 4294901760, %v17514_v10  ;;  %v17521_v25 = vand.u32 4294901760, %v107_v19  ;;  %v299_v26 = vand.u32 4294901760, %v298_v12 }
  0xcd   :  { %22310 = vst [vmem:[#allocation16_spill] sm:$0xff] %v17521_v25  ;;  %v17524_v32 = vsub.f32 %v107_v19, %v17521_v25  ;;  %v64_v37 = vpop.trf.xlu0  ;;  %13779 = vmatmul.mubr.f32.gmra.mrb[10].mxu0 %v299_v26  ;;  %v308_v38 = vsub.f32 %v17514_v10, %v21819_v22 }
  0xce   :  { %v110_v39 = vsel %vm66_vm3, %v64_v37, 0 }
  0xcf   :  { %v21817_v45 = vand.u32 4294901760, %v17524_v32  ;;  %v17531_v49 = vand.u32 4294901760, %v110_v39  ;;  %v309_v51 = vand.u32 4294901760, %v308_v38 }
  0xd1   :  { %22311 = vst [vmem:[#allocation17_spill] sm:$0xff] %v17531_v49  ;;  %v17534_v52 = vsub.f32 %v110_v39, %v17531_v49  ;;  %v65_v58 = vpop.trf.xlu0  ;;  %13781 = vmatprep.mubr.f32.mxu0 %v309_v51  ;;  %v318_v60 = vsub.f32 %v17524_v32, %v21817_v45 }
  0xd2   :  { %v113_v63 = vsel %vm66_vm3, %v65_v58, 0 }
  0xd3   :  { %v21816_v1 = vand.u32 4294901760, %v17534_v52  ;;  %v17541_v7 = vand.u32 4294901760, %v113_v63  ;;  %v319_v11 = vand.u32 4294901760, %v318_v60 }
  0xd5   :  { %22312 = vst [vmem:[#allocation18_spill] sm:$0xff] %v17541_v7  ;;  %v17544_v12 = vsub.f32 %v113_v63, %v17541_v7  ;;  %v1252_v19 = vpop.trf.xlu0  ;;  %13782 = vmatmul.mubr.f32.gmra.mrb[12].mxu0 %v319_v11  ;;  %v328_v26 = vsub.f32 %v17534_v52, %v21816_v1 }
  0xd6   :  { %v1269_v37 = vsel %vm66_vm3, %v1252_v19, 0 }
  0xd7   :  { %v21818_v38 = vand.u32 4294901760, %v17544_v12  ;;  %v17551_v39 = vand.u32 4294901760, %v1269_v37  ;;  %v329_v51 = vand.u32 4294901760, %v328_v26 }
  0xd9   :  { %v17554_v58 = vsub.f32 %v1269_v37, %v17551_v39  ;;  %v1253_v60 = vpop.trf.xlu0  ;;  %13784 = vmatprep.mubr.f32.mxu0 %v329_v51  ;;  %v338_v63 = vsub.f32 %v17544_v12, %v21818_v38 }
  0xda   :  { %v1272_v11 = vsel %vm66_vm3, %v1253_v60, 0 }
  0xdb   :  { %v17560_v9 = vand.u32 4294901760, %v1272_v11  ;;  %v339_v1 = vand.u32 4294901760, %v338_v63  ;;  %v21820_v19 = vand.u32 4294901760, %v17554_v58 }
  0xdd   :  { %v17564_v45 = vsub.f32 %v1272_v11, %v17560_v9  ;;  %v1254_v26 = vpop.trf.xlu0  ;;  %13785 = vmatmul.mubr.f32.gmra.mrb[14].mxu0 %v339_v1  ;;  %v1385_v37 = vsub.f32 %v17554_v58, %v21820_v19 }
  0xde   :  { %v1275_v51 = vsel %vm66_vm3, %v1254_v26, 0  ;;  %13789 = vmatprep.mubr.f32.mxu0 %v17392_v23 }
  0xdf   :  { %v21822_v60 = vand.u32 4294901760, %v17564_v45  ;;  %v17572_v38 = vand.u32 4294901760, %v1275_v51  ;;  %v1386_v63 = vand.u32 4294901760, %v1385_v37 }
  0xe1   :  { %v17575_v22 = vsub.f32 %v1275_v51, %v17572_v38  ;;  %13919 = vmatprep.mubr.f32.mxu1 %v1386_v63  ;;  %v1255_v11 = vpop.trf.xlu0  ;;  %13790 = vmatmul.mubr.f32.vlgmr.msra.gmra.mrb[0].mxu0 %v17398_v27  ;;  %v1395_v1 = vsub.f32 %v17564_v45, %v21822_v60 }
  0xe2   :  { %v1278_v26 = vsel %vm66_vm3, %v1255_v11, 0  ;;  %13792 = vmatprep.mubr.f32.mxu0 %v17409_v34  ;;  %13814 = vmatpush3.msra.mxu0 %v17380_v17 }
  0xe3   :  { %v21825_v19 = vand.u32 4294901760, %v17575_v22  ;;  %v17585_v37 = vand.u32 4294901760, %v1278_v26  ;;  %v1396_v51 = vand.u32 4294901760, %v1395_v1  ;;  %13839 = vmatprep.subr.mxu0 %v17365_v13 }
  0xe5   :  { %v17589_v63 = vsub.f32 %v1278_v26, %v17585_v37  ;;  %v1256_v2 = vpop.trf.xlu0  ;;  %13793 = vmatmul.mubr.f32.gmra.mrb[2].mxu0 %v17419_v41  ;;  %13920 = vmatmul.mubr.f32.vlgmr.msra.gmra.mrb[0].mxu1 %v1396_v51  ;;  %v1405_v11 = vsub.f32 %v17575_v22, %v21825_v19 }
  0xe6   :  { %v1281_v60 = vsel %vm66_vm3, %v1256_v2, 0  ;;  %13795 = vmatprep.mubr.f32.mxu0 %v17430_v48  ;;  %13944 = vmatpush3.msra.mxu1 %v17387_v20 }
  0xe7   :  { %v21828_v1 = vand.u32 4294901760, %v17589_v63  ;;  %v17599_v53 = vand.u32 4294901760, %v1281_v60  ;;  %v1406_v26 = vand.u32 4294901760, %v1405_v11  ;;  %13969 = vmatprep.subr.mxu1 %v17380_v17 }
  0xe9   :  { %v17603_v42 = vsub.f32 %v1281_v60, %v17599_v53  ;;  %v1257_v51 = vpop.trf.xlu0  ;;  %13796 = vmatmul.mubr.f32.gmra.mrb[4].mxu0 %v17441_v55  ;;  %13922 = vmatprep.mubr.f32.mxu1 %v1406_v26  ;;  %v1415_v2 = vsub.f32 %v17589_v63, %v21828_v1 }
  0xea   :  { %v1284_v20 = vsel %vm66_vm3, %v1257_v51, 0  ;;  %13798 = vmatprep.mubr.f32.mxu0 %v17451_v62 }
  0xeb   :  { %v21831_v19 = vand.u32 4294901760, %v17603_v42  ;;  %v17612_v11 = vand.u32 4294901760, %v1284_v20  ;;  %v1416_v30 = vand.u32 4294901760, %v1415_v2 }
  0xed   :  { %v17615_v60 = vsub.f32 %v1284_v20, %v17612_v11  ;;  %v1258_v14 = vpop.trf.xlu0  ;;  %13799 = vmatmul.mubr.f32.gmra.mrb[6].mxu0 %v17461_v5  ;;  %13923 = vmatmul.mubr.f32.gmra.mrb[2].mxu1 %v1416_v30  ;;  %v1425_v26 = vsub.f32 %v17603_v42, %v21831_v19 }
  0xee   :  { %v1287_v51 = vsel %vm66_vm3, %v1258_v14, 0  ;;  %13801 = vmatprep.mubr.f32.mxu0 %v17471_v16 }
  0xef   :  { %v21834_v1 = vand.u32 4294901760, %v17615_v60  ;;  %v17624_v4 = vand.u32 4294901760, %v1287_v51  ;;  %v1426_v2 = vand.u32 4294901760, %v1425_v26 }
  0xf1   :  { %v17627_v20 = vsub.f32 %v1287_v51, %v17624_v4  ;;  %v1259_v61 = vpop.trf.xlu0  ;;  %13802 = vmatmul.mubr.f32.gmra.mrb[8].mxu0 %v17481_v31  ;;  %13925 = vmatprep.mubr.f32.mxu1 %v1426_v2  ;;  %v1435_v30 = vsub.f32 %v17615_v60, %v21834_v1 }
  0xf2   :  { %v1290_v14 = vsel %vm66_vm3, %v1259_v61, 0  ;;  %13804 = vmatprep.mubr.f32.mxu0 %v17491_v44 }
  0xf3   :  { %v21837_v19 = vand.u32 4294901760, %v17627_v20  ;;  %v17636_v54 = vand.u32 4294901760, %v1290_v14  ;;  %v1436_v26 = vand.u32 4294901760, %v1435_v30 }
  0xf5   :  { %v17639_v51 = vsub.f32 %v1290_v14, %v17636_v54  ;;  %v1260_v47 = vpop.trf.xlu0  ;;  %13805 = vmatmul.mubr.f32.gmra.mrb[10].mxu0 %v17501_v56  ;;  %13926 = vmatmul.mubr.f32.gmra.mrb[4].mxu1 %v1436_v26  ;;  %v1445_v2 = vsub.f32 %v17627_v20, %v21837_v19 }
  0xf6   :  { %v1293_v61 = vsel %vm66_vm3, %v1260_v47, 0  ;;  %13807 = vmatprep.mubr.f32.mxu0 %v17511_v3 }
  0xf7   :  { %v21840_v1 = vand.u32 4294901760, %v17639_v51  ;;  %v17648_v40 = vand.u32 4294901760, %v1293_v61  ;;  %v1446_v30 = vand.u32 4294901760, %v1445_v2 }
  0xf9   :  { %v17651_v14 = vsub.f32 %v1293_v61, %v17648_v40  ;;  %v1261_v33 = vpop.trf.xlu0  ;;  %13808 = vmatmul.mubr.f32.gmra.mrb[12].mxu0 %v17521_v25  ;;  %13928 = vmatprep.mubr.f32.mxu1 %v1446_v30  ;;  %v1455_v26 = vsub.f32 %v17639_v51, %v21840_v1 }
  0xfa   :  { %v1296_v47 = vsel %vm66_vm3, %v1261_v33, 0  ;;  %13810 = vmatprep.mubr.f32.mxu0 %v17531_v49 }
  0xfb   :  { %v21845_v19 = vand.u32 4294901760, %v17651_v14  ;;  %v17660_v28 = vand.u32 4294901760, %v1296_v47  ;;  %v1456_v2 = vand.u32 4294901760, %v1455_v26 }
  0xfd   :  { %v17663_v61 = vsub.f32 %v1296_v47, %v17660_v28  ;;  %v1262_v15 = vpop.trf.xlu0  ;;  %13811 = vmatmul.mubr.f32.gmra.mrb[14].mxu0 %v17541_v7  ;;  %13929 = vmatmul.mubr.f32.gmra.mrb[6].mxu1 %v1456_v2  ;;  %v1465_v30 = vsub.f32 %v17651_v14, %v21845_v19 }
  0xfe   :  { %v1299_v33 = vsel %vm66_vm3, %v1262_v15, 0  ;;  %13815 = vmatprep.mubr.f32.mxu0 %v17395_v24 }
  0xff   :  { %22313 = vst [vmem:[#allocation19_spill] sm:$0xff] %v17663_v61  ;;  %v21848_v1 = vand.u32 4294901760, %v17663_v61  ;;  %v17672_v6 = vand.u32 4294901760, %v1299_v33  ;;  %v1466_v26 = vand.u32 4294901760, %v1465_v30 }
 0x101   :  { %v17675_v47 = vsub.f32 %v1299_v33, %v17672_v6  ;;  %v1263_v49 = vpop.trf.xlu0  ;;  %13816 = vmatmul.mubr.f32.vlgmr.msra.gmra.mrb[0].mxu0 %v17402_v29  ;;  %13931 = vmatprep.mubr.f32.mxu1 %v1466_v26  ;;  %v1475_v2 = vsub.f32 %v17663_v61, %v21848_v1 }
 0x102   :  { %v1302_v15 = vsel %vm66_vm3, %v1263_v49, 0  ;;  %13818 = vmatprep.mubr.f32.mxu0 %v17412_v36  ;;  %13840 = vmatpush3.msra.mxu0 %v17365_v13 }
 0x103   :  { %22314 = vst [vmem:[#allocation20_spill] sm:$0xff] %v17675_v47  ;;  %v21855_v19 = vand.u32 4294901760, %v17675_v47  ;;  %v17685_v30 = vand.u32 4294901760, %v1302_v15  ;;  %v1476_v33 = vand.u32 4294901760, %v1475_v2  ;;  %13865 = vmatprep.subr.mxu0 %v17383_v18 }
 0x105   :  { %v17689_v7 = vsub.f32 %v1302_v15, %v17685_v30  ;;  %v1264_v26 = vpop.trf.xlu0  ;;  %13819 = vmatmul.mubr.f32.gmra.mrb[2].mxu0 %v17422_v43  ;;  %13932 = vmatmul.mubr.f32.gmra.mrb[8].mxu1 %v1476_v33  ;;  %v1485_v49 = vsub.f32 %v17675_v47, %v21855_v19 }
 0x106   :  { %v1305_v1 = vsel %vm66_vm3, %v1264_v26, 0  ;;  %13821 = vmatprep.mubr.f32.mxu0 %v17434_v50 }
 0x107   :  { %22315 = vst [vmem:[#allocation21_spill] sm:$0xff] %v17689_v7  ;;  %v21860_v25 = vand.u32 4294901760, %v17689_v7  ;;  %v17698_v2 = vand.u32 4294901760, %v1305_v1  ;;  %v1486_v3 = vand.u32 4294901760, %v1485_v49 }
 0x109   :  { %v17701_v15 = vsub.f32 %v1305_v1, %v17698_v2  ;;  %v1265_v56 = vpop.trf.xlu0  ;;  %13822 = vmatmul.mubr.f32.gmra.mrb[4].mxu0 %v17444_v57  ;;  %13934 = vmatprep.mubr.f32.mxu1 %v1486_v3  ;;  %v1495_v33 = vsub.f32 %v17689_v7, %v21860_v25 }
 0x10a   :  { %v1308_v26 = vsel %vm66_vm3, %v1265_v56, 0  ;;  %13824 = vmatprep.mubr.f32.mxu0 %v17454_v0 }
 0x10b   :  { %22316 = vst [vmem:[#allocation22_spill] sm:$0xff] %v17701_v15  ;;  %v21865_v19 = vand.u32 4294901760, %v17701_v15  ;;  %v17710_v47 = vand.u32 4294901760, %v1308_v26  ;;  %v1496_v49 = vand.u32 4294901760, %v1495_v33 }
 0x10d   :  { %v17713_v1 = vsub.f32 %v1308_v26, %v17710_v47  ;;  %v1266_v44 = vpop.trf.xlu0  ;;  %13825 = vmatmul.mubr.f32.gmra.mrb[6].mxu0 %v17464_v8  ;;  %13935 = vmatmul.mubr.f32.gmra.mrb[10].mxu1 %v1496_v49  ;;  %v1505_v3 = vsub.f32 %v17701_v15, %v21865_v19 }
 0x10e   :  { %v1311_v56 = vsel %vm66_vm3, %v1266_v44, 0  ;;  %13827 = vmatprep.mubr.f32.mxu0 %v17474_v21 }
 0x10f   :  { %v21868_v25 = vand.u32 4294901760, %v17713_v1  ;;  %v17722_v7 = vand.u32 4294901760, %v1311_v56  ;;  %v1506_v33 = vand.u32 4294901760, %v1505_v3 }
 0x111   :  { %v17725_v26 = vsub.f32 %v1311_v56, %v17722_v7  ;;  %v1267_v61 = vpop.trf.xlu0  ;;  %13828 = vmatmul.mubr.f32.gmra.mrb[8].mxu0 %v17484_v35  ;;  %13937 = vmatprep.mubr.f32.mxu1 %v1506_v33  ;;  %v1515_v49 = vsub.f32 %v17713_v1, %v21868_v25 }
 0x112   :  { %v1314_v44 = vsel %vm66_vm3, %v1267_v61, 0  ;;  %13830 = vmatprep.mubr.f32.mxu0 %v17494_v46 }
 0x113   :  { %v1524_v19 = vand.u32 4294901760, %v17725_v26  ;;  %v17734_v15 = vand.u32 4294901760, %v1314_v44  ;;  %v1516_v3 = vand.u32 4294901760, %v1515_v49 }
 0x115   :  { %v17737_v56 = vsub.f32 %v1314_v44, %v17734_v15  ;;  %13831 = vmatmul.mubr.f32.gmra.mrb[10].mxu0 %v17504_v59  ;;  %13938 = vmatmul.mubr.f32.gmra.mrb[12].mxu1 %v1516_v3  ;;  %v1525_v33 = vsub.f32 %v17725_v26, %v1524_v19  ;;  %v22317_v3 = vand.u32 4294901760, %v17395_v24  ;;  %v22320_v24 = vand.u32 4294901760, %v17422_v43 }
 0x116   :  { %13833 = vmatprep.mubr.f32.mxu0 %v17514_v10  ;;  %v22324_v43 = vand.u32 4294901760, %v17464_v8  ;;  %v22328_v8 = vand.u32 4294901760, %v17504_v59  ;;  %v22332_v59 = vand.u32 4294901760, %v17544_v12 }
 0x117   :  { %v1534_v61 = vand.u32 4294901760, %v17737_v56  ;;  %v1526_v25 = vand.u32 4294901760, %v1525_v33  ;;  %v22318_v33 = vand.u32 4294901760, %v17402_v29  ;;  %v22321_v29 = vand.u32 4294901760, %v17434_v50 }
 0x118   :  { %v22325_v50 = vand.u32 4294901760, %v17474_v21  ;;  %v22329_v21 = vand.u32 4294901760, %v17514_v10  ;;  %v22333_v10 = vld [vmem:[#allocation19_spill] sm:$0xff] }
 0x119   :  { %13834 = vmatmul.mubr.f32.gmra.mrb[12].mxu0 %v17524_v32  ;;  %13940 = vmatprep.mubr.f32.mxu1 %v1526_v25  ;;  %v1535_v49 = vsub.f32 %v17737_v56, %v1534_v61  ;;  %v22319_v25 = vand.u32 4294901760, %v17412_v36  ;;  %v22322_v36 = vand.u32 4294901760, %v17444_v57  ;;  %v22326_v57 = vand.u32 4294901760, %v17484_v35 }
 0x11a   :  { %13836 = vmatprep.mubr.f32.mxu0 %v17534_v52  ;;  %v22330_v35 = vand.u32 4294901760, %v17524_v32  ;;  %v22334_v32 = vld [vmem:[#allocation13_spill] sm:$0xff] }
 0x11b   :  { %v1536_v44 = vand.u32 4294901760, %v1535_v49  ;;  %v22337_v49 = vld [vmem:[#allocation21_spill] sm:$0xff] }
 0x11d   :  { %13837 = vmatmul.mubr.f32.gmra.mrb[14].mxu0 %v17544_v12  ;;  %13941 = vmatmul.mubr.f32.gmra.mrb[14].mxu1 %v1536_v44  ;;  %v22336_v12 = vld [vmem:[#allocation14_spill] sm:$0xff]  ;;  %v22338_v44 = vld [vmem:[#allocation15_spill] sm:$0xff] }
 0x11e   :  { %13841 = vmatprep.mubr.f32.mxu0 %v22317_v3  ;;  %13945 = vmatprep.mubr.f32.mxu1 %v17551_v39  ;;  %v22339_v3 = vld [vmem:[#allocation22_spill] sm:$0xff] }
 0x121   :  { %13842 = vmatmul.mubr.f32.vlgmr.msra.gmra.mrb[0].mxu0 %v22318_v33  ;;  %13946 = vmatmul.mubr.f32.vlgmr.msra.gmra.mrb[0].mxu1 %v17560_v9  ;;  %v22340_v33 = vld [vmem:[#allocation16_spill] sm:$0xff] }
 0x122   :  { %13844 = vmatprep.mubr.f32.mxu0 %v22319_v25  ;;  %13948 = vmatprep.mubr.f32.mxu1 %v17572_v38  ;;  %v22341_v25 = vld [vmem:[#allocation17_spill] sm:$0xff] }
 0x123   :  { %13866 = vmatpush3.msra.mxu0 %v17383_v18  ;;  %13970 = vmatpush3.msra.mxu1 %v17380_v17  ;;  %v22323_v17 = vand.u32 4294901760, %v17454_v0  ;;  %v22327_v0 = vand.u32 4294901760, %v17494_v46  ;;  %v22331_v46 = vand.u32 4294901760, %v17534_v52  ;;  %v22335_v52 = vld [vmem:[#allocation20_spill] sm:$0xff] }
 0x124   :  { %13891 = vmatprep.subr.mxu0 %v17365_v13  ;;  %13995 = vmatprep.subr.mxu1 %v17365_v13 }
 0x125   :  { %13845 = vmatmul.mubr.f32.gmra.mrb[2].mxu0 %v22320_v24  ;;  %13949 = vmatmul.mubr.f32.gmra.mrb[2].mxu1 %v17585_v37  ;;  %v22342_v24 = vld [vmem:[#allocation18_spill] sm:$0xff] }
 0x126   :  { %13847 = vmatprep.mubr.f32.mxu0 %v22321_v29  ;;  %13951 = vmatprep.mubr.f32.mxu1 %v17599_v53  ;;  %v22343_v29 = vand.u32 4294901760, %v17554_v58 }
 0x129   :  { %13848 = vmatmul.mubr.f32.gmra.mrb[4].mxu0 %v22322_v36  ;;  %13952 = vmatmul.mubr.f32.gmra.mrb[4].mxu1 %v17612_v11  ;;  %v22344_v36 = vand.u32 4294901760, %v17564_v45 }
 0x12a   :  { %13850 = vmatprep.mubr.f32.mxu0 %v22323_v17  ;;  %13954 = vmatprep.mubr.f32.mxu1 %v17624_v4  ;;  %v22345_v17 = vand.u32 4294901760, %v17575_v22 }
 0x12d   :  { %13851 = vmatmul.mubr.f32.gmra.mrb[6].mxu0 %v22324_v43  ;;  %13955 = vmatmul.mubr.f32.gmra.mrb[6].mxu1 %v17636_v54 }
 0x12e   :  { %13853 = vmatprep.mubr.f32.mxu0 %v22325_v50  ;;  %13957 = vmatprep.mubr.f32.mxu1 %v17648_v40 }
 0x131   :  { %13854 = vmatmul.mubr.f32.gmra.mrb[8].mxu0 %v22326_v57  ;;  %13958 = vmatmul.mubr.f32.gmra.mrb[8].mxu1 %v17660_v28 }
 0x132   :  { %13856 = vmatprep.mubr.f32.mxu0 %v22327_v0  ;;  %13960 = vmatprep.mubr.f32.mxu1 %v17672_v6 }
 0x135   :  { %13857 = vmatmul.mubr.f32.gmra.mrb[10].mxu0 %v22328_v8  ;;  %13961 = vmatmul.mubr.f32.gmra.mrb[10].mxu1 %v17685_v30 }
 0x136   :  { %13859 = vmatprep.mubr.f32.mxu0 %v22329_v21  ;;  %13963 = vmatprep.mubr.f32.mxu1 %v17698_v2 }
 0x139   :  { %13860 = vmatmul.mubr.f32.gmra.mrb[12].mxu0 %v22330_v35  ;;  %13964 = vmatmul.mubr.f32.gmra.mrb[12].mxu1 %v17710_v47 }
 0x13a   :  { %13862 = vmatprep.mubr.f32.mxu0 %v22331_v46  ;;  %13966 = vmatprep.mubr.f32.mxu1 %v17722_v7 }
 0x13d   :  { %13863 = vmatmul.mubr.f32.gmra.mrb[14].mxu0 %v22332_v59  ;;  %13967 = vmatmul.mubr.f32.gmra.mrb[14].mxu1 %v17734_v15 }
 0x13e   :  { %13867 = vmatprep.mubr.f32.mxu0 %v17392_v23  ;;  %13971 = vmatprep.mubr.f32.mxu1 %v17554_v58 }
 0x141   :  { %13868 = vmatmul.mubr.f32.vlgmr.msra.gmra.mrb[0].mxu0 %v17398_v27  ;;  %13972 = vmatmul.mubr.f32.vlgmr.msra.gmra.mrb[0].mxu1 %v17564_v45 }
 0x142   :  { %13870 = vmatprep.mubr.f32.mxu0 %v17409_v34  ;;  %13974 = vmatprep.mubr.f32.mxu1 %v17575_v22 }
 0x143   :  { %13892 = vmatpush3.msra.mxu0 %v17365_v13  ;;  %13996 = vmatpush3.msra.mxu1 %v17365_v13 }
 0x144   :  { %14021 = vmatprep.subr.mxu1 %v17383_v18 }
 0x145   :  { %13871 = vmatmul.mubr.f32.gmra.mrb[2].mxu0 %v17419_v41  ;;  %13975 = vmatmul.mubr.f32.gmra.mrb[2].mxu1 %v17589_v63 }
 0x146   :  { %13873 = vmatprep.mubr.f32.mxu0 %v17430_v48  ;;  %13977 = vmatprep.mubr.f32.mxu1 %v17603_v42 }
 0x149   :  { %13874 = vmatmul.mubr.f32.gmra.mrb[4].mxu0 %v17441_v55  ;;  %13978 = vmatmul.mubr.f32.gmra.mrb[4].mxu1 %v17615_v60 }
 0x14a   :  { %13876 = vmatprep.mubr.f32.mxu0 %v17451_v62  ;;  %13980 = vmatprep.mubr.f32.mxu1 %v17627_v20 }
 0x14d   :  { %13877 = vmatmul.mubr.f32.gmra.mrb[6].mxu0 %v17461_v5  ;;  %13981 = vmatmul.mubr.f32.gmra.mrb[6].mxu1 %v17639_v51 }
 0x14e   :  { %13879 = vmatprep.mubr.f32.mxu0 %v17471_v16  ;;  %13983 = vmatprep.mubr.f32.mxu1 %v17651_v14 }
 0x151   :  { %13880 = vmatmul.mubr.f32.gmra.mrb[8].mxu0 %v17481_v31  ;;  %13984 = vmatmul.mubr.f32.gmra.mrb[8].mxu1 %v22333_v10 }
 0x152   :  { %13882 = vmatprep.mubr.f32.mxu0 %v22334_v32  ;;  %13986 = vmatprep.mubr.f32.mxu1 %v22335_v52 }
 0x155   :  { %13883 = vmatmul.mubr.f32.gmra.mrb[10].mxu0 %v22336_v12  ;;  %13987 = vmatmul.mubr.f32.gmra.mrb[10].mxu1 %v22337_v49 }
 0x156   :  { %13885 = vmatprep.mubr.f32.mxu0 %v22338_v44  ;;  %13989 = vmatprep.mubr.f32.mxu1 %v22339_v3 }
 0x159   :  { %13886 = vmatmul.mubr.f32.gmra.mrb[12].mxu0 %v22340_v33  ;;  %13990 = vmatmul.mubr.f32.gmra.mrb[12].mxu1 %v17713_v1 }
 0x15a   :  { %13888 = vmatprep.mubr.f32.mxu0 %v22341_v25  ;;  %13992 = vmatprep.mubr.f32.mxu1 %v17725_v26 }
 0x15d   :  { %13889 = vmatmul.mubr.f32.gmra.mrb[14].mxu0 %v22342_v24  ;;  %13993 = vmatmul.mubr.f32.gmra.mrb[14].mxu1 %v17737_v56 }
 0x15e   :  { %13893 = vmatprep.mubr.f32.mxu0 %v17392_v23  ;;  %13997 = vmatprep.mubr.f32.mxu1 %v22343_v29  ;;  %v22346_v23 = vand.u32 4294901760, %v17589_v63 }
 0x161   :  { %13894 = vmatmul.mubr.f32.vlgmr.msra.gmra.mrb[0].mxu0 %v17398_v27  ;;  %13998 = vmatmul.mubr.f32.vlgmr.msra.gmra.mrb[0].mxu1 %v22344_v36  ;;  %v22347_v27 = vand.u32 4294901760, %v17603_v42 }
 0x162   :  { %13896 = vmatprep.mubr.f32.mxu0 %v17409_v34  ;;  %14000 = vmatprep.mubr.f32.mxu1 %v22345_v17  ;;  %v22348_v34 = vand.u32 4294901760, %v17615_v60 }
 0x163   :  { %14022 = vmatpush3.msra.mxu1 %v17383_v18  ;;  %v22349_v18 = vand.u32 4294901760, %v17627_v20 }
 0x164   :  { %14047 = vmatprep.subr.mxu1 %v17365_v13 }
 0x165   :  { %13897 = vmatmul.mubr.f32.gmra.mrb[2].mxu0 %v17419_v41  ;;  %14001 = vmatmul.mubr.f32.gmra.mrb[2].mxu1 %v22346_v23  ;;  %v22350_v41 = vand.u32 4294901760, %v17639_v51 }
 0x166   :  { %13899 = vmatprep.mubr.f32.mxu0 %v17430_v48  ;;  %14003 = vmatprep.mubr.f32.mxu1 %v22347_v27  ;;  %v22351_v48 = vand.u32 4294901760, %v17651_v14 }
 0x169   :  { %13900 = vmatmul.mubr.f32.gmra.mrb[4].mxu0 %v17441_v55  ;;  %14004 = vmatmul.mubr.f32.gmra.mrb[4].mxu1 %v22348_v34  ;;  %v22352_v55 = vand.u32 4294901760, %v22333_v10 }
 0x16a   :  { %13902 = vmatprep.mubr.f32.mxu0 %v17451_v62  ;;  %14006 = vmatprep.mubr.f32.mxu1 %v22349_v18  ;;  %v22353_v62 = vand.u32 4294901760, %v22335_v52 }
 0x16d   :  { %13903 = vmatmul.mubr.f32.gmra.mrb[6].mxu0 %v17461_v5  ;;  %14007 = vmatmul.mubr.f32.gmra.mrb[6].mxu1 %v22350_v41  ;;  %v22354_v5 = vand.u32 4294901760, %v22337_v49 }
 0x16e   :  { %13905 = vmatprep.mubr.f32.mxu0 %v17471_v16  ;;  %14009 = vmatprep.mubr.f32.mxu1 %v22351_v48  ;;  %v22355_v16 = vand.u32 4294901760, %v22339_v3 }
 0x171   :  { %13906 = vmatmul.mubr.f32.gmra.mrb[8].mxu0 %v17481_v31  ;;  %14010 = vmatmul.mubr.f32.gmra.mrb[8].mxu1 %v22352_v55  ;;  %v22356_v31 = vand.u32 4294901760, %v17713_v1 }
 0x172   :  { %13908 = vmatprep.mubr.f32.mxu0 %v22334_v32  ;;  %14012 = vmatprep.mubr.f32.mxu1 %v22353_v62 }
 0x175   :  { %13909 = vmatmul.mubr.f32.gmra.mrb[10].mxu0 %v22336_v12  ;;  %14013 = vmatmul.mubr.f32.gmra.mrb[10].mxu1 %v22354_v5 }
 0x176   :  { %13911 = vmatprep.mubr.f32.mxu0 %v22338_v44  ;;  %14015 = vmatprep.mubr.f32.mxu1 %v22355_v16 }
 0x179   :  { %13912 = vmatmul.mubr.f32.gmra.mrb[12].mxu0 %v22340_v33  ;;  %14016 = vmatmul.mubr.f32.gmra.mrb[12].mxu1 %v22356_v31 }
 0x17a   :  { %13914 = vmatprep.mubr.f32.mxu0 %v22341_v25  ;;  %14018 = vmatprep.mubr.f32.mxu1 %v1524_v19 }
 0x17d   :  { %13915 = vmatmul.mubr.f32.gmra.mrb[14].mxu0 %v22342_v24  ;;  %14019 = vmatmul.mubr.f32.gmra.mrb[14].mxu1 %v1534_v61  ;;  %v17970_v61 = vld [vmem:[#allocation2 + $0x8] ss:$0 sm:$0xff] }
 0x17e   :  { %14023 = vmatprep.mubr.f32.mxu1 %v17551_v39 }
 0x181   :  { %14024 = vmatmul.mubr.f32.vlgmr.msra.gmra.mrb[0].mxu1 %v17560_v9 }
 0x182   :  { %14026 = vmatprep.mubr.f32.mxu1 %v17572_v38  ;;  %14048 = vmatpush3.msra.mxu1 %v17365_v13  ;;  %v2498_v13 = vld [vmem:[#allocation2 + $0x18] sm:$0xff] }
 0x185   :  { %14027 = vmatmul.mubr.f32.gmra.mrb[2].mxu1 %v17585_v37 }
 0x186   :  { %14029 = vmatprep.mubr.f32.mxu1 %v17599_v53 }
 0x189   :  { %14030 = vmatmul.mubr.f32.gmra.mrb[4].mxu1 %v17612_v11 }
 0x18a   :  { %14032 = vmatprep.mubr.f32.mxu1 %v17624_v4 }
 0x18d   :  { %14033 = vmatmul.mubr.f32.gmra.mrb[6].mxu1 %v17636_v54 }
 0x18e   :  { %14035 = vmatprep.mubr.f32.mxu1 %v17648_v40 }
 0x191   :  { %14036 = vmatmul.mubr.f32.gmra.mrb[8].mxu1 %v17660_v28 }
 0x192   :  { %14038 = vmatprep.mubr.f32.mxu1 %v17672_v6 }
 0x195   :  { %14039 = vmatmul.mubr.f32.gmra.mrb[10].mxu1 %v17685_v30 }
 0x196   :  { %14041 = vmatprep.mubr.f32.mxu1 %v17698_v2 }
 0x199   :  { %14042 = vmatmul.mubr.f32.gmra.mrb[12].mxu1 %v17710_v47 }
 0x19a   :  { %14044 = vmatprep.mubr.f32.mxu1 %v17722_v7 }
 0x19d   :  { %14045 = vmatmul.mubr.f32.gmra.mrb[14].mxu1 %v17734_v15 }
 0x19e   :  { %14049 = vmatprep.mubr.f32.mxu1 %v17551_v39 }
 0x1a1   :  { %14050 = vmatmul.mubr.f32.vlgmr.msra.gmra.mrb[0].mxu1 %v17560_v9  ;;  %v2497_v9 = vld [vmem:[#allocation2 + $0x10] sm:$0xff] }
 0x1a2   :  { %14052 = vmatprep.mubr.f32.mxu1 %v17572_v38  ;;  %v2604_v42 = vand.u32 4294901760, %v2497_v9 }
 0x1a4   :  { %v17933_v45 = vsub.f32 %v2497_v9, %v2604_v42 }
 0x1a5   :  { %14053 = vmatmul.mubr.f32.gmra.mrb[2].mxu1 %v17585_v37 }
 0x1a6   :  { %14055 = vmatprep.mubr.f32.mxu1 %v17599_v53  ;;  %v21889_v38 = vand.u32 4294901760, %v17933_v45 }
 0x1a8   :  { %v2996_v58 = vsub.f32 %v17933_v45, %v21889_v38 }
 0x1a9   :  { %14056 = vmatmul.mubr.f32.gmra.mrb[4].mxu1 %v17612_v11 }
 0x1aa   :  { %14058 = vmatprep.mubr.f32.mxu1 %v17624_v4  ;;  %v2607_v4 = vand.u32 4294901760, %v2498_v13  ;;  %v2997_v11 = vand.u32 4294901760, %v2996_v58 }
 0x1ac   :  { %v17920_v53 = vpack.c.bf16 %v2607_v4, %v2604_v42 }
 0x1ad   :  { %14059 = vmatmul.mubr.f32.gmra.mrb[6].mxu1 %v17636_v54 }
 0x1ae   :  { %14061 = vmatprep.mubr.f32.mxu1 %v17648_v40  ;;  %v2499_v40 = vld [vmem:[#allocation2 + $0x20] sm:$0xff]  ;;  %15682 = vmatprep.subr.bf16.mxu0 %v17920_v53 }
 0x1af   :  { %16395 = vmatprep.subr.bf16.mxu1 %v17920_v53  ;;  %15684 = vmatpush3.bf16.msra.mxu0 %v17920_v53 }
 0x1b0   :  { %16397 = vmatpush3.bf16.msra.mxu1 %v17920_v53 }
 0x1b1   :  { %14062 = vmatmul.mubr.f32.gmra.mrb[8].mxu1 %v17660_v28  ;;  %v2500_v28 = vld [vmem:[#allocation2 + $0x28] sm:$0xff] }
 0x1b2   :  { %14064 = vmatprep.mubr.f32.mxu1 %v17672_v6  ;;  %v2610_v6 = vand.u32 4294901760, %v2499_v40  ;;  %v2613_v54 = vand.u32 4294901760, %v2500_v28 }
 0x1b4   :  { %v17927_v22 = vpack.c.bf16 %v2613_v54, %v2610_v6  ;;  %v17945_v37 = vsub.f32 %v2499_v40, %v2610_v6  ;;  %v17947_v63 = vsub.f32 %v2500_v28, %v2613_v54 }
 0x1b5   :  { %14065 = vmatmul.mubr.f32.gmra.mrb[10].mxu1 %v17685_v30 }
 0x1b6   :  { %14067 = vmatprep.mubr.f32.mxu1 %v17698_v2  ;;  %15686 = vmatprep.subr.bf16.mxu0 %v17927_v22  ;;  %v21886_v20 = vand.u32 4294901760, %v17945_v37  ;;  %v21884_v51 = vand.u32 4294901760, %v17947_v63  ;;  %v17968_v56 = vpack.c.bf16 %v17947_v63, %v17945_v37 }
 0x1b7   :  { %16396 = vmatprep.subr.bf16.mxu1 %v17927_v22  ;;  %15688 = vmatpush3.bf16.msra.mxu0 %v17927_v22 }
 0x1b8   :  { %16398 = vmatpush3.bf16.msra.mxu1 %v17927_v22  ;;  %v3017_v30 = vsub.f32 %v17947_v63, %v21884_v51 }
 0x1b9   :  { %14068 = vmatmul.mubr.f32.gmra.mrb[12].mxu1 %v17710_v47  ;;  %v3010_v47 = vsub.f32 %v17945_v37, %v21886_v20 }
 0x1ba   :  { %14070 = vmatprep.mubr.f32.mxu1 %v17722_v7  ;;  %v17935_v7 = vsub.f32 %v2498_v13, %v2607_v4 }
 0x1bb   :  { %v3011_v2 = vand.u32 4294901760, %v3010_v47 }
 0x1bc   :  { %v21888_v39 = vand.u32 4294901760, %v17935_v7  ;;  %v17964_v26 = vpack.c.bf16 %v17935_v7, %v17933_v45 }
 0x1bd   :  { %14071 = vmatmul.mubr.f32.gmra.mrb[14].mxu1 %v17734_v15  ;;  %v3018_v15 = vand.u32 4294901760, %v3017_v30 }
 0x1be   :  { %v3003_v19 = vsub.f32 %v17935_v7, %v21888_v39 }
 0x1bf   :  { %v17960_v1 = vpack.c.bf16 %v3018_v15, %v3011_v2 }
 0x1c0   :  { %v3004_v60 = vand.u32 4294901760, %v3003_v19 }
 0x1c2   :  { %v17951_v14 = vpack.c.bf16 %v3004_v60, %v2997_v11 }
 0x1c4   :  { %15690 = vmatprep.subr.bf16.mxu0 %v17951_v14 }
 0x234   :  { %v13895_v43 = vpop.f32.mrb[0].mxu0 }
 0x235   :  { %v2434_v50 = vadd.f32 %v13895_v43, %v17970_v61  ;;  %v1116_v57 = vpop.f32.mrb[1].mxu0 }
 0x236   :  { %v2433_v0 = vadd.f32 %v17970_v61, %v1116_v57 }
 0x237   :  { %v2466_v8 = vmax.f32 %v2434_v50, 0.0 }
 0x238   :  { %v2465_v21 = vmax.f32 %v2433_v0, 0.0  ;;  %v13898_v35 = vpop.f32.mrb[2].mxu0 }
 0x239   :  { %v2511_v46 = vsel %vm2506_vm4, %v2466_v8, 0  ;;  %v2436_v59 = vadd.f32 %v13898_v35, %v17970_v61  ;;  %v1128_v10 = vpop.f32.mrb[3].mxu0 }
 0x23a   :  { %v17976_v32 = vand.u32 4294901760, %v2511_v46  ;;  %v2508_v52 = vsel %vm2506_vm4, %v2465_v21, 0  ;;  %v2435_v12 = vadd.f32 %v17970_v61, %v1128_v10 }
 0x23b   :  { %v17980_v49 = vand.u32 4294901760, %v2508_v52  ;;  %v2468_v44 = vmax.f32 %v2436_v59, 0.0 }
 0x23c   :  { %v17983_v3 = vsub.f32 %v2511_v46, %v17976_v32  ;;  %v2467_v33 = vmax.f32 %v2435_v12, 0.0  ;;  %v13901_v25 = vpop.f32.mrb[4].mxu0 }
 0x23d   :  { %v17986_v24 = vsub.f32 %v2508_v52, %v17980_v49  ;;  %v2517_v29 = vsel %vm2506_vm4, %v2468_v44, 0  ;;  %v2438_v36 = vadd.f32 %v13901_v25, %v17970_v61  ;;  %v1140_v17 = vpop.f32.mrb[5].mxu0 }
 0x23e   :  { %v21883_v23 = vand.u32 4294901760, %v17983_v3  ;;  %v17991_v27 = vand.u32 4294901760, %v2517_v29  ;;  %v2514_v34 = vsel %vm2506_vm4, %v2467_v33, 0  ;;  %v2437_v18 = vadd.f32 %v17970_v61, %v1140_v17 }
 0x23f   :  { %v17995_v41 = vand.u32 4294901760, %v2514_v34  ;;  %v2470_v48 = vmax.f32 %v2438_v36, 0.0  ;;  %v21887_v55 = vand.u32 4294901760, %v17986_v24 }
 0x240   :  { %v2685_v62 = vsub.f32 %v17983_v3, %v21883_v23  ;;  %v18002_v5 = vsub.f32 %v2517_v29, %v17991_v27  ;;  %v2469_v16 = vmax.f32 %v2437_v18, 0.0  ;;  %v13904_v31 = vpop.f32.mrb[6].mxu0 }
 0x241   :  { %v18005_v9 = vsub.f32 %v2514_v34, %v17995_v41  ;;  %v2523_v13 = vsel %vm2506_vm4, %v2470_v48, 0  ;;  %v2440_v42 = vadd.f32 %v13904_v31, %v17970_v61  ;;  %v1152_v4 = vpop.f32.mrb[7].mxu0  ;;  %v2675_v40 = vsub.f32 %v17986_v24, %v21887_v55 }
 0x242   :  { %v18012_v28 = vand.u32 4294901760, %v2523_v13  ;;  %v2520_v6 = vsel %vm2506_vm4, %v2469_v16, 0  ;;  %v2439_v54 = vadd.f32 %v17970_v61, %v1152_v4  ;;  %v2686_v47 = vand.u32 4294901760, %v2685_v62 }
 0x243   :  { %v18016_v58 = vand.u32 4294901760, %v2520_v6  ;;  %v2472_v19 = vmax.f32 %v2440_v42, 0.0  ;;  %v2676_v11 = vand.u32 4294901760, %v2675_v40  ;;  %v21882_v60 = vand.u32 4294901760, %v18005_v9 }
 0x244   :  { %v18020_v30 = vsub.f32 %v2523_v13, %v18012_v28  ;;  %v2471_v2 = vmax.f32 %v2439_v54, 0.0  ;;  %v13907_v15 = vpop.f32.mrb[8].mxu0  ;;  %v21881_v43 = vand.u32 4294901760, %v18002_v5 }
 0x245   :  { %v18024_v50 = vsub.f32 %v2520_v6, %v18016_v58  ;;  %v2529_v57 = vsel %vm2506_vm4, %v2472_v19, 0  ;;  %v2442_v0 = vadd.f32 %v13907_v15, %v17970_v61  ;;  %v1164_v8 = vpop.f32.mrb[9].mxu0  ;;  %14081 = vmatprep.mubr.f32.mxu0 %v2676_v11  ;;  %v2695_v21 = vsub.f32 %v18005_v9, %v21882_v60 }
 0x246   :  { %v18031_v35 = vand.u32 4294901760, %v2529_v57  ;;  %v2526_v46 = vsel %vm2506_vm4, %v2471_v2, 0  ;;  %v2441_v59 = vadd.f32 %v17970_v61, %v1164_v8  ;;  %14082 = vmatmul.mubr.f32.vlgmr.msra.gmra.mrb[16].mxu0 %v2686_v47  ;;  %v2705_v10 = vsub.f32 %v18002_v5, %v21881_v43 }
 0x247   :  { %v18038_v52 = vand.u32 4294901760, %v2526_v46  ;;  %v2474_v12 = vmax.f32 %v2442_v0, 0.0  ;;  %v2696_v44 = vand.u32 4294901760, %v2695_v21  ;;  %v21880_v33 = vand.u32 4294901760, %v18024_v50  ;;  %15692 = vmatpush3.bf16.msra.mxu0 %v17951_v14 }
 0x248   :  { %v18043_v25 = vsub.f32 %v2529_v57, %v18031_v35  ;;  %v2473_v29 = vmax.f32 %v2441_v59, 0.0  ;;  %v13910_v36 = vpop.f32.mrb[10].mxu0  ;;  %v2706_v17 = vand.u32 4294901760, %v2705_v10  ;;  %v21879_v34 = vand.u32 4294901760, %v18020_v30  ;;  %15694 = vmatprep.subr.bf16.mxu0 %v17960_v1 }
 0x249   :  { %v18048_v18 = vsub.f32 %v2526_v46, %v18038_v52  ;;  %v2535_v48 = vsel %vm2506_vm4, %v2474_v12, 0  ;;  %v2444_v62 = vadd.f32 %v13910_v36, %v17970_v61  ;;  %v1176_v16 = vpop.f32.mrb[11].mxu0  ;;  %14084 = vmatprep.mubr.f32.mxu0 %v2696_v44  ;;  %v2715_v14 = vsub.f32 %v18024_v50, %v21880_v33 }
 0x24a   :  { %v18055_v31 = vand.u32 4294901760, %v2535_v48  ;;  %v2532_v13 = vsel %vm2506_vm4, %v2473_v29, 0  ;;  %v2443_v42 = vadd.f32 %v17970_v61, %v1176_v16  ;;  %14085 = vmatmul.mubr.f32.gmra.mrb[18].mxu0 %v2706_v17  ;;  %v2725_v4 = vsub.f32 %v18020_v30, %v21879_v34 }
 0x24b   :  { %v18062_v40 = vand.u32 4294901760, %v2532_v13  ;;  %v2476_v6 = vmax.f32 %v2444_v62, 0.0  ;;  %v2716_v54 = vand.u32 4294901760, %v2715_v14  ;;  %v21878_v19 = vand.u32 4294901760, %v18048_v18  ;;  %15696 = vmatpush3.bf16.msra.mxu0 %v17960_v1 }
 0x24c   :  { %v18067_v11 = vsub.f32 %v2535_v48, %v18055_v31  ;;  %v2475_v47 = vmax.f32 %v2443_v42, 0.0  ;;  %v13913_v2 = vpop.f32.mrb[12].mxu0  ;;  %v2726_v15 = vand.u32 4294901760, %v2725_v4  ;;  %v21877_v57 = vand.u32 4294901760, %v18043_v25  ;;  %15698 = vmatprep.subr.bf16.mxu0 %v17964_v26 }
 0x24d   :  { %v18072_v0 = vsub.f32 %v2532_v13, %v18062_v40  ;;  %v2541_v8 = vsel %vm2506_vm4, %v2476_v6, 0  ;;  %v2446_v21 = vadd.f32 %v13913_v2, %v17970_v61  ;;  %v1188_v46 = vpop.f32.mrb[13].mxu0  ;;  %14087 = vmatprep.mubr.f32.mxu0 %v2716_v54  ;;  %v2735_v1 = vsub.f32 %v18048_v18, %v21878_v19 }
 0x24e   :  { %v18079_v59 = vand.u32 4294901760, %v2541_v8  ;;  %v2538_v10 = vsel %vm2506_vm4, %v2475_v47, 0  ;;  %v2445_v12 = vadd.f32 %v17970_v61, %v1188_v46  ;;  %14088 = vmatmul.mubr.f32.gmra.mrb[20].mxu0 %v2726_v15  ;;  %v2745_v44 = vsub.f32 %v18043_v25, %v21877_v57 }
 0x24f   :  { %v18086_v29 = vand.u32 4294901760, %v2538_v10  ;;  %v2478_v36 = vmax.f32 %v2446_v21, 0.0  ;;  %v2736_v17 = vand.u32 4294901760, %v2735_v1  ;;  %v21871_v48 = vand.u32 4294901760, %v18072_v0 }
 0x250   :  { %22357 = vst [vmem:[#allocation19_spill] sm:$0xff] %v18079_v59  ;;  %v18090_v62 = vsub.f32 %v2541_v8, %v18079_v59  ;;  %v2477_v16 = vmax.f32 %v2445_v12, 0.0  ;;  %v13916_v14 = vpop.f32.mrb[14].mxu0  ;;  %v2746_v13 = vand.u32 4294901760, %v2745_v44  ;;  %v21869_v42 = vand.u32 4294901760, %v18067_v11 }
 0x251   :  { %v18094_v4 = vsub.f32 %v2538_v10, %v18086_v29  ;;  %v2547_v6 = vsel %vm2506_vm4, %v2478_v36, 0  ;;  %v2448_v54 = vadd.f32 %v13916_v14, %v17970_v61  ;;  %v1200_v47 = vpop.f32.mrb[15].mxu0  ;;  %14090 = vmatprep.mubr.f32.mxu0 %v2736_v17  ;;  %v2755_v2 = vsub.f32 %v18072_v0, %v21871_v48 }
 0x252   :  { %v21870_v15 = vand.u32 4294901760, %v18090_v62  ;;  %v18102_v8 = vand.u32 4294901760, %v2547_v6  ;;  %v2544_v21 = vsel %vm2506_vm4, %v2477_v16, 0  ;;  %v2447_v46 = vadd.f32 %v17970_v61, %v1200_v47  ;;  %14091 = vmatmul.mubr.f32.gmra.mrb[22].mxu0 %v2746_v13 }
 0x253   :  { %v18106_v1 = vand.u32 4294901760, %v2544_v21  ;;  %v2480_v10 = vmax.f32 %v2448_v54, 0.0  ;;  %v2756_v12 = vand.u32 4294901760, %v2755_v2  ;;  %v2765_v44 = vsub.f32 %v18067_v11, %v21869_v42 }
 0x254   :  { %22358 = vst [vmem:[#allocation13_spill] sm:$0xff] %v18102_v8  ;;  %v18112_v36 = vsub.f32 %v2547_v6, %v18102_v8  ;;  %v2479_v17 = vmax.f32 %v2447_v46, 0.0  ;;  %v21872_v14 = vand.u32 4294901760, %v18094_v4  ;;  %v2785_v16 = vsub.f32 %v18090_v62, %v21870_v15 }
 0x255   :  { %22359 = vst [vmem:[#allocation20_spill] sm:$0xff] %v18106_v1  ;;  %v18119_v13 = vsub.f32 %v2544_v21, %v18106_v1  ;;  %v2553_v54 = vsel %vm2506_vm4, %v2480_v10, 0  ;;  %14093 = vmatprep.mubr.f32.mxu0 %v2756_v12  ;;  %v2766_v47 = vand.u32 4294901760, %v2765_v44 }
 0x256   :  { %v18122_v2 = vand.u32 4294901760, %v2553_v54  ;;  %v2550_v42 = vsel %vm2506_vm4, %v2479_v17, 0  ;;  %v2775_v6 = vsub.f32 %v18094_v4, %v21872_v14  ;;  %v21875_v21 = vand.u32 4294901760, %v18112_v36 }
 0x257   :  { %v18128_v46 = vand.u32 4294901760, %v2550_v42  ;;  %14094 = vmatmul.mubr.f32.gmra.mrb[24].mxu0 %v2766_v47  ;;  %v21876_v15 = vand.u32 4294901760, %v18119_v13  ;;  %v2786_v12 = vand.u32 4294901760, %v2785_v16 }
 0x258   :  { %22360 = vst [vmem:[#allocation14_spill] sm:$0xff] %v18122_v2  ;;  %v18133_v48 = vsub.f32 %v2553_v54, %v18122_v2  ;;  %14137 = vmatprep.mubr.f32.mxu0 %v17980_v49  ;;  %v2776_v10 = vand.u32 4294901760, %v2775_v6  ;;  %v2805_v47 = vsub.f32 %v18112_v36, %v21875_v21 }
 0x259   :  { %22361 = vst [vmem:[#allocation21_spill] sm:$0xff] %v18128_v46  ;;  %v18137_v44 = vsub.f32 %v2550_v42, %v18128_v46  ;;  %v2795_v17 = vsub.f32 %v18119_v13, %v21876_v15 }
 0x25a   :  { %14096 = vmatprep.mubr.f32.mxu1 %v2776_v10  ;;  %v21873_v14 = vand.u32 4294901760, %v18133_v48  ;;  %v2806_v42 = vand.u32 4294901760, %v2805_v47 }
 0x25b   :  { %14097 = vmatmul.mubr.f32.vlgmr.msra.gmra.mrb[16].mxu1 %v2786_v12  ;;  %14138 = vmatmul.mubr.f32.vlgmr.msra.gmra.mrb[16].mxu0 %v17976_v32  ;;  %v2796_v54 = vand.u32 4294901760, %v2795_v17  ;;  %v21874_v16 = vand.u32 4294901760, %v18137_v44 }
 0x25c   :  { %14140 = vmatprep.mubr.f32.mxu0 %v17995_v41  ;;  %15700 = vmatpush3.bf16.msra.mxu0 %v17964_v26  ;;  %v2825_v10 = vsub.f32 %v18133_v48, %v21873_v14 }
 0x25d   :  { %14099 = vmatprep.mubr.f32.mxu1 %v2796_v54  ;;  %v2815_v6 = vsub.f32 %v18137_v44, %v21874_v16  ;;  %15702 = vmatprep.subr.bf16.mxu0 %v17968_v56 }
 0x25e   :  { %v2826_v26 = vand.u32 4294901760, %v2825_v10 }
 0x25f   :  { %14100 = vmatmul.mubr.f32.gmra.mrb[18].mxu1 %v2806_v42  ;;  %14141 = vmatmul.mubr.f32.gmra.mrb[18].mxu0 %v17991_v27  ;;  %v2816_v12 = vand.u32 4294901760, %v2815_v6 }
 0x260   :  { %14143 = vmatprep.mubr.f32.mxu0 %v18016_v58  ;;  %15704 = vmatpush3.bf16.msra.mxu0 %v17968_v56 }
 0x261   :  { %14102 = vmatprep.mubr.f32.mxu1 %v2816_v12  ;;  %15706 = vmatprep.subr.bf16.mxu0 %v17920_v53 }
 0x263   :  { %14103 = vmatmul.mubr.f32.gmra.mrb[20].mxu1 %v2826_v26  ;;  %14144 = vmatmul.mubr.f32.gmra.mrb[20].mxu0 %v18012_v28 }
 0x264   :  { %14146 = vmatprep.mubr.f32.mxu0 %v18038_v52 }
 0x267   :  { %14147 = vmatmul.mubr.f32.gmra.mrb[22].mxu0 %v18031_v35 }
 0x268   :  { %14149 = vmatprep.mubr.f32.mxu0 %v18062_v40 }
 0x26b   :  { %14150 = vmatmul.mubr.f32.gmra.mrb[24].mxu0 %v18055_v31 }
 0x26c   :  { %14152 = vmatprep.mubr.f32.mxu0 %v18086_v29 }
 0x26f   :  { %14153 = vmatmul.mubr.f32.gmra.mrb[26].mxu0 %v18079_v59 }
 0x270   :  { %14155 = vmatprep.mubr.f32.mxu0 %v18106_v1 }
 0x273   :  { %14156 = vmatmul.mubr.f32.gmra.mrb[28].mxu0 %v18102_v8 }
 0x274   :  { %14158 = vmatprep.mubr.f32.mxu0 %v18128_v46  ;;  %v14051_v56 = vpop.f32.mrb[0].mxu1 }
 0x275   :  { %v2450_v17 = vadd.f32 %v14051_v56, %v17970_v61  ;;  %v2313_v47 = vpop.f32.mrb[1].mxu1 }
 0x276   :  { %v2449_v54 = vadd.f32 %v17970_v61, %v2313_v47 }
 0x277   :  { %v2482_v42 = vmax.f32 %v2450_v17, 0.0  ;;  %14159 = vmatmul.mubr.f32.gmra.mrb[30].mxu0 %v18122_v2 }
 0x278   :  { %v2481_v6 = vmax.f32 %v2449_v54, 0.0  ;;  %v14054_v10 = vpop.f32.mrb[2].mxu1 }
 0x279   :  { %v2559_v12 = vsel %vm2506_vm4, %v2482_v42, 0  ;;  %v2452_v26 = vadd.f32 %v14054_v10, %v17970_v61  ;;  %v2325_v14 = vpop.f32.mrb[3].mxu1 }
 0x27a   :  { %v18176_v16 = vand.u32 4294901760, %v2559_v12  ;;  %v2556_v21 = vsel %vm2506_vm4, %v2481_v6, 0  ;;  %v2451_v15 = vadd.f32 %v17970_v61, %v2325_v14 }
 0x27b   :  { %v18180_v56 = vand.u32 4294901760, %v2556_v21  ;;  %v2484_v57 = vmax.f32 %v2452_v26, 0.0 }
 0x27c   :  { %22362 = vst [vmem:[#allocation15_spill] sm:$0xff] %v18176_v16  ;;  %v18183_v17 = vsub.f32 %v2559_v12, %v18176_v16  ;;  %v2483_v47 = vmax.f32 %v2451_v15, 0.0  ;;  %v14057_v54 = vpop.f32.mrb[4].mxu1 }
 0x27d   :  { %22363 = vst [vmem:[#allocation22_spill] sm:$0xff] %v18180_v56  ;;  %v18186_v19 = vsub.f32 %v2556_v21, %v18180_v56  ;;  %v2565_v42 = vsel %vm2506_vm4, %v2484_v57, 0  ;;  %v2454_v10 = vadd.f32 %v14057_v54, %v17970_v61  ;;  %v2337_v34 = vpop.f32.mrb[5].mxu1  ;;  %14161 = vmatprep.mubr.f32.mxu0 %v18180_v56 }
 0x27e   :  { %v18191_v6 = vand.u32 4294901760, %v2565_v42  ;;  %v2562_v14 = vsel %vm2506_vm4, %v2483_v47, 0  ;;  %v2453_v26 = vadd.f32 %v17970_v61, %v2337_v34  ;;  %14162 = vmatmul.mubr.f32.gmra.mrb[32].mxu0 %v18176_v16  ;;  %v21885_v15 = vand.u32 4294901760, %v18183_v17 }
 0x27f   :  { %v18197_v12 = vand.u32 4294901760, %v2562_v14  ;;  %v2486_v21 = vmax.f32 %v2454_v10, 0.0  ;;  %v21890_v57 = vand.u32 4294901760, %v18186_v19 }
 0x280   :  { %22364 = vst [vmem:[#allocation16_spill] sm:$0xff] %v18191_v6  ;;  %v18201_v54 = vsub.f32 %v2565_v42, %v18191_v6  ;;  %v2485_v33 = vmax.f32 %v2453_v26, 0.0  ;;  %v14060_v43 = vpop.f32.mrb[6].mxu1  ;;  %v2845_v47 = vsub.f32 %v18183_v17, %v21885_v15 }
 0x281   :  { %22365 = vst [vmem:[#allocation17_spill] sm:$0xff] %v18197_v12  ;;  %v18207_v34 = vsub.f32 %v2562_v14, %v18197_v12  ;;  %v2571_v60 = vsel %vm2506_vm4, %v2486_v21, 0  ;;  %v2456_v23 = vadd.f32 %v14060_v43, %v17970_v61  ;;  %v2349_v51 = vpop.f32.mrb[7].mxu1  ;;  %14164 = vmatprep.mubr.f32.mxu0 %v18197_v12  ;;  %v2835_v42 = vsub.f32 %v18186_v19, %v21890_v57 }
 0x282   :  { %v18215_v10 = vand.u32 4294901760, %v2571_v60  ;;  %v2568_v26 = vsel %vm2506_vm4, %v2485_v33, 0  ;;  %v2455_v15 = vadd.f32 %v17970_v61, %v2349_v51  ;;  %14165 = vmatmul.mubr.f32.gmra.mrb[34].mxu0 %v18191_v6  ;;  %v2846_v57 = vand.u32 4294901760, %v2845_v47 }
 0x283   :  { %v18220_v14 = vand.u32 4294901760, %v2568_v26  ;;  %v2488_v21 = vmax.f32 %v2456_v23, 0.0  ;;  %v2836_v20 = vand.u32 4294901760, %v2835_v42  ;;  %v21897_v43 = vand.u32 4294901760, %v18207_v34 }
 0x284   :  { %22366 = vst [vmem:[#allocation18_spill] sm:$0xff] %v18215_v10  ;;  %v18224_v55 = vsub.f32 %v2571_v60, %v18215_v10  ;;  %v2487_v39 = vmax.f32 %v2455_v15, 0.0  ;;  %v14063_v38 = vpop.f32.mrb[8].mxu1  ;;  %v21904_v12 = vand.u32 4294901760, %v18201_v54 }
 0x285   :  { %22367 = vst [vmem:[#allocation23_spill] sm:$0xff] %v18220_v14  ;;  %v18228_v33 = vsub.f32 %v2568_v26, %v18220_v14  ;;  %v2577_v51 = vsel %vm2506_vm4, %v2488_v21, 0  ;;  %v2458_v6 = vadd.f32 %v14063_v38, %v17970_v61  ;;  %v2361_v16 = vpop.f32.mrb[9].mxu1  ;;  %14105 = vmatprep.mubr.f32.mxu1 %v2836_v20  ;;  %14167 = vmatprep.mubr.f32.mxu0 %v18220_v14 }
 0x286   :  { %v2855_v23 = vsub.f32 %v18207_v34, %v21897_v43  ;;  %v18236_v60 = vand.u32 4294901760, %v2577_v51  ;;  %v2574_v15 = vsel %vm2506_vm4, %v2487_v39, 0  ;;  %v2457_v47 = vadd.f32 %v17970_v61, %v2361_v16  ;;  %14106 = vmatmul.mubr.f32.gmra.mrb[22].mxu1 %v2846_v57  ;;  %14168 = vmatmul.mubr.f32.gmra.mrb[36].mxu0 %v18215_v10 }
 0x287   :  { %v2865_v38 = vsub.f32 %v18201_v54, %v21904_v12  ;;  %v18244_v20 = vand.u32 4294901760, %v2574_v15  ;;  %v2490_v42 = vmax.f32 %v2458_v6, 0.0  ;;  %v21907_v21 = vand.u32 4294901760, %v18228_v33 }
 0x288   :  { %22368 = vst [vmem:[#allocation24_spill] sm:$0xff] %v18236_v60  ;;  %v2856_v26 = vand.u32 4294901760, %v2855_v23  ;;  %v18248_v43 = vsub.f32 %v2577_v51, %v18236_v60  ;;  %v2489_v14 = vmax.f32 %v2457_v47, 0.0  ;;  %v14066_v39 = vpop.f32.mrb[10].mxu1  ;;  %v21914_v16 = vand.u32 4294901760, %v18224_v55 }
 0x289   :  { %22369 = vst [vmem:[#allocation25_spill] sm:$0xff] %v18244_v20  ;;  %v2866_v56 = vand.u32 4294901760, %v2865_v38  ;;  %v18252_v57 = vsub.f32 %v2574_v15, %v18244_v20  ;;  %v2583_v10 = vsel %vm2506_vm4, %v2490_v42, 0  ;;  %v2460_v12 = vadd.f32 %v14066_v39, %v17970_v61  ;;  %v2373_v2 = vpop.f32.mrb[11].mxu1  ;;  %14170 = vmatprep.mubr.f32.mxu0 %v18244_v20 }
 0x28a   :  { %14108 = vmatprep.mubr.f32.mxu1 %v2856_v26  ;;  %v2875_v6 = vsub.f32 %v18228_v33, %v21907_v21  ;;  %v18260_v51 = vand.u32 4294901760, %v2583_v10  ;;  %v2580_v23 = vsel %vm2506_vm4, %v2489_v14, 0  ;;  %v2459_v47 = vadd.f32 %v17970_v61, %v2373_v2  ;;  %14171 = vmatmul.mubr.f32.gmra.mrb[38].mxu0 %v18236_v60 }
 0x28b   :  { %14109 = vmatmul.mubr.f32.gmra.mrb[24].mxu1 %v2866_v56  ;;  %v2885_v15 = vsub.f32 %v18224_v55, %v21914_v16  ;;  %v18268_v38 = vand.u32 4294901760, %v2580_v23  ;;  %v2492_v42 = vmax.f32 %v2460_v12, 0.0  ;;  %v21917_v39 = vand.u32 4294901760, %v18252_v57 }
 0x28c   :  { %22370 = vst [vmem:[#allocation26_spill] sm:$0xff] %v18260_v51  ;;  %v2876_v26 = vand.u32 4294901760, %v2875_v6  ;;  %v18272_v21 = vsub.f32 %v2583_v10, %v18260_v51  ;;  %v2491_v20 = vmax.f32 %v2459_v47, 0.0  ;;  %v14069_v14 = vpop.f32.mrb[12].mxu1  ;;  %v21924_v2 = vand.u32 4294901760, %v18248_v43 }
 0x28d   :  { %22371 = vst [vmem:[#allocation27_spill] sm:$0xff] %v18268_v38  ;;  %v2886_v46 = vand.u32 4294901760, %v2885_v15  ;;  %v18276_v56 = vsub.f32 %v2580_v23, %v18268_v38  ;;  %v2589_v60 = vsel %vm2506_vm4, %v2492_v42, 0  ;;  %v2462_v16 = vadd.f32 %v14069_v14, %v17970_v61  ;;  %v2385_v8 = vpop.f32.mrb[13].mxu1  ;;  %14173 = vmatprep.mubr.f32.mxu0 %v18268_v38 }
 0x28e   :  { %14111 = vmatprep.mubr.f32.mxu1 %v2876_v26  ;;  %v2895_v12 = vsub.f32 %v18252_v57, %v21917_v39  ;;  %v18284_v10 = vand.u32 4294901760, %v2589_v60  ;;  %v2586_v6 = vsel %vm2506_vm4, %v2491_v20, 0  ;;  %v2461_v47 = vadd.f32 %v17970_v61, %v2385_v8  ;;  %14174 = vmatmul.mubr.f32.gmra.mrb[40].mxu0 %v18260_v51 }
 0x28f   :  { %14112 = vmatmul.mubr.f32.gmra.mrb[26].mxu1 %v2886_v46  ;;  %v2905_v23 = vsub.f32 %v18248_v43, %v21924_v2  ;;  %v18292_v15 = vand.u32 4294901760, %v2586_v6  ;;  %v2494_v42 = vmax.f32 %v2462_v16, 0.0  ;;  %v21927_v14 = vand.u32 4294901760, %v18276_v56 }
 0x290   :  { %v2896_v26 = vand.u32 4294901760, %v2895_v12  ;;  %v18296_v39 = vsub.f32 %v2589_v60, %v18284_v10  ;;  %v2493_v38 = vmax.f32 %v2461_v47, 0.0  ;;  %v14072_v20 = vpop.f32.mrb[14].mxu1  ;;  %v21931_v8 = vand.u32 4294901760, %v18272_v21 }
 0x291   :  { %22372 = vst [vmem:[#allocation28_spill] sm:$0xff] %v18292_v15  ;;  %v2906_v1 = vand.u32 4294901760, %v2905_v23  ;;  %v18300_v46 = vsub.f32 %v2586_v6, %v18292_v15  ;;  %v2595_v51 = vsel %vm2506_vm4, %v2494_v42, 0  ;;  %v2464_v2 = vadd.f32 %v14072_v20, %v17970_v61  ;;  %v2397_v59 = vpop.f32.mrb[15].mxu1  ;;  %14176 = vmatprep.mubr.f32.mxu0 %v18292_v15 }
 0x292   :  { %14114 = vmatprep.mubr.f32.mxu1 %v2896_v26  ;;  %v2915_v60 = vsub.f32 %v18276_v56, %v21927_v14  ;;  %v18308_v16 = vand.u32 4294901760, %v2595_v51  ;;  %v2592_v12 = vsel %vm2506_vm4, %v2493_v38, 0  ;;  %v2463_v47 = vadd.f32 %v17970_v61, %v2397_v59  ;;  %14177 = vmatmul.mubr.f32.gmra.mrb[42].mxu0 %v18284_v10 }
 0x293   :  { %14115 = vmatmul.mubr.f32.gmra.mrb[28].mxu1 %v2906_v1  ;;  %v2925_v6 = vsub.f32 %v18272_v21, %v21931_v8  ;;  %v18316_v23 = vand.u32 4294901760, %v2592_v12  ;;  %v2496_v42 = vmax.f32 %v2464_v2, 0.0  ;;  %v21930_v20 = vand.u32 4294901760, %v18300_v46 }
 0x294   :  { %v2916_v26 = vand.u32 4294901760, %v2915_v60  ;;  %v18320_v14 = vsub.f32 %v2595_v51, %v18308_v16  ;;  %v2495_v15 = vmax.f32 %v2463_v47, 0.0  ;;  %v21933_v61 = vand.u32 4294901760, %v18296_v39 }
 0x295   :  { %v2926_v38 = vand.u32 4294901760, %v2925_v6  ;;  %v18324_v59 = vsub.f32 %v2592_v12, %v18316_v23  ;;  %v2601_v1 = vsel %vm2506_vm4, %v2496_v42, 0  ;;  %14179 = vmatprep.mubr.f32.mxu0 %v18316_v23  ;;  %v2935_v2 = vsub.f32 %v18300_v46, %v21930_v20 }
 0x296   :  { %14117 = vmatprep.mubr.f32.mxu1 %v2916_v26  ;;  %v18331_v60 = vand.u32 4294901760, %v2601_v1  ;;  %v2598_v51 = vsel %vm2506_vm4, %v2495_v15, 0  ;;  %14180 = vmatmul.mubr.f32.gmra.mrb[44].mxu0 %v18308_v16  ;;  %v2945_v12 = vsub.f32 %v18296_v39, %v21933_v61  ;;  %v21932_v47 = vand.u32 4294901760, %v18320_v14 }
 0x297   :  { %14118 = vmatmul.mubr.f32.gmra.mrb[30].mxu1 %v2926_v38  ;;  %v18339_v6 = vand.u32 4294901760, %v2598_v51  ;;  %v2936_v42 = vand.u32 4294901760, %v2935_v2  ;;  %v2954_v26 = vand.u32 4294901760, %v18324_v59 }
 0x298   :  { %v18343_v20 = vsub.f32 %v2601_v1, %v18331_v60  ;;  %v2946_v8 = vand.u32 4294901760, %v2945_v12  ;;  %v2965_v15 = vsub.f32 %v18320_v14, %v21932_v47 }
 0x299   :  { %v18349_v38 = vsub.f32 %v2598_v51, %v18339_v6  ;;  %14120 = vmatprep.mubr.f32.mxu1 %v2936_v42  ;;  %14182 = vmatprep.mubr.f32.mxu0 %v18339_v6  ;;  %v2955_v2 = vsub.f32 %v18324_v59, %v2954_v26 }
 0x29a   :  { %14183 = vmatmul.mubr.f32.gmra.mrb[46].mxu0 %v18331_v60  ;;  %v21934_v1 = vand.u32 4294901760, %v18343_v20  ;;  %v2966_v61 = vand.u32 4294901760, %v2965_v15  ;;  %v22373_v15 = vand.u32 4294901760, %v17933_v45  ;;  %v22375_v45 = vand.u32 4294901760, %v17986_v24 }
 0x29b   :  { %14121 = vmatmul.mubr.f32.gmra.mrb[32].mxu1 %v2946_v8  ;;  %14193 = vmatprep.mubr.f32.mxu0 %v17986_v24  ;;  %v2956_v12 = vand.u32 4294901760, %v2955_v2  ;;  %v2974_v47 = vand.u32 4294901760, %v18349_v38  ;;  %v22385_v24 = vand.u32 4294901760, %v18072_v0 }
 0x29c   :  { %v2985_v51 = vsub.f32 %v18343_v20, %v21934_v1  ;;  %v22374_v1 = vand.u32 4294901760, %v17935_v7  ;;  %v22376_v7 = vand.u32 4294901760, %v17945_v37  ;;  %v22382_v37 = vand.u32 4294901760, %v18020_v30 }
 0x29d   :  { %14123 = vmatprep.mubr.f32.mxu1 %v2956_v12  ;;  %v2975_v42 = vsub.f32 %v18349_v38, %v2974_v47 }
 0x29e   :  { %14194 = vmatmul.mubr.f32.vlgmr.msra.gmra.mrb[16].mxu0 %v17983_v3  ;;  %v2986_v2 = vand.u32 4294901760, %v2985_v51  ;;  %v15713_v12 = vpack.c.bf16 %v22374_v1, %v22373_v15  ;;  %v22378_v51 = vand.u32 4294901760, %v17983_v3  ;;  %v22384_v3 = vand.u32 4294901760, %v18043_v25  ;;  %v22414_v15 = vld [vmem:[#allocation17_spill] sm:$0xff] }
 0x29f   :  { %14124 = vmatmul.mubr.f32.gmra.mrb[34].mxu1 %v2966_v61  ;;  %14196 = vmatprep.mubr.f32.mxu0 %v18005_v9  ;;  %v2976_v8 = vand.u32 4294901760, %v2975_v42  ;;  %v22377_v61 = vand.u32 4294901760, %v17947_v63  ;;  %v22379_v42 = vand.u32 4294901760, %v18005_v9  ;;  %v22383_v63 = vand.u32 4294901760, %v18048_v18 }
 0x2a0   :  { %15708 = vmatpush3.bf16.msra.mxu0 %v17920_v53  ;;  %v22387_v9 = vand.u32 4294901760, %v18094_v4 }
 0x2a1   :  { %15710 = vmatprep.subr.bf16.mxu0 %v17927_v22  ;;  %14126 = vmatprep.mubr.f32.mxu1 %v2976_v8  ;;  %v15717_v1 = vpack.c.bf16 %v22377_v61, %v22376_v7  ;;  %v22380_v8 = vand.u32 4294901760, %v18002_v5  ;;  %v22417_v7 = vld [vmem:[#allocation18_spill] sm:$0xff]  ;;  %v22418_v61 = vld [vmem:[#allocation25_spill] sm:$0xff] }
 0x2a2   :  { %14197 = vmatmul.mubr.f32.gmra.mrb[18].mxu0 %v18002_v5  ;;  %v22386_v5 = vand.u32 4294901760, %v18067_v11 }
 0x2a3   :  { %14127 = vmatmul.mubr.f32.gmra.mrb[36].mxu1 %v2986_v2  ;;  %14199 = vmatprep.mubr.f32.mxu0 %v18024_v50  ;;  %v22381_v2 = vand.u32 4294901760, %v18024_v50  ;;  %v22388_v50 = vand.u32 4294901760, %v18090_v62 }
 0x2a4   :  { %15712 = vmatpush3.bf16.msra.mxu0 %v17927_v22 }
 0x2a5   :  { %15714 = vmatprep.subr.bf16.mxu0 %v15713_v12 }
 0x2a6   :  { %14200 = vmatmul.mubr.f32.gmra.mrb[20].mxu0 %v18020_v30  ;;  %v22389_v30 = vand.u32 4294901760, %v18119_v13 }
 0x2a7   :  { %14202 = vmatprep.mubr.f32.mxu0 %v18048_v18  ;;  %v22390_v18 = vand.u32 4294901760, %v18112_v36 }
 0x2aa   :  { %14203 = vmatmul.mubr.f32.gmra.mrb[22].mxu0 %v18043_v25  ;;  %v22391_v25 = vand.u32 4294901760, %v18137_v44 }
 0x2ab   :  { %14205 = vmatprep.mubr.f32.mxu0 %v18072_v0  ;;  %v22392_v0 = vand.u32 4294901760, %v18133_v48 }
 0x2ae   :  { %14206 = vmatmul.mubr.f32.gmra.mrb[24].mxu0 %v18067_v11  ;;  %v22393_v11 = vand.u32 4294901760, %v18186_v19 }
 0x2af   :  { %14208 = vmatprep.mubr.f32.mxu0 %v18094_v4  ;;  %v22394_v4 = vand.u32 4294901760, %v18183_v17 }
 0x2b2   :  { %14209 = vmatmul.mubr.f32.gmra.mrb[26].mxu0 %v18090_v62  ;;  %v22395_v62 = vand.u32 4294901760, %v18207_v34 }
 0x2b3   :  { %14211 = vmatprep.mubr.f32.mxu0 %v18119_v13  ;;  %v22396_v13 = vand.u32 4294901760, %v18201_v54 }
 0x2b6   :  { %14212 = vmatmul.mubr.f32.gmra.mrb[28].mxu0 %v18112_v36  ;;  %v22397_v36 = vand.u32 4294901760, %v18228_v33 }
 0x2b7   :  { %14214 = vmatprep.mubr.f32.mxu0 %v18137_v44  ;;  %v22398_v44 = vand.u32 4294901760, %v18224_v55 }
 0x2ba   :  { %14215 = vmatmul.mubr.f32.gmra.mrb[30].mxu0 %v18133_v48  ;;  %v22399_v48 = vand.u32 4294901760, %v18252_v57 }
 0x2bb   :  { %14217 = vmatprep.mubr.f32.mxu0 %v18186_v19  ;;  %v22400_v19 = vand.u32 4294901760, %v18248_v43 }
 0x2be   :  { %14218 = vmatmul.mubr.f32.gmra.mrb[32].mxu0 %v18183_v17  ;;  %v22401_v17 = vand.u32 4294901760, %v18276_v56 }
 0x2bf   :  { %14220 = vmatprep.mubr.f32.mxu0 %v18207_v34  ;;  %v22402_v34 = vand.u32 4294901760, %v18272_v21 }
 0x2c2   :  { %14221 = vmatmul.mubr.f32.gmra.mrb[34].mxu0 %v18201_v54  ;;  %v22403_v54 = vand.u32 4294901760, %v18300_v46 }
 0x2c3   :  { %14223 = vmatprep.mubr.f32.mxu0 %v18228_v33  ;;  %v22404_v33 = vand.u32 4294901760, %v18296_v39 }
 0x2c6   :  { %14224 = vmatmul.mubr.f32.gmra.mrb[36].mxu0 %v18224_v55  ;;  %v22405_v55 = vand.u32 4294901760, %v18320_v14 }
 0x2c7   :  { %14226 = vmatprep.mubr.f32.mxu0 %v18252_v57 }
 0x2ca   :  { %14227 = vmatmul.mubr.f32.gmra.mrb[38].mxu0 %v18248_v43  ;;  %v22406_v43 = vand.u32 4294901760, %v18343_v20 }
 0x2cb   :  { %14229 = vmatprep.mubr.f32.mxu0 %v18276_v56  ;;  %v22408_v56 = vld [vmem:[#allocation20_spill] sm:$0xff] }
 0x2ce   :  { %14230 = vmatmul.mubr.f32.gmra.mrb[40].mxu0 %v18272_v21 }
 0x2cf   :  { %14232 = vmatprep.mubr.f32.mxu0 %v18300_v46  ;;  %v22409_v46 = vld [vmem:[#allocation13_spill] sm:$0xff] }
 0x2d2   :  { %14233 = vmatmul.mubr.f32.gmra.mrb[42].mxu0 %v18296_v39  ;;  %v22407_v39 = vld [vmem:[#allocation19_spill] sm:$0xff] }
 0x2d3   :  { %14235 = vmatprep.mubr.f32.mxu0 %v18324_v59  ;;  %v22410_v59 = vld [vmem:[#allocation21_spill] sm:$0xff] }
 0x2d6   :  { %14236 = vmatmul.mubr.f32.gmra.mrb[44].mxu0 %v18320_v14 }
 0x2d7   :  { %14238 = vmatprep.mubr.f32.mxu0 %v18349_v38  ;;  %v22413_v38 = vld [vmem:[#allocation15_spill] sm:$0xff] }
 0x2da   :  { %14239 = vmatmul.mubr.f32.gmra.mrb[46].mxu0 %v18343_v20 }
 0x2db   :  { %14249 = vmatprep.mubr.f32.mxu0 %v22375_v45  ;;  %v22416_v45 = vld [vmem:[#allocation23_spill] sm:$0xff] }
 0x2de   :  { %14250 = vmatmul.mubr.f32.vlgmr.msra.gmra.mrb[16].mxu0 %v22378_v51  ;;  %v22420_v51 = vld [vmem:[#allocation27_spill] sm:$0xff] }
 0x2df   :  { %14252 = vmatprep.mubr.f32.mxu0 %v22379_v42  ;;  %15716 = vmatpush3.bf16.msra.mxu0 %v15713_v12  ;;  %v22415_v12 = vld [vmem:[#allocation16_spill] sm:$0xff]  ;;  %v22421_v42 = vld [vmem:[#allocation26_spill] sm:$0xff] }
 0x2e0   :  { %15718 = vmatprep.subr.bf16.mxu0 %v15717_v1 }
 0x2e2   :  { %14253 = vmatmul.mubr.f32.gmra.mrb[18].mxu0 %v22380_v8  ;;  %v22422_v8 = vld [vmem:[#allocation28_spill] sm:$0xff] }
 0x2e3   :  { %14255 = vmatprep.mubr.f32.mxu0 %v22381_v2  ;;  %15720 = vmatpush3.bf16.msra.mxu0 %v15717_v1  ;;  %v22419_v1 = vld [vmem:[#allocation24_spill] sm:$0xff] }
 0x2e4   :  { %15722 = vmatprep.subr.bf16.mxu0 %v17920_v53 }
 0x2e6   :  { %14256 = vmatmul.mubr.f32.gmra.mrb[20].mxu0 %v22382_v37 }
 0x2e7   :  { %14258 = vmatprep.mubr.f32.mxu0 %v22383_v63 }
 0x2ea   :  { %14259 = vmatmul.mubr.f32.gmra.mrb[22].mxu0 %v22384_v3 }
 0x2eb   :  { %14261 = vmatprep.mubr.f32.mxu0 %v22385_v24 }
 0x2ee   :  { %14262 = vmatmul.mubr.f32.gmra.mrb[24].mxu0 %v22386_v5 }
 0x2ef   :  { %14264 = vmatprep.mubr.f32.mxu0 %v22387_v9 }
 0x2f2   :  { %14265 = vmatmul.mubr.f32.gmra.mrb[26].mxu0 %v22388_v50 }
 0x2f3   :  { %14267 = vmatprep.mubr.f32.mxu0 %v22389_v30 }
 0x2f6   :  { %14268 = vmatmul.mubr.f32.gmra.mrb[28].mxu0 %v22390_v18 }
 0x2f7   :  { %14270 = vmatprep.mubr.f32.mxu0 %v22391_v25  ;;  %v4455_v25 = vld [vmem:[#allocation2 + $0x48] sm:$0xff] }
 0x2fa   :  { %14271 = vmatmul.mubr.f32.gmra.mrb[30].mxu0 %v22392_v0  ;;  %v4456_v0 = vld [vmem:[#allocation2 + $0x50] sm:$0xff] }
 0x2fb   :  { %14273 = vmatprep.mubr.f32.mxu0 %v22393_v11  ;;  %v4570_v11 = vand.u32 4294901760, %v4455_v25 }
 0x2fe   :  { %14274 = vmatmul.mubr.f32.gmra.mrb[32].mxu0 %v22394_v4 }
 0x2ff   :  { %14276 = vmatprep.mubr.f32.mxu0 %v22395_v62 }
 0x302   :  { %14277 = vmatmul.mubr.f32.gmra.mrb[34].mxu0 %v22396_v13  ;;  %v4459_v13 = vld [vmem:[#allocation2 + $0x68] sm:$0xff] }
 0x303   :  { %14279 = vmatprep.mubr.f32.mxu0 %v22397_v36  ;;  %v4460_v36 = vld [vmem:[#allocation2 + $0x70] sm:$0xff] }
 0x306   :  { %14280 = vmatmul.mubr.f32.gmra.mrb[36].mxu0 %v22398_v44  ;;  %v4582_v44 = vand.u32 4294901760, %v4459_v13 }
 0x307   :  { %14282 = vmatprep.mubr.f32.mxu0 %v22399_v48  ;;  %v4585_v48 = vand.u32 4294901760, %v4460_v36 }
 0x30a   :  { %14283 = vmatmul.mubr.f32.gmra.mrb[38].mxu0 %v22400_v19  ;;  %v18595_v19 = vpack.c.bf16 %v4585_v48, %v4582_v44 }
 0x30b   :  { %14285 = vmatprep.mubr.f32.mxu0 %v22401_v17 }
 0x30c   :  { %22425 = vst [vmem:[#allocation13_spill] sm:$0xff] %v18595_v19 }
 0x30e   :  { %14286 = vmatmul.mubr.f32.gmra.mrb[40].mxu0 %v22402_v34 }
 0x30f   :  { %14288 = vmatprep.mubr.f32.mxu0 %v22403_v54 }
 0x312   :  { %14289 = vmatmul.mubr.f32.gmra.mrb[42].mxu0 %v22404_v33 }
 0x313   :  { %14291 = vmatprep.mubr.f32.mxu0 %v2954_v26  ;;  %v22412_v26 = vld [vmem:[#allocation22_spill] sm:$0xff] }
 0x316   :  { %14292 = vmatmul.mubr.f32.gmra.mrb[44].mxu0 %v22405_v55 }
 0x317   :  { %14294 = vmatprep.mubr.f32.mxu0 %v2974_v47  ;;  %v22411_v47 = vld [vmem:[#allocation14_spill] sm:$0xff] }
 0x31a   :  { %14295 = vmatmul.mubr.f32.gmra.mrb[46].mxu0 %v22406_v43 }
 0x31b   :  { %14305 = vmatprep.mubr.f32.mxu0 %v17980_v49 }
 0x31e   :  { %14306 = vmatmul.mubr.f32.vlgmr.msra.gmra.mrb[16].mxu0 %v17976_v32 }
 0x31f   :  { %14308 = vmatprep.mubr.f32.mxu0 %v17995_v41  ;;  %15724 = vmatpush3.bf16.msra.mxu0 %v17920_v53 }
 0x320   :  { %15726 = vmatprep.subr.bf16.mxu0 %v17927_v22 }
 0x322   :  { %14309 = vmatmul.mubr.f32.gmra.mrb[18].mxu0 %v17991_v27 }
 0x323   :  { %14311 = vmatprep.mubr.f32.mxu0 %v18016_v58  ;;  %15728 = vmatpush3.bf16.msra.mxu0 %v17927_v22 }
 0x326   :  { %14312 = vmatmul.mubr.f32.gmra.mrb[20].mxu0 %v18012_v28 }
 0x327   :  { %14314 = vmatprep.mubr.f32.mxu0 %v18038_v52 }
 0x32a   :  { %14315 = vmatmul.mubr.f32.gmra.mrb[22].mxu0 %v18031_v35 }
 0x32b   :  { %14317 = vmatprep.mubr.f32.mxu0 %v18062_v40 }
 0x32e   :  { %v18484_v21 = vpop.f32.mrb[16].mxu1  ;;  %14318 = vmatmul.mubr.f32.gmra.mrb[24].mxu0 %v18055_v31 }
 0x32f   :  { %v18487_v53 = vpop.f32.mrb[17].mxu1  ;;  %14320 = vmatprep.mubr.f32.mxu0 %v18086_v29 }
 0x332   :  { %v18490_v57 = vpop.f32.mrb[18].mxu1  ;;  %14321 = vmatmul.mubr.f32.gmra.mrb[26].mxu0 %v22407_v39 }
 0x333   :  { %v18493_v22 = vpop.f32.mrb[19].mxu1  ;;  %14323 = vmatprep.mubr.f32.mxu0 %v22408_v56 }
 0x336   :  { %v18496_v14 = vpop.f32.mrb[20].mxu1  ;;  %14324 = vmatmul.mubr.f32.gmra.mrb[28].mxu0 %v22409_v46 }
 0x337   :  { %v18499_v20 = vpop.f32.mrb[21].mxu1  ;;  %14326 = vmatprep.mubr.f32.mxu0 %v22410_v59 }
 0x33a   :  { %14327 = vmatmul.mubr.f32.gmra.mrb[30].mxu0 %v22411_v47 }
 0x33b   :  { %14329 = vmatprep.mubr.f32.mxu0 %v22412_v26 }
 0x33e   :  { %14330 = vmatmul.mubr.f32.gmra.mrb[32].mxu0 %v22413_v38 }
 0x33f   :  { %14332 = vmatprep.mubr.f32.mxu0 %v22414_v15 }
 0x342   :  { %14333 = vmatmul.mubr.f32.gmra.mrb[34].mxu0 %v22415_v12 }
 0x343   :  { %14335 = vmatprep.mubr.f32.mxu0 %v22416_v45 }
 0x346   :  { %14336 = vmatmul.mubr.f32.gmra.mrb[36].mxu0 %v22417_v7 }
 0x347   :  { %14338 = vmatprep.mubr.f32.mxu0 %v22418_v61 }
 0x34a   :  { %14339 = vmatmul.mubr.f32.gmra.mrb[38].mxu0 %v22419_v1 }
 0x34b   :  { %14341 = vmatprep.mubr.f32.mxu0 %v22420_v51 }
 0x34e   :  { %14342 = vmatmul.mubr.f32.gmra.mrb[40].mxu0 %v22421_v42 }
 0x34f   :  { %14344 = vmatprep.mubr.f32.mxu0 %v22422_v8 }
 0x352   :  { %14345 = vmatmul.mubr.f32.gmra.mrb[42].mxu0 %v18284_v10 }
 0x353   :  { %14347 = vmatprep.mubr.f32.mxu0 %v18316_v23 }
 0x356   :  { %14348 = vmatmul.mubr.f32.gmra.mrb[44].mxu0 %v18308_v16 }
 0x357   :  { %14350 = vmatprep.mubr.f32.mxu0 %v18339_v6 }
 0x359   :  { %v18518_v2 = vpop.f32.mrb[22].mxu1 }
 0x35a   :  { %v18520_v37 = vpop.f32.mrb[23].mxu1  ;;  %14351 = vmatmul.mubr.f32.gmra.mrb[46].mxu0 %v18331_v60 }
 0x35b   :  { %14361 = vmatprep.mubr.f32.mxu0 %v17980_v49 }
 0x35e   :  { %v18524_v63 = vpop.f32.mrb[24].mxu1  ;;  %14362 = vmatmul.mubr.f32.vlgmr.msra.gmra.mrb[16].mxu0 %v17976_v32 }
 0x35f   :  { %v18526_v3 = vpop.f32.mrb[25].mxu1  ;;  %14364 = vmatprep.mubr.f32.mxu0 %v17995_v41 }
 0x362   :  { %v18530_v24 = vpop.f32.mrb[26].mxu1  ;;  %14365 = vmatmul.mubr.f32.gmra.mrb[18].mxu0 %v17991_v27 }
 0x363   :  { %v18532_v5 = vpop.f32.mrb[27].mxu1  ;;  %14367 = vmatprep.mubr.f32.mxu0 %v18016_v58 }
 0x366   :  { %v18536_v9 = vpop.f32.mrb[28].mxu1  ;;  %14368 = vmatmul.mubr.f32.gmra.mrb[20].mxu0 %v18012_v28 }
 0x367   :  { %v18538_v50 = vpop.f32.mrb[29].mxu1  ;;  %14370 = vmatprep.mubr.f32.mxu0 %v18038_v52 }
 0x36a   :  { %v18542_v49 = vpop.f32.mrb[30].mxu1  ;;  %14371 = vmatmul.mubr.f32.gmra.mrb[22].mxu0 %v18031_v35 }
 0x36b   :  { %v18544_v32 = vpop.f32.mrb[31].mxu1  ;;  %14373 = vmatprep.mubr.f32.mxu0 %v18062_v40  ;;  %v4454_v40 = vld [vmem:[#allocation2 + $0x40] sm:$0xff] }
 0x36c   :  { %v4567_v30 = vand.u32 4294901760, %v4454_v40 }
 0x36e   :  { %v18548_v41 = vpop.f32.mrb[32].mxu1  ;;  %14374 = vmatmul.mubr.f32.gmra.mrb[24].mxu0 %v18055_v31  ;;  %v4453_v31 = vld [vmem:[#allocation2 + $0x38] sm:$0xff]  ;;  %v18601_v34 = vsub.f32 %v4454_v40, %v4567_v30  ;;  %v18640_v40 = vld [vmem:[#allocation2 + $0x30] ss:$0 sm:$0xff] }
 0x36f   :  { %v18550_v27 = vpop.f32.mrb[33].mxu1  ;;  %14376 = vmatprep.mubr.f32.mxu0 %v18086_v29  ;;  %v4564_v29 = vand.u32 4294901760, %v4453_v31 }
 0x370   :  { %22427 = vst [vmem:[#allocation14_spill] sm:$0xff] %v18601_v34  ;;  %v21941_v33 = vand.u32 4294901760, %v18601_v34 }
 0x371   :  { %v18583_v18 = vpack.c.bf16 %v4567_v30, %v4564_v29  ;;  %v18599_v17 = vsub.f32 %v4453_v31, %v4564_v29  ;;  %v18644_v29 = vadd.f32 %v18484_v21, %v18640_v40  ;;  %v18648_v30 = vadd.f32 %v18640_v40, %v18487_v53 }
 0x372   :  { %v18554_v58 = vpop.f32.mrb[34].mxu1  ;;  %14377 = vmatmul.mubr.f32.gmra.mrb[26].mxu0 %v22407_v39  ;;  %v4967_v43 = vsub.f32 %v18601_v34, %v21941_v33  ;;  %v18664_v21 = vadd.f32 %v18640_v40, %v18499_v20  ;;  %v18668_v53 = vadd.f32 %v18518_v2, %v18640_v40  ;;  %v18685_v20 = vadd.f32 %v18640_v40, %v18526_v3 }
 0x373   :  { %v18556_v28 = vpop.f32.mrb[35].mxu1  ;;  %14379 = vmatprep.mubr.f32.mxu0 %v22408_v56  ;;  %15730 = vmatprep.subr.bf16.mxu1 %v18583_v18  ;;  %22426 = vst [vmem:[#allocation21_spill] sm:$0xff] %v18599_v17  ;;  %v21942_v54 = vand.u32 4294901760, %v18599_v17  ;;  %v18638_v31 = vpack.c.bf16 %v18601_v34, %v18599_v17  ;;  %v18689_v2 = vadd.f32 %v18530_v24, %v18640_v40 }
 0x374   :  { %15732 = vmatpush3.bf16.msra.mxu1 %v18583_v18  ;;  %v4968_v56 = vand.u32 4294901760, %v4967_v43  ;;  %v18705_v24 = vadd.f32 %v18640_v40, %v18538_v50 }
 0x375   :  { %v4960_v55 = vsub.f32 %v18599_v17, %v21942_v54 }
 0x376   :  { %v18560_v52 = vpop.f32.mrb[36].mxu1  ;;  %14380 = vmatmul.mubr.f32.gmra.mrb[28].mxu0 %v22409_v46  ;;  %v18611_v46 = vsub.f32 %v4455_v25, %v4570_v11  ;;  %v18652_v25 = vadd.f32 %v18490_v57, %v18640_v40  ;;  %v18672_v57 = vadd.f32 %v18640_v40, %v18520_v37 }
 0x377   :  { %v18562_v35 = vpop.f32.mrb[37].mxu1  ;;  %14382 = vmatprep.mubr.f32.mxu0 %v22410_v59  ;;  %v4961_v39 = vand.u32 4294901760, %v4960_v55 }
 0x378   :  { %22428 = vst [vmem:[#allocation22_spill] sm:$0xff] %v18611_v46 }
 0x37a   :  { %14383 = vmatmul.mubr.f32.gmra.mrb[30].mxu0 %v22411_v47  ;;  %v18615_v47 = vpack.c.bf16 %v4968_v56, %v4961_v39  ;;  %v18735_v39 = vadd.f32 %v18554_v58, %v18640_v40 }
 0x37b   :  { %14385 = vmatprep.mubr.f32.mxu0 %v22412_v26  ;;  %v21940_v26 = vand.u32 4294901760, %v18611_v46 }
 0x37e   :  { %14386 = vmatmul.mubr.f32.gmra.mrb[32].mxu0 %v22413_v38 }
 0x37f   :  { %14388 = vmatprep.mubr.f32.mxu0 %v22414_v15  ;;  %v4974_v15 = vsub.f32 %v18611_v46, %v21940_v26 }
 0x382   :  { %14389 = vmatmul.mubr.f32.gmra.mrb[34].mxu0 %v22415_v12 }
 0x383   :  { %14391 = vmatprep.mubr.f32.mxu0 %v22416_v45 }
 0x386   :  { %14392 = vmatmul.mubr.f32.gmra.mrb[36].mxu0 %v22417_v7 }
 0x387   :  { %14394 = vmatprep.mubr.f32.mxu0 %v22418_v61  ;;  %v4975_v61 = vand.u32 4294901760, %v4974_v15 }
 0x38a   :  { %14395 = vmatmul.mubr.f32.gmra.mrb[38].mxu0 %v22419_v1 }
 0x38b   :  { %14397 = vmatprep.mubr.f32.mxu0 %v22420_v51 }
 0x38e   :  { %14398 = vmatmul.mubr.f32.gmra.mrb[40].mxu0 %v22421_v42  ;;  %v18632_v42 = vsub.f32 %v4459_v13, %v4582_v44  ;;  %v18718_v44 = vadd.f32 %v18548_v41, %v18640_v40 }
 0x38f   :  { %14400 = vmatprep.mubr.f32.mxu0 %v22422_v8  ;;  %v18634_v8 = vsub.f32 %v4460_v36, %v4585_v48  ;;  %v18709_v36 = vadd.f32 %v18542_v49, %v18640_v40  ;;  %v18725_v49 = vadd.f32 %v18640_v40, %v18550_v27 }
 0x391   :  { %v21935_v13 = vand.u32 4294901760, %v18634_v8 }
 0x392   :  { %14401 = vmatmul.mubr.f32.gmra.mrb[42].mxu0 %v18284_v10  ;;  %v4573_v10 = vand.u32 4294901760, %v4456_v0 }
 0x393   :  { %14403 = vmatprep.mubr.f32.mxu0 %v18316_v23 }
 0x394   :  { %v18587_v23 = vpack.c.bf16 %v4573_v10, %v4570_v11  ;;  %v18613_v59 = vsub.f32 %v4456_v0, %v4573_v10  ;;  %v18656_v0 = vadd.f32 %v18640_v40, %v18493_v22  ;;  %v18660_v11 = vadd.f32 %v18496_v14, %v18640_v40 }
 0x395   :  { %v18676_v22 = vadd.f32 %v18524_v63, %v18640_v40  ;;  %v21936_v63 = vand.u32 4294901760, %v18632_v42 }
 0x396   :  { %14404 = vmatmul.mubr.f32.gmra.mrb[44].mxu0 %v18308_v16  ;;  %22423 = vst [vmem:[#allocation19_spill] sm:$0xff] %v18587_v23  ;;  %v4457_v16 = vld [vmem:[#allocation2 + $0x58] sm:$0xff]  ;;  %15734 = vmatprep.subr.bf16.mxu1 %v18587_v23  ;;  %22429 = vst [vmem:[#allocation15_spill] sm:$0xff] %v18613_v59  ;;  %v21939_v38 = vand.u32 4294901760, %v18613_v59  ;;  %v18681_v14 = vpack.c.bf16 %v18613_v59, %v18611_v46 }
 0x397   :  { %14406 = vmatprep.mubr.f32.mxu0 %v18339_v6  ;;  %v4458_v6 = vld [vmem:[#allocation2 + $0x60] sm:$0xff]  ;;  %15736 = vmatpush3.bf16.msra.mxu1 %v18587_v23  ;;  %v5002_v41 = vsub.f32 %v18632_v42, %v21936_v63 }
 0x398   :  { %v4579_v4 = vand.u32 4294901760, %v4458_v6  ;;  %v4981_v12 = vsub.f32 %v18613_v59, %v21939_v38 }
 0x39a   :  { %14407 = vmatmul.mubr.f32.gmra.mrb[46].mxu0 %v18331_v60  ;;  %v4576_v60 = vand.u32 4294901760, %v4457_v16  ;;  %v18628_v7 = vsub.f32 %v4458_v6, %v4579_v4  ;;  %v4982_v1 = vand.u32 4294901760, %v4981_v12  ;;  %v18695_v6 = vadd.f32 %v18640_v40, %v18532_v5 }
 0x39b   :  { %v5009_v12 = vsub.f32 %v18634_v8, %v21935_v13 }
 0x39c   :  { %v18591_v62 = vpack.c.bf16 %v4579_v4, %v4576_v60  ;;  %v18626_v45 = vsub.f32 %v4457_v16, %v4576_v60  ;;  %v18630_v51 = vpack.c.bf16 %v4982_v1, %v4975_v61  ;;  %v21937_v16 = vand.u32 4294901760, %v18628_v7 }
 0x39d   :  { %v18699_v60 = vadd.f32 %v18536_v9, %v18640_v40  ;;  %v18714_v9 = vadd.f32 %v18640_v40, %v18544_v32  ;;  %v18744_v61 = vadd.f32 %v18640_v40, %v18556_v28  ;;  %v5010_v38 = vand.u32 4294901760, %v5009_v12 }
 0x39e   :  { %22424 = vst [vmem:[#allocation20_spill] sm:$0xff] %v18591_v62  ;;  %15738 = vmatprep.subr.bf16.mxu1 %v18591_v62  ;;  %v21938_v10 = vand.u32 4294901760, %v18626_v45  ;;  %v4995_v32 = vsub.f32 %v18628_v7, %v21937_v16  ;;  %v5003_v16 = vand.u32 4294901760, %v5002_v41 }
 0x39f   :  { %15740 = vmatpush3.bf16.msra.mxu1 %v18591_v62 }
 0x3a0   :  { %15742 = vmatprep.subr.bf16.mxu1 %v18595_v19  ;;  %v4988_v50 = vsub.f32 %v18626_v45, %v21938_v10  ;;  %v4996_v63 = vand.u32 4294901760, %v4995_v32  ;;  %v18771_v32 = vadd.f32 %v18640_v40, %v18562_v35 }
 0x3a3   :  { %15744 = vmatpush3.bf16.msra.mxu1 %v18595_v19 }
 0x3a4   :  { %15746 = vmatprep.subr.bf16.mxu1 %v18615_v47 }
 0x431   :  { %v14363_v37 = vpop.f32.mrb[16].mxu0 }
 0x432   :  { %v16399_v3 = vadd.f32 %v14363_v37, %v18640_v40  ;;  %v4231_v4 = vpop.f32.mrb[17].mxu0 }
 0x433   :  { %v16400_v5 = vadd.f32 %v18640_v40, %v4231_v4 }
 0x434   :  { %v4422_v48 = vmax.f32 %v16399_v3, 0.0  ;;  %v18752_v3 = vadd.f32 %v18560_v52, %v18640_v40 }
 0x435   :  { %v4421_v55 = vmax.f32 %v16400_v5, 0.0  ;;  %v14366_v43 = vpop.f32.mrb[18].mxu0 }
 0x436   :  { %v4471_v56 = vsel %vm22300_vm5, %v4422_v48, 0  ;;  %v16401_v15 = vadd.f32 %v14366_v43, %v18640_v40  ;;  %v4243_v27 = vpop.f32.mrb[19].mxu0  ;;  %v4989_v48 = vand.u32 4294901760, %v4988_v50 }
 0x437   :  { %v18746_v1 = vand.u32 4294901760, %v4471_v56  ;;  %v4468_v37 = vsel %vm22300_vm5, %v4421_v55, 0  ;;  %v16402_v58 = vadd.f32 %v18640_v40, %v4243_v27 }
 0x438   :  { %v18754_v4 = vand.u32 4294901760, %v4468_v37  ;;  %v4424_v5 = vmax.f32 %v16401_v15, 0.0  ;;  %v18782_v33 = vpack.c.bf16 %v4996_v63, %v4989_v48  ;;  %v18796_v63 = vpack.c.bf16 %v5010_v38, %v5003_v16 }
 0x439   :  { %v18757_v43 = vsub.f32 %v4471_v56, %v18746_v1  ;;  %v4423_v13 = vmax.f32 %v16402_v58, 0.0  ;;  %v14369_v28 = vpop.f32.mrb[20].mxu0 }
 0x43a   :  { %v18760_v10 = vsub.f32 %v4468_v37, %v18754_v4  ;;  %v4477_v55 = vsel %vm22300_vm5, %v4424_v5, 0  ;;  %v16403_v27 = vadd.f32 %v14369_v28, %v18640_v40  ;;  %v4255_v52 = vpop.f32.mrb[21].mxu0 }
 0x43b   :  { %v21944_v26 = vand.u32 4294901760, %v18757_v43  ;;  %v18765_v15 = vand.u32 4294901760, %v4477_v55  ;;  %v4474_v50 = vsel %vm22300_vm5, %v4423_v13, 0  ;;  %v16404_v56 = vadd.f32 %v18640_v40, %v4255_v52 }
 0x43c   :  { %v18773_v41 = vand.u32 4294901760, %v4474_v50  ;;  %v4426_v37 = vmax.f32 %v16403_v27, 0.0  ;;  %v21948_v58 = vand.u32 4294901760, %v18760_v10 }
 0x43d   :  { %v4649_v12 = vsub.f32 %v18757_v43, %v21944_v26  ;;  %v18780_v5 = vsub.f32 %v4477_v55, %v18765_v15  ;;  %v4425_v28 = vmax.f32 %v16404_v56, 0.0  ;;  %v14372_v13 = vpop.f32.mrb[22].mxu0 }
 0x43e   :  { %v18785_v52 = vsub.f32 %v4474_v50, %v18773_v41  ;;  %v4483_v35 = vsel %vm22300_vm5, %v4426_v37, 0  ;;  %v16405_v27 = vadd.f32 %v14372_v13, %v18640_v40  ;;  %v4267_v54 = vpop.f32.mrb[23].mxu0  ;;  %v4639_v59 = vsub.f32 %v18760_v10, %v21948_v58 }
 0x43f   :  { %v18792_v26 = vand.u32 4294901760, %v4483_v35  ;;  %v4480_v55 = vsel %vm22300_vm5, %v4425_v28, 0  ;;  %v16406_v56 = vadd.f32 %v18640_v40, %v4267_v54  ;;  %v4650_v13 = vand.u32 4294901760, %v4649_v12 }
 0x440   :  { %v18798_v48 = vand.u32 4294901760, %v4480_v55  ;;  %v4428_v50 = vmax.f32 %v16405_v27, 0.0  ;;  %v4640_v46 = vand.u32 4294901760, %v4639_v59  ;;  %v21951_v37 = vand.u32 4294901760, %v18785_v52 }
 0x441   :  { %v18802_v34 = vsub.f32 %v4483_v35, %v18792_v26  ;;  %v4427_v17 = vmax.f32 %v16406_v56, 0.0  ;;  %v14375_v58 = vpop.f32.mrb[24].mxu0  ;;  %v21957_v19 = vand.u32 4294901760, %v18780_v5 }
 0x442   :  { %v18806_v28 = vsub.f32 %v4480_v55, %v18798_v48  ;;  %v4489_v54 = vsel %vm22300_vm5, %v4428_v50, 0  ;;  %v16407_v38 = vadd.f32 %v14375_v58, %v18640_v40  ;;  %v4279_v16 = vpop.f32.mrb[25].mxu0  ;;  %14425 = vmatprep.mubr.f32.mxu1 %v4640_v46  ;;  %v4659_v59 = vsub.f32 %v18785_v52, %v21951_v37 }
 0x443   :  { %v18813_v12 = vand.u32 4294901760, %v4489_v54  ;;  %v4486_v35 = vsel %vm22300_vm5, %v4427_v17, 0  ;;  %v16408_v27 = vadd.f32 %v18640_v40, %v4279_v16  ;;  %14426 = vmatmul.mubr.f32.vlgmr.msra.gmra.mrb[38].mxu1 %v4650_v13  ;;  %v4669_v55 = vsub.f32 %v18780_v5, %v21957_v19 }
 0x444   :  { %22430 = vst [vmem:[#allocation17_spill] sm:$0xff] %v18806_v28  ;;  %v18820_v56 = vand.u32 4294901760, %v4486_v35  ;;  %v4430_v58 = vmax.f32 %v16407_v38, 0.0  ;;  %v4660_v50 = vand.u32 4294901760, %v4659_v59  ;;  %v21956_v46 = vand.u32 4294901760, %v18806_v28  ;;  %15748 = vmatpush3.bf16.msra.mxu1 %v18615_v47 }
 0x445   :  { %v18825_v37 = vsub.f32 %v4489_v54, %v18813_v12  ;;  %v4429_v62 = vmax.f32 %v16408_v27, 0.0  ;;  %v14378_v17 = vpop.f32.mrb[26].mxu0  ;;  %v4670_v23 = vand.u32 4294901760, %v4669_v55  ;;  %v21961_v40 = vand.u32 4294901760, %v18802_v34  ;;  %15750 = vmatprep.subr.bf16.mxu1 %v18630_v51 }
 0x446   :  { %v18830_v13 = vsub.f32 %v4486_v35, %v18820_v56  ;;  %v4495_v38 = vsel %vm22300_vm5, %v4430_v58, 0  ;;  %v16410_v16 = vadd.f32 %v14378_v17, %v18644_v29  ;;  %v4291_v59 = vpop.f32.mrb[27].mxu0  ;;  %14428 = vmatprep.mubr.f32.mxu1 %v4660_v50  ;;  %v4679_v47 = vsub.f32 %v18806_v28, %v21956_v46 }
 0x447   :  { %v18837_v54 = vand.u32 4294901760, %v4495_v38  ;;  %v4492_v27 = vsel %vm22300_vm5, %v4429_v62, 0  ;;  %v16412_v55 = vadd.f32 %v4291_v59, %v18648_v30  ;;  %14429 = vmatmul.mubr.f32.gmra.mrb[40].mxu1 %v4670_v23  ;;  %v4689_v35 = vsub.f32 %v18802_v34, %v21961_v40 }
 0x448   :  { %22431 = vst [vmem:[#allocation16_spill] sm:$0xff] %v18830_v13  ;;  %v18844_v58 = vand.u32 4294901760, %v4492_v27  ;;  %v4432_v29 = vmax.f32 %v16410_v16, 0.0  ;;  %v4680_v17 = vand.u32 4294901760, %v4679_v47  ;;  %v21960_v50 = vand.u32 4294901760, %v18830_v13  ;;  %15752 = vmatpush3.bf16.msra.mxu1 %v18630_v51 }
 0x449   :  { %v18849_v46 = vsub.f32 %v4495_v38, %v18837_v54  ;;  %v4431_v19 = vmax.f32 %v16412_v55, 0.0  ;;  %v14381_v62 = vpop.f32.mrb[28].mxu0  ;;  %v4690_v28 = vand.u32 4294901760, %v4689_v35  ;;  %v21965_v23 = vand.u32 4294901760, %v18825_v37  ;;  %15754 = vmatprep.subr.bf16.mxu1 %v18782_v33 }
 0x44a   :  { %v18854_v30 = vsub.f32 %v4492_v27, %v18844_v58  ;;  %v4501_v16 = vsel %vm22300_vm5, %v4432_v29, 0  ;;  %v16414_v59 = vadd.f32 %v14381_v62, %v18652_v25  ;;  %v4303_v47 = vpop.f32.mrb[29].mxu0  ;;  %14431 = vmatprep.mubr.f32.mxu1 %v4680_v17  ;;  %v4699_v51 = vsub.f32 %v18830_v13, %v21960_v50 }
 0x44b   :  { %22432 = vst [vmem:[#allocation23_spill] sm:$0xff] %v18849_v46  ;;  %v18861_v38 = vand.u32 4294901760, %v4501_v16  ;;  %v4498_v55 = vsel %vm22300_vm5, %v4431_v19, 0  ;;  %v16416_v35 = vadd.f32 %v4303_v47, %v18656_v0  ;;  %14432 = vmatmul.mubr.f32.gmra.mrb[42].mxu1 %v4690_v28  ;;  %v4709_v27 = vsub.f32 %v18825_v37, %v21965_v23 }
 0x44c   :  { %22433 = vst [vmem:[#allocation18_spill] sm:$0xff] %v18854_v30  ;;  %v18868_v29 = vand.u32 4294901760, %v4498_v55  ;;  %v4434_v25 = vmax.f32 %v16414_v59, 0.0  ;;  %v4700_v62 = vand.u32 4294901760, %v4699_v51  ;;  %v21964_v17 = vand.u32 4294901760, %v18854_v30  ;;  %15756 = vmatpush3.bf16.msra.mxu1 %v18782_v33 }
 0x44d   :  { %v18873_v50 = vsub.f32 %v4501_v16, %v18861_v38  ;;  %v4433_v40 = vmax.f32 %v16416_v35, 0.0  ;;  %v14384_v19 = vpop.f32.mrb[30].mxu0  ;;  %v4710_v13 = vand.u32 4294901760, %v4709_v27  ;;  %v21968_v0 = vand.u32 4294901760, %v18849_v46  ;;  %15758 = vmatprep.subr.bf16.mxu1 %v18796_v63 }
 0x44e   :  { %v18878_v28 = vsub.f32 %v4498_v55, %v18868_v29  ;;  %v4507_v59 = vsel %vm22300_vm5, %v4434_v25, 0  ;;  %v16418_v47 = vadd.f32 %v14384_v19, %v18660_v11  ;;  %v4315_v51 = vpop.f32.mrb[31].mxu0  ;;  %14434 = vmatprep.mubr.f32.mxu1 %v4700_v62  ;;  %v4719_v33 = vsub.f32 %v18854_v30, %v21964_v17 }
 0x44f   :  { %22434 = vst [vmem:[#allocation25_spill] sm:$0xff] %v18873_v50  ;;  %v18885_v16 = vand.u32 4294901760, %v4507_v59  ;;  %v4504_v35 = vsel %vm22300_vm5, %v4433_v40, 0  ;;  %v16420_v27 = vadd.f32 %v4315_v51, %v18664_v21  ;;  %14435 = vmatmul.mubr.f32.gmra.mrb[44].mxu1 %v4710_v13  ;;  %v4729_v55 = vsub.f32 %v18849_v46, %v21968_v0 }
 0x450   :  { %22435 = vst [vmem:[#allocation24_spill] sm:$0xff] %v18878_v28  ;;  %v18892_v25 = vand.u32 4294901760, %v4504_v35  ;;  %v4436_v11 = vmax.f32 %v16418_v47, 0.0  ;;  %v4720_v19 = vand.u32 4294901760, %v4719_v33  ;;  %v21969_v62 = vand.u32 4294901760, %v18878_v28  ;;  %15760 = vmatpush3.bf16.msra.mxu1 %v18796_v63 }
 0x451   :  { %22436 = vst [vmem:[#allocation27_spill] sm:$0xff] %v18885_v16  ;;  %v18897_v17 = vsub.f32 %v4507_v59, %v18885_v16  ;;  %v4435_v23 = vmax.f32 %v16420_v27, 0.0  ;;  %v14387_v40 = vpop.f32.mrb[32].mxu0  ;;  %v4730_v30 = vand.u32 4294901760, %v4729_v55  ;;  %v21974_v21 = vand.u32 4294901760, %v18873_v50  ;;  %15762 = vmatprep.subr.bf16.mxu1 %v18638_v31 }
 0x452   :  { %22437 = vst [vmem:[#allocation26_spill] sm:$0xff] %v18892_v25  ;;  %v18902_v13 = vsub.f32 %v4504_v35, %v18892_v25  ;;  %v4513_v47 = vsel %vm22300_vm5, %v4436_v11, 0  ;;  %v16422_v51 = vadd.f32 %v14387_v40, %v18668_v53  ;;  %v4327_v33 = vpop.f32.mrb[33].mxu0  ;;  %14437 = vmatprep.mubr.f32.mxu1 %v4720_v19  ;;  %v4739_v63 = vsub.f32 %v18878_v28, %v21969_v62 }
 0x453   :  { %22438 = vst [vmem:[#allocation28_spill] sm:$0xff] %v18897_v17  ;;  %v18909_v59 = vand.u32 4294901760, %v4513_v47  ;;  %v4510_v27 = vsel %vm22300_vm5, %v4435_v23, 0  ;;  %v16424_v55 = vadd.f32 %v4327_v33, %v18672_v57  ;;  %14438 = vmatmul.mubr.f32.gmra.mrb[46].mxu1 %v4730_v30  ;;  %v4749_v35 = vsub.f32 %v18873_v50, %v21974_v21 }
 0x454   :  { %22439 = vst [vmem:[#allocation29_spill] sm:$0xff] %v18902_v13  ;;  %v18916_v11 = vand.u32 4294901760, %v4510_v27  ;;  %v4438_v53 = vmax.f32 %v16422_v51, 0.0  ;;  %v4740_v40 = vand.u32 4294901760, %v4739_v63  ;;  %v21975_v19 = vand.u32 4294901760, %v18902_v13 }
 0x455   :  { %22440 = vst [vmem:[#allocation30_spill] sm:$0xff] %v18909_v59  ;;  %v18920_v0 = vsub.f32 %v4513_v47, %v18909_v59  ;;  %v4437_v62 = vmax.f32 %v16424_v55, 0.0  ;;  %v14390_v28 = vpop.f32.mrb[34].mxu0  ;;  %v4750_v46 = vand.u32 4294901760, %v4749_v35  ;;  %v21980_v23 = vand.u32 4294901760, %v18897_v17 }
 0x456   :  { %22441 = vst [vmem:[#allocation31_spill] sm:$0xff] %v18916_v11  ;;  %v18924_v57 = vsub.f32 %v4510_v27, %v18916_v11  ;;  %v4519_v30 = vsel %vm22300_vm5, %v4438_v53, 0  ;;  %v16426_v33 = vadd.f32 %v14390_v28, %v18676_v22  ;;  %v4339_v21 = vpop.f32.mrb[35].mxu0  ;;  %14440 = vmatprep.mubr.f32.mxu1 %v4740_v40  ;;  %v4759_v51 = vsub.f32 %v18902_v13, %v21975_v19 }
 0x457   :  { %22442 = vst [vmem:[#allocation32_spill] sm:$0xff] %v18920_v0  ;;  %v18931_v47 = vand.u32 4294901760, %v4519_v30  ;;  %v4516_v63 = vsel %vm22300_vm5, %v4437_v62, 0  ;;  %v16428_v55 = vadd.f32 %v4339_v21, %v18685_v20  ;;  %14441 = vmatmul.mubr.f32.gmra.mrb[48].mxu1 %v4750_v46  ;;  %v4769_v27 = vsub.f32 %v18897_v17, %v21980_v23 }
 0x458   :  { %22443 = vst [vmem:[#allocation33_spill] sm:$0xff] %v18924_v57  ;;  %v18938_v35 = vand.u32 4294901760, %v4516_v63  ;;  %v4440_v22 = vmax.f32 %v16426_v33, 0.0  ;;  %v4760_v28 = vand.u32 4294901760, %v4759_v51  ;;  %v21981_v53 = vand.u32 4294901760, %v18924_v57 }
 0x459   :  { %22444 = vst [vmem:[#allocation34_spill] sm:$0xff] %v18931_v47  ;;  %v18942_v40 = vsub.f32 %v4519_v30, %v18931_v47  ;;  %v4439_v19 = vmax.f32 %v16428_v55, 0.0  ;;  %v14393_v13 = vpop.f32.mrb[36].mxu0  ;;  %v4770_v50 = vand.u32 4294901760, %v4769_v27  ;;  %v21986_v62 = vand.u32 4294901760, %v18920_v0 }
 0x45a   :  { %22445 = vst [vmem:[#allocation35_spill] sm:$0xff] %v18938_v35  ;;  %v18946_v20 = vsub.f32 %v4516_v63, %v18938_v35  ;;  %v4525_v46 = vsel %vm22300_vm5, %v4440_v22, 0  ;;  %v16430_v21 = vadd.f32 %v14393_v13, %v18689_v2  ;;  %v4351_v23 = vpop.f32.mrb[37].mxu0  ;;  %14443 = vmatprep.mubr.f32.mxu1 %v4760_v28  ;;  %v4779_v33 = vsub.f32 %v18924_v57, %v21981_v53 }
 0x45b   :  { %22446 = vst [vmem:[#allocation36_spill] sm:$0xff] %v18942_v40  ;;  %v18953_v30 = vand.u32 4294901760, %v4525_v46  ;;  %v4522_v51 = vsel %vm22300_vm5, %v4439_v19, 0  ;;  %v16432_v55 = vadd.f32 %v4351_v23, %v18695_v6  ;;  %14444 = vmatmul.mubr.f32.gmra.mrb[50].mxu1 %v4770_v50  ;;  %v4789_v63 = vsub.f32 %v18920_v0, %v21986_v62 }
 0x45c   :  { %22447 = vst [vmem:[#allocation37_spill] sm:$0xff] %v18946_v20  ;;  %v18960_v27 = vand.u32 4294901760, %v4522_v51  ;;  %v4442_v2 = vmax.f32 %v16430_v21, 0.0  ;;  %v4780_v13 = vand.u32 4294901760, %v4779_v33  ;;  %v21987_v22 = vand.u32 4294901760, %v18946_v20 }
 0x45d   :  { %22448 = vst [vmem:[#allocation38_spill] sm:$0xff] %v18953_v30  ;;  %v18964_v28 = vsub.f32 %v4525_v46, %v18953_v30  ;;  %v4441_v53 = vmax.f32 %v16432_v55, 0.0  ;;  %v14396_v57 = vpop.f32.mrb[38].mxu0  ;;  %v4790_v17 = vand.u32 4294901760, %v4789_v63  ;;  %v21992_v19 = vand.u32 4294901760, %v18942_v40 }
 0x45e   :  { %22449 = vst [vmem:[#allocation39_spill] sm:$0xff] %v18960_v27  ;;  %v18968_v6 = vsub.f32 %v4522_v51, %v18960_v27  ;;  %v4531_v50 = vsel %vm22300_vm5, %v4442_v2, 0  ;;  %v16434_v23 = vadd.f32 %v14396_v57, %v18699_v60  ;;  %v4363_v62 = vpop.f32.mrb[39].mxu0  ;;  %14446 = vmatprep.mubr.f32.mxu1 %v4780_v13  ;;  %v4799_v21 = vsub.f32 %v18946_v20, %v21987_v22 }
 0x45f   :  { %22450 = vst [vmem:[#allocation40_spill] sm:$0xff] %v18964_v28  ;;  %v18975_v46 = vand.u32 4294901760, %v4531_v50  ;;  %v4528_v33 = vsel %vm22300_vm5, %v4441_v53, 0  ;;  %v16436_v55 = vadd.f32 %v4363_v62, %v18705_v24  ;;  %14447 = vmatmul.mubr.f32.gmra.mrb[52].mxu1 %v4790_v17  ;;  %v4809_v51 = vsub.f32 %v18942_v40, %v21992_v19 }
 0x460   :  { %22451 = vst [vmem:[#allocation41_spill] sm:$0xff] %v18968_v6  ;;  %v18982_v63 = vand.u32 4294901760, %v4528_v33  ;;  %v4444_v60 = vmax.f32 %v16434_v23, 0.0  ;;  %v4800_v57 = vand.u32 4294901760, %v4799_v21  ;;  %v21993_v2 = vand.u32 4294901760, %v18968_v6 }
 0x461   :  { %22452 = vst [vmem:[#allocation42_spill] sm:$0xff] %v18975_v46  ;;  %v18986_v13 = vsub.f32 %v4531_v50, %v18975_v46  ;;  %v4443_v22 = vmax.f32 %v16436_v55, 0.0  ;;  %v14399_v20 = vpop.f32.mrb[40].mxu0  ;;  %v4810_v0 = vand.u32 4294901760, %v4809_v51  ;;  %v21998_v53 = vand.u32 4294901760, %v18964_v28 }
 0x462   :  { %22453 = vst [vmem:[#allocation43_spill] sm:$0xff] %v18982_v63  ;;  %v18990_v24 = vsub.f32 %v4528_v33, %v18982_v63  ;;  %v4537_v17 = vsel %vm22300_vm5, %v4444_v60, 0  ;;  %v16438_v62 = vadd.f32 %v14399_v20, %v18709_v36  ;;  %v4375_v19 = vpop.f32.mrb[41].mxu0  ;;  %14449 = vmatprep.mubr.f32.mxu1 %v4800_v57  ;;  %v4819_v23 = vsub.f32 %v18968_v6, %v21993_v2 }
 0x463   :  { %22454 = vst [vmem:[#allocation44_spill] sm:$0xff] %v18986_v13  ;;  %v18997_v50 = vand.u32 4294901760, %v4537_v17  ;;  %v4534_v21 = vsel %vm22300_vm5, %v4443_v22, 0  ;;  %v16440_v55 = vadd.f32 %v4375_v19, %v18714_v9  ;;  %14450 = vmatmul.mubr.f32.gmra.mrb[54].mxu1 %v4810_v0  ;;  %v4829_v33 = vsub.f32 %v18964_v28, %v21998_v53 }
 0x464   :  { %22455 = vst [vmem:[#allocation45_spill] sm:$0xff] %v18990_v24  ;;  %v19004_v51 = vand.u32 4294901760, %v4534_v21  ;;  %v4446_v36 = vmax.f32 %v16438_v62, 0.0  ;;  %v4820_v20 = vand.u32 4294901760, %v4819_v23  ;;  %v21999_v60 = vand.u32 4294901760, %v18990_v24 }
 0x465   :  { %22456 = vst [vmem:[#allocation46_spill] sm:$0xff] %v18997_v50  ;;  %v19008_v57 = vsub.f32 %v4537_v17, %v18997_v50  ;;  %v4445_v2 = vmax.f32 %v16440_v55, 0.0  ;;  %v14402_v6 = vpop.f32.mrb[42].mxu0  ;;  %v4830_v40 = vand.u32 4294901760, %v4829_v33  ;;  %v22004_v22 = vand.u32 4294901760, %v18986_v13 }
 0x466   :  { %22457 = vst [vmem:[#allocation47_spill] sm:$0xff] %v19004_v51  ;;  %v19012_v9 = vsub.f32 %v4534_v21, %v19004_v51  ;;  %v4543_v0 = vsel %vm22300_vm5, %v4446_v36, 0  ;;  %v16442_v19 = vadd.f32 %v14402_v6, %v18718_v44  ;;  %v4387_v53 = vpop.f32.mrb[43].mxu0  ;;  %14452 = vmatprep.mubr.f32.mxu1 %v4820_v20  ;;  %v4839_v62 = vsub.f32 %v18990_v24, %v21999_v60 }
 0x467   :  { %v19019_v17 = vand.u32 4294901760, %v4543_v0  ;;  %v4540_v23 = vsel %vm22300_vm5, %v4445_v2, 0  ;;  %v16444_v55 = vadd.f32 %v4387_v53, %v18725_v49  ;;  %14453 = vmatmul.mubr.f32.gmra.mrb[56].mxu1 %v4830_v40  ;;  %v4849_v21 = vsub.f32 %v18986_v13, %v22004_v22 }
 0x468   :  { %22458 = vst [vmem:[#allocation48_spill] sm:$0xff] %v19012_v9  ;;  %v19026_v33 = vand.u32 4294901760, %v4540_v23  ;;  %v4448_v44 = vmax.f32 %v16442_v19, 0.0  ;;  %v4840_v6 = vand.u32 4294901760, %v4839_v62  ;;  %v22005_v36 = vand.u32 4294901760, %v19012_v9 }
 0x469   :  { %22459 = vst [vmem:[#allocation49_spill] sm:$0xff] %v19019_v17  ;;  %v19030_v20 = vsub.f32 %v4543_v0, %v19019_v17  ;;  %v4447_v60 = vmax.f32 %v16444_v55, 0.0  ;;  %v14405_v24 = vpop.f32.mrb[44].mxu0  ;;  %v4850_v28 = vand.u32 4294901760, %v4849_v21  ;;  %v22010_v2 = vand.u32 4294901760, %v19008_v57 }
 0x46a   :  { %22460 = vst [vmem:[#allocation50_spill] sm:$0xff] %v19026_v33  ;;  %v19034_v49 = vsub.f32 %v4540_v23, %v19026_v33  ;;  %v4549_v40 = vsel %vm22300_vm5, %v4448_v44, 0  ;;  %v16446_v53 = vadd.f32 %v14405_v24, %v18735_v39  ;;  %v4399_v22 = vpop.f32.mrb[45].mxu0  ;;  %14455 = vmatprep.mubr.f32.mxu1 %v4840_v6  ;;  %v4859_v19 = vsub.f32 %v19012_v9, %v22005_v36 }
 0x46b   :  { %v19041_v0 = vand.u32 4294901760, %v4549_v40  ;;  %v4546_v62 = vsel %vm22300_vm5, %v4447_v60, 0  ;;  %v16448_v55 = vadd.f32 %v4399_v22, %v18744_v61  ;;  %14456 = vmatmul.mubr.f32.gmra.mrb[58].mxu1 %v4850_v28  ;;  %v4869_v23 = vsub.f32 %v19008_v57, %v22010_v2 }
 0x46c   :  { %22461 = vst [vmem:[#allocation51_spill] sm:$0xff] %v19034_v49  ;;  %v19048_v21 = vand.u32 4294901760, %v4546_v62  ;;  %v4450_v39 = vmax.f32 %v16446_v53, 0.0  ;;  %v4860_v24 = vand.u32 4294901760, %v4859_v19  ;;  %v22011_v44 = vand.u32 4294901760, %v19034_v49 }
 0x46d   :  { %22462 = vst [vmem:[#allocation52_spill] sm:$0xff] %v19041_v0  ;;  %v19052_v6 = vsub.f32 %v4549_v40, %v19041_v0  ;;  %v4449_v36 = vmax.f32 %v16448_v55, 0.0  ;;  %v14408_v9 = vpop.f32.mrb[46].mxu0  ;;  %v4870_v13 = vand.u32 4294901760, %v4869_v23  ;;  %v22016_v60 = vand.u32 4294901760, %v19030_v20 }
 0x46e   :  { %22463 = vst [vmem:[#allocation53_spill] sm:$0xff] %v19048_v21  ;;  %v19056_v61 = vsub.f32 %v4546_v62, %v19048_v21  ;;  %v4555_v28 = vsel %vm22300_vm5, %v4450_v39, 0  ;;  %v16450_v22 = vadd.f32 %v14408_v9, %v18752_v3  ;;  %v4411_v2 = vpop.f32.mrb[47].mxu0  ;;  %14458 = vmatprep.mubr.f32.mxu1 %v4860_v24  ;;  %v4879_v53 = vsub.f32 %v19034_v49, %v22011_v44 }
 0x46f   :  { %22464 = vst [vmem:[#allocation54_spill] sm:$0xff] %v19052_v6  ;;  %v19063_v40 = vand.u32 4294901760, %v4555_v28  ;;  %v4552_v19 = vsel %vm22300_vm5, %v4449_v36, 0  ;;  %v16452_v55 = vadd.f32 %v4411_v2, %v18771_v32  ;;  %14459 = vmatmul.mubr.f32.gmra.mrb[60].mxu1 %v4870_v13  ;;  %v4889_v62 = vsub.f32 %v19030_v20, %v22016_v60 }
 0x470   :  { %v19070_v23 = vand.u32 4294901760, %v4552_v19  ;;  %v4452_v3 = vmax.f32 %v16450_v22, 0.0  ;;  %v4880_v9 = vand.u32 4294901760, %v4879_v53  ;;  %v22014_v39 = vand.u32 4294901760, %v19056_v61 }
 0x471   :  { %22465 = vst [vmem:[#allocation55_spill] sm:$0xff] %v19063_v40  ;;  %v19074_v24 = vsub.f32 %v4555_v28, %v19063_v40  ;;  %v4451_v44 = vmax.f32 %v16452_v55, 0.0  ;;  %v4890_v49 = vand.u32 4294901760, %v4889_v62  ;;  %v22015_v36 = vand.u32 4294901760, %v19052_v6 }
 0x472   :  { %22466 = vst [vmem:[#allocation56_spill] sm:$0xff] %v19070_v23  ;;  %v19078_v32 = vsub.f32 %v4552_v19, %v19070_v23  ;;  %v4561_v13 = vsel %vm22300_vm5, %v4452_v3, 0  ;;  %14461 = vmatprep.mubr.f32.mxu1 %v4880_v9  ;;  %v4899_v2 = vsub.f32 %v19056_v61, %v22014_v39 }
 0x473   :  { %v19084_v22 = vand.u32 4294901760, %v4561_v13  ;;  %v4558_v53 = vsel %vm22300_vm5, %v4451_v44, 0  ;;  %14462 = vmatmul.mubr.f32.gmra.mrb[62].mxu1 %v4890_v49  ;;  %v4909_v28 = vsub.f32 %v19052_v6, %v22015_v36  ;;  %v22019_v55 = vand.u32 4294901760, %v19074_v24 }
 0x474   :  { %v19091_v19 = vand.u32 4294901760, %v4558_v53  ;;  %v4900_v62 = vand.u32 4294901760, %v4899_v2  ;;  %v22022_v3 = vand.u32 4294901760, %v19078_v32 }
 0x475   :  { %22467 = vst [vmem:[#allocation57_spill] sm:$0xff] %v19084_v22  ;;  %v19095_v9 = vsub.f32 %v4561_v13, %v19084_v22  ;;  %v4910_v39 = vand.u32 4294901760, %v4909_v28  ;;  %v4929_v44 = vsub.f32 %v19074_v24, %v22019_v55 }
 0x476   :  { %22468 = vst [vmem:[#allocation58_spill] sm:$0xff] %v19091_v19  ;;  %v19101_v49 = vsub.f32 %v4558_v53, %v19091_v19  ;;  %14464 = vmatprep.mubr.f32.mxu1 %v4900_v62  ;;  %v4919_v36 = vsub.f32 %v19078_v32, %v22022_v3  ;;  %v22481_v3 = vld [vmem:[#allocation25_spill] sm:$0xff] }
 0x477   :  { %14465 = vmatmul.mubr.f32.gmra.mrb[64].mxu1 %v4910_v39  ;;  %v22020_v2 = vand.u32 4294901760, %v19095_v9  ;;  %v4930_v6 = vand.u32 4294901760, %v4929_v44  ;;  %v22471_v39 = vld [vmem:[#allocation20_spill] sm:$0xff]  ;;  %v22474_v44 = vld [vmem:[#allocation21_spill] sm:$0xff] }
 0x478   :  { %v4920_v60 = vand.u32 4294901760, %v4919_v36  ;;  %v22021_v13 = vand.u32 4294901760, %v19101_v49  ;;  %v22472_v36 = vld [vmem:[#allocation16_spill] sm:$0xff] }
 0x479   :  { %v4949_v28 = vsub.f32 %v19095_v9, %v22020_v2  ;;  %v22479_v2 = vld [vmem:[#allocation23_spill] sm:$0xff] }
 0x47a   :  { %14467 = vmatprep.mubr.f32.mxu1 %v4920_v60  ;;  %v4939_v53 = vsub.f32 %v19101_v49, %v22021_v13  ;;  %v15769_v60 = vpack.c.bf16 %v18628_v7, %v18626_v45  ;;  %v22480_v13 = vld [vmem:[#allocation24_spill] sm:$0xff] }
 0x47b   :  { %14468 = vmatmul.mubr.f32.gmra.mrb[66].mxu1 %v4930_v6  ;;  %v4950_v55 = vand.u32 4294901760, %v4949_v28  ;;  %v15773_v6 = vpack.c.bf16 %v18634_v8, %v18632_v42  ;;  %v22475_v28 = vand.u32 4294901760, %v22474_v44  ;;  %v22484_v44 = vld [vmem:[#allocation33_spill] sm:$0xff] }
 0x47c   :  { %v4940_v62 = vand.u32 4294901760, %v4939_v53  ;;  %v22476_v53 = vld [vmem:[#allocation14_spill] sm:$0xff] }
 0x47e   :  { %14470 = vmatprep.mubr.f32.mxu1 %v4940_v62  ;;  %v22477_v62 = vand.u32 4294901760, %v22476_v53  ;;  %v22486_v53 = vld [vmem:[#allocation37_spill] sm:$0xff] }
 0x47f   :  { %14471 = vmatmul.mubr.f32.gmra.mrb[68].mxu1 %v4950_v55  ;;  %v22473_v55 = vld [vmem:[#allocation13_spill] sm:$0xff] }
 0x480   :  { %14489 = vmatprep.mubr.f32.mxu1 %v18754_v4 }
 0x483   :  { %14490 = vmatmul.mubr.f32.vlgmr.msra.gmra.mrb[38].mxu1 %v18746_v1 }
 0x484   :  { %14492 = vmatprep.mubr.f32.mxu1 %v18773_v41  ;;  %15764 = vmatpush3.bf16.msra.mxu1 %v18638_v31  ;;  %v22469_v31 = vld [vmem:[#allocation19_spill] sm:$0xff] }
 0x485   :  { %15766 = vmatprep.subr.bf16.mxu1 %v18681_v14 }
 0x487   :  { %14493 = vmatmul.mubr.f32.gmra.mrb[40].mxu1 %v18765_v15 }
 0x488   :  { %14495 = vmatprep.mubr.f32.mxu1 %v18798_v48  ;;  %15768 = vmatpush3.bf16.msra.mxu1 %v18681_v14  ;;  %v22470_v14 = vld [vmem:[#allocation17_spill] sm:$0xff] }
 0x489   :  { %15770 = vmatprep.subr.bf16.mxu1 %v15769_v60 }
 0x48b   :  { %14496 = vmatmul.mubr.f32.gmra.mrb[42].mxu1 %v18792_v26 }
 0x48c   :  { %14498 = vmatprep.mubr.f32.mxu1 %v18820_v56  ;;  %15772 = vmatpush3.bf16.msra.mxu1 %v15769_v60  ;;  %v15793_v60 = vpack.c.bf16 %v22477_v62, %v22475_v28  ;;  %v22485_v28 = vld [vmem:[#allocation32_spill] sm:$0xff] }
 0x48d   :  { %15774 = vmatprep.subr.bf16.mxu1 %v15773_v6  ;;  %v22487_v62 = vld [vmem:[#allocation36_spill] sm:$0xff] }
 0x48f   :  { %14499 = vmatmul.mubr.f32.gmra.mrb[44].mxu1 %v18813_v12 }
 0x490   :  { %14501 = vmatprep.mubr.f32.mxu1 %v18844_v58  ;;  %15776 = vmatpush3.bf16.msra.mxu1 %v15773_v6  ;;  %v22478_v6 = vld [vmem:[#allocation18_spill] sm:$0xff] }
 0x491   :  { %15778 = vmatprep.subr.bf16.mxu1 %v18583_v18 }
 0x493   :  { %14502 = vmatmul.mubr.f32.gmra.mrb[46].mxu1 %v18837_v54 }
 0x494   :  { %14504 = vmatprep.mubr.f32.mxu1 %v18868_v29 }
 0x497   :  { %14505 = vmatmul.mubr.f32.gmra.mrb[48].mxu1 %v18861_v38 }
 0x498   :  { %14507 = vmatprep.mubr.f32.mxu1 %v18892_v25 }
 0x49b   :  { %14508 = vmatmul.mubr.f32.gmra.mrb[50].mxu1 %v18885_v16  ;;  %v22503_v16 = vand.u32 4294901760, %v18628_v7  ;;  %v22510_v7 = vand.u32 4294901760, %v18825_v37 }
 0x49c   :  { %14510 = vmatprep.mubr.f32.mxu1 %v18916_v11  ;;  %v22502_v11 = vand.u32 4294901760, %v18626_v45  ;;  %v22509_v45 = vand.u32 4294901760, %v22472_v36 }
 0x49e   :  { %v15801_v25 = vpack.c.bf16 %v22503_v16, %v22502_v11  ;;  %v22518_v11 = vand.u32 4294901760, %v22485_v28 }
 0x49f   :  { %14511 = vmatmul.mubr.f32.gmra.mrb[52].mxu1 %v18909_v59  ;;  %v22501_v59 = vand.u32 4294901760, %v18785_v52 }
 0x4a0   :  { %14513 = vmatprep.mubr.f32.mxu1 %v18938_v35  ;;  %v22500_v35 = vand.u32 4294901760, %v18757_v43 }
 0x4a3   :  { %14514 = vmatmul.mubr.f32.gmra.mrb[54].mxu1 %v18931_v47 }
 0x4a4   :  { %14516 = vmatprep.mubr.f32.mxu1 %v18960_v27 }
 0x4a7   :  { %14517 = vmatmul.mubr.f32.gmra.mrb[56].mxu1 %v18953_v30  ;;  %v22498_v30 = vld [vmem:[#allocation15_spill] sm:$0xff] }
 0x4a8   :  { %14519 = vmatprep.mubr.f32.mxu1 %v18982_v63  ;;  %v22499_v27 = vand.u32 4294901760, %v22498_v30  ;;  %v22520_v30 = vand.u32 4294901760, %v22487_v62 }
 0x4ab   :  { %14520 = vmatmul.mubr.f32.gmra.mrb[58].mxu1 %v18975_v46  ;;  %v22496_v46 = vld [vmem:[#allocation22_spill] sm:$0xff] }
 0x4ac   :  { %14522 = vmatprep.mubr.f32.mxu1 %v19004_v51  ;;  %v22495_v51 = vand.u32 4294901760, %v18760_v10  ;;  %v22497_v63 = vand.u32 4294901760, %v22496_v46  ;;  %v22505_v46 = vand.u32 4294901760, %v22470_v14 }
 0x4ae   :  { %v15797_v47 = vpack.c.bf16 %v22499_v27, %v22497_v63 }
 0x4af   :  { %14523 = vmatmul.mubr.f32.gmra.mrb[60].mxu1 %v18997_v50  ;;  %v22494_v50 = vld [vmem:[#allocation54_spill] sm:$0xff] }
 0x4b0   :  { %14525 = vmatprep.mubr.f32.mxu1 %v19026_v33  ;;  %v22493_v33 = vld [vmem:[#allocation51_spill] sm:$0xff] }
 0x4b3   :  { %14526 = vmatmul.mubr.f32.gmra.mrb[62].mxu1 %v19019_v17  ;;  %v22492_v17 = vld [vmem:[#allocation48_spill] sm:$0xff] }
 0x4b4   :  { %14528 = vmatprep.mubr.f32.mxu1 %v19048_v21  ;;  %v22491_v21 = vld [vmem:[#allocation44_spill] sm:$0xff] }
 0x4b7   :  { %14529 = vmatmul.mubr.f32.gmra.mrb[64].mxu1 %v19041_v0  ;;  %v22490_v0 = vld [vmem:[#allocation45_spill] sm:$0xff] }
 0x4b8   :  { %14531 = vmatprep.mubr.f32.mxu1 %v19070_v23  ;;  %v22489_v23 = vld [vmem:[#allocation40_spill] sm:$0xff] }
 0x4b9   :  { %v22522_v63 = vand.u32 4294901760, %v22489_v23 }
 0x4bb   :  { %14532 = vmatmul.mubr.f32.gmra.mrb[66].mxu1 %v19063_v40  ;;  %v22488_v40 = vld [vmem:[#allocation41_spill] sm:$0xff] }
 0x4bc   :  { %14534 = vmatprep.mubr.f32.mxu1 %v19091_v19  ;;  %v22483_v19 = vld [vmem:[#allocation28_spill] sm:$0xff]  ;;  %v22521_v27 = vand.u32 4294901760, %v22488_v40 }
 0x4bf   :  { %14535 = vmatmul.mubr.f32.gmra.mrb[68].mxu1 %v19084_v22  ;;  %v22482_v22 = vld [vmem:[#allocation29_spill] sm:$0xff] }
 0x4c0   :  { %14553 = vmatprep.mubr.f32.mxu1 %v18760_v10  ;;  %v22504_v10 = vand.u32 4294901760, %v18780_v5  ;;  %v22515_v16 = vand.u32 4294901760, %v22482_v22 }
 0x4c3   :  { %14554 = vmatmul.mubr.f32.vlgmr.msra.gmra.mrb[38].mxu1 %v18757_v43  ;;  %v22506_v43 = vand.u32 4294901760, %v18632_v42  ;;  %v22512_v42 = vand.u32 4294901760, %v22479_v2 }
 0x4c4   :  { %14556 = vmatprep.mubr.f32.mxu1 %v18785_v52  ;;  %15780 = vmatpush3.bf16.msra.mxu1 %v18583_v18  ;;  %v22507_v52 = vand.u32 4294901760, %v18634_v8  ;;  %v22514_v8 = vand.u32 4294901760, %v22481_v3 }
 0x4c5   :  { %15782 = vmatprep.subr.bf16.mxu1 %v22469_v31 }
 0x4c7   :  { %14557 = vmatmul.mubr.f32.gmra.mrb[40].mxu1 %v18780_v5  ;;  %v22511_v5 = vand.u32 4294901760, %v22478_v6 }
 0x4c8   :  { %14559 = vmatprep.mubr.f32.mxu1 %v22470_v14  ;;  %15784 = vmatpush3.bf16.msra.mxu1 %v22469_v31  ;;  %v22545_v14 = vld [vmem:[#allocation47_spill] sm:$0xff] }
 0x4c9   :  { %15786 = vmatprep.subr.bf16.mxu1 %v22471_v39 }
 0x4cb   :  { %14560 = vmatmul.mubr.f32.gmra.mrb[42].mxu1 %v18802_v34 }
 0x4cc   :  { %14562 = vmatprep.mubr.f32.mxu1 %v22472_v36  ;;  %15788 = vmatpush3.bf16.msra.mxu1 %v22471_v39  ;;  %v22547_v36 = vld [vmem:[#allocation50_spill] sm:$0xff] }
 0x4cd   :  { %15790 = vmatprep.subr.bf16.mxu1 %v22473_v55 }
 0x4cf   :  { %14563 = vmatmul.mubr.f32.gmra.mrb[44].mxu1 %v18825_v37  ;;  %v22516_v37 = vand.u32 4294901760, %v22483_v19 }
 0x4d0   :  { %14565 = vmatprep.mubr.f32.mxu1 %v22478_v6  ;;  %15792 = vmatpush3.bf16.msra.mxu1 %v22473_v55  ;;  %v22550_v6 = vld [vmem:[#allocation52_spill] sm:$0xff] }
 0x4d1   :  { %15794 = vmatprep.subr.bf16.mxu1 %v15793_v60 }
 0x4d3   :  { %14566 = vmatmul.mubr.f32.gmra.mrb[46].mxu1 %v22479_v2  ;;  %v22527_v2 = vand.u32 4294901760, %v22493_v33 }
 0x4d4   :  { %14568 = vmatprep.mubr.f32.mxu1 %v22480_v13 }
 0x4d7   :  { %14569 = vmatmul.mubr.f32.gmra.mrb[48].mxu1 %v22481_v3  ;;  %v22526_v3 = vand.u32 4294901760, %v19008_v57 }
 0x4d8   :  { %14571 = vmatprep.mubr.f32.mxu1 %v22482_v22  ;;  %v22524_v22 = vand.u32 4294901760, %v22491_v21 }
 0x4db   :  { %14572 = vmatmul.mubr.f32.gmra.mrb[50].mxu1 %v22483_v19  ;;  %v22525_v19 = vand.u32 4294901760, %v22492_v17 }
 0x4dc   :  { %14574 = vmatprep.mubr.f32.mxu1 %v22484_v44 }
 0x4df   :  { %14575 = vmatmul.mubr.f32.gmra.mrb[52].mxu1 %v22485_v28  ;;  %v22552_v28 = vld [vmem:[#allocation55_spill] sm:$0xff] }
 0x4e0   :  { %14577 = vmatprep.mubr.f32.mxu1 %v22486_v53 }
 0x4e3   :  { %14578 = vmatmul.mubr.f32.gmra.mrb[54].mxu1 %v22487_v62  ;;  %v22554_v62 = vld [vmem:[#allocation57_spill] sm:$0xff] }
 0x4e4   :  { %14580 = vmatprep.mubr.f32.mxu1 %v22488_v40  ;;  %v22528_v40 = vand.u32 4294901760, %v19030_v20 }
 0x4e7   :  { %14581 = vmatmul.mubr.f32.gmra.mrb[56].mxu1 %v22489_v23  ;;  %v22529_v23 = vand.u32 4294901760, %v19056_v61 }
 0x4e8   :  { %14583 = vmatprep.mubr.f32.mxu1 %v22490_v0 }
 0x4eb   :  { %14584 = vmatmul.mubr.f32.gmra.mrb[58].mxu1 %v22491_v21  ;;  %v22531_v21 = vand.u32 4294901760, %v19078_v32 }
 0x4ec   :  { %14586 = vmatprep.mubr.f32.mxu1 %v22492_v17  ;;  %v22532_v17 = vand.u32 4294901760, %v19074_v24 }
 0x4ef   :  { %14587 = vmatmul.mubr.f32.gmra.mrb[60].mxu1 %v19008_v57  ;;  %v22533_v57 = vand.u32 4294901760, %v19101_v49 }
 0x4f0   :  { %14589 = vmatprep.mubr.f32.mxu1 %v22493_v33  ;;  %v22534_v33 = vand.u32 4294901760, %v19095_v9 }
 0x4f3   :  { %14590 = vmatmul.mubr.f32.gmra.mrb[62].mxu1 %v19030_v20  ;;  %v22537_v20 = vld [vmem:[#allocation31_spill] sm:$0xff] }
 0x4f4   :  { %14592 = vmatprep.mubr.f32.mxu1 %v19056_v61  ;;  %v22538_v61 = vld [vmem:[#allocation30_spill] sm:$0xff] }
 0x4f7   :  { %14593 = vmatmul.mubr.f32.gmra.mrb[64].mxu1 %v22494_v50 }
 0x4f8   :  { %14595 = vmatprep.mubr.f32.mxu1 %v19078_v32  ;;  %v22540_v32 = vld [vmem:[#allocation34_spill] sm:$0xff] }
 0x4fb   :  { %14596 = vmatmul.mubr.f32.gmra.mrb[66].mxu1 %v19074_v24  ;;  %v22539_v24 = vld [vmem:[#allocation35_spill] sm:$0xff] }
 0x4fc   :  { %14598 = vmatprep.mubr.f32.mxu1 %v19101_v49  ;;  %v22542_v49 = vld [vmem:[#allocation38_spill] sm:$0xff] }
 0x4ff   :  { %14599 = vmatmul.mubr.f32.gmra.mrb[68].mxu1 %v19095_v9  ;;  %v22541_v9 = vld [vmem:[#allocation39_spill] sm:$0xff] }
 0x500   :  { %14617 = vmatprep.mubr.f32.mxu1 %v22495_v51  ;;  %v22523_v51 = vand.u32 4294901760, %v22490_v0  ;;  %v22530_v0 = vand.u32 4294901760, %v22494_v50  ;;  %v22536_v50 = vld [vmem:[#allocation27_spill] sm:$0xff] }
 0x503   :  { %14618 = vmatmul.mubr.f32.vlgmr.msra.gmra.mrb[38].mxu1 %v22500_v35  ;;  %v22508_v35 = vand.u32 4294901760, %v18802_v34  ;;  %v22513_v34 = vand.u32 4294901760, %v22480_v13  ;;  %v22543_v13 = vld [vmem:[#allocation43_spill] sm:$0xff] }
 0x504   :  { %14620 = vmatprep.mubr.f32.mxu1 %v22501_v59  ;;  %15796 = vmatpush3.bf16.msra.mxu1 %v15793_v60  ;;  %v15805_v59 = vpack.c.bf16 %v22507_v52, %v22506_v43  ;;  %v22549_v60 = vld [vmem:[#allocation53_spill] sm:$0xff] }
 0x505   :  { %15798 = vmatprep.subr.bf16.mxu1 %v15797_v47 }
 0x507   :  { %14621 = vmatmul.mubr.f32.gmra.mrb[40].mxu1 %v22504_v10 }
 0x508   :  { %14623 = vmatprep.mubr.f32.mxu1 %v22505_v46  ;;  %15800 = vmatpush3.bf16.msra.mxu1 %v15797_v47  ;;  %v22519_v47 = vand.u32 4294901760, %v22486_v53  ;;  %v22553_v53 = vld [vmem:[#allocation58_spill] sm:$0xff] }
 0x509   :  { %15802 = vmatprep.subr.bf16.mxu1 %v15801_v25 }
 0x50b   :  { %14624 = vmatmul.mubr.f32.gmra.mrb[42].mxu1 %v22508_v35 }
 0x50c   :  { %14626 = vmatprep.mubr.f32.mxu1 %v22509_v45  ;;  %15804 = vmatpush3.bf16.msra.mxu1 %v15801_v25  ;;  %v22517_v25 = vand.u32 4294901760, %v22484_v44  ;;  %v22551_v44 = vld [vmem:[#allocation56_spill] sm:$0xff]  ;;  %v22063_v45 = vmov 0.0  }
 0x50d   :  { %15806 = vmatprep.subr.bf16.mxu1 %v15805_v59 }
 0x50f   :  { %14627 = vmatmul.mubr.f32.gmra.mrb[44].mxu1 %v22510_v7 }
 0x510   :  { %14629 = vmatprep.mubr.f32.mxu1 %v22511_v5  ;;  %15808 = vmatpush3.bf16.msra.mxu1 %v15805_v59 }
 0x511   :  { %15810 = vmatprep.subr.bf16.mxu1 %v18583_v18 }
 0x513   :  { %14630 = vmatmul.mubr.f32.gmra.mrb[46].mxu1 %v22512_v42 }
 0x514   :  { %14632 = vmatprep.mubr.f32.mxu1 %v22513_v34 }
 0x517   :  { %14633 = vmatmul.mubr.f32.gmra.mrb[48].mxu1 %v22514_v8 }
 0x518   :  { %14635 = vmatprep.mubr.f32.mxu1 %v22515_v16  ;;  %v22074_v16 = vmov 1.0  }
 0x51b   :  { %14636 = vmatmul.mubr.f32.gmra.mrb[50].mxu1 %v22516_v37  ;;  %v22559_v37 = vld [vmem:[#allocation12_spill] sm:$0xff] }
 0x51c   :  { %14638 = vmatprep.mubr.f32.mxu1 %v22517_v25  ;;  %v1222_v25 = vrot.slane %v22559_v37, 4 }
 0x51e   :  { %vm1223_vm11 = vcmp.lt.s32.totalorder %v22559_v37, %v1222_v25 }
 0x51f   :  { %14639 = vmatmul.mubr.f32.gmra.mrb[52].mxu1 %v22518_v11  ;;  %v1224_v11 = vsel %vm1223_vm11, %v22559_v37, %v1222_v25 }
 0x520   :  { %14641 = vmatprep.mubr.f32.mxu1 %v22519_v47  ;;  %v1225_v47 = vrot.slane %v1224_v11, 2 }
 0x522   :  { %vm1226_vm12 = vcmp.lt.s32.totalorder %v1224_v11, %v1225_v47 }
 0x523   :  { %14642 = vmatmul.mubr.f32.gmra.mrb[54].mxu1 %v22520_v30  ;;  %v1227_v30 = vsel %vm1226_vm12, %v1224_v11, %v1225_v47 }
 0x524   :  { %14644 = vmatprep.mubr.f32.mxu1 %v22521_v27  ;;  %v1228_v27 = vrot.slane %v1227_v30, 1 }
 0x526   :  { %vm1229_vm13 = vcmp.lt.s32.totalorder %v1227_v30, %v1228_v27 }
 0x527   :  { %14645 = vmatmul.mubr.f32.gmra.mrb[56].mxu1 %v22522_v63  ;;  %v19377_v63 = vsel %vm1229_vm13, %v1227_v30, %v1228_v27 }
 0x528   :  { %14647 = vmatprep.mubr.f32.mxu1 %v22523_v51  ;;  %v19381_v51 = vld [vmem:[#allocation2 + $0x78] ss:$0 sm:$0xff] }
 0x52b   :  { %14648 = vmatmul.mubr.f32.gmra.mrb[58].mxu1 %v22524_v22 }
 0x52c   :  { %14650 = vmatprep.mubr.f32.mxu1 %v22525_v19 }
 0x52f   :  { %14651 = vmatmul.mubr.f32.gmra.mrb[60].mxu1 %v22526_v3 }
 0x530   :  { %14653 = vmatprep.mubr.f32.mxu1 %v22527_v2 }
 0x533   :  { %14654 = vmatmul.mubr.f32.gmra.mrb[62].mxu1 %v22528_v40 }
 0x534   :  { %14656 = vmatprep.mubr.f32.mxu1 %v22529_v23 }
 0x537   :  { %14657 = vmatmul.mubr.f32.gmra.mrb[64].mxu1 %v22530_v0 }
 0x538   :  { %14659 = vmatprep.mubr.f32.mxu1 %v22531_v21 }
 0x53b   :  { %14660 = vmatmul.mubr.f32.gmra.mrb[66].mxu1 %v22532_v17 }
 0x53c   :  { %14662 = vmatprep.mubr.f32.mxu1 %v22533_v57 }
 0x53f   :  { %14663 = vmatmul.mubr.f32.gmra.mrb[68].mxu1 %v22534_v33 }
 0x540   :  { %14681 = vmatprep.mubr.f32.mxu1 %v18754_v4 }
 0x543   :  { %14682 = vmatmul.mubr.f32.vlgmr.msra.gmra.mrb[38].mxu1 %v18746_v1 }
 0x544   :  { %14684 = vmatprep.mubr.f32.mxu1 %v18773_v41  ;;  %15812 = vmatpush3.bf16.msra.mxu1 %v18583_v18  ;;  %v22535_v18 = vld [vmem:[#allocation26_spill] sm:$0xff] }
 0x545   :  { %15814 = vmatprep.subr.bf16.mxu1 %v22469_v31 }
 0x547   :  { %14685 = vmatmul.mubr.f32.gmra.mrb[40].mxu1 %v18765_v15 }
 0x548   :  { %14687 = vmatprep.mubr.f32.mxu1 %v18798_v48  ;;  %15816 = vmatpush3.bf16.msra.mxu1 %v22469_v31  ;;  %v22544_v31 = vld [vmem:[#allocation42_spill] sm:$0xff] }
 0x549   :  { %15818 = vmatprep.subr.bf16.mxu1 %v22471_v39 }
 0x54b   :  { %14688 = vmatmul.mubr.f32.gmra.mrb[42].mxu1 %v18792_v26 }
 0x54c   :  { %14690 = vmatprep.mubr.f32.mxu1 %v18820_v56  ;;  %15820 = vmatpush3.bf16.msra.mxu1 %v22471_v39  ;;  %v22546_v39 = vld [vmem:[#allocation46_spill] sm:$0xff] }
 0x54d   :  { %15822 = vmatprep.subr.bf16.mxu1 %v22473_v55 }
 0x54f   :  { %14691 = vmatmul.mubr.f32.gmra.mrb[44].mxu1 %v18813_v12 }
 0x550   :  { %14693 = vmatprep.mubr.f32.mxu1 %v18844_v58  ;;  %15824 = vmatpush3.bf16.msra.mxu1 %v22473_v55  ;;  %v22548_v55 = vld [vmem:[#allocation49_spill] sm:$0xff] }
 0x553   :  { %14694 = vmatmul.mubr.f32.gmra.mrb[46].mxu1 %v18837_v54 }
 0x554   :  { %14696 = vmatprep.mubr.f32.mxu1 %v18868_v29 }
 0x557   :  { %14697 = vmatmul.mubr.f32.gmra.mrb[48].mxu1 %v18861_v38 }
 0x558   :  { %14699 = vmatprep.mubr.f32.mxu1 %v22535_v18 }
 0x55b   :  { %14700 = vmatmul.mubr.f32.gmra.mrb[50].mxu1 %v22536_v50 }
 0x55c   :  { %14702 = vmatprep.mubr.f32.mxu1 %v22537_v20 }
 0x55f   :  { %14703 = vmatmul.mubr.f32.gmra.mrb[52].mxu1 %v22538_v61 }
 0x560   :  { %14705 = vmatprep.mubr.f32.mxu1 %v22539_v24 }
 0x563   :  { %14706 = vmatmul.mubr.f32.gmra.mrb[54].mxu1 %v22540_v32 }
 0x564   :  { %14708 = vmatprep.mubr.f32.mxu1 %v22541_v9 }
 0x567   :  { %14709 = vmatmul.mubr.f32.gmra.mrb[56].mxu1 %v22542_v49 }
 0x568   :  { %14711 = vmatprep.mubr.f32.mxu1 %v22543_v13 }
 0x56b   :  { %14712 = vmatmul.mubr.f32.gmra.mrb[58].mxu1 %v22544_v31 }
 0x56c   :  { %14714 = vmatprep.mubr.f32.mxu1 %v22545_v14 }
 0x56f   :  { %14715 = vmatmul.mubr.f32.gmra.mrb[60].mxu1 %v22546_v39 }
 0x570   :  { %14717 = vmatprep.mubr.f32.mxu1 %v22547_v36 }
 0x573   :  { %14718 = vmatmul.mubr.f32.gmra.mrb[62].mxu1 %v22548_v55 }
 0x574   :  { %14720 = vmatprep.mubr.f32.mxu1 %v22549_v60 }
 0x577   :  { %14721 = vmatmul.mubr.f32.gmra.mrb[64].mxu1 %v22550_v6 }
 0x578   :  { %14723 = vmatprep.mubr.f32.mxu1 %v22551_v44 }
 0x57b   :  { %14724 = vmatmul.mubr.f32.gmra.mrb[66].mxu1 %v22552_v28 }
 0x57c   :  { %14726 = vmatprep.mubr.f32.mxu1 %v22553_v53 }
 0x57f   :  { %14727 = vmatmul.mubr.f32.gmra.mrb[68].mxu1 %v22554_v62 }
 0x580   :  { %14745 = vmatprep.mubr.f32.mxu1 %v18754_v4 }
 0x583   :  { %14746 = vmatmul.mubr.f32.vlgmr.msra.gmra.mrb[38].mxu1 %v18746_v1 }
 0x584   :  { %14748 = vmatprep.mubr.f32.mxu1 %v18773_v41 }
 0x587   :  { %14749 = vmatmul.mubr.f32.gmra.mrb[40].mxu1 %v18765_v15 }
 0x588   :  { %14751 = vmatprep.mubr.f32.mxu1 %v18798_v48 }
 0x58b   :  { %14752 = vmatmul.mubr.f32.gmra.mrb[42].mxu1 %v18792_v26  ;;  %v17244_v26 = vld [vmem:[%s21811_s0 + $0x8] sm:$0x7f]  ;;  %s17324_s0 = smov [#allocation6]  }
 0x58c   :  { %14754 = vmatprep.mubr.f32.mxu1 %v18820_v56  ;;  %v2407_v1 = vsel %vm1210_vm0, %v17244_v26, -inf  ;;  %s12381_s4 = sshll.u32 %s17324_s0, 4  ;;  %s12382_s4 = int_to_ptr.vmem [resolvable:$true] %s12381_s4 }
 0x58d   :  { %v2408_v4 = vrot.slane %v2407_v1, 4  ;;  %s17267_s5 = scalar_lea.vmem %s12382_s4, 32  ;;  %p17272_p9 = scmp.lt.s32.totalorder %s12382_s4, %s12382_s4 }
 0x58e   :  { %p17268_p8 = scmp.ne.s32.totalorder %s12382_s4, %s17267_s5  ;;  %p17273_p10 = scmp.lt.s32.totalorder %s17267_s5, %s17267_s5 }
 0x58f   :  { %14755 = vmatmul.mubr.f32.gmra.mrb[44].mxu1 %v18813_v12  ;;  %v2409_v15 = vmax.f32 %v2407_v1, %v2408_v4 }
 0x590   :  { %14757 = vmatprep.mubr.f32.mxu1 %v18844_v58  ;;  %p17274_p11 = por %p17273_p10, %p17272_p9 }
 0x591   :  { %v2410_v41 = vrot.slane %v2409_v15, 2 }
 0x592   :  { %p17275_p12 = pnand %p17274_p11, %p17268_p8 }
 0x593   :  { %14758 = vmatmul.mubr.f32.gmra.mrb[46].mxu1 %v18837_v54  ;;  %v2411_v48 = vmax.f32 %v2409_v15, %v2410_v41  ;;  %v22555_v54 = vld [vmem:[#allocation11_spill] sm:$0xff] }
 0x594   :  { %14760 = vmatprep.mubr.f32.mxu1 %v18868_v29  ;;  %v22556_v58 = vrot.slane %v22555_v54, 5  ;;  %vm1231_vm14 = vcmp.eq.s32.totalorder %v22555_v54, %v19377_v63 }
 0x595   :  { %v2412_v12 = vrot.slane %v2411_v48, 1  ;;  %v19387_v19 = vsel %vm1231_vm14, 1.0, %v22063_v45 }
 0x596   :  { %v19397_v17 = vsub.f32 %v19387_v19, %v19387_v19 }
 0x597   :  { %14761 = vmatmul.mubr.f32.gmra.mrb[48].mxu1 %v18861_v38  ;;  %v2413_v56 = vmax.f32 %v2411_v48, %v2412_v12 }
 0x598   :  { %14763 = vmatprep.mubr.f32.mxu1 %v22535_v18  ;;  %22562 = vst [vmem:[#allocation13_spill] sm:$0xff] %v19397_v17 }
 0x599   :  { %vm2414_vm6 = vcmp.ge.f32.partialorder %v17244_v26, %v2413_v56 }
 0x59a   :  { %v2415_v38 = vsel %vm2414_vm6, %v22556_v58, 4 }
 0x59b   :  { %14764 = vmatmul.mubr.f32.gmra.mrb[50].mxu1 %v22536_v50  ;;  %v2416_v29 = vsel %vm1210_vm0, %v2415_v38, 2147483647  ;;  %vm22301_vm0 = vmmov 0  }
 0x59c   :  { %14766 = vmatprep.mubr.f32.mxu1 %v22537_v20  ;;  %v2417_v10 = vrot.slane %v2416_v29, 4 }
 0x59e   :  { %vm2418_vm7 = vcmp.lt.s32.totalorder %v2416_v29, %v2417_v10 }
 0x59f   :  { %14767 = vmatmul.mubr.f32.gmra.mrb[52].mxu1 %v22538_v61  ;;  %v2419_v46 = vsel %vm2418_vm7, %v2416_v29, %v2417_v10 }
 0x5a0   :  { %14769 = vmatprep.mubr.f32.mxu1 %v22539_v24  ;;  %v2420_v43 = vrot.slane %v2419_v46, 2 }
 0x5a2   :  { %vm2421_vm8 = vcmp.lt.s32.totalorder %v2419_v46, %v2420_v43 }
 0x5a3   :  { %14770 = vmatmul.mubr.f32.gmra.mrb[54].mxu1 %v22540_v32  ;;  %v2422_v52 = vsel %vm2421_vm8, %v2419_v46, %v2420_v43 }
 0x5a4   :  { %14772 = vmatprep.mubr.f32.mxu1 %v22541_v9  ;;  %v2423_v59 = vrot.slane %v2422_v52, 1 }
 0x5a6   :  { %vm2424_vm9 = vcmp.lt.s32.totalorder %v2422_v52, %v2423_v59 }
 0x5a7   :  { %14773 = vmatmul.mubr.f32.gmra.mrb[56].mxu1 %v22542_v49  ;;  %v19352_v35 = vsel %vm2424_vm9, %v2422_v52, %v2423_v59 }
 0x5a8   :  { %14775 = vmatprep.mubr.f32.mxu1 %v22543_v13  ;;  %22557 = vst [vmem:[#allocation19_spill] sm:$0xff] %v19352_v35  ;;  %vm2426_vm10 = vcmp.eq.s32.totalorder %v22555_v54, %v19352_v35  ;;  %v22065_v13 = vand.u32 4294901760, %v19397_v17 }
 0x5a9   :  { %v19360_v7 = vsel %vm2426_vm10, 1.0, %v22063_v45 }
 0x5aa   :  { %22558 = vst [vmem:[#allocation17_spill] sm:$0xff] %v19360_v7  ;;  %v19364_v5 = vsub.f32 %v19360_v7, %v19360_v7 }
 0x5ab   :  { %14776 = vmatmul.mubr.f32.gmra.mrb[58].mxu1 %v22544_v31 }
 0x5ac   :  { %14778 = vmatprep.mubr.f32.mxu1 %v22545_v14  ;;  %v22072_v42 = vand.u32 4294901760, %v19364_v5 }
 0x5ae   :  { %v6570_v34 = vsub.f32 %v19364_v5, %v22072_v42 }
 0x5af   :  { %14779 = vmatmul.mubr.f32.gmra.mrb[60].mxu1 %v22546_v39 }
 0x5b0   :  { %14781 = vmatprep.mubr.f32.mxu1 %v22547_v36  ;;  %v6571_v8 = vand.u32 4294901760, %v6570_v34 }
 0x5b2   :  { %6572 = vmatprep.mubr.f32.mxu0 %v6571_v8 }
 0x5b3   :  { %14782 = vmatmul.mubr.f32.gmra.mrb[62].mxu1 %v22548_v55 }
 0x5b4   :  { %14784 = vmatprep.mubr.f32.mxu1 %v22549_v60 }
 0x5b7   :  { %14785 = vmatmul.mubr.f32.gmra.mrb[64].mxu1 %v22550_v6 }
 0x5b8   :  { %14787 = vmatprep.mubr.f32.mxu1 %v22551_v44 }
 0x5bb   :  { %14788 = vmatmul.mubr.f32.gmra.mrb[66].mxu1 %v22552_v28 }
 0x5bc   :  { %14790 = vmatprep.mubr.f32.mxu1 %v22553_v53 }
 0x5bf   :  { %14791 = vmatmul.mubr.f32.gmra.mrb[68].mxu1 %v22554_v62  ;;  %v19427_v62 = vsub.f32 %v19397_v17, %v22065_v13 }
 0x5c0   :  { %12400 = vmatprep.mubr.msk.f32.mxu1 %vm2426_vm10, %v22074_v16 }
 0x656   :  { %v14747_v22 = vpop.f32.mrb[38].mxu1 }
 0x657   :  { %v16453_v3 = vadd.f32 %v14747_v22, %v19381_v51  ;;  %v6243_v2 = vpop.f32.mrb[39].mxu1 }
 0x658   :  { %v16454_v40 = vadd.f32 %v19381_v51, %v6243_v2 }
 0x659   :  { %v19391_v23 = vmax.f32 %v16453_v3, 0.0 }
 0x65a   :  { %v19393_v0 = vmax.f32 %v16454_v40, 0.0  ;;  %v14750_v21 = vpop.f32.mrb[40].mxu1 }
 0x65b   :  { %22560 = vst [vmem:[#allocation20_spill] sm:$0xff] %v19391_v23  ;;  %v6475_v57 = vand.u32 4294901760, %v19391_v23  ;;  %v16455_v33 = vadd.f32 %v14750_v21, %v19381_v51  ;;  %v6255_v18 = vpop.f32.mrb[41].mxu1 }
 0x65c   :  { %22561 = vst [vmem:[#allocation16_spill] sm:$0xff] %v19393_v0  ;;  %v6472_v50 = vand.u32 4294901760, %v19393_v0  ;;  %v16456_v20 = vadd.f32 %v19381_v51, %v6255_v18 }
 0x65d   :  { %v19404_v61 = vsub.f32 %v19391_v23, %v6475_v57  ;;  %v19406_v24 = vmax.f32 %v16455_v33, 0.0 }
 0x65e   :  { %v19409_v32 = vsub.f32 %v19393_v0, %v6472_v50  ;;  %v19411_v9 = vmax.f32 %v16456_v20, 0.0  ;;  %v14753_v49 = vpop.f32.mrb[42].mxu1  ;;  %v19465_v2 = vpack.c.bf16 %v6475_v57, %v6472_v50 }
 0x65f   :  { %22563 = vst [vmem:[#allocation21_spill] sm:$0xff] %v19406_v24  ;;  %v22069_v31 = vand.u32 4294901760, %v19404_v61  ;;  %v6481_v14 = vand.u32 4294901760, %v19406_v24  ;;  %v16457_v39 = vadd.f32 %v14753_v49, %v19381_v51  ;;  %v6267_v36 = vpop.f32.mrb[43].mxu1 }
 0x660   :  { %22564 = vst [vmem:[#allocation14_spill] sm:$0xff] %v19411_v9  ;;  %v22071_v55 = vand.u32 4294901760, %v19409_v32  ;;  %v16458_v60 = vadd.f32 %v19381_v51, %v6267_v36  ;;  %v6478_v6 = vand.u32 4294901760, %v19411_v9 }
 0x661   :  { %v19420_v44 = vmax.f32 %v16457_v39, 0.0  ;;  %v19430_v26 = vsub.f32 %v19406_v24, %v6481_v14  ;;  %v6594_v15 = vsub.f32 %v19404_v61, %v22069_v31 }
 0x662   :  { %v19422_v28 = vmax.f32 %v16458_v60, 0.0  ;;  %v14756_v53 = vpop.f32.mrb[44].mxu1  ;;  %v6587_v56 = vsub.f32 %v19409_v32, %v22071_v55  ;;  %v19443_v58 = vsub.f32 %v19411_v9, %v6478_v6  ;;  %v19477_v20 = vpack.c.bf16 %v6481_v14, %v6478_v6 }
 0x663   :  { %22565 = vst [vmem:[#allocation18_spill] sm:$0xff] %v19420_v44  ;;  %v16459_v1 = vadd.f32 %v14756_v53, %v19381_v51  ;;  %v6279_v4 = vpop.f32.mrb[45].mxu1  ;;  %v6487_v41 = vand.u32 4294901760, %v19420_v44  ;;  %v22067_v52 = vand.u32 4294901760, %v19430_v26  ;;  %v6595_v37 = vand.u32 4294901760, %v6594_v15 }
 0x664   :  { %22566 = vst [vmem:[#allocation23_spill] sm:$0xff] %v19422_v28  ;;  %v6484_v48 = vand.u32 4294901760, %v19422_v28  ;;  %v16460_v12 = vadd.f32 %v19381_v51, %v6279_v4  ;;  %v6588_v30 = vand.u32 4294901760, %v6587_v56  ;;  %v22068_v27 = vand.u32 4294901760, %v19443_v58 }
 0x665   :  { %v19445_v38 = vmax.f32 %v16459_v1, 0.0  ;;  %v19457_v25 = vsub.f32 %v19420_v44, %v6487_v41  ;;  %v6608_v50 = vsub.f32 %v19430_v26, %v22067_v52 }
 0x666   :  { %v19448_v29 = vsub.f32 %v19422_v28, %v6484_v48  ;;  %v19450_v10 = vmax.f32 %v16460_v12, 0.0  ;;  %v14759_v46 = vpop.f32.mrb[46].mxu1  ;;  %v19481_v57 = vpack.c.bf16 %v6487_v41, %v6484_v48  ;;  %v19489_v4 = vpack.c.bf16 %v6595_v37, %v6588_v30 }
 0x667   :  { %22567 = vst [vmem:[#allocation24_spill] sm:$0xff] %v19445_v38  ;;  %v22077_v59 = vand.u32 4294901760, %v19445_v38  ;;  %v16461_v34 = vadd.f32 %v14759_v46, %v19381_v51  ;;  %v6291_v8 = vpop.f32.mrb[47].mxu1  ;;  %v22070_v60 = vand.u32 4294901760, %v19457_v25  ;;  %v6601_v15 = vsub.f32 %v19443_v58, %v22068_v27 }
 0x668   :  { %22568 = vst [vmem:[#allocation25_spill] sm:$0xff] %v19450_v10  ;;  %v6490_v11 = vand.u32 4294901760, %v19450_v10  ;;  %v16462_v47 = vadd.f32 %v19381_v51, %v6291_v8  ;;  %v22066_v22 = vand.u32 4294901760, %v19448_v29 }
 0x669   :  { %v19463_v3 = vmax.f32 %v16461_v34, 0.0  ;;  %v19470_v40 = vsub.f32 %v19445_v38, %v22077_v59  ;;  %v6602_v52 = vand.u32 4294901760, %v6601_v15 }
 0x66a   :  { %v19473_v21 = vsub.f32 %v19450_v10, %v6490_v11  ;;  %v19475_v33 = vmax.f32 %v16462_v47, 0.0  ;;  %v14762_v18 = vpop.f32.mrb[48].mxu1  ;;  %v6615_v41 = vsub.f32 %v19448_v29, %v22066_v22 }
 0x66b   :  { %22569 = vst [vmem:[#allocation29_spill] sm:$0xff] %v19463_v3  ;;  %v6499_v49 = vand.u32 4294901760, %v19463_v3  ;;  %v16463_v39 = vadd.f32 %v14762_v18, %v19381_v51  ;;  %v6303_v36 = vpop.f32.mrb[49].mxu1  ;;  %v22076_v48 = vand.u32 4294901760, %v19470_v40  ;;  %v6609_v18 = vand.u32 4294901760, %v6608_v50 }
 0x66c   :  { %22570 = vst [vmem:[#allocation28_spill] sm:$0xff] %v19475_v33  ;;  %v6496_v53 = vand.u32 4294901760, %v19475_v33  ;;  %v16464_v1 = vadd.f32 %v19381_v51, %v6303_v36  ;;  %v22073_v12 = vand.u32 4294901760, %v19473_v21  ;;  %v6616_v27 = vand.u32 4294901760, %v6615_v41 }
 0x66d   :  { %v19492_v14 = vsub.f32 %v19463_v3, %v6499_v49  ;;  %v19494_v6 = vmax.f32 %v16463_v39, 0.0 }
 0x66e   :  { %v19505_v56 = vsub.f32 %v19475_v33, %v6496_v53  ;;  %v19507_v46 = vmax.f32 %v16464_v1, 0.0  ;;  %v14765_v34 = vpop.f32.mrb[50].mxu1  ;;  %v6622_v1 = vsub.f32 %v19457_v25, %v22070_v60  ;;  %v6636_v60 = vsub.f32 %v19470_v40, %v22076_v48 }
 0x66f   :  { %22571 = vst [vmem:[#allocation33_spill] sm:$0xff] %v19494_v6  ;;  %v22081_v8 = vand.u32 4294901760, %v19492_v14  ;;  %v6505_v37 = vand.u32 4294901760, %v19494_v6  ;;  %v16465_v47 = vadd.f32 %v14765_v34, %v19381_v51  ;;  %v6315_v30 = vpop.f32.mrb[51].mxu1  ;;  %v19557_v42 = vpack.c.bf16 %v6499_v49, %v6496_v53 }
 0x670   :  { %22572 = vst [vmem:[#allocation32_spill] sm:$0xff] %v19507_v46  ;;  %v22079_v39 = vand.u32 4294901760, %v19505_v56  ;;  %v6502_v36 = vand.u32 4294901760, %v19507_v46  ;;  %v16466_v45 = vadd.f32 %v19381_v51, %v6315_v30  ;;  %v6629_v30 = vsub.f32 %v19473_v21, %v22073_v12 }
 0x671   :  { %v19519_v13 = vsub.f32 %v19494_v6, %v6505_v37  ;;  %v19521_v22 = vmax.f32 %v16465_v47, 0.0  ;;  %v6623_v48 = vand.u32 4294901760, %v6622_v1  ;;  %22581 = vst [vmem:[#allocation51_spill] sm:$0xff] %v19557_v42  ;;  %v6637_v3 = vand.u32 4294901760, %v6636_v60 }
 0x672   :  { %v19524_v34 = vsub.f32 %v19507_v46, %v6502_v36  ;;  %v19526_v50 = vmax.f32 %v16466_v45, 0.0  ;;  %v14768_v31 = vpop.f32.mrb[52].mxu1  ;;  %v6643_v41 = vsub.f32 %v19505_v56, %v22079_v39  ;;  %v6650_v45 = vsub.f32 %v19492_v14, %v22081_v8 }
 0x673   :  { %22573 = vst [vmem:[#allocation37_spill] sm:$0xff] %v19519_v13  ;;  %22574 = vst [vmem:[#allocation36_spill] sm:$0xff] %v19521_v22  ;;  %v6511_v55 = vand.u32 4294901760, %v19521_v22  ;;  %v16467_v47 = vadd.f32 %v14768_v31, %v19381_v51  ;;  %v6327_v15 = vpop.f32.mrb[53].mxu1  ;;  %v22578_v31 = vand.u32 4294901760, %v19445_v38  ;;  %v19552_v39 = vpack.c.bf16 %v6609_v18, %v6602_v52 }
 0x674   :  { %22575 = vst [vmem:[#allocation41_spill] sm:$0xff] %v19524_v34  ;;  %22576 = vst [vmem:[#allocation40_spill] sm:$0xff] %v19526_v50  ;;  %v6508_v12 = vand.u32 4294901760, %v19526_v50  ;;  %v16468_v16 = vadd.f32 %v19381_v51, %v6327_v15  ;;  %v6630_v33 = vand.u32 4294901760, %v6629_v30  ;;  %v6644_v43 = vand.u32 4294901760, %v6643_v41 }
 0x675   :  { %v19546_v59 = vmax.f32 %v16467_v47, 0.0  ;;  %v19550_v46 = vpack.c.bf16 %v22578_v31, %v6490_v11  ;;  %v19555_v6 = vsub.f32 %v19521_v22, %v6511_v55  ;;  %v6651_v10 = vand.u32 4294901760, %v6650_v45 }
 0x676   :  { %v14771_v8 = vpop.f32.mrb[54].mxu1  ;;  %v19559_v15 = vmax.f32 %v16468_v16, 0.0  ;;  %v19563_v11 = vsub.f32 %v19526_v50, %v6508_v12  ;;  %v19566_v18 = vpack.c.bf16 %v6623_v48, %v6616_v27  ;;  %v22584_v31 = vand.u32 4294901760, %v19524_v34 }
 0x677   :  { %22577 = vst [vmem:[#allocation45_spill] sm:$0xff] %v19546_v59  ;;  %22579 = vst [vmem:[#allocation44_spill] sm:$0xff] %v19550_v46  ;;  %v16469_v1 = vadd.f32 %v14771_v8, %v19381_v51  ;;  %v6339_v47 = vpop.f32.mrb[55].mxu1  ;;  %v6517_v16 = vand.u32 4294901760, %v19546_v59  ;;  %v19576_v53 = vpack.c.bf16 %v6505_v37, %v6502_v36  ;;  %v22586_v8 = vand.u32 4294901760, %v19519_v13 }
 0x678   :  { %22580 = vst [vmem:[#allocation48_spill] sm:$0xff] %v19555_v6  ;;  %22582 = vst [vmem:[#allocation54_spill] sm:$0xff] %v19559_v15  ;;  %v16470_v52 = vadd.f32 %v19381_v51, %v6339_v47  ;;  %v19571_v49 = vsub.f32 %v19524_v34, %v22584_v31  ;;  %v19586_v45 = vpack.c.bf16 %v6637_v3, %v6630_v33  ;;  %v6514_v31 = vand.u32 4294901760, %v19559_v15 }
 0x679   :  { %22583 = vst [vmem:[#allocation22_spill] sm:$0xff] %v19563_v11  ;;  %v19574_v60 = vmax.f32 %v16469_v1, 0.0  ;;  %v19581_v30 = vsub.f32 %v19519_v13, %v22586_v8  ;;  %v19588_v47 = vpack.c.bf16 %v6511_v55, %v6508_v12  ;;  %v19593_v50 = vpack.c.bf16 %v6651_v10, %v6644_v43 }
 0x67a   :  { %v19584_v27 = vmax.f32 %v16470_v52, 0.0  ;;  %v14774_v48 = vpop.f32.mrb[56].mxu1  ;;  %v19600_v55 = vsub.f32 %v19546_v59, %v6517_v16  ;;  %v19621_v59 = vsub.f32 %v19559_v15, %v6514_v31  ;;  %v22592_v9 = vand.u32 4294901760, %v19563_v11 }
 0x67b   :  { %22585 = vst [vmem:[#allocation15_spill] sm:$0xff] %v19574_v60  ;;  %v6523_v1 = vand.u32 4294901760, %v19574_v60  ;;  %v16471_v37 = vadd.f32 %v14774_v48, %v19381_v51  ;;  %v6351_v36 = vpop.f32.mrb[57].mxu1  ;;  %v6665_v48 = vand.u32 4294901760, %v19581_v30 }
 0x67c   :  { %22587 = vst [vmem:[#allocation26_spill] sm:$0xff] %v19584_v27  ;;  %v6520_v41 = vand.u32 4294901760, %v19584_v27  ;;  %v16472_v52 = vadd.f32 %v19381_v51, %v6351_v36  ;;  %v22590_v36 = vand.u32 4294901760, %v19555_v6 }
 0x67d   :  { %v19603_v33 = vsub.f32 %v19574_v60, %v6523_v1  ;;  %v19605_v12 = vmax.f32 %v16471_v37, 0.0 }
 0x67e   :  { %v19609_v10 = vsub.f32 %v19584_v27, %v6520_v41  ;;  %v19611_v43 = vmax.f32 %v16472_v52, 0.0  ;;  %v14777_v8 = vpop.f32.mrb[58].mxu1  ;;  %v19613_v22 = vpack.c.bf16 %v6523_v1, %v6520_v41  ;;  %v19618_v3 = vsub.f32 %v19555_v6, %v22590_v36 }
 0x67f   :  { %22588 = vst [vmem:[#allocation27_spill] sm:$0xff] %v19605_v12  ;;  %v6529_v37 = vand.u32 4294901760, %v19605_v12  ;;  %v16473_v30 = vadd.f32 %v14777_v8, %v19381_v51  ;;  %v6363_v38 = vpop.f32.mrb[59].mxu1  ;;  %v22096_v28 = vand.u32 4294901760, %v19603_v33  ;;  %v19630_v36 = vpack.c.bf16 %v6517_v16, %v6514_v31 }
 0x680   :  { %22589 = vst [vmem:[#allocation31_spill] sm:$0xff] %v19611_v43  ;;  %v6526_v52 = vand.u32 4294901760, %v19611_v43  ;;  %v16474_v41 = vadd.f32 %v19381_v51, %v6363_v38  ;;  %15826 = vmatprep.subr.bf16.mxu0 %v19613_v22  ;;  %v19644_v38 = vsub.f32 %v19563_v11, %v22592_v9 }
 0x681   :  { %v19633_v15 = vsub.f32 %v19605_v12, %v6529_v37  ;;  %v19635_v44 = vmax.f32 %v16473_v30, 0.0  ;;  %15828 = vmatpush3.bf16.msra.mxu0 %v19465_v2  ;;  %v6706_v8 = vsub.f32 %v19603_v33, %v22096_v28  ;;  %v22594_v30 = vand.u32 4294901760, %v19609_v10 }
 0x682   :  { %v19647_v1 = vsub.f32 %v19611_v43, %v6526_v52  ;;  %v19649_v16 = vmax.f32 %v16474_v41, 0.0  ;;  %v14780_v31 = vpop.f32.mrb[60].mxu1  ;;  %v19651_v12 = vpack.c.bf16 %v6529_v37, %v6526_v52 }
 0x683   :  { %22591 = vst [vmem:[#allocation30_spill] sm:$0xff] %v19635_v44  ;;  %v6699_v24 = vsub.f32 %v19609_v10, %v22594_v30  ;;  %v6535_v27 = vand.u32 4294901760, %v19635_v44  ;;  %v16475_v28 = vadd.f32 %v14780_v31, %v19381_v51  ;;  %v6375_v0 = vpop.f32.mrb[61].mxu1  ;;  %v6707_v60 = vand.u32 4294901760, %v6706_v8 }
 0x684   :  { %22593 = vst [vmem:[#allocation35_spill] sm:$0xff] %v19649_v16  ;;  %v22112_v9 = vand.u32 4294901760, %v19633_v15  ;;  %v6532_v43 = vand.u32 4294901760, %v19649_v16  ;;  %v16476_v41 = vadd.f32 %v19381_v51, %v6375_v0  ;;  %15830 = vmatprep.subr.bf16.mxu0 %v19651_v12  ;;  %v22597_v6 = vand.u32 4294901760, %v19647_v1 }
 0x685   :  { %v6700_v37 = vand.u32 4294901760, %v6699_v24  ;;  %v19665_v30 = vsub.f32 %v19635_v44, %v6535_v27  ;;  %v19667_v35 = vmax.f32 %v16475_v28, 0.0  ;;  %15832 = vmatpush3.bf16.msra.mxu0 %v19477_v20 }
 0x686   :  { %v6720_v8 = vsub.f32 %v19633_v15, %v22112_v9  ;;  %v19674_v0 = vsub.f32 %v19649_v16, %v6532_v43  ;;  %v19676_v31 = vmax.f32 %v16476_v41, 0.0  ;;  %v14783_v24 = vpop.f32.mrb[62].mxu1  ;;  %v19678_v52 = vpack.c.bf16 %v6535_v27, %v6532_v43 }
 0x687   :  { %22595 = vst [vmem:[#allocation34_spill] sm:$0xff] %v19667_v35  ;;  %v15857_v23 = vpack.c.bf16 %v6707_v60, %v6700_v37  ;;  %v6541_v44 = vand.u32 4294901760, %v19667_v35  ;;  %v16477_v28 = vadd.f32 %v14783_v24, %v19381_v51  ;;  %v6387_v17 = vpop.f32.mrb[63].mxu1  ;;  %v6713_v11 = vsub.f32 %v19647_v1, %v22597_v6 }
 0x688   :  { %22596 = vst [vmem:[#allocation39_spill] sm:$0xff] %v19676_v31  ;;  %v6721_v13 = vand.u32 4294901760, %v6720_v8  ;;  %v6538_v9 = vand.u32 4294901760, %v19676_v31  ;;  %v16478_v16 = vadd.f32 %v19381_v51, %v6387_v17  ;;  %15834 = vmatprep.subr.bf16.mxu0 %v19678_v52  ;;  %v22116_v27 = vand.u32 4294901760, %v19674_v0 }
 0x689   :  { %15858 = vmatprep.subr.bf16.mxu1 %v15857_v23  ;;  %v19691_v43 = vsub.f32 %v19667_v35, %v6541_v44  ;;  %v19693_v41 = vmax.f32 %v16477_v28, 0.0  ;;  %15836 = vmatpush3.bf16.msra.mxu0 %v19481_v57  ;;  %v6714_v6 = vand.u32 4294901760, %v6713_v11  ;;  %v22599_v37 = vand.u32 4294901760, %v19571_v49 }
 0x68a   :  { %15860 = vmatpush3.bf16.msra.mxu1 %v19489_v4  ;;  %v19702_v23 = vsub.f32 %v19676_v31, %v6538_v9  ;;  %v19704_v8 = vmax.f32 %v16478_v16, 0.0  ;;  %v14786_v24 = vpop.f32.mrb[64].mxu1  ;;  %v19706_v60 = vpack.c.bf16 %v6541_v44, %v6538_v9  ;;  %v6727_v28 = vsub.f32 %v19674_v0, %v22116_v27 }
 0x68b   :  { %22598 = vst [vmem:[#allocation38_spill] sm:$0xff] %v19693_v41  ;;  %v19699_v17 = vpack.c.bf16 %v6665_v48, %v22599_v37  ;;  %v6547_v35 = vand.u32 4294901760, %v19693_v41  ;;  %v16479_v4 = vadd.f32 %v14786_v24, %v19381_v51  ;;  %v6399_v11 = vpop.f32.mrb[65].mxu1  ;;  %v15861_v49 = vpack.c.bf16 %v6721_v13, %v6714_v6 }
 0x68c   :  { %22600 = vst [vmem:[#allocation43_spill] sm:$0xff] %v19704_v8  ;;  %22601 = vst [vmem:[#allocation42_spill] sm:$0xff] %v19706_v60  ;;  %v22602_v48 = vand.u32 4294901760, %v19665_v30  ;;  %v6544_v16 = vand.u32 4294901760, %v19704_v8  ;;  %v16480_v31 = vadd.f32 %v19381_v51, %v6399_v11  ;;  %15838 = vmatprep.subr.bf16.mxu0 %v19706_v60  ;;  %v6728_v44 = vand.u32 4294901760, %v6727_v28 }
 0x68d   :  { %v22123_v9 = vand.u32 4294901760, %v19702_v23  ;;  %v19721_v27 = vsub.f32 %v19693_v41, %v6547_v35  ;;  %v19723_v34 = vmax.f32 %v16479_v4, 0.0  ;;  %15862 = vmatprep.subr.bf16.mxu1 %v15861_v49  ;;  %15840 = vmatpush3.bf16.msra.mxu0 %v19550_v46 }
 0x68e   :  { %v6734_v37 = vsub.f32 %v19665_v30, %v22602_v48  ;;  %v19728_v24 = vsub.f32 %v19704_v8, %v6544_v16  ;;  %v19730_v11 = vmax.f32 %v16480_v31, 0.0  ;;  %15864 = vmatpush3.bf16.msra.mxu1 %v19552_v39  ;;  %v14789_v28 = vpop.f32.mrb[66].mxu1  ;;  %v19733_v48 = vpack.c.bf16 %v6547_v35, %v6544_v16 }
 0x68f   :  { %22603 = vst [vmem:[#allocation47_spill] sm:$0xff] %v19723_v34  ;;  %v6741_v4 = vsub.f32 %v19702_v23, %v22123_v9  ;;  %v6553_v49 = vand.u32 4294901760, %v19723_v34  ;;  %v6411_v41 = vpop.f32.mrb[67].mxu1  ;;  %v22606_v8 = vand.u32 4294901760, %v19691_v43 }
 0x690   :  { %v6735_v13 = vand.u32 4294901760, %v6734_v37  ;;  %22604 = vst [vmem:[#allocation46_spill] sm:$0xff] %v19730_v11  ;;  %22605 = vst [vmem:[#allocation50_spill] sm:$0xff] %v19733_v48  ;;  %v16481_v37 = vadd.f32 %v14789_v28, %v19381_v51  ;;  %v6550_v46 = vand.u32 4294901760, %v19730_v11  ;;  %v16482_v39 = vadd.f32 %v19381_v51, %v6411_v41  ;;  %15842 = vmatprep.subr.bf16.mxu0 %v19733_v48 }
 0x691   :  { %v6748_v31 = vsub.f32 %v19691_v43, %v22606_v8  ;;  %v6742_v35 = vand.u32 4294901760, %v6741_v4  ;;  %v22130_v16 = vand.u32 4294901760, %v19728_v24  ;;  %v19748_v9 = vsub.f32 %v19723_v34, %v6553_v49  ;;  %15844 = vmatpush3.bf16.msra.mxu0 %v19557_v42 }
 0x692   :  { %v15865_v6 = vpack.c.bf16 %v6735_v13, %v6728_v44  ;;  %v19750_v60 = vmax.f32 %v16481_v37, 0.0  ;;  %v19755_v13 = vsub.f32 %v19730_v11, %v6550_v46  ;;  %v19757_v41 = vmax.f32 %v16482_v39, 0.0  ;;  %v14792_v28 = vpop.f32.mrb[68].mxu1 }
 0x693   :  { %v6749_v44 = vand.u32 4294901760, %v6748_v31  ;;  %v19760_v4 = vpack.c.bf16 %v6553_v49, %v6550_v46  ;;  %v6755_v37 = vsub.f32 %v19728_v24, %v22130_v16  ;;  %v16483_v31 = vadd.f32 %v14792_v28, %v19381_v51  ;;  %v6423_v34 = vpop.f32.mrb[69].mxu1 }
 0x694   :  { %22607 = vst [vmem:[#allocation49_spill] sm:$0xff] %v19750_v60  ;;  %15866 = vmatprep.subr.bf16.mxu1 %v15865_v6  ;;  %22608 = vst [vmem:[#allocation53_spill] sm:$0xff] %v19757_v41  ;;  %v6559_v6 = vand.u32 4294901760, %v19750_v60  ;;  %v22609_v11 = vand.u32 4294901760, %v19721_v27  ;;  %v6556_v42 = vand.u32 4294901760, %v19757_v41  ;;  %v22135_v49 = vand.u32 4294901760, %v19755_v13 }
 0x695   :  { %15868 = vmatpush3.bf16.msra.mxu1 %v19566_v18  ;;  %v15869_v8 = vpack.c.bf16 %v6749_v44, %v6742_v35  ;;  %v16484_v18 = vadd.f32 %v19381_v51, %v6423_v34  ;;  %15846 = vmatprep.subr.bf16.mxu0 %v19760_v4  ;;  %v6756_v46 = vand.u32 4294901760, %v6755_v37  ;;  %v19777_v48 = vmax.f32 %v16483_v31, 0.0 }
 0x696   :  { %v6762_v39 = vsub.f32 %v19721_v27, %v22609_v11  ;;  %v19775_v16 = vsub.f32 %v19750_v60, %v6559_v6  ;;  %15848 = vmatpush3.bf16.msra.mxu0 %v19576_v53  ;;  %v22134_v11 = vand.u32 4294901760, %v19748_v9  ;;  %v19782_v44 = vsub.f32 %v19757_v41, %v6556_v42 }
 0x697   :  { %22610 = vst [vmem:[#allocation52_spill] sm:$0xff] %v19777_v48  ;;  %15870 = vmatprep.subr.bf16.mxu1 %v15869_v8  ;;  %v19784_v51 = vmax.f32 %v16484_v18, 0.0  ;;  %v19787_v34 = vpack.c.bf16 %v6559_v6, %v6556_v42  ;;  %v6769_v28 = vsub.f32 %v19755_v13, %v22135_v49  ;;  %v6565_v8 = vand.u32 4294901760, %v19777_v48 }
 0x698   :  { %v6763_v35 = vand.u32 4294901760, %v6762_v39  ;;  %v6776_v31 = vsub.f32 %v19748_v9, %v22134_v11  ;;  %v22138_v39 = vand.u32 4294901760, %v19775_v16  ;;  %v6672_v11 = vand.u32 4294901760, %v19644_v38 }
 0x699   :  { %22611 = vst [vmem:[#allocation56_spill] sm:$0xff] %v19784_v51  ;;  %15872 = vmatpush3.bf16.msra.mxu1 %v19586_v45  ;;  %v6562_v41 = vand.u32 4294901760, %v19784_v51  ;;  %15850 = vmatprep.subr.bf16.mxu0 %v19787_v34  ;;  %v6770_v42 = vand.u32 4294901760, %v6769_v28  ;;  %v22139_v45 = vand.u32 4294901760, %v19782_v44  ;;  %v19802_v6 = vsub.f32 %v19777_v48, %v6565_v8 }
 0x69a   :  { %v15873_v37 = vpack.c.bf16 %v6763_v35, %v6756_v46  ;;  %15852 = vmatpush3.bf16.msra.mxu0 %v19588_v47  ;;  %v6777_v46 = vand.u32 4294901760, %v6776_v31  ;;  %v6790_v35 = vsub.f32 %v19775_v16, %v22138_v39  ;;  %v6679_v18 = vand.u32 4294901760, %v19618_v3 }
 0x69b   :  { %v19810_v49 = vsub.f32 %v19784_v51, %v6562_v41  ;;  %v19813_v28 = vpack.c.bf16 %v6565_v8, %v6562_v41  ;;  %v22140_v60 = vand.u32 4294901760, %v19802_v6  ;;  %v22612_v39 = vand.u32 4294901760, %v19600_v55 }
 0x69c   :  { %15874 = vmatprep.subr.bf16.mxu1 %v15873_v37  ;;  %v6783_v37 = vsub.f32 %v19782_v44, %v22139_v45  ;;  %v15877_v31 = vpack.c.bf16 %v6777_v46, %v6770_v42  ;;  %v6791_v48 = vand.u32 4294901760, %v6790_v35  ;;  %v22613_v45 = vand.u32 4294901760, %v19621_v59 }
 0x69d   :  { %15876 = vmatpush3.bf16.msra.mxu1 %v19593_v50  ;;  %v6692_v38 = vsub.f32 %v19600_v55, %v22612_v39  ;;  %15854 = vmatprep.subr.bf16.mxu0 %v19813_v28  ;;  %v15889_v50 = vpack.c.bf16 %v19603_v33, %v19609_v10  ;;  %v22141_v8 = vand.u32 4294901760, %v19810_v49  ;;  %v6804_v42 = vsub.f32 %v19802_v6, %v22140_v60 }
 0x69e   :  { %v6784_v41 = vand.u32 4294901760, %v6783_v37  ;;  %v6685_v3 = vsub.f32 %v19621_v59, %v22613_v45  ;;  %15878 = vmatprep.subr.bf16.mxu1 %v15877_v31  ;;  %15856 = vmatpush3.bf16.msra.mxu0 %v19630_v36  ;;  %v15883_v35 = vpack.c.bf16 %v6679_v18, %v6672_v11  ;;  %v15891_v37 = vpack.c.bf16 %v19404_v61, %v19409_v32 }
 0x69f   :  { %15890 = vmatprep.subr.bf16.mxu0 %v15889_v50  ;;  %v6797_v46 = vsub.f32 %v19810_v49, %v22141_v8  ;;  %v6805_v45 = vand.u32 4294901760, %v6804_v42  ;;  %v22614_v31 = vand.u32 4294901760, %v19427_v62  ;;  %v15893_v60 = vpack.c.bf16 %v19633_v15, %v19647_v1 }
 0x6a0   :  { %v15881_v39 = vpack.c.bf16 %v6791_v48, %v6784_v41  ;;  %v6686_v50 = vand.u32 4294901760, %v6685_v3  ;;  %v6693_v48 = vand.u32 4294901760, %v6692_v38  ;;  %v6466_v18 = vsel %vm6465_vm15, %v19387_v19, 0.0 }
 0x6a1   :  { %15880 = vmatpush3.bf16.msra.mxu1 %v19699_v17  ;;  %6578 = vmatmul.mubr.f32.vlgmr.msra.gmra.mrb[48].mxu0 %v22614_v31  ;;  %v6798_v17 = vand.u32 4294901760, %v6797_v46  ;;  %v6467_v41 = vsel %vm6465_vm15, %v19360_v7, 0.0  ;;  %v15895_v62 = vpack.c.bf16 %v19430_v26, %v19443_v58  ;;  %v15897_v38 = vpack.c.bf16 %v19665_v30, %v19674_v0 }
 0x6a2   :  { %15882 = vmatprep.subr.bf16.mxu1 %v15881_v39  ;;  %15892 = vmatpush3.bf16.msra.mxu0 %v15891_v37  ;;  %v15887_v42 = vpack.c.bf16 %v6693_v48, %v6686_v50  ;;  %v6468_v3 = vadd.f32 %v6467_v41, %v6466_v18  ;;  %v15901_v39 = vpack.c.bf16 %v19691_v43, %v19702_v23  ;;  %v22615_v46 = vmov 1.0   ;;  %v22618_v50 = vld [vmem:[#allocation41_spill] sm:$0xff]  ;;  %v22620_v41 = vld [vmem:[#allocation44_spill] sm:$0xff] }
 0x6a3   :  { %6945 = vmatprep.mubr.f32.mxu0 %v19364_v5  ;;  %15894 = vmatprep.subr.bf16.mxu0 %v15893_v60  ;;  %v15885_v11 = vpack.c.bf16 %v6805_v45, %v6798_v17  ;;  %v15899_v60 = vpack.c.bf16 %v19457_v25, %v19448_v29  ;;  %v22616_v37 = vand.u32 4294901760, %v19364_v5  ;;  %v15905_v45 = vpack.c.bf16 %v19721_v27, %v19728_v24  ;;  %v22617_v5 = vld [vmem:[#allocation42_spill] sm:$0xff]  ;;  %v22619_v48 = vld [vmem:[#allocation37_spill] sm:$0xff] }
 0x6a4   :  { %6469 = vadd.xlane.f32.xlu1 %v6468_v3  ;;  %v15907_v31 = vpack.c.bf16 %v19492_v14, %v19505_v56  ;;  %v15909_v17 = vpack.c.bf16 %v19748_v9, %v19755_v13  ;;  %v15913_v18 = vpack.c.bf16 %v19775_v16, %v19782_v44 }
 0x6a5   :  { %15884 = vmatpush3.bf16.msra.mxu1 %v15883_v35  ;;  %v15903_v35 = vpack.c.bf16 %v19470_v40, %v19473_v21 }
 0x6a6   :  { %15886 = vmatprep.subr.bf16.mxu1 %v15885_v11  ;;  %15896 = vmatpush3.bf16.msra.mxu0 %v15895_v62  ;;  %v15911_v11 = vpack.c.bf16 %v22619_v48, %v22618_v50  ;;  %v22621_v62 = vld [vmem:[#allocation50_spill] sm:$0xff] }
 0x6a7   :  { %15898 = vmatprep.subr.bf16.mxu0 %v15897_v38  ;;  %v22623_v38 = vld [vmem:[#allocation48_spill] sm:$0xff] }
 0x6a9   :  { %15888 = vmatpush3.bf16.msra.mxu1 %v15887_v42  ;;  %v22622_v42 = vld [vmem:[#allocation22_spill] sm:$0xff] }
 0x6aa   :  { %15922 = vmatprep.subr.bf16.mxu1 %v19613_v22  ;;  %15900 = vmatpush3.bf16.msra.mxu0 %v15899_v60  ;;  %v15915_v3 = vpack.c.bf16 %v22623_v38, %v22622_v42  ;;  %v15917_v60 = vpack.c.bf16 %v19802_v6, %v19810_v49 }
 0x6ab   :  { %15902 = vmatprep.subr.bf16.mxu0 %v15901_v39  ;;  %v22624_v39 = vld [vmem:[#allocation51_spill] sm:$0xff] }
 0x6ac   :  { %12401 = vmatmul.mubr.msk.f32.vlgmr.msra.gmra.mrb[70].mxu1 %vm1231_vm14, %v22615_v46 }
 0x6ad   :  { %15924 = vmatpush3.bf16.msra.mxu1 %v19465_v2  ;;  %7052 = vmatprep.mubr.f32.mxu1 %v22616_v37  ;;  %v22625_v37 = vand.u32 4294901760, %v19609_v10  ;;  %v22631_v10 = vand.u32 4294901760, %v19633_v15  ;;  %v22636_v15 = vand.u32 4294901760, %v19665_v30  ;;  %v22644_v30 = vand.u32 4294901760, %v19728_v24 }
 0x6ae   :  { %15926 = vmatprep.subr.bf16.mxu1 %v19651_v12  ;;  %15904 = vmatpush3.bf16.msra.mxu0 %v15903_v35  ;;  %v15919_v35 = vpack.c.bf16 %v19600_v55, %v19621_v59 }
 0x6af   :  { %15906 = vmatprep.subr.bf16.mxu0 %v15905_v45  ;;  %v22626_v45 = vand.u32 4294901760, %v19603_v33 }
 0x6b1   :  { %15928 = vmatpush3.bf16.msra.mxu1 %v19477_v20 }
 0x6b2   :  { %15930 = vmatprep.subr.bf16.mxu1 %v19678_v52  ;;  %15908 = vmatpush3.bf16.msra.mxu0 %v15907_v31  ;;  %v15953_v31 = vpack.c.bf16 %v22626_v45, %v22625_v37  ;;  %v22638_v45 = vand.u32 4294901760, %v19457_v25 }
 0x6b3   :  { %15910 = vmatprep.subr.bf16.mxu0 %v15909_v17  ;;  %v22627_v17 = vand.u32 4294901760, %v19409_v32  ;;  %v22634_v32 = vand.u32 4294901760, %v19430_v26  ;;  %v22640_v26 = vand.u32 4294901760, %v19691_v43  ;;  %v22645_v43 = vand.u32 4294901760, %v19721_v27 }
 0x6b5   :  { %15932 = vmatpush3.bf16.msra.mxu1 %v19481_v57 }
 0x6b6   :  { %15934 = vmatprep.subr.bf16.mxu1 %v22617_v5  ;;  %15912 = vmatpush3.bf16.msra.mxu0 %v15911_v11  ;;  %v22628_v11 = vand.u32 4294901760, %v19404_v61  ;;  %v22633_v61 = vand.u32 4294901760, %v19443_v58  ;;  %v22639_v58 = vand.u32 4294901760, %v19702_v23  ;;  %v15969_v23 = vpack.c.bf16 %v22645_v43, %v22644_v30  ;;  %v7348_v30 = vld [vmem:[#allocation2 + $0xe0] sm:$0xff]  ;;  %v7349_v43 = vld [vmem:[#allocation2 + $0xe8] sm:$0xff] }
 0x6b7   :  { %15914 = vmatprep.subr.bf16.mxu0 %v15913_v18 }
 0x6b8   :  { %v15955_v18 = vpack.c.bf16 %v22628_v11, %v22627_v17  ;;  %v15965_v17 = vpack.c.bf16 %v22640_v26, %v22639_v58  ;;  %v22649_v11 = vand.u32 4294901760, %v19748_v9  ;;  %v22655_v9 = vand.u32 4294901760, %v22623_v38  ;;  %v7344_v58 = vld [vmem:[#allocation2 + $0xc0] sm:$0xff]  ;;  %v7345_v26 = vld [vmem:[#allocation2 + $0xc8] sm:$0xff] }
 0x6b9   :  { %15936 = vmatpush3.bf16.msra.mxu1 %v22620_v41 }
 0x6ba   :  { %15938 = vmatprep.subr.bf16.mxu1 %v22621_v62  ;;  %15916 = vmatpush3.bf16.msra.mxu0 %v15915_v3  ;;  %v22629_v3 = vld [vmem:[#allocation13_spill] sm:$0xff] }
 0x6bb   :  { %15918 = vmatprep.subr.bf16.mxu0 %v15917_v60  ;;  %v22630_v60 = vand.u32 4294901760, %v19647_v1  ;;  %v22635_v1 = vand.u32 4294901760, %v19674_v0  ;;  %v22641_v0 = vand.u32 4294901760, %v22629_v3 }
 0x6bd   :  { %15940 = vmatpush3.bf16.msra.mxu1 %v22624_v39  ;;  %v15957_v8 = vpack.c.bf16 %v22631_v10, %v22630_v60  ;;  %v15961_v37 = vpack.c.bf16 %v22636_v15, %v22635_v1  ;;  %v7342_v60 = vld [vmem:[#allocation2 + $0xb0] sm:$0xff] }
 0x6be   :  { %15942 = vmatprep.subr.bf16.mxu1 %v19760_v4  ;;  %15920 = vmatpush3.bf16.msra.mxu0 %v15919_v35  ;;  %v15959_v35 = vpack.c.bf16 %v22634_v32, %v22633_v61  ;;  %v7343_v61 = vld [vmem:[#allocation2 + $0xb8] sm:$0xff]  ;;  %v7376_v32 = vand.u32 4294901760, %v7342_v60 }
 0x6bf   :  { %15954 = vmatprep.subr.bf16.mxu0 %v15953_v31 }
 0x6c1   :  { %15944 = vmatpush3.bf16.msra.mxu1 %v19576_v53  ;;  %6948 = vmatmul.mubr.f32.vlgmr.msra.gmra.mrb[50].mxu0 %v22629_v3  ;;  %v7341_v3 = vld [vmem:[#allocation2 + $0xa8] sm:$0xff] }
 0x6c2   :  { %15946 = vmatprep.subr.bf16.mxu1 %v19787_v34  ;;  %15956 = vmatpush3.bf16.msra.mxu0 %v15955_v18  ;;  %v7373_v33 = vand.u32 4294901760, %v7341_v3 }
 0x6c3   :  { %12402 = vmatprep.mubr.msk.f32.mxu0 %vm2426_vm10, %v22615_v46  ;;  %15958 = vmatprep.subr.bf16.mxu0 %v15957_v8  ;;  %v22637_v8 = vand.u32 4294901760, %v19448_v29  ;;  %v22643_v29 = vand.u32 4294901760, %v19470_v40  ;;  %v22647_v40 = vand.u32 4294901760, %v19492_v14  ;;  %v22653_v14 = vand.u32 4294901760, %v19775_v16 }
 0x6c4   :  { %v22658_v16 = vand.u32 4294901760, %v19621_v59  ;;  %v7336_v59 = vld [vmem:[#allocation2 + $0x80] sm:$0xff] }
 0x6c5   :  { %15948 = vmatpush3.bf16.msra.mxu1 %v19588_v47  ;;  %v15963_v31 = vpack.c.bf16 %v22638_v45, %v22637_v8  ;;  %v20020_v8 = vsub.f32 %v7342_v60, %v7376_v32 }
 0x6c6   :  { %15950 = vmatprep.subr.bf16.mxu1 %v19813_v28  ;;  %15960 = vmatpush3.bf16.msra.mxu0 %v15959_v35  ;;  %v7379_v35 = vand.u32 4294901760, %v7343_v61 }
 0x6c7   :  { %15962 = vmatprep.subr.bf16.mxu0 %v15961_v37  ;;  %v20018_v37 = vsub.f32 %v7341_v3, %v7373_v33 }
 0x6c8   :  { %v20022_v45 = vsub.f32 %v7343_v61, %v7379_v35 }
 0x6c9   :  { %15952 = vmatpush3.bf16.msra.mxu1 %v19630_v36 }
 0x6ca   :  { %15986 = vmatprep.subr.bf16.mxu1 %v19613_v22  ;;  %15964 = vmatpush3.bf16.msra.mxu0 %v15963_v31  ;;  %v22642_v22 = vand.u32 4294901760, %v19473_v21  ;;  %v20025_v31 = vpack.c.bf16 %v7379_v35, %v7376_v32 }
 0x6cb   :  { %15966 = vmatprep.subr.bf16.mxu0 %v15965_v17  ;;  %v7346_v17 = vld [vmem:[#allocation2 + $0xd0] sm:$0xff] }
 0x6cc   :  { %7056 = vmatmul.mubr.f32.vlgmr.msra.gmra.mrb[72].mxu1 %v22641_v0  ;;  %v15967_v25 = vpack.c.bf16 %v22643_v29, %v22642_v22  ;;  %v7382_v0 = vand.u32 4294901760, %v7344_v58  ;;  %v7385_v22 = vand.u32 4294901760, %v7345_v26  ;;  %v7347_v29 = vld [vmem:[#allocation2 + $0xd8] sm:$0xff] }
 0x6cd   :  { %15988 = vmatpush3.bf16.msra.mxu1 %v19465_v2  ;;  %12404 = vmatprep.mubr.msk.f32.mxu1 %vm2426_vm10, %v22615_v46  ;;  %v22646_v2 = vand.u32 4294901760, %v19505_v56  ;;  %v22652_v56 = vand.u32 4294901760, %v19782_v44  ;;  %v22659_v44 = vand.u32 4294901760, %v19600_v55  ;;  %v7338_v55 = vld [vmem:[#allocation2 + $0x90] sm:$0xff] }
 0x6ce   :  { %15990 = vmatprep.subr.bf16.mxu1 %v19651_v12  ;;  %15968 = vmatpush3.bf16.msra.mxu0 %v15967_v25  ;;  %v22648_v12 = vand.u32 4294901760, %v19755_v13  ;;  %v7388_v25 = vand.u32 4294901760, %v7346_v17 }
 0x6cf   :  { %15970 = vmatprep.subr.bf16.mxu0 %v15969_v23  ;;  %v15971_v21 = vpack.c.bf16 %v22647_v40, %v22646_v2  ;;  %v15977_v24 = vpack.c.bf16 %v22653_v14, %v22652_v56  ;;  %v22660_v23 = vmov 0.0   ;;  %v7391_v2 = vand.u32 4294901760, %v7347_v29 }
 0x6d0   :  { %v15973_v18 = vpack.c.bf16 %v22649_v11, %v22648_v12  ;;  %v7394_v40 = vand.u32 4294901760, %v7348_v30  ;;  %v7350_v12 = vld [vmem:[#allocation2 + $0xf0] sm:$0xff]  ;;  %v7351_v11 = vld [vmem:[#allocation2 + $0xf8] sm:$0xff] }
 0x6d1   :  { %15992 = vmatpush3.bf16.msra.mxu1 %v19477_v20  ;;  %v22650_v20 = vand.u32 4294901760, %v22618_v50  ;;  %v22657_v50 = vand.u32 4294901760, %v19802_v6  ;;  %v7339_v6 = vld [vmem:[#allocation2 + $0x98] sm:$0xff]  ;;  %v20042_v56 = vsub.f32 %v7347_v29, %v7391_v2 }
 0x6d2   :  { %15994 = vmatprep.subr.bf16.mxu1 %v19678_v52  ;;  %15972 = vmatpush3.bf16.msra.mxu0 %v15971_v21  ;;  %v22651_v52 = vand.u32 4294901760, %v22619_v48  ;;  %v7397_v21 = vand.u32 4294901760, %v7349_v43  ;;  %v20044_v14 = vsub.f32 %v7348_v30, %v7394_v40 }
 0x6d3   :  { %15974 = vmatprep.subr.bf16.mxu0 %v15973_v18  ;;  %v20034_v18 = vpack.c.bf16 %v7385_v22, %v7382_v0 }
 0x6d4   :  { %v15975_v27 = vpack.c.bf16 %v22651_v52, %v22650_v20  ;;  %v20036_v20 = vsub.f32 %v7344_v58, %v7382_v0  ;;  %v20038_v52 = vsub.f32 %v7345_v26, %v7385_v22  ;;  %v22151_v26 = vand.u32 4294901760, %v20020_v8 }
 0x6d5   :  { %15996 = vmatpush3.bf16.msra.mxu1 %v19481_v57  ;;  %v22654_v57 = vand.u32 4294901760, %v22622_v42 }
 0x6d6   :  { %15998 = vmatprep.subr.bf16.mxu1 %v22617_v5  ;;  %15976 = vmatpush3.bf16.msra.mxu0 %v15975_v27  ;;  %v22656_v5 = vand.u32 4294901760, %v19810_v49  ;;  %v7358_v49 = vand.u32 4294901760, %v7336_v59  ;;  %v20040_v27 = vsub.f32 %v7346_v17, %v7388_v25  ;;  %v22150_v17 = vand.u32 4294901760, %v20022_v45 }
 0x6d7   :  { %15978 = vmatprep.subr.bf16.mxu0 %v15977_v24  ;;  %v15979_v13 = vpack.c.bf16 %v22655_v9, %v22654_v57  ;;  %v20047_v24 = vpack.c.bf16 %v7391_v2, %v7388_v25  ;;  %v20049_v57 = vsub.f32 %v7349_v43, %v7397_v21  ;;  %v7400_v9 = vand.u32 4294901760, %v7350_v12 }
 0x6d8   :  { %v15981_v48 = vpack.c.bf16 %v22657_v50, %v22656_v5  ;;  %v7494_v22 = vsub.f32 %v20020_v8, %v22151_v26  ;;  %v7501_v29 = vsub.f32 %v20022_v45, %v22150_v17  ;;  %v22149_v2 = vand.u32 4294901760, %v20036_v20 }
 0x6d9   :  { %16000 = vmatpush3.bf16.msra.mxu1 %v22620_v41  ;;  %v15983_v41 = vpack.c.bf16 %v22659_v44, %v22658_v16  ;;  %v20052_v5 = vsub.f32 %v7350_v12, %v7400_v9  ;;  %v20059_v44 = vpack.c.bf16 %v7397_v21, %v7394_v40  ;;  %v22148_v40 = vand.u32 4294901760, %v20038_v52 }
 0x6da   :  { %16002 = vmatprep.subr.bf16.mxu1 %v22621_v62  ;;  %15980 = vmatpush3.bf16.msra.mxu0 %v15979_v13  ;;  %v7364_v62 = vand.u32 4294901760, %v7338_v55  ;;  %v7403_v13 = vand.u32 4294901760, %v7351_v11  ;;  %v7495_v30 = vand.u32 4294901760, %v7494_v22  ;;  %v7502_v43 = vand.u32 4294901760, %v7501_v29 }
 0x6db   :  { %15982 = vmatprep.subr.bf16.mxu0 %v15981_v48  ;;  %v7508_v12 = vsub.f32 %v20036_v20, %v22149_v2 }
 0x6dc   :  { %v20004_v63 = vsub.f32 %v7338_v55, %v7364_v62  ;;  %v20054_v50 = vsub.f32 %v7351_v11, %v7403_v13  ;;  %v20106_v21 = vpack.c.bf16 %v7502_v43, %v7495_v30  ;;  %v7515_v11 = vsub.f32 %v20038_v52, %v22148_v40 }
 0x6dd   :  { %16004 = vmatpush3.bf16.msra.mxu1 %v22624_v39  ;;  %v7340_v39 = vld [vmem:[#allocation2 + $0xa0] sm:$0xff]  ;;  %v22142_v30 = vand.u32 4294901760, %v20052_v5 }
 0x6de   :  { %16006 = vmatprep.subr.bf16.mxu1 %v19760_v4  ;;  %15984 = vmatpush3.bf16.msra.mxu0 %v15983_v41  ;;  %v22158_v4 = vmov 0.0|0.0   ;;  %v7370_v10 = vand.u32 4294901760, %v7340_v39  ;;  %v22144_v43 = vand.u32 4294901760, %v20054_v50 }
 0x6df   :  { %16017 = vmatprep.subr.bf16.mxu0 %v22158_v4 }
 0x6e0   :  { %v20014_v1 = vpack.c.bf16 %v7373_v33, %v7370_v10  ;;  %v20016_v15 = vsub.f32 %v7340_v39, %v7370_v10  ;;  %v22152_v33 = vand.u32 4294901760, %v20018_v37 }
 0x6e1   :  { %16008 = vmatpush3.bf16.msra.mxu1 %v19576_v53  ;;  %12403 = vmatmul.mubr.msk.f32.vlgmr.msra.gmra.mrb[52].mxu0 %vm1231_vm14, %v22615_v46  ;;  %v7337_v53 = vld [vmem:[#allocation2 + $0x88] sm:$0xff] }
 0x6e2   :  { %16010 = vmatprep.subr.bf16.mxu1 %v19787_v34  ;;  %v7361_v34 = vand.u32 4294901760, %v7337_v53  ;;  %14825 = vmatprep.mubr.msk.f32.mxu0 %vm22301_vm0, %v22660_v23  ;;  %v22153_v10 = vand.u32 4294901760, %v20016_v15  ;;  %v7487_v35 = vsub.f32 %v20018_v37, %v22152_v33 }
 0x6e4   :  { %v20002_v42 = vsub.f32 %v7337_v53, %v7361_v34  ;;  %v22155_v53 = vand.u32 4294901760, %v20004_v63  ;;  %v7480_v32 = vsub.f32 %v20016_v15, %v22153_v10  ;;  %v7488_v0 = vand.u32 4294901760, %v7487_v35 }
 0x6e5   :  { %16012 = vmatpush3.bf16.msra.mxu1 %v19588_v47  ;;  %v7367_v47 = vand.u32 4294901760, %v7339_v6 }
 0x6e6   :  { %16014 = vmatprep.subr.bf16.mxu1 %v19813_v28  ;;  %v19998_v28 = vpack.c.bf16 %v7361_v34, %v7358_v49  ;;  %v22156_v16 = vand.u32 4294901760, %v20002_v42  ;;  %v7481_v58 = vand.u32 4294901760, %v7480_v32  ;;  %v22143_v32 = vand.u32 4294901760, %v20049_v57 }
 0x6e7   :  { %v20009_v38 = vpack.c.bf16 %v7367_v47, %v7364_v62 }
 0x6e8   :  { %16019 = vmatpush3.bf16.msra.mxu0 %v19998_v28  ;;  %v20102_v25 = vpack.c.bf16 %v7488_v0, %v7481_v58  ;;  %v7543_v0 = vsub.f32 %v20049_v57, %v22143_v32 }
 0x6e9   :  { %16016 = vmatpush3.bf16.msra.mxu1 %v19630_v36  ;;  %v20000_v36 = vsub.f32 %v7336_v59, %v7358_v49  ;;  %16020 = vmatprep.subr.bf16.mxu0 %v22158_v4  ;;  %v7459_v59 = vsub.f32 %v20002_v42, %v22156_v16 }
 0x6ea   :  { %16161 = vmatprep.subr.bf16.mxu1 %v22158_v4  ;;  %v7544_v29 = vand.u32 4294901760, %v7543_v0 }
 0x6eb   :  { %v22157_v48 = vand.u32 4294901760, %v20000_v36  ;;  %v7460_v34 = vand.u32 4294901760, %v7459_v59  ;;  %v22146_v59 = vand.u32 4294901760, %v20042_v56 }
 0x6ec   :  { %12405 = vmatmul.mubr.msk.f32.vlgmr.msra.gmra.mrb[74].mxu1 %vm1231_vm14, %v22615_v46  ;;  %v20006_v46 = vsub.f32 %v7339_v6, %v7367_v47  ;;  %16022 = vmatpush3.bf16.msra.mxu0 %v20009_v38  ;;  %v7466_v6 = vsub.f32 %v20004_v63, %v22155_v53  ;;  %v20077_v47 = vpack.c.bf16 %v7403_v13, %v7400_v9  ;;  %v7509_v9 = vand.u32 4294901760, %v7508_v12 }
 0x6ed   :  { %16023 = vmatprep.subr.bf16.mxu0 %v22158_v4  ;;  %15007 = vmatprep.mubr.msk.f32.mxu1 %vm22301_vm0, %v22660_v23  ;;  %v7452_v41 = vsub.f32 %v20000_v36, %v22157_v48  ;;  %v7516_v13 = vand.u32 4294901760, %v7515_v11  ;;  %v7550_v11 = vsub.f32 %v20052_v5, %v22142_v30  ;;  %v16075_v30 = vpack.c.bf16 %v20022_v45, %v20020_v8 }
 0x6ee   :  { %v22154_v55 = vand.u32 4294901760, %v20006_v46  ;;  %v7467_v3 = vand.u32 4294901760, %v7466_v6  ;;  %v7529_v6 = vsub.f32 %v20042_v56, %v22146_v59  ;;  %v16087_v59 = vpack.c.bf16 %v20054_v50, %v20052_v5 }
 0x6ef   :  { %v7453_v49 = vand.u32 4294901760, %v7452_v41  ;;  %v22147_v41 = vand.u32 4294901760, %v20040_v27 }
 0x6f0   :  { %16025 = vmatpush3.bf16.msra.mxu0 %v20014_v1  ;;  %v7473_v62 = vsub.f32 %v20006_v46, %v22154_v55 }
 0x6f1   :  { %16026 = vmatprep.subr.bf16.mxu0 %v22158_v4  ;;  %v20080_v39 = vpack.c.bf16 %v7460_v34, %v7453_v49  ;;  %v20116_v49 = vpack.c.bf16 %v7516_v13, %v7509_v9  ;;  %v7522_v34 = vsub.f32 %v20040_v27, %v22147_v41  ;;  %v7557_v9 = vsub.f32 %v20054_v50, %v22144_v43 }
 0x6f2   :  { %v7474_v60 = vand.u32 4294901760, %v7473_v62  ;;  %v7551_v13 = vand.u32 4294901760, %v7550_v11  ;;  %v16078_v11 = vpack.c.bf16 %v20038_v52, %v20036_v20  ;;  %v16081_v43 = vpack.c.bf16 %v20042_v56, %v20040_v27 }
 0x6f3   :  { %v7523_v62 = vand.u32 4294901760, %v7522_v34  ;;  %v7558_v34 = vand.u32 4294901760, %v7557_v9 }
 0x6f4   :  { %16028 = vmatpush3.bf16.msra.mxu0 %v20025_v31  ;;  %v20084_v61 = vpack.c.bf16 %v7474_v60, %v7467_v3  ;;  %v7530_v3 = vand.u32 4294901760, %v7529_v6  ;;  %v22145_v60 = vand.u32 4294901760, %v20044_v14 }
 0x6f5   :  { %16029 = vmatprep.subr.bf16.mxu0 %v22158_v4  ;;  %v16063_v6 = vpack.c.bf16 %v7558_v34, %v7551_v13 }
 0x6f6   :  { %v20126_v35 = vpack.c.bf16 %v7530_v3, %v7523_v62  ;;  %v7536_v58 = vsub.f32 %v20044_v14, %v22145_v60  ;;  %v16066_v62 = vpack.c.bf16 %v20002_v42, %v20000_v36  ;;  %v16069_v3 = vpack.c.bf16 %v20006_v46, %v20004_v63 }
 0x6f7   :  { %v16084_v60 = vpack.c.bf16 %v20049_v57, %v20044_v14 }
 0x6f8   :  { %16031 = vmatpush3.bf16.msra.mxu0 %v20034_v18  ;;  %v7537_v22 = vand.u32 4294901760, %v7536_v58 }
 0x6f9   :  { %16032 = vmatprep.subr.bf16.mxu0 %v22158_v4 }
 0x6fa   :  { %v16060_v12 = vpack.c.bf16 %v7544_v29, %v7537_v22  ;;  %v16072_v22 = vpack.c.bf16 %v20018_v37, %v20016_v15 }
 0x6fc   :  { %16034 = vmatpush3.bf16.msra.mxu0 %v20047_v24 }
 0x6fd   :  { %16035 = vmatprep.subr.bf16.mxu0 %v22158_v4 }
 0x700   :  { %16037 = vmatpush3.bf16.msra.mxu0 %v20059_v44 }
 0x701   :  { %16038 = vmatprep.subr.bf16.mxu0 %v22158_v4 }
 0x704   :  { %16040 = vmatpush3.bf16.msra.mxu0 %v20077_v47 }
 0x705   :  { %16041 = vmatprep.subr.bf16.mxu0 %v22158_v4 }
 0x731   :  { %v6470_v10 = vpop.xlane.xlu1 %6469 }
 0x774   :  { %v13103_v58 = vpop.f32.mrb[48].mxu0 }
 0x775   :  { %v13104_v0 = vpop.f32.mrb[49].mxu0 }
 0x776   :  { %v13105_v29 = vadd.f32 %v13104_v0, %v13103_v58 }
 0x77f   :  { %v13138_v32 = vpop.f32.mrb[70].mxu1 }
 0x780   :  { %v13139_v9 = vpop.f32.mrb[71].mxu1 }
 0x781   :  { %v13140_v13 = vadd.f32 %v13139_v9, %v13138_v32  ;;  %v7333_v32 = vmax.f32 %v6470_v10, 1.0  ;;  %v22661_v10 = vmov 0.0|0.0  }
 0x783   :  { %v6812_v34 = vadd.f32 %v13140_v13, %v13105_v29  ;;  %17238 = vrcp.f32 %v7333_v32 }
 0x78d   :  { %v17239_v4 = vpop.eup %17238 }
 0x794   :  { %v13173_v58 = vpop.f32.mrb[50].mxu0 }
 0x795   :  { %v13174_v0 = vpop.f32.mrb[51].mxu0 }
 0x796   :  { %v13175_v41 = vadd.f32 %v13174_v0, %v13173_v58 }
 0x798   :  { %v6950_v40 = vadd.f32 %v13175_v41, %v6812_v34 }
 0x79f   :  { %v13208_v2 = vpop.f32.mrb[72].mxu1 }
 0x7a0   :  { %v13209_v17 = vpop.f32.mrb[73].mxu1 }
 0x7a1   :  { %v13210_v26 = vadd.f32 %v13209_v17, %v13208_v2 }
 0x7a3   :  { %v7058_v33 = vadd.f32 %v13210_v26, %v6950_v40 }
 0x7b4   :  { %v13243_v29 = vpop.f32.mrb[52].mxu0 }
 0x7b5   :  { %v13244_v9 = vpop.f32.mrb[53].mxu0 }
 0x7b6   :  { %v13245_v13 = vadd.f32 %v13244_v9, %v13243_v29 }
 0x7b8   :  { %v7226_v55 = vadd.f32 %v13245_v13, %v7058_v33  ;;  %v22670_v33 = vand.u32 4294901760, %v20036_v20  ;;  %v22676_v20 = vand.u32 4294901760, %v20052_v5 }
 0x7bf   :  { %v13278_v53 = vpop.f32.mrb[74].mxu1 }
 0x7c0   :  { %v13279_v16 = vpop.f32.mrb[75].mxu1 }
 0x7c1   :  { %v13280_v48 = vadd.f32 %v13279_v16, %v13278_v53  ;;  %v22665_v16 = vand.u32 4294901760, %v20006_v46 }
 0x7c3   :  { %v7330_v51 = vadd.f32 %v13280_v48, %v7226_v55  ;;  %v22664_v48 = vand.u32 4294901760, %v20004_v63  ;;  %v22669_v63 = vand.u32 4294901760, %v20022_v45  ;;  %v22675_v45 = vand.u32 4294901760, %v20049_v57 }
 0x7c5   :  { %v7335_v54 = vmul.f32 %v17239_v4, %v7330_v51  ;;  %v22663_v51 = vand.u32 4294901760, %v20002_v42  ;;  %v16117_v53 = vpack.c.bf16 %v22665_v16, %v22664_v48  ;;  %v22667_v42 = vand.u32 4294901760, %v20018_v37 }
 0x7c6   :  { %v22673_v37 = vand.u32 4294901760, %v20042_v56 }
 0x7c7   :  { %v20158_v7 = vand.u32 4294901760, %v7335_v54 }
 0x7c9   :  { %v7439_v41 = vsub.f32 %v7335_v54, %v20158_v7  ;;  %v22662_v54 = vand.u32 4294901760, %v20000_v36  ;;  %v22666_v36 = vand.u32 4294901760, %v20016_v15  ;;  %v22672_v15 = vand.u32 4294901760, %v20040_v27 }
 0x7cb   :  { %v7440_v34 = vand.u32 4294901760, %v7439_v41  ;;  %v16114_v4 = vpack.c.bf16 %v22663_v51, %v22662_v54  ;;  %v16120_v55 = vpack.c.bf16 %v22667_v42, %v22666_v36  ;;  %v16129_v2 = vpack.c.bf16 %v22673_v37, %v22672_v15 }
 0x7cd   :  { %v7441_v17 = vsub.f32 %v7439_v41, %v7440_v34 }
 0x7cf   :  { %v7442_v26 = vand.u32 4294901760, %v7441_v17 }
 0x7d1   :  { %14826 = vmatmul.mubr.f32.vlgmr.msra.gmra.mrb[54].mxu0 %v7442_v26 }
 0x7d2   :  { %16043 = vmatpush3.bf16.msra.mxu0 %v20080_v39  ;;  %14860 = vmatprep.mubr.msk.f32.mxu0 %vm22301_vm0, %v22660_v23  ;;  %v22668_v39 = vand.u32 4294901760, %v20020_v8  ;;  %v22674_v8 = vand.u32 4294901760, %v20044_v14 }
 0x7d3   :  { %16044 = vmatprep.subr.bf16.mxu0 %v22661_v10 }
 0x7d4   :  { %v16123_v46 = vpack.c.bf16 %v22669_v63, %v22668_v39  ;;  %v16132_v40 = vpack.c.bf16 %v22675_v45, %v22674_v8 }
 0x7d6   :  { %16046 = vmatpush3.bf16.msra.mxu0 %v20084_v61  ;;  %v22671_v61 = vand.u32 4294901760, %v20038_v52  ;;  %v22677_v52 = vand.u32 4294901760, %v20054_v50 }
 0x7d7   :  { %16047 = vmatprep.subr.bf16.mxu0 %v22661_v10 }
 0x7da   :  { %16049 = vmatpush3.bf16.msra.mxu0 %v20102_v25  ;;  %v16126_v25 = vpack.c.bf16 %v22671_v61, %v22670_v33 }
 0x7db   :  { %16050 = vmatprep.subr.bf16.mxu0 %v22661_v10 }
 0x7de   :  { %16052 = vmatpush3.bf16.msra.mxu0 %v20106_v21  ;;  %v16135_v21 = vpack.c.bf16 %v22677_v52, %v22676_v20 }
 0x7df   :  { %16053 = vmatprep.subr.bf16.mxu0 %v22661_v10 }
 0x7e2   :  { %16055 = vmatpush3.bf16.msra.mxu0 %v20116_v49 }
 0x7e3   :  { %16056 = vmatprep.subr.bf16.mxu0 %v22661_v10 }
 0x7e6   :  { %16058 = vmatpush3.bf16.msra.mxu0 %v20126_v35  ;;  %v12406_v35 = vld [vmem:[#allocation2 + $0x100] ss:$0 sm:$0xff] }
 0x7e7   :  { %16059 = vmatprep.subr.bf16.mxu0 %v22661_v10 }
 0x7ea   :  { %16061 = vmatpush3.bf16.msra.mxu0 %v16060_v12 }
 0x7eb   :  { %16062 = vmatprep.subr.bf16.mxu0 %v22661_v10 }
 0x7ee   :  { %16064 = vmatpush3.bf16.msra.mxu0 %v16063_v6 }
 0x7ef   :  { %16065 = vmatprep.subr.bf16.mxu0 %v22661_v10 }
 0x7f1   :  { %14861 = vmatmul.mubr.f32.vlgmr.msra.gmra.mrb[54].mxu0 %v20158_v7 }
 0x7f2   :  { %16067 = vmatpush3.bf16.msra.mxu0 %v16066_v62  ;;  %14895 = vmatprep.mubr.msk.f32.mxu0 %vm22301_vm0, %v22660_v23 }
 0x7f3   :  { %16068 = vmatprep.subr.bf16.mxu0 %v22661_v10 }
 0x7f6   :  { %16070 = vmatpush3.bf16.msra.mxu0 %v16069_v3 }
 0x7f7   :  { %16071 = vmatprep.subr.bf16.mxu0 %v22661_v10 }
 0x7fa   :  { %16073 = vmatpush3.bf16.msra.mxu0 %v16072_v22 }
 0x7fb   :  { %16074 = vmatprep.subr.bf16.mxu0 %v22661_v10 }
 0x7fe   :  { %16076 = vmatpush3.bf16.msra.mxu0 %v16075_v30 }
 0x7ff   :  { %16077 = vmatprep.subr.bf16.mxu0 %v22661_v10 }
 0x802   :  { %16079 = vmatpush3.bf16.msra.mxu0 %v16078_v11 }
 0x803   :  { %16080 = vmatprep.subr.bf16.mxu0 %v22661_v10 }
 0x806   :  { %16082 = vmatpush3.bf16.msra.mxu0 %v16081_v43 }
 0x807   :  { %16083 = vmatprep.subr.bf16.mxu0 %v22661_v10 }
 0x80a   :  { %16085 = vmatpush3.bf16.msra.mxu0 %v16084_v60 }
 0x80b   :  { %16086 = vmatprep.subr.bf16.mxu0 %v22661_v10 }
 0x80e   :  { %16088 = vmatpush3.bf16.msra.mxu0 %v16087_v59 }
 0x80f   :  { %16089 = vmatprep.subr.bf16.mxu0 %v22661_v10 }
 0x811   :  { %14896 = vmatmul.mubr.f32.vlgmr.msra.gmra.mrb[54].mxu0 %v7439_v41 }
 0x812   :  { %16091 = vmatpush3.bf16.msra.mxu0 %v19998_v28  ;;  %14930 = vmatprep.mubr.msk.f32.mxu0 %vm22301_vm0, %v22660_v23 }
 0x813   :  { %16092 = vmatprep.subr.bf16.mxu0 %v22661_v10 }
 0x816   :  { %16094 = vmatpush3.bf16.msra.mxu0 %v20009_v38 }
 0x817   :  { %16095 = vmatprep.subr.bf16.mxu0 %v22661_v10 }
 0x81a   :  { %16097 = vmatpush3.bf16.msra.mxu0 %v20014_v1 }
 0x81b   :  { %16098 = vmatprep.subr.bf16.mxu0 %v22661_v10 }
 0x81e   :  { %16100 = vmatpush3.bf16.msra.mxu0 %v20025_v31 }
 0x81f   :  { %16101 = vmatprep.subr.bf16.mxu0 %v22661_v10 }
 0x822   :  { %16103 = vmatpush3.bf16.msra.mxu0 %v20034_v18 }
 0x823   :  { %16104 = vmatprep.subr.bf16.mxu0 %v22661_v10 }
 0x826   :  { %16106 = vmatpush3.bf16.msra.mxu0 %v20047_v24 }
 0x827   :  { %16107 = vmatprep.subr.bf16.mxu0 %v22661_v10 }
 0x82a   :  { %16109 = vmatpush3.bf16.msra.mxu0 %v20059_v44 }
 0x82b   :  { %16110 = vmatprep.subr.bf16.mxu0 %v22661_v10 }
 0x82e   :  { %16112 = vmatpush3.bf16.msra.mxu0 %v20077_v47 }
 0x82f   :  { %16113 = vmatprep.subr.bf16.mxu0 %v22661_v10 }
 0x831   :  { %14931 = vmatmul.mubr.f32.vlgmr.msra.gmra.mrb[54].mxu0 %v7440_v34 }
 0x832   :  { %16115 = vmatpush3.bf16.msra.mxu0 %v16114_v4  ;;  %14965 = vmatprep.mubr.msk.f32.mxu0 %vm22301_vm0, %v22660_v23 }
 0x833   :  { %16116 = vmatprep.subr.bf16.mxu0 %v22661_v10 }
 0x836   :  { %16118 = vmatpush3.bf16.msra.mxu0 %v16117_v53 }
 0x837   :  { %16119 = vmatprep.subr.bf16.mxu0 %v22661_v10 }
 0x83a   :  { %16121 = vmatpush3.bf16.msra.mxu0 %v16120_v55 }
 0x83b   :  { %16122 = vmatprep.subr.bf16.mxu0 %v22661_v10 }
 0x83e   :  { %16124 = vmatpush3.bf16.msra.mxu0 %v16123_v46 }
 0x83f   :  { %16125 = vmatprep.subr.bf16.mxu0 %v22661_v10 }
 0x842   :  { %16127 = vmatpush3.bf16.msra.mxu0 %v16126_v25 }
 0x843   :  { %16128 = vmatprep.subr.bf16.mxu0 %v22661_v10 }
 0x846   :  { %16130 = vmatpush3.bf16.msra.mxu0 %v16129_v2 }
 0x847   :  { %16131 = vmatprep.subr.bf16.mxu0 %v22661_v10 }
 0x84a   :  { %16133 = vmatpush3.bf16.msra.mxu0 %v16132_v40 }
 0x84b   :  { %16134 = vmatprep.subr.bf16.mxu0 %v22661_v10 }
 0x84e   :  { %16136 = vmatpush3.bf16.msra.mxu0 %v16135_v21 }
 0x84f   :  { %16137 = vmatprep.subr.bf16.mxu0 %v22661_v10 }
 0x851   :  { %14966 = vmatmul.mubr.f32.vlgmr.msra.gmra.mrb[54].mxu0 %v20158_v7 }
 0x852   :  { %16139 = vmatpush3.bf16.msra.mxu0 %v19998_v28  ;;  %15000 = vmatprep.mubr.msk.f32.mxu0 %vm22301_vm0, %v22660_v23  ;;  %v7999_v28 = vld [vmem:[#allocation2 + $0x108] sm:$0xff] }
 0x853   :  { %16140 = vmatprep.subr.bf16.mxu0 %v22661_v10 }
 0x856   :  { %16142 = vmatpush3.bf16.msra.mxu0 %v20009_v38  ;;  %v8000_v38 = vld [vmem:[#allocation2 + $0x110] sm:$0xff] }
 0x857   :  { %16143 = vmatprep.subr.bf16.mxu0 %v22661_v10 }
 0x85a   :  { %16145 = vmatpush3.bf16.msra.mxu0 %v20014_v1  ;;  %v8011_v1 = vand.u32 4294901760, %v7999_v28 }
 0x85b   :  { %16146 = vmatprep.subr.bf16.mxu0 %v22661_v10 }
 0x85e   :  { %16148 = vmatpush3.bf16.msra.mxu0 %v20025_v31  ;;  %v8014_v31 = vand.u32 4294901760, %v8000_v38 }
 0x85f   :  { %16149 = vmatprep.subr.bf16.mxu0 %v22661_v10 }
 0x860   :  { %v16162_v27 = vpack.c.bf16 %v8014_v31, %v8011_v1  ;;  %v8096_v56 = vsub.f32 %v8000_v38, %v8014_v31 }
 0x862   :  { %16151 = vmatpush3.bf16.msra.mxu0 %v20034_v18  ;;  %v8089_v18 = vsub.f32 %v7999_v28, %v8011_v1  ;;  %16163 = vmatpush3.bf16.msra.mxu1 %v16162_v27 }
 0x863   :  { %16152 = vmatprep.subr.bf16.mxu0 %v22661_v10  ;;  %16164 = vmatprep.subr.bf16.mxu1 %v22661_v10 }
 0x864   :  { %v8090_v14 = vand.u32 4294901760, %v8089_v18 }
 0x866   :  { %16154 = vmatpush3.bf16.msra.mxu0 %v20047_v24  ;;  %v8097_v24 = vand.u32 4294901760, %v8096_v56  ;;  %v8091_v57 = vsub.f32 %v8089_v18, %v8090_v14 }
 0x867   :  { %16155 = vmatprep.subr.bf16.mxu0 %v22661_v10 }
 0x868   :  { %v8098_v5 = vsub.f32 %v8096_v56, %v8097_v24  ;;  %v8092_v50 = vand.u32 4294901760, %v8091_v57  ;;  %v16174_v49 = vpack.c.bf16 %v8097_v24, %v8090_v14  ;;  %v12407_v24 = vld [vmem:[#allocation2 + $0x118] ss:$0 sm:$0xff] }
 0x86a   :  { %16157 = vmatpush3.bf16.msra.mxu0 %v20059_v44  ;;  %v8099_v44 = vand.u32 4294901760, %v8098_v5 }
 0x86b   :  { %16158 = vmatprep.subr.bf16.mxu0 %v22661_v10 }
 0x86c   :  { %v16165_v59 = vpack.c.bf16 %v8099_v44, %v8092_v50 }
 0x86e   :  { %16160 = vmatpush3.bf16.msra.mxu0 %v20077_v47  ;;  %v16168_v47 = vpack.c.bf16 %v8096_v56, %v8089_v18 }
 0x871   :  { %15001 = vmatmul.mubr.f32.vlgmr.msra.gmra.mrb[54].mxu0 %v20158_v7  ;;  %v22678_v7 = vld [vmem:[#allocation17_spill] sm:$0xff] }
 0x872   :  { %v17156_v60 = vpack.i.bf16 %v22678_v7, %v19387_v19 }
 0x874   :  { %17157 = vxpose.xlu1.b32.start.end [1/1] (short) %v17156_v60, 128 }
 0x8f4   :  { %v17158_v19 = vpop.trf.xlu1 }
 0x8f5   :  { %v17162_v13 = vunpack.i.h.bf16 %v17158_v19  ;;  %v17159_v41 = vunpack.i.l.bf16 %v17158_v19 }
 0x8f7   :  { %v9845_v34 = vsel %vm8510_vm2, %v17162_v13, 0  ;;  %v8512_v17 = vsel %vm8510_vm2, %v17159_v41, 0 }
 0x8f8   :  { %v17163_v32 = vpop.trf.xlu1  ;;  %v20286_v26 = vand.u32 4294901760, %v9845_v34  ;;  %v20288_v54 = vand.u32 4294901760, %v8512_v17 }
 0x8f9   :  { %v17164_v20 = vunpack.i.l.bf16 %v17163_v32  ;;  %v17167_v52 = vunpack.i.h.bf16 %v17163_v32 }
 0x8fa   :  { %v20291_v51 = vsub.f32 %v9845_v34, %v20286_v26  ;;  %v20294_v4 = vsub.f32 %v8512_v17, %v20288_v54 }
 0x8fb   :  { %v8515_v28 = vsel %vm8510_vm2, %v17164_v20, 0  ;;  %v9848_v1 = vsel %vm8510_vm2, %v17167_v52, 0 }
 0x8fc   :  { %v17168_v29 = vpop.trf.xlu1  ;;  %22679 = vst [vmem:[#allocation55_spill] sm:$0xff] %v20291_v51  ;;  %22680 = vst [vmem:[#allocation58_spill] sm:$0xff] %v20294_v4  ;;  %v22169_v16 = vand.u32 4294901760, %v20294_v4  ;;  %v22168_v53 = vand.u32 4294901760, %v20291_v51  ;;  %v20326_v31 = vand.u32 4294901760, %v8515_v28  ;;  %v20330_v14 = vand.u32 4294901760, %v9848_v1 }
 0x8fd   :  { %v17169_v21 = vunpack.i.l.bf16 %v17168_v29  ;;  %v17172_v38 = vunpack.i.h.bf16 %v17168_v29 }
 0x8fe   :  { %v8631_v36 = vsub.f32 %v20294_v4, %v22169_v16  ;;  %v9961_v42 = vsub.f32 %v20291_v51, %v22168_v53  ;;  %v20335_v5 = vsub.f32 %v8515_v28, %v20326_v31 }
 0x8ff   :  { %v9851_v18 = vsel %vm8510_vm2, %v17172_v38, 0 }
 0x900   :  { %v17173_v9 = vpop.trf.xlu1  ;;  %v8632_v39 = vand.u32 4294901760, %v8631_v36  ;;  %v9962_v63 = vand.u32 4294901760, %v9961_v42  ;;  %22681 = vst [vmem:[#allocation57_spill] sm:$0xff] %v20335_v5  ;;  %v20337_v50 = vand.u32 4294901760, %v9851_v18 }
 0x901   :  { %v17174_v56 = vunpack.i.l.bf16 %v17173_v9 }
 0x902   :  { %15203 = vmatprep.mubr.f32.mxu0 %v9962_v63 }
 0x904   :  { %v17178_v48 = vpop.trf.xlu1 }
 0x905   :  { %v17182_v60 = vunpack.i.h.bf16 %v17178_v48 }
 0x908   :  { %v17183_v55 = vpop.trf.xlu1 }
 0x90c   :  { %v20304_v46 = vpop.trf.xlu1 }
 0x90d   :  { %v17189_v13 = vunpack.i.l.bf16 %v20304_v46 }
 0x910   :  { %v20306_v33 = vpop.trf.xlu1 }
 0x911   :  { %v17194_v28 = vunpack.i.l.bf16 %v20306_v33 }
 0x914   :  { %v20308_v61 = vpop.trf.xlu1 }
 0x918   :  { %v20310_v25 = vpop.trf.xlu1 }
 0x91c   :  { %v20312_v15 = vpop.trf.xlu1 }
 0x91d   :  { %v17209_v16 = vunpack.i.l.bf16 %v20312_v15 }
 0x920   :  { %v20314_v37 = vpop.trf.xlu1 }
 0x924   :  { %v20316_v2 = vpop.trf.xlu1 }
 0x928   :  { %v20318_v8 = vpop.trf.xlu1 }
 0x92c   :  { %v20320_v45 = vpop.trf.xlu1 }
 0x930   :  { %v20322_v40 = vpop.trf.xlu1 }
 0x944   :  { %v7994_v30 = vpop.f32.mrb[54].mxu0 }
 0x945   :  { %v16485_v43 = vadd.f32 %v12406_v35, %v7994_v30  ;;  %v15002_v12 = vpop.f32.mrb[55].mxu0  ;;  %v20341_v35 = vsub.f32 %v9848_v1, %v20330_v14  ;;  %v17179_v30 = vunpack.i.l.bf16 %v17178_v48 }
 0x947   :  { %v7998_v6 = vmax.f32 %v16485_v43, 0.0  ;;  %22682 = vst [vmem:[#allocation12_spill] sm:$0xff] %v20341_v35  ;;  %v8524_v19 = vsel %vm8510_vm2, %v17179_v30, 0  ;;  %v22166_v32 = vand.u32 4294901760, %v20341_v35 }
 0x948   :  { %v20368_v42 = vand.u32 4294901760, %v8524_v19 }
 0x949   :  { %v8008_v62 = vsel %vm8006_vm1, %v7998_v6, 0  ;;  %v17187_v6 = vunpack.i.h.bf16 %v17183_v55  ;;  %v20383_v52 = vsub.f32 %v20341_v35, %v22166_v32  ;;  %v17204_v32 = vunpack.i.l.bf16 %v20310_v25 }
 0x94a   :  { %v8077_v3 = vand.u32 4294901760, %v8008_v62 }
 0x94b   :  { %v9860_v29 = vsel %vm8510_vm2, %v17187_v6, 0  ;;  %v17202_v6 = vunpack.i.h.bf16 %v20308_v61 }
 0x94c   :  { %v8078_v22 = vsub.f32 %v8008_v62, %v8077_v3  ;;  %v17184_v62 = vunpack.i.l.bf16 %v17183_v55  ;;  %v17192_v55 = vunpack.i.h.bf16 %v20304_v46  ;;  %v20376_v63 = vand.u32 4294901760, %v9860_v29 }
 0x94e   :  { %v8079_v11 = vand.u32 4294901760, %v8078_v22 }
 0x950   :  { %v8080_v58 = vsub.f32 %v8078_v22, %v8079_v11 }
 0x952   :  { %v8081_v0 = vand.u32 4294901760, %v8080_v58  ;;  %v9857_v58 = vsel %vm8510_vm2, %v17182_v60, 0  ;;  %v8539_v60 = vsel %vm8510_vm2, %v17204_v32, 0  ;;  %v8542_v32 = vsel %vm8510_vm2, %v17209_v16, 0 }
 0x953   :  { %v20365_v48 = vand.u32 4294901760, %v9857_v58 }
 0x954   :  { %15008 = vmatmul.mubr.f32.vlgmr.msra.gmra.mrb[76].mxu1 %v8081_v0  ;;  %v22167_v0 = vand.u32 4294901760, %v20335_v5 }
 0x955   :  { %16166 = vmatpush3.bf16.msra.mxu1 %v16165_v59  ;;  %15014 = vmatprep.mubr.msk.f32.mxu1 %vm22301_vm0, %v22660_v23  ;;  %v17177_v59 = vunpack.i.h.bf16 %v17173_v9  ;;  %v8527_v9 = vsel %vm8510_vm2, %v17184_v62, 0  ;;  %v20396_v1 = vsub.f32 %v9857_v58, %v20365_v48  ;;  %v17199_v62 = vunpack.i.l.bf16 %v20308_v61 }
 0x956   :  { %16167 = vmatprep.subr.bf16.mxu1 %v22661_v10  ;;  %v20378_v20 = vand.u32 4294901760, %v8527_v9 }
 0x957   :  { %22687 = vst [vmem:[#allocation50_spill] sm:$0xff] %v20396_v1  ;;  %v22172_v61 = vand.u32 4294901760, %v20396_v1 }
 0x95c   :  { %15015 = vmatmul.mubr.f32.vlgmr.msra.gmra.mrb[76].mxu1 %v8077_v3 }
 0x95d   :  { %16169 = vmatpush3.bf16.msra.mxu1 %v16168_v47  ;;  %15021 = vmatprep.mubr.msk.f32.mxu1 %vm22301_vm0, %v22660_v23  ;;  %v8521_v47 = vsel %vm8510_vm2, %v17174_v56, 0  ;;  %v20405_v56 = vsub.f32 %v8524_v19, %v20368_v42 }
 0x95e   :  { %16170 = vmatprep.subr.bf16.mxu1 %v22661_v10 }
 0x95f   :  { %22688 = vst [vmem:[#allocation22_spill] sm:$0xff] %v20405_v56 }
 0x964   :  { %15022 = vmatmul.mubr.f32.vlgmr.msra.gmra.mrb[76].mxu1 %v8078_v22  ;;  %v20349_v22 = vand.u32 4294901760, %v8521_v47 }
 0x965   :  { %16172 = vmatpush3.bf16.msra.mxu1 %v16162_v27  ;;  %15028 = vmatprep.mubr.msk.f32.mxu1 %vm22301_vm0, %v22660_v23 }
 0x966   :  { %16173 = vmatprep.subr.bf16.mxu1 %v22661_v10  ;;  %v20363_v17 = vsub.f32 %v8521_v47, %v20349_v22  ;;  %v20411_v47 = vsub.f32 %v9860_v29, %v20376_v63 }
 0x968   :  { %22685 = vst [vmem:[#allocation37_spill] sm:$0xff] %v20363_v17  ;;  %22689 = vst [vmem:[#allocation48_spill] sm:$0xff] %v20411_v47 }
 0x96c   :  { %15029 = vmatmul.mubr.f32.vlgmr.msra.gmra.mrb[76].mxu1 %v8079_v11  ;;  %v9854_v11 = vsel %vm8510_vm2, %v17177_v59, 0 }
 0x96d   :  { %16175 = vmatpush3.bf16.msra.mxu1 %v16174_v49  ;;  %15035 = vmatprep.mubr.msk.f32.mxu1 %vm22301_vm0, %v22660_v23  ;;  %v20360_v34 = vand.u32 4294901760, %v9854_v11 }
 0x96e   :  { %16176 = vmatprep.subr.bf16.mxu1 %v22661_v10 }
 0x96f   :  { %v20393_v38 = vsub.f32 %v9854_v11, %v20360_v34 }
 0x971   :  { %22686 = vst [vmem:[#allocation44_spill] sm:$0xff] %v20393_v38 }
 0x974   :  { %15036 = vmatmul.mubr.f32.vlgmr.msra.gmra.mrb[76].mxu1 %v8077_v3 }
 0x975   :  { %16178 = vmatpush3.bf16.msra.mxu1 %v16162_v27  ;;  %15042 = vmatprep.mubr.msk.f32.mxu1 %vm22301_vm0, %v22660_v23  ;;  %v8518_v27 = vsel %vm8510_vm2, %v17169_v21, 0  ;;  %v8530_v21 = vsel %vm8510_vm2, %v17189_v13, 0  ;;  %v22170_v13 = vand.u32 4294901760, %v20393_v38 }
 0x976   :  { %v20332_v57 = vand.u32 4294901760, %v8518_v27 }
 0x978   :  { %v20344_v43 = vsub.f32 %v8518_v27, %v20332_v57 }
 0x97a   :  { %22683 = vst [vmem:[#allocation42_spill] sm:$0xff] %v20344_v43  ;;  %v22164_v41 = vand.u32 4294901760, %v20344_v43 }
 0x97c   :  { %15043 = vmatmul.mubr.f32.vlgmr.msra.gmra.mrb[76].mxu1 %v8077_v3  ;;  %v20347_v3 = vsub.f32 %v9851_v18, %v20337_v50  ;;  %v20390_v46 = vsub.f32 %v20344_v43, %v22164_v41  ;;  %v22165_v18 = vand.u32 4294901760, %v20363_v17  ;;  %v9869_v41 = vsel %vm8510_vm2, %v17202_v6, 0 }
 0x97d   :  { %15047 = vmatprep.mubr.f32.mxu1 %v8632_v39  ;;  %v20374_v39 = vsub.f32 %v20335_v5, %v22167_v0  ;;  %v20456_v6 = vsub.f32 %v20393_v38, %v22170_v13  ;;  %v20471_v19 = vand.u32 4294901760, %v9869_v41  ;;  %v17217_v38 = vunpack.i.h.bf16 %v20314_v37 }
 0x97e   :  { %22684 = vst [vmem:[#allocation41_spill] sm:$0xff] %v20347_v3  ;;  %v22163_v36 = vand.u32 4294901760, %v20347_v3  ;;  %v20429_v29 = vsub.f32 %v20363_v17, %v22165_v18  ;;  %v8536_v18 = vsel %vm8510_vm2, %v17199_v62, 0  ;;  %v22705_v43 = vand.u32 4294901760, %v20390_v46 }
 0x97f   :  { %v9992_v23 = vand.u32 4294901760, %v20456_v6 }
 0x980   :  { %v20401_v27 = vsub.f32 %v20347_v3, %v22163_v36 }
 0xa4f   :  { %v8465_v44 = vpop.f32.mrb[76].mxu1 }
 0xa50   :  { %v16486_v49 = vadd.f32 %v12407_v24, %v8465_v44  ;;  %v15044_v7 = vpop.f32.mrb[77].mxu1  ;;  %v9863_v24 = vsel %vm8510_vm2, %v17192_v55, 0  ;;  %v17197_v44 = vunpack.i.h.bf16 %v20306_v33  ;;  %v22171_v55 = vand.u32 4294901760, %v20405_v56 }
 0xa51   :  { %v20416_v7 = vand.u32 4294901760, %v8530_v21  ;;  %v20423_v58 = vand.u32 4294901760, %v9863_v24 }
 0xa52   :  { %v12408_v12 = vmul.f32 -1.442695, %v16486_v49  ;;  %v20414_v49 = vsub.f32 %v8527_v9, %v20378_v20  ;;  %v9866_v9 = vsel %vm8510_vm2, %v17197_v44, 0  ;;  %v17207_v44 = vunpack.i.h.bf16 %v20310_v25 }
 0xa53   :  { %v20446_v0 = vsub.f32 %v9863_v24, %v20423_v58  ;;  %v20448_v53 = vand.u32 4294901760, %v9866_v9  ;;  %v20461_v25 = vsub.f32 %v20405_v56, %v22171_v55  ;;  %v20466_v24 = vsub.f32 %v20396_v1, %v22172_v61 }
 0xa54   :  { %17240 = vpow2.f32 %v12408_v12  ;;  %22690 = vst [vmem:[#allocation51_spill] sm:$0xff] %v20414_v49  ;;  %v8533_v12 = vsel %vm8510_vm2, %v17194_v28, 0  ;;  %v20436_v28 = vsub.f32 %v8530_v21, %v20416_v7  ;;  %v22174_v36 = vand.u32 4294901760, %v20414_v49 }
 0xa55   :  { %22692 = vst [vmem:[#allocation19_spill] sm:$0xff] %v20446_v0  ;;  %v17212_v21 = vunpack.i.h.bf16 %v20312_v15  ;;  %v20473_v15 = vand.u32 4294901760, %v8536_v18  ;;  %v9872_v33 = vsel %vm8510_vm2, %v17207_v44, 0  ;;  %v20517_v44 = vand.u32 4294901760, %v8542_v32 }
 0xa56   :  { %22691 = vst [vmem:[#allocation13_spill] sm:$0xff] %v20436_v28  ;;  %v20481_v55 = vsub.f32 %v20414_v49, %v22174_v36  ;;  %v20504_v10 = vand.u32 4294901760, %v9872_v33  ;;  %v22696_v6 = vand.u32 4294901760, %v20436_v28  ;;  %v22697_v49 = vand.u32 4294901760, %v20446_v0 }
 0xa57   :  { %v9875_v59 = vsel %vm8510_vm2, %v17212_v21, 0  ;;  %v20502_v21 = vsub.f32 %v8536_v18, %v20473_v15  ;;  %v17222_v61 = vunpack.i.h.bf16 %v20316_v2  ;;  %v22711_v51 = vand.u32 4294901760, %v20466_v24 }
 0xa58   :  { %v20514_v36 = vsub.f32 %v20436_v28, %v22696_v6  ;;  %v20523_v1 = vsub.f32 %v20446_v0, %v22697_v49  ;;  %v17214_v6 = vunpack.i.l.bf16 %v20314_v37  ;;  %v20533_v17 = vsub.f32 %v9872_v33, %v20504_v10 }
 0xa59   :  { %22695 = vst [vmem:[#allocation60_spill] sm:$0xff] %v20502_v21  ;;  %v17219_v49 = vunpack.i.l.bf16 %v20316_v2  ;;  %v22703_v2 = vand.u32 4294901760, %v20383_v52 }
 0xa5a   :  { %22698 = vst [vmem:[#allocation61_spill] sm:$0xff] %v20533_v17  ;;  %v8545_v3 = vsel %vm8510_vm2, %v17214_v6, 0 }
 0xa5b   :  { %v20591_v35 = vand.u32 4294901760, %v8545_v3 }
 0xa5e   :  { %v17241_v30 = vpop.eup %17240 }
 0xa5f   :  { %v8472_v11 = vadd.f32 1.0, %v17241_v30  ;;  %v20438_v30 = vand.u32 4294901760, %v8533_v12 }
 0xa61   :  { %17242 = vrcp.f32 %v8472_v11  ;;  %v22176_v11 = vand.u32 4294901760, %v20411_v47  ;;  %v20469_v62 = vsub.f32 %v8533_v12, %v20438_v30  ;;  %v20485_v12 = vsub.f32 %v9866_v9, %v20448_v53 }
 0xa62   :  { %v20499_v9 = vsub.f32 %v9869_v41, %v20471_v19 }
 0xa63   :  { %22693 = vst [vmem:[#allocation17_spill] sm:$0xff] %v20469_v62  ;;  %22694 = vst [vmem:[#allocation59_spill] sm:$0xff] %v20485_v12  ;;  %v20491_v13 = vsub.f32 %v20411_v47, %v22176_v11  ;;  %v20506_v11 = vand.u32 4294901760, %v8539_v60  ;;  %v20508_v47 = vand.u32 4294901760, %v9875_v59  ;;  %v22699_v0 = vand.u32 4294901760, %v20469_v62 }
 0xa65   :  { %v20536_v18 = vsub.f32 %v8539_v60, %v20506_v11  ;;  %v20540_v56 = vsub.f32 %v9875_v59, %v20508_v47  ;;  %v20546_v37 = vsub.f32 %v20469_v62, %v22699_v0  ;;  %v20553_v60 = vsub.f32 %v8542_v32, %v20517_v44 }
 0xa66   :  { %v22701_v59 = vand.u32 4294901760, %v20485_v12  ;;  %v9878_v0 = vsel %vm8510_vm2, %v17217_v38, 0  ;;  %v9881_v32 = vsel %vm8510_vm2, %v17222_v61, 0  ;;  %v22702_v62 = vand.u32 4294901760, %v20374_v39 }
 0xa67   :  { %22700 = vst [vmem:[#allocation62_spill] sm:$0xff] %v20553_v60  ;;  %v17227_v38 = vunpack.i.h.bf16 %v20318_v8  ;;  %v22706_v61 = vand.u32 4294901760, %v20401_v27  ;;  %v17232_v39 = vunpack.i.h.bf16 %v20320_v45  ;;  %v8702_v52 = vand.u32 4294901760, %v20546_v37 }
 0xa68   :  { %v20596_v27 = vand.u32 4294901760, %v9881_v32  ;;  %v22213_v4 = vand.u32 4294901760, %v20536_v18 }
 0xa6a   :  { %22708 = vst [vmem:[#allocation64_spill] sm:$0xff] %v20596_v27 }
 0xa6b   :  { %v17243_v41 = vpop.eup %17242 }
 0xa6c   :  { %v8560_v16 = vsel %vm6465_vm15, %v17243_v41, 0  ;;  %v20561_v41 = vsub.f32 %v20485_v12, %v22701_v59  ;;  %v8548_v59 = vsel %vm8510_vm2, %v17219_v49, 0  ;;  %v17229_v12 = vunpack.i.l.bf16 %v20320_v45 }
 0xa6d   :  { %v20530_v28 = vand.u32 4294901760, %v8560_v16  ;;  %v20598_v45 = vand.u32 4294901760, %v8548_v59 }
 0xa6e   :  { %v10032_v46 = vand.u32 4294901760, %v20561_v41  ;;  %v8554_v5 = vsel %vm8510_vm2, %v17229_v12, 0  ;;  %v22710_v41 = vand.u32 4294901760, %v20461_v25  ;;  %v20619_v12 = vsub.f32 %v8545_v3, %v20591_v35 }
 0xa6f   :  { %v20550_v33 = vsub.f32 %v8560_v16, %v20530_v28  ;;  %15045 = vmatprep.subr.mxu1 %v20530_v28  ;;  %15201 = vmatprep.subr.mxu0 %v20530_v28  ;;  %v17224_v16 = vunpack.i.l.bf16 %v20318_v8  ;;  %v9884_v8 = vsel %vm8510_vm2, %v17227_v38, 0  ;;  %v20627_v24 = vsub.f32 %v8548_v59, %v20598_v45 }
 0xa70   :  { %15046 = vmatpush3.msra.mxu1 %v20530_v28  ;;  %15202 = vmatpush3.msra.mxu0 %v20530_v28 }
 0xa71   :  { %15048 = vmatmul.mubr.f32.vlgmr.msra.gmra.mrb[78].mxu1 %v22702_v62  ;;  %15204 = vmatmul.mubr.f32.vlgmr.msra.gmra.mrb[56].mxu0 %v22703_v2  ;;  %v20576_v6 = vand.u32 4294901760, %v20550_v33  ;;  %v22707_v62 = vand.u32 4294901760, %v20502_v21  ;;  %v20589_v2 = vand.u32 4294901760, %v9878_v0  ;;  %v8551_v37 = vsel %vm8510_vm2, %v17224_v16, 0 }
 0xa72   :  { %15050 = vmatprep.mubr.f32.mxu1 %v22705_v43  ;;  %15206 = vmatprep.mubr.f32.mxu0 %v22706_v61  ;;  %v17234_v61 = vunpack.i.l.bf16 %v20322_v40  ;;  %v9887_v16 = vsel %vm8510_vm2, %v17232_v39, 0  ;;  %v20629_v39 = vand.u32 4294901760, %v9884_v8 }
 0xa73   :  { %22704 = vst [vmem:[#allocation63_spill] sm:$0xff] %v20576_v6  ;;  %v8711_v49 = vsub.f32 %v20502_v21, %v22707_v62  ;;  %v8792_v43 = vsub.f32 %v20550_v33, %v20576_v6  ;;  %v22709_v62 = vand.u32 4294901760, %v20429_v29  ;;  %v17237_v6 = vunpack.i.h.bf16 %v20322_v40 }
 0xa74   :  { %v22214_v29 = vand.u32 4294901760, %v20533_v17  ;;  %v20616_v38 = vsub.f32 %v9878_v0, %v20589_v2  ;;  %v20621_v40 = vand.u32 4294901760, %v8551_v37  ;;  %22714 = vst [vmem:[#allocation66_spill] sm:$0xff] %v20629_v39  ;;  %v20631_v0 = vand.u32 4294901760, %v8554_v5 }
 0xa75   :  { %15051 = vmatmul.mubr.f32.gmra.mrb[80].mxu1 %v22709_v62  ;;  %15207 = vmatmul.mubr.f32.gmra.mrb[58].mxu0 %v9992_v23  ;;  %v8793_v21 = vand.u32 4294901760, %v8792_v43  ;;  %v22215_v23 = vand.u32 4294901760, %v20553_v60  ;;  %v8557_v3 = vsel %vm8510_vm2, %v17234_v61, 0  ;;  %v20635_v43 = vsub.f32 %v9881_v32, %v20596_v27 }
 0xa76   :  { %15053 = vmatprep.mubr.f32.mxu1 %v22710_v41  ;;  %15209 = vmatprep.mubr.f32.mxu0 %v22711_v51  ;;  %22712 = vst [vmem:[#allocation65_spill] sm:$0xff] %v20621_v40  ;;  %v22713_v51 = vand.u32 4294901760, %v20499_v9  ;;  %22715 = vst [vmem:[#allocation67_spill] sm:$0xff] %v20631_v0  ;;  %v22716_v62 = vand.u32 4294901760, %v20481_v55  ;;  %v20640_v41 = vand.u32 4294901760, %v9887_v16  ;;  %v9890_v59 = vsel %vm8510_vm2, %v17237_v6, 0 }
 0xa77   :  { %15071 = vmatprep.subr.mxu1 %v8793_v21  ;;  %15227 = vmatprep.subr.mxu0 %v8793_v21  ;;  %v8712_v61 = vand.u32 4294901760, %v8711_v49  ;;  %v8721_v32 = vsub.f32 %v20536_v18, %v22213_v4  ;;  %v10051_v55 = vsub.f32 %v20533_v17, %v22214_v29  ;;  %v8731_v6 = vsub.f32 %v20553_v60, %v22215_v23 }
 0xa78   :  { %v10041_v25 = vsub.f32 %v20499_v9, %v22713_v51  ;;  %15072 = vmatpush3.msra.mxu1 %v8793_v21  ;;  %15228 = vmatpush3.msra.mxu0 %v8793_v21  ;;  %22717 = vst [vmem:[#allocation68_spill] sm:$0xff] %v20640_v41  ;;  %v22718_v21 = vand.u32 4294901760, %v20491_v13  ;;  %v22719_v13 = vand.u32 4294901760, %v20514_v36  ;;  %v22720_v49 = vand.u32 4294901760, %v20523_v1 }
 0xa79   :  { %15054 = vmatmul.mubr.f32.gmra.mrb[82].mxu1 %v22716_v62  ;;  %15097 = vmatprep.subr.mxu1 %v20550_v33  ;;  %v20657_v62 = vsub.f32 %v8551_v37, %v20621_v40  ;;  %v20668_v29 = vsub.f32 %v9884_v8, %v20629_v39  ;;  %v20671_v23 = vsub.f32 %v8554_v5, %v20631_v0  ;;  %v20673_v37 = vand.u32 4294901760, %v9890_v59 }
 0xa7a   :  { %15210 = vmatmul.mubr.f32.gmra.mrb[60].mxu0 %v22718_v21  ;;  %15253 = vmatprep.subr.mxu0 %v20550_v33  ;;  %v20663_v21 = vand.u32 4294901760, %v8557_v3  ;;  %v10042_v1 = vand.u32 4294901760, %v10041_v25  ;;  %v22220_v51 = vand.u32 4294901760, %v20635_v43  ;;  %v8722_v8 = vand.u32 4294901760, %v8721_v32 }
 0xa7b   :  { %15056 = vmatprep.mubr.f32.mxu1 %v22719_v13  ;;  %15212 = vmatprep.mubr.f32.mxu0 %v22720_v49  ;;  %22722 = vst [vmem:[#allocation70_spill] sm:$0xff] %v20673_v37  ;;  %v20677_v13 = vsub.f32 %v9887_v16, %v20640_v41  ;;  %v22723_v49 = vand.u32 4294901760, %v20540_v56  ;;  %v10052_v5 = vand.u32 4294901760, %v10051_v55  ;;  %v8732_v60 = vand.u32 4294901760, %v8731_v6 }
 0xa7c   :  { %22721 = vst [vmem:[#allocation69_spill] sm:$0xff] %v20663_v21  ;;  %v20684_v17 = vsub.f32 %v8557_v3, %v20663_v21  ;;  %v22724_v16 = vand.u32 4294901760, %v20619_v12  ;;  %v22725_v25 = vand.u32 4294901760, %v20616_v38 }
 0xa7d   :  { %15057 = vmatmul.mubr.f32.gmra.mrb[84].mxu1 %v8702_v52  ;;  %v10061_v4 = vsub.f32 %v20540_v56, %v22723_v49  ;;  %v22221_v49 = vand.u32 4294901760, %v20657_v62 }
 0xa7e   :  { %15213 = vmatmul.mubr.f32.gmra.mrb[62].mxu0 %v10032_v46  ;;  %15059 = vmatprep.mubr.f32.mxu1 %v8712_v61  ;;  %v8741_v52 = vsub.f32 %v20619_v12, %v22724_v16  ;;  %v10071_v36 = vsub.f32 %v20616_v38, %v22725_v25  ;;  %v20694_v46 = vsub.f32 %v9890_v59, %v20673_v37  ;;  %v22726_v61 = vand.u32 4294901760, %v20627_v24 }
 0xa7f   :  { %15215 = vmatprep.mubr.f32.mxu0 %v10042_v1  ;;  %v10062_v6 = vand.u32 4294901760, %v10061_v4  ;;  %v10081_v1 = vsub.f32 %v20635_v43, %v22220_v51  ;;  %v22223_v3 = vand.u32 4294901760, %v20684_v17  ;;  %v22727_v4 = vand.u32 4294901760, %v20668_v29 }
 0xa80   :  { %v8751_v32 = vsub.f32 %v20627_v24, %v22726_v61  ;;  %v8742_v59 = vand.u32 4294901760, %v8741_v52  ;;  %v10072_v25 = vand.u32 4294901760, %v10071_v36  ;;  %v8761_v61 = vsub.f32 %v20657_v62, %v22221_v49 }
 0xa81   :  { %15060 = vmatmul.mubr.f32.gmra.mrb[86].mxu1 %v8722_v8  ;;  %v10091_v8 = vsub.f32 %v20668_v29, %v22727_v4  ;;  %v22728_v51 = vand.u32 4294901760, %v20671_v23  ;;  %v22729_v36 = vand.u32 4294901760, %v20677_v13 }
 0xa82   :  { %15216 = vmatmul.mubr.f32.gmra.mrb[64].mxu0 %v10052_v5  ;;  %15062 = vmatprep.mubr.f32.mxu1 %v8732_v60  ;;  %v8752_v55 = vand.u32 4294901760, %v8751_v32  ;;  %v22222_v60 = vand.u32 4294901760, %v20694_v46  ;;  %v10082_v5 = vand.u32 4294901760, %v10081_v1  ;;  %v8762_v32 = vand.u32 4294901760, %v8761_v61  ;;  %v22734_v61 = vld [vmem:[#allocation42_spill] sm:$0xff] }
 0xa83   :  { %15218 = vmatprep.mubr.f32.mxu0 %v10062_v6  ;;  %v8771_v16 = vsub.f32 %v20671_v23, %v22728_v51  ;;  %v10101_v52 = vsub.f32 %v20677_v13, %v22729_v36  ;;  %v8781_v6 = vsub.f32 %v20684_v17, %v22223_v3  ;;  %v10092_v4 = vand.u32 4294901760, %v10091_v8  ;;  %v22735_v8 = vld [vmem:[#allocation63_spill] sm:$0xff]  ;;  %v22737_v36 = vld [vmem:[#allocation37_spill] sm:$0xff]  ;;  %v22747_v3 = vld [vmem:[#allocation60_spill] sm:$0xff] }
 0xa84   :  { %v10111_v51 = vsub.f32 %v20694_v46, %v22222_v60  ;;  %v22746_v60 = vld [vmem:[#allocation59_spill] sm:$0xff] }
 0xa85   :  { %15063 = vmatmul.mubr.f32.gmra.mrb[88].mxu1 %v8742_v59  ;;  %v8772_v49 = vand.u32 4294901760, %v8771_v16  ;;  %v10102_v1 = vand.u32 4294901760, %v10101_v52  ;;  %v8782_v59 = vand.u32 4294901760, %v8781_v6  ;;  %v22733_v16 = vld [vmem:[#allocation12_spill] sm:$0xff]  ;;  %v22740_v6 = vld [vmem:[#allocation50_spill] sm:$0xff] }
 0xa86   :  { %15219 = vmatmul.mubr.f32.gmra.mrb[66].mxu0 %v10072_v25  ;;  %15065 = vmatprep.mubr.f32.mxu1 %v8752_v55  ;;  %v10112_v25 = vand.u32 4294901760, %v10111_v51  ;;  %v22732_v55 = vld [vmem:[#allocation57_spill] sm:$0xff]  ;;  %v22738_v52 = vld [vmem:[#allocation44_spill] sm:$0xff] }
 0xa87   :  { %15221 = vmatprep.mubr.f32.mxu0 %v10082_v5  ;;  %v22736_v5 = vld [vmem:[#allocation41_spill] sm:$0xff]  ;;  %v22742_v51 = vld [vmem:[#allocation48_spill] sm:$0xff] }
 0xa89   :  { %15066 = vmatmul.mubr.f32.gmra.mrb[90].mxu1 %v8762_v32  ;;  %v22739_v32 = vld [vmem:[#allocation22_spill] sm:$0xff] }
 0xa8a   :  { %15222 = vmatmul.mubr.f32.gmra.mrb[68].mxu0 %v10092_v4  ;;  %15068 = vmatprep.mubr.f32.mxu1 %v8772_v49  ;;  %v22731_v49 = vld [vmem:[#allocation55_spill] sm:$0xff] }
 0xa8b   :  { %15224 = vmatprep.mubr.f32.mxu0 %v10102_v1  ;;  %v22741_v4 = vld [vmem:[#allocation51_spill] sm:$0xff]  ;;  %v22743_v1 = vld [vmem:[#allocation13_spill] sm:$0xff] }
 0xa8d   :  { %15069 = vmatmul.mubr.f32.gmra.mrb[92].mxu1 %v8782_v59  ;;  %v22744_v59 = vld [vmem:[#allocation19_spill] sm:$0xff] }
 0xa8e   :  { %15225 = vmatmul.mubr.f32.gmra.mrb[70].mxu0 %v10112_v25  ;;  %15073 = vmatprep.mubr.f32.mxu1 %v20288_v54  ;;  %v22745_v25 = vld [vmem:[#allocation17_spill] sm:$0xff] }
 0xa8f   :  { %15229 = vmatprep.mubr.f32.mxu0 %v20286_v26 }
 0xa91   :  { %15074 = vmatmul.mubr.f32.vlgmr.msra.gmra.mrb[78].mxu1 %v20326_v31 }
 0xa92   :  { %15098 = vmatpush3.msra.mxu1 %v20550_v33  ;;  %15230 = vmatmul.mubr.f32.vlgmr.msra.gmra.mrb[56].mxu0 %v20330_v14 }
 0xa93   :  { %15254 = vmatpush3.msra.mxu0 %v20550_v33  ;;  %15076 = vmatprep.mubr.f32.mxu1 %v20332_v57  ;;  %v22730_v33 = vld [vmem:[#allocation58_spill] sm:$0xff] }
 0xa94   :  { %15123 = vmatprep.subr.mxu1 %v20530_v28  ;;  %15232 = vmatprep.mubr.f32.mxu0 %v20337_v50 }
 0xa95   :  { %15279 = vmatprep.subr.mxu0 %v20530_v28  ;;  %15077 = vmatmul.mubr.f32.gmra.mrb[80].mxu1 %v20349_v22 }
 0xa96   :  { %15233 = vmatmul.mubr.f32.gmra.mrb[58].mxu0 %v20360_v34  ;;  %15079 = vmatprep.mubr.f32.mxu1 %v20368_v42 }
 0xa97   :  { %15235 = vmatprep.mubr.f32.mxu0 %v20365_v48 }
 0xa99   :  { %15080 = vmatmul.mubr.f32.gmra.mrb[82].mxu1 %v20378_v20 }
 0xa9a   :  { %15236 = vmatmul.mubr.f32.gmra.mrb[60].mxu0 %v20376_v63  ;;  %15082 = vmatprep.mubr.f32.mxu1 %v20416_v7 }
 0xa9b   :  { %15238 = vmatprep.mubr.f32.mxu0 %v20423_v58 }
 0xa9d   :  { %15083 = vmatmul.mubr.f32.gmra.mrb[84].mxu1 %v20438_v30 }
 0xa9e   :  { %15239 = vmatmul.mubr.f32.gmra.mrb[62].mxu0 %v20448_v53  ;;  %15085 = vmatprep.mubr.f32.mxu1 %v20473_v15 }
 0xa9f   :  { %15241 = vmatprep.mubr.f32.mxu0 %v20471_v19 }
 0xaa1   :  { %15086 = vmatmul.mubr.f32.gmra.mrb[86].mxu1 %v20506_v11 }
 0xaa2   :  { %15242 = vmatmul.mubr.f32.gmra.mrb[64].mxu0 %v20504_v10  ;;  %15088 = vmatprep.mubr.f32.mxu1 %v20517_v44 }
 0xaa3   :  { %15244 = vmatprep.mubr.f32.mxu0 %v20508_v47 }
 0xaa5   :  { %15089 = vmatmul.mubr.f32.gmra.mrb[88].mxu1 %v20591_v35 }
 0xaa6   :  { %15245 = vmatmul.mubr.f32.gmra.mrb[66].mxu0 %v20589_v2  ;;  %15091 = vmatprep.mubr.f32.mxu1 %v20598_v45 }
 0xaa7   :  { %15247 = vmatprep.mubr.f32.mxu0 %v20596_v27  ;;  %v22754_v27 = vand.u32 4294901760, %v22734_v61 }
 0xaa9   :  { %15092 = vmatmul.mubr.f32.gmra.mrb[90].mxu1 %v20621_v40  ;;  %v22753_v40 = vand.u32 4294901760, %v22733_v16 }
 0xaaa   :  { %15248 = vmatmul.mubr.f32.gmra.mrb[68].mxu0 %v20629_v39  ;;  %15094 = vmatprep.mubr.f32.mxu1 %v20631_v0  ;;  %v22751_v0 = vand.u32 4294901760, %v22731_v49  ;;  %v22752_v39 = vand.u32 4294901760, %v22732_v55 }
 0xaab   :  { %15250 = vmatprep.mubr.f32.mxu0 %v20640_v41  ;;  %v22750_v41 = vand.u32 4294901760, %v22730_v33 }
 0xaad   :  { %15095 = vmatmul.mubr.f32.gmra.mrb[92].mxu1 %v20663_v21  ;;  %v22749_v21 = vld [vmem:[#allocation62_spill] sm:$0xff] }
 0xaae   :  { %15251 = vmatmul.mubr.f32.gmra.mrb[70].mxu0 %v20673_v37  ;;  %15099 = vmatprep.mubr.f32.mxu1 %v22730_v33  ;;  %v22748_v37 = vld [vmem:[#allocation61_spill] sm:$0xff]  ;;  %v22759_v33 = vand.u32 4294901760, %v22740_v6 }
 0xaaf   :  { %15255 = vmatprep.mubr.f32.mxu0 %v22731_v49  ;;  %v22761_v49 = vand.u32 4294901760, %v22742_v51 }
 0xab1   :  { %15100 = vmatmul.mubr.f32.vlgmr.msra.gmra.mrb[78].mxu1 %v22732_v55  ;;  %v22762_v55 = vand.u32 4294901760, %v22743_v1 }
 0xab2   :  { %15124 = vmatpush3.msra.mxu1 %v20530_v28  ;;  %15256 = vmatmul.mubr.f32.vlgmr.msra.gmra.mrb[56].mxu0 %v22733_v16  ;;  %v22763_v16 = vand.u32 4294901760, %v22744_v59 }
 0xab3   :  { %15280 = vmatpush3.msra.mxu0 %v20530_v28  ;;  %15102 = vmatprep.mubr.f32.mxu1 %v22734_v61  ;;  %v22764_v61 = vand.u32 4294901760, %v22745_v25 }
 0xab4   :  { %15149 = vmatprep.subr.mxu1 %v22735_v8  ;;  %15258 = vmatprep.mubr.f32.mxu0 %v22736_v5 }
 0xab5   :  { %15305 = vmatprep.subr.mxu0 %v22735_v8  ;;  %15103 = vmatmul.mubr.f32.gmra.mrb[80].mxu1 %v22737_v36 }
 0xab6   :  { %15259 = vmatmul.mubr.f32.gmra.mrb[58].mxu0 %v22738_v52  ;;  %15105 = vmatprep.mubr.f32.mxu1 %v22739_v32 }
 0xab7   :  { %15261 = vmatprep.mubr.f32.mxu0 %v22740_v6  ;;  %v22770_v6 = vand.u32 4294901760, %v22749_v21 }
 0xab9   :  { %15106 = vmatmul.mubr.f32.gmra.mrb[82].mxu1 %v22741_v4 }
 0xaba   :  { %15262 = vmatmul.mubr.f32.gmra.mrb[60].mxu0 %v22742_v51  ;;  %15108 = vmatprep.mubr.f32.mxu1 %v22743_v1  ;;  %v11156_v51 = vld [vmem:[#allocation2 + $0x170] sm:$0xff]  ;;  %v11157_v1 = vld [vmem:[#allocation2 + $0x178] sm:$0xff] }
 0xabb   :  { %15264 = vmatprep.mubr.f32.mxu0 %v22744_v59  ;;  %v20951_v59 = vld [vmem:[#allocation2 + $0x180] sm:$0xff] }
 0xabd   :  { %15109 = vmatmul.mubr.f32.gmra.mrb[84].mxu1 %v22745_v25 }
 0xabe   :  { %15265 = vmatmul.mubr.f32.gmra.mrb[62].mxu0 %v22746_v60  ;;  %15111 = vmatprep.mubr.f32.mxu1 %v22747_v3 }
 0xabf   :  { %15267 = vmatprep.mubr.f32.mxu0 %v20499_v9 }
 0xac1   :  { %15112 = vmatmul.mubr.f32.gmra.mrb[86].mxu1 %v20536_v18 }
 0xac2   :  { %15268 = vmatmul.mubr.f32.gmra.mrb[64].mxu0 %v22748_v37  ;;  %15114 = vmatprep.mubr.f32.mxu1 %v22749_v21  ;;  %v22777_v21 = vand.u32 4294901760, %v20668_v29 }
 0xac3   :  { %15270 = vmatprep.mubr.f32.mxu0 %v20540_v56 }
 0xac5   :  { %15115 = vmatmul.mubr.f32.gmra.mrb[88].mxu1 %v20619_v12 }
 0xac6   :  { %15271 = vmatmul.mubr.f32.gmra.mrb[66].mxu0 %v20616_v38  ;;  %15117 = vmatprep.mubr.f32.mxu1 %v20627_v24 }
 0xac7   :  { %15273 = vmatprep.mubr.f32.mxu0 %v20635_v43 }
 0xac9   :  { %15118 = vmatmul.mubr.f32.gmra.mrb[90].mxu1 %v20657_v62 }
 0xaca   :  { %15274 = vmatmul.mubr.f32.gmra.mrb[68].mxu0 %v20668_v29  ;;  %15120 = vmatprep.mubr.f32.mxu1 %v20671_v23  ;;  %v22784_v29 = vld [vmem:[#allocation65_spill] sm:$0xff] }
 0xacb   :  { %15276 = vmatprep.mubr.f32.mxu0 %v20677_v13 }
 0xacd   :  { %15121 = vmatmul.mubr.f32.gmra.mrb[92].mxu1 %v20684_v17 }
 0xace   :  { %15277 = vmatmul.mubr.f32.gmra.mrb[70].mxu0 %v20694_v46  ;;  %15125 = vmatprep.mubr.f32.mxu1 %v22750_v41  ;;  %v22755_v41 = vand.u32 4294901760, %v22736_v5  ;;  %v22766_v5 = vand.u32 4294901760, %v22747_v3  ;;  %v22773_v3 = vand.u32 4294901760, %v20616_v38  ;;  %v22780_v38 = vand.u32 4294901760, %v20684_v17 }
 0xacf   :  { %15281 = vmatprep.mubr.f32.mxu0 %v22751_v0  ;;  %v22756_v0 = vand.u32 4294901760, %v22737_v36  ;;  %v22767_v36 = vand.u32 4294901760, %v20499_v9  ;;  %v22774_v9 = vand.u32 4294901760, %v20627_v24  ;;  %v22781_v24 = vand.u32 4294901760, %v20694_v46  ;;  %v22789_v46 = vld [vmem:[#allocation70_spill] sm:$0xff] }
 0xad0   :  { %v22782_v17 = vmov 0.0|0.0  }
 0xad1   :  { %15126 = vmatmul.mubr.f32.vlgmr.msra.gmra.mrb[78].mxu1 %v22752_v39  ;;  %v22757_v39 = vand.u32 4294901760, %v22738_v52  ;;  %v22768_v52 = vand.u32 4294901760, %v20536_v18  ;;  %v22775_v18 = vand.u32 4294901760, %v20635_v43  ;;  %v22786_v43 = vld [vmem:[#allocation67_spill] sm:$0xff] }
 0xad2   :  { %15150 = vmatpush3.msra.mxu1 %v22735_v8  ;;  %15282 = vmatmul.mubr.f32.vlgmr.msra.gmra.mrb[56].mxu0 %v22753_v40  ;;  %v22758_v40 = vand.u32 4294901760, %v22739_v32  ;;  %v22769_v32 = vand.u32 4294901760, %v22748_v37  ;;  %v22776_v37 = vand.u32 4294901760, %v20657_v62  ;;  %v22787_v62 = vld [vmem:[#allocation68_spill] sm:$0xff] }
 0xad3   :  { %15306 = vmatpush3.msra.mxu0 %v22735_v8  ;;  %15128 = vmatprep.mubr.f32.mxu1 %v22754_v27  ;;  %v22760_v27 = vand.u32 4294901760, %v22741_v4  ;;  %v22765_v8 = vand.u32 4294901760, %v22746_v60  ;;  %v22771_v4 = vand.u32 4294901760, %v20540_v56  ;;  %v22772_v60 = vand.u32 4294901760, %v20619_v12 }
 0xad4   :  { %15175 = vmatprep.subr.mxu1 %v20530_v28  ;;  %15284 = vmatprep.mubr.f32.mxu0 %v22755_v41  ;;  %v22778_v56 = vand.u32 4294901760, %v20671_v23  ;;  %v22779_v12 = vand.u32 4294901760, %v20677_v13  ;;  %v22785_v23 = vld [vmem:[#allocation66_spill] sm:$0xff]  ;;  %v22788_v13 = vld [vmem:[#allocation69_spill] sm:$0xff] }
 0xad5   :  { %15331 = vmatprep.subr.mxu0 %v20530_v28  ;;  %15129 = vmatmul.mubr.f32.gmra.mrb[80].mxu1 %v22756_v0 }
 0xad6   :  { %15285 = vmatmul.mubr.f32.gmra.mrb[58].mxu0 %v22757_v39  ;;  %15131 = vmatprep.mubr.f32.mxu1 %v22758_v40  ;;  %v20959_v39 = vld [vmem:[#allocation2 + $0x188] sm:$0xff]  ;;  %v20961_v40 = vld [vmem:[#allocation2 + $0x190] sm:$0xff] }
 0xad7   :  { %15287 = vmatprep.mubr.f32.mxu0 %v22759_v33 }
 0xad9   :  { %15132 = vmatmul.mubr.f32.gmra.mrb[82].mxu1 %v22760_v27 }
 0xada   :  { %15288 = vmatmul.mubr.f32.gmra.mrb[60].mxu0 %v22761_v49  ;;  %15134 = vmatprep.mubr.f32.mxu1 %v22762_v55 }
 0xadb   :  { %15290 = vmatprep.mubr.f32.mxu0 %v22763_v16  ;;  %v11198_v16 = vand.u32 4294901760, %v11156_v51 }
 0xadd   :  { %15135 = vmatmul.mubr.f32.gmra.mrb[84].mxu1 %v22764_v61  ;;  %v11201_v61 = vand.u32 4294901760, %v11157_v1 }
 0xade   :  { %15291 = vmatmul.mubr.f32.gmra.mrb[62].mxu0 %v22765_v8  ;;  %15137 = vmatprep.mubr.f32.mxu1 %v22766_v5  ;;  %v11204_v8 = vand.u32 4294901760, %v20951_v59  ;;  %v11161_v5 = vld [vmem:[#allocation2 + $0x198] sm:$0xff] }
 0xadf   :  { %15293 = vmatprep.mubr.f32.mxu0 %v22767_v36 }
 0xae1   :  { %15138 = vmatmul.mubr.f32.gmra.mrb[86].mxu1 %v22768_v52 }
 0xae2   :  { %15294 = vmatmul.mubr.f32.gmra.mrb[64].mxu0 %v22769_v32  ;;  %15140 = vmatprep.mubr.f32.mxu1 %v22770_v6  ;;  %v11207_v32 = vand.u32 4294901760, %v20959_v39  ;;  %v11210_v6 = vand.u32 4294901760, %v20961_v40 }
 0xae3   :  { %15296 = vmatprep.mubr.f32.mxu0 %v22771_v4 }
 0xae5   :  { %15141 = vmatmul.mubr.f32.gmra.mrb[88].mxu1 %v22772_v60  ;;  %v20978_v60 = vsub.f32 %v11156_v51, %v11198_v16 }
 0xae6   :  { %15297 = vmatmul.mubr.f32.gmra.mrb[66].mxu0 %v22773_v3  ;;  %15143 = vmatprep.mubr.f32.mxu1 %v22774_v9  ;;  %v20980_v3 = vsub.f32 %v11157_v1, %v11201_v61  ;;  %v20984_v9 = vsub.f32 %v20951_v59, %v11204_v8 }
 0xae7   :  { %15299 = vmatprep.mubr.f32.mxu0 %v22775_v18  ;;  %22804 = vst [vmem:[#allocation13_spill] sm:$0xff] %v20978_v60  ;;  %v20987_v18 = vsub.f32 %v20959_v39, %v11207_v32  ;;  %v21044_v39 = vpack.c.bf16 %v11207_v32, %v11204_v8 }
 0xae8   :  { %22805 = vst [vmem:[#allocation19_spill] sm:$0xff] %v20980_v3  ;;  %22806 = vst [vmem:[#allocation17_spill] sm:$0xff] %v20984_v9 }
 0xae9   :  { %15144 = vmatmul.mubr.f32.gmra.mrb[90].mxu1 %v22776_v37  ;;  %22807 = vst [vmem:[#allocation59_spill] sm:$0xff] %v20987_v18  ;;  %v11213_v37 = vand.u32 4294901760, %v11161_v5  ;;  %22812 = vst [vmem:[#allocation65_spill] sm:$0xff] %v21044_v39 }
 0xaea   :  { %15300 = vmatmul.mubr.f32.gmra.mrb[68].mxu0 %v22777_v21  ;;  %15146 = vmatprep.mubr.f32.mxu1 %v22778_v56  ;;  %v20990_v21 = vsub.f32 %v20961_v40, %v11210_v6 }
 0xaeb   :  { %15302 = vmatprep.mubr.f32.mxu0 %v22779_v12  ;;  %v21058_v8 = vpack.c.bf16 %v11213_v37, %v11210_v6 }
 0xaec   :  { %22808 = vst [vmem:[#allocation60_spill] sm:$0xff] %v20990_v21 }
 0xaed   :  { %15147 = vmatmul.mubr.f32.gmra.mrb[92].mxu1 %v22780_v38  ;;  %22813 = vst [vmem:[#allocation66_spill] sm:$0xff] %v21058_v8 }
 0xaee   :  { %15303 = vmatmul.mubr.f32.gmra.mrb[70].mxu0 %v22781_v24  ;;  %15151 = vmatprep.mubr.f32.mxu1 %v20288_v54  ;;  %v20996_v24 = vsub.f32 %v11161_v5, %v11213_v37  ;;  %v22243_v5 = vand.u32 4294901760, %v20978_v60 }
 0xaef   :  { %15307 = vmatprep.mubr.f32.mxu0 %v20286_v26 }
 0xaf0   :  { %22809 = vst [vmem:[#allocation61_spill] sm:$0xff] %v20996_v24 }
 0xaf1   :  { %15152 = vmatmul.mubr.f32.vlgmr.msra.gmra.mrb[78].mxu1 %v20326_v31 }
 0xaf2   :  { %15176 = vmatpush3.msra.mxu1 %v20530_v28  ;;  %15308 = vmatmul.mubr.f32.vlgmr.msra.gmra.mrb[56].mxu0 %v20330_v14 }
 0xaf3   :  { %15332 = vmatpush3.msra.mxu0 %v20530_v28  ;;  %15154 = vmatprep.mubr.f32.mxu1 %v20332_v57  ;;  %v22783_v28 = vld [vmem:[#allocation64_spill] sm:$0xff] }
 0xaf4   :  { %15310 = vmatprep.mubr.f32.mxu0 %v20337_v50  ;;  %16179 = vmatprep.subr.bf16.mxu1 %v22782_v17 }
 0xaf5   :  { %15155 = vmatmul.mubr.f32.gmra.mrb[80].mxu1 %v20349_v22  ;;  %16323 = vmatprep.subr.bf16.mxu0 %v22782_v17 }
 0xaf6   :  { %15311 = vmatmul.mubr.f32.gmra.mrb[58].mxu0 %v20360_v34  ;;  %15157 = vmatprep.mubr.f32.mxu1 %v20368_v42 }
 0xaf7   :  { %15313 = vmatprep.mubr.f32.mxu0 %v20365_v48 }
 0xaf9   :  { %15158 = vmatmul.mubr.f32.gmra.mrb[82].mxu1 %v20378_v20 }
 0xafa   :  { %15314 = vmatmul.mubr.f32.gmra.mrb[60].mxu0 %v20376_v63  ;;  %15160 = vmatprep.mubr.f32.mxu1 %v20416_v7 }
 0xafb   :  { %15316 = vmatprep.mubr.f32.mxu0 %v20423_v58 }
 0xafd   :  { %15161 = vmatmul.mubr.f32.gmra.mrb[84].mxu1 %v20438_v30 }
 0xafe   :  { %15317 = vmatmul.mubr.f32.gmra.mrb[62].mxu0 %v20448_v53  ;;  %15163 = vmatprep.mubr.f32.mxu1 %v20473_v15 }
 0xaff   :  { %15319 = vmatprep.mubr.f32.mxu0 %v20471_v19 }
 0xb01   :  { %15164 = vmatmul.mubr.f32.gmra.mrb[86].mxu1 %v20506_v11 }
 0xb02   :  { %15320 = vmatmul.mubr.f32.gmra.mrb[64].mxu0 %v20504_v10  ;;  %15166 = vmatprep.mubr.f32.mxu1 %v20517_v44 }
 0xb03   :  { %15322 = vmatprep.mubr.f32.mxu0 %v20508_v47 }
 0xb05   :  { %15167 = vmatmul.mubr.f32.gmra.mrb[88].mxu1 %v20591_v35 }
 0xb06   :  { %15323 = vmatmul.mubr.f32.gmra.mrb[66].mxu0 %v20589_v2  ;;  %15169 = vmatprep.mubr.f32.mxu1 %v20598_v45 }
 0xb07   :  { %15325 = vmatprep.mubr.f32.mxu0 %v22783_v28 }
 0xb09   :  { %15170 = vmatmul.mubr.f32.gmra.mrb[90].mxu1 %v22784_v29 }
 0xb0a   :  { %15326 = vmatmul.mubr.f32.gmra.mrb[68].mxu0 %v22785_v23  ;;  %15172 = vmatprep.mubr.f32.mxu1 %v22786_v43 }
 0xb0b   :  { %15328 = vmatprep.mubr.f32.mxu0 %v22787_v62 }
 0xb0d   :  { %15173 = vmatmul.mubr.f32.gmra.mrb[92].mxu1 %v22788_v13 }
 0xb0e   :  { %15329 = vmatmul.mubr.f32.gmra.mrb[70].mxu0 %v22789_v46  ;;  %15177 = vmatprep.mubr.f32.mxu1 %v20288_v54  ;;  %v11147_v54 = vld [vmem:[#allocation2 + $0x128] sm:$0xff] }
 0xb0f   :  { %15333 = vmatprep.mubr.f32.mxu0 %v20286_v26  ;;  %v11146_v26 = vld [vmem:[#allocation2 + $0x120] sm:$0xff] }
 0xb11   :  { %15178 = vmatmul.mubr.f32.vlgmr.msra.gmra.mrb[78].mxu1 %v20326_v31  ;;  %v11171_v31 = vand.u32 4294901760, %v11147_v54 }
 0xb12   :  { %15334 = vmatmul.mubr.f32.vlgmr.msra.gmra.mrb[56].mxu0 %v20330_v14  ;;  %15180 = vmatprep.mubr.f32.mxu1 %v20332_v57  ;;  %v11148_v57 = vld [vmem:[#allocation2 + $0x130] sm:$0xff] }
 0xb13   :  { %15336 = vmatprep.mubr.f32.mxu0 %v20337_v50  ;;  %v11149_v50 = vld [vmem:[#allocation2 + $0x138] sm:$0xff] }
 0xb15   :  { %15181 = vmatmul.mubr.f32.gmra.mrb[80].mxu1 %v20349_v22  ;;  %v20942_v22 = vsub.f32 %v11147_v54, %v11171_v31 }
 0xb16   :  { %15337 = vmatmul.mubr.f32.gmra.mrb[58].mxu0 %v20360_v34  ;;  %15183 = vmatprep.mubr.f32.mxu1 %v20368_v42  ;;  %v11174_v34 = vand.u32 4294901760, %v11148_v57  ;;  %v11150_v42 = vld [vmem:[#allocation2 + $0x140] sm:$0xff] }
 0xb17   :  { %15339 = vmatprep.mubr.f32.mxu0 %v20365_v48  ;;  %v11177_v48 = vand.u32 4294901760, %v11149_v50  ;;  %v22252_v12 = vand.u32 4294901760, %v20942_v22 }
 0xb19   :  { %15184 = vmatmul.mubr.f32.gmra.mrb[82].mxu1 %v20378_v20  ;;  %v11152_v20 = vld [vmem:[#allocation2 + $0x150] sm:$0xff] }
 0xb1a   :  { %15340 = vmatmul.mubr.f32.gmra.mrb[60].mxu0 %v20376_v63  ;;  %15186 = vmatprep.mubr.f32.mxu1 %v20416_v7  ;;  %v11151_v63 = vld [vmem:[#allocation2 + $0x148] sm:$0xff] }
 0xb1b   :  { %15342 = vmatprep.mubr.f32.mxu0 %v20423_v58  ;;  %v11183_v7 = vand.u32 4294901760, %v11151_v63  ;;  %v11153_v58 = vld [vmem:[#allocation2 + $0x158] sm:$0xff] }
 0xb1d   :  { %15187 = vmatmul.mubr.f32.gmra.mrb[84].mxu1 %v20438_v30  ;;  %v11154_v30 = vld [vmem:[#allocation2 + $0x160] sm:$0xff]  ;;  %v20955_v41 = vsub.f32 %v11151_v63, %v11183_v7 }
 0xb1e   :  { %15343 = vmatmul.mubr.f32.gmra.mrb[62].mxu0 %v20448_v53  ;;  %15189 = vmatprep.mubr.f32.mxu1 %v20473_v15  ;;  %v11168_v53 = vand.u32 4294901760, %v11146_v26  ;;  %v20945_v15 = vpack.c.bf16 %v11177_v48, %v11174_v34  ;;  %v11192_v49 = vand.u32 4294901760, %v11154_v30 }
 0xb1f   :  { %15345 = vmatprep.mubr.f32.mxu0 %v20471_v19  ;;  %v11186_v19 = vand.u32 4294901760, %v11152_v20  ;;  %22797 = vst [vmem:[#allocation41_spill] sm:$0xff] %v20955_v41 }
 0xb20   :  { %v20937_v14 = vpack.c.bf16 %v11171_v31, %v11168_v53  ;;  %22793 = vst [vmem:[#allocation57_spill] sm:$0xff] %v20945_v15  ;;  %v20970_v36 = vsub.f32 %v11154_v30, %v11192_v49 }
 0xb21   :  { %15190 = vmatmul.mubr.f32.gmra.mrb[86].mxu1 %v20506_v11  ;;  %v11155_v11 = vld [vmem:[#allocation2 + $0x168] sm:$0xff]  ;;  %v20957_v0 = vsub.f32 %v11152_v20, %v11186_v19 }
 0xb22   :  { %15346 = vmatmul.mubr.f32.gmra.mrb[64].mxu0 %v20504_v10  ;;  %15192 = vmatprep.mubr.f32.mxu1 %v20517_v44  ;;  %v22790_v10 = vmov 0.0   ;;  %22791 = vst [vmem:[#allocation58_spill] sm:$0xff] %v20937_v14  ;;  %v20947_v44 = vsub.f32 %v11148_v57, %v11174_v34  ;;  %v11195_v55 = vand.u32 4294901760, %v11155_v11  ;;  %22801 = vst [vmem:[#allocation50_spill] sm:$0xff] %v20970_v36  ;;  %v22245_v1 = vand.u32 4294901760, %v20970_v36 }
 0xb23   :  { %15348 = vmatprep.mubr.f32.mxu0 %v20508_v47  ;;  %16181 = vmatpush3.bf16.msra.mxu1 %v20937_v14  ;;  %v11180_v47 = vand.u32 4294901760, %v11150_v42  ;;  %22798 = vst [vmem:[#allocation37_spill] sm:$0xff] %v20957_v0 }
 0xb24   :  { %16182 = vmatprep.subr.bf16.mxu1 %v22782_v17  ;;  %22794 = vst [vmem:[#allocation12_spill] sm:$0xff] %v20947_v44  ;;  %v20972_v52 = vsub.f32 %v11155_v11, %v11195_v55  ;;  %v22251_v38 = vand.u32 4294901760, %v20947_v44 }
 0xb25   :  { %15193 = vmatmul.mubr.f32.gmra.mrb[88].mxu1 %v20591_v35  ;;  %v20940_v35 = vsub.f32 %v11146_v26, %v11168_v53  ;;  %v20953_v25 = vsub.f32 %v11150_v42, %v11180_v47  ;;  %v20964_v33 = vpack.c.bf16 %v11183_v7, %v11180_v47  ;;  %v22247_v42 = vand.u32 4294901760, %v20957_v0 }
 0xb26   :  { %15349 = vmatmul.mubr.f32.gmra.mrb[66].mxu0 %v20589_v2  ;;  %15195 = vmatprep.mubr.f32.mxu1 %v20598_v45  ;;  %v20949_v2 = vsub.f32 %v11149_v50, %v11177_v48  ;;  %v11189_v45 = vand.u32 4294901760, %v11153_v58  ;;  %22802 = vst [vmem:[#allocation51_spill] sm:$0xff] %v20972_v52  ;;  %v21028_v7 = vpack.c.bf16 %v11201_v61, %v11198_v16  ;;  %v22244_v59 = vand.u32 4294901760, %v20972_v52 }
 0xb27   :  { %15351 = vmatprep.mubr.f32.mxu0 %v22783_v28  ;;  %22792 = vst [vmem:[#allocation55_spill] sm:$0xff] %v20940_v35  ;;  %22796 = vst [vmem:[#allocation63_spill] sm:$0xff] %v20953_v25  ;;  %16184 = vmatpush3.bf16.msra.mxu1 %v20945_v15  ;;  %v22253_v56 = vand.u32 4294901760, %v20940_v35  ;;  %v22833_v15 = vld [vmem:[#allocation28_spill] sm:$0xff] }
 0xb28   :  { %22795 = vst [vmem:[#allocation42_spill] sm:$0xff] %v20949_v2  ;;  %22799 = vst [vmem:[#allocation44_spill] sm:$0xff] %v20964_v33  ;;  %v20966_v27 = vsub.f32 %v11153_v58, %v11189_v45  ;;  %16185 = vmatprep.subr.bf16.mxu1 %v22782_v17  ;;  %v20976_v4 = vpack.c.bf16 %v11189_v45, %v11186_v19  ;;  %v22250_v28 = vand.u32 4294901760, %v20949_v2 }
 0xb29   :  { %15196 = vmatmul.mubr.f32.gmra.mrb[90].mxu1 %v22784_v29  ;;  %v22249_v29 = vand.u32 4294901760, %v20953_v25  ;;  %22811 = vst [vmem:[#allocation64_spill] sm:$0xff] %v21028_v7  ;;  %v11304_v19 = vsub.f32 %v20957_v0, %v22247_v42  ;;  %v22822_v42 = vld [vmem:[#allocation18_spill] sm:$0xff] }
 0xb2a   :  { %15352 = vmatmul.mubr.f32.gmra.mrb[68].mxu0 %v22785_v23  ;;  %15198 = vmatprep.mubr.f32.mxu1 %v22786_v43  ;;  %22800 = vst [vmem:[#allocation22_spill] sm:$0xff] %v20966_v27  ;;  %22803 = vst [vmem:[#allocation48_spill] sm:$0xff] %v20976_v4  ;;  %v11262_v23 = vsub.f32 %v20940_v35, %v22253_v56  ;;  %v11269_v43 = vsub.f32 %v20942_v22, %v22252_v12  ;;  %v22246_v63 = vand.u32 4294901760, %v20966_v27  ;;  %v22825_v12 = vld [vmem:[#allocation35_spill] sm:$0xff]  ;;  %v22841_v35 = vld [vmem:[#allocation36_spill] sm:$0xff] }
 0xb2b   :  { %15354 = vmatprep.mubr.f32.mxu0 %v22787_v62  ;;  %16187 = vmatpush3.bf16.msra.mxu1 %v20964_v33  ;;  %v11276_v62 = vsub.f32 %v20947_v44, %v22251_v38  ;;  %v11283_v26 = vsub.f32 %v20949_v2, %v22250_v28  ;;  %v11290_v54 = vsub.f32 %v20953_v25, %v22249_v29  ;;  %v11305_v45 = vand.u32 4294901760, %v11304_v19 }
 0xb2c   :  { %16188 = vmatprep.subr.bf16.mxu1 %v22782_v17  ;;  %v11263_v53 = vand.u32 4294901760, %v11262_v23  ;;  %v11270_v31 = vand.u32 4294901760, %v11269_v43  ;;  %v11311_v30 = vsub.f32 %v20966_v27, %v22246_v63  ;;  %v22242_v23 = vand.u32 4294901760, %v20980_v3 }
 0xb2d   :  { %15199 = vmatmul.mubr.f32.gmra.mrb[92].mxu1 %v22788_v13  ;;  %v22248_v13 = vand.u32 4294901760, %v20955_v41  ;;  %v11277_v57 = vand.u32 4294901760, %v11276_v62  ;;  %v11284_v34 = vand.u32 4294901760, %v11283_v26  ;;  %v11291_v48 = vand.u32 4294901760, %v11290_v54 }
 0xb2e   :  { %15355 = vmatmul.mubr.f32.gmra.mrb[70].mxu0 %v22789_v46  ;;  %15389 = vmatprep.mubr.msk.f32.mxu1 %vm22301_vm0, %v22790_v10  ;;  %v21011_v46 = vpack.c.bf16 %v11195_v55, %v11192_v49  ;;  %v21025_v20 = vpack.c.bf16 %v11270_v31, %v11263_v53  ;;  %v11312_v51 = vand.u32 4294901760, %v11311_v30  ;;  %v11318_v49 = vsub.f32 %v20970_v36, %v22245_v1 }
 0xb2f   :  { %15583 = vmatprep.mubr.msk.f32.mxu0 %vm22301_vm0, %v22790_v10  ;;  %16190 = vmatpush3.bf16.msra.mxu1 %v20976_v4  ;;  %v11297_v50 = vsub.f32 %v20955_v41, %v22248_v13  ;;  %v21030_v58 = vpack.c.bf16 %v11284_v34, %v11277_v57  ;;  %v11325_v55 = vsub.f32 %v20972_v52, %v22244_v59  ;;  %v22241_v53 = vand.u32 4294901760, %v20984_v9  ;;  %v22823_v13 = vld [vmem:[#allocation30_spill] sm:$0xff]  ;;  %v22834_v52 = vld [vmem:[#allocation43_spill] sm:$0xff] }
 0xb30   :  { %22810 = vst [vmem:[#allocation62_spill] sm:$0xff] %v21011_v46  ;;  %16191 = vmatprep.subr.bf16.mxu1 %v22782_v17  ;;  %v21046_v40 = vpack.c.bf16 %v11312_v51, %v11305_v45  ;;  %v11319_v16 = vand.u32 4294901760, %v11318_v49  ;;  %v11332_v43 = vsub.f32 %v20978_v60, %v22243_v5  ;;  %v11339_v62 = vsub.f32 %v20980_v3, %v22242_v23  ;;  %v22821_v5 = vld [vmem:[#allocation31_spill] sm:$0xff]  ;;  %v22832_v4 = vld [vmem:[#allocation38_spill] sm:$0xff] }
 0xb31   :  { %v11298_v47 = vand.u32 4294901760, %v11297_v50  ;;  %v11326_v61 = vand.u32 4294901760, %v11325_v55  ;;  %v22240_v31 = vand.u32 4294901760, %v20987_v18  ;;  %v11346_v37 = vsub.f32 %v20984_v9, %v22241_v53  ;;  %v22837_v9 = vld [vmem:[#allocation32_spill] sm:$0xff]  ;;  %v22838_v41 = vld [vmem:[#allocation46_spill] sm:$0xff] }
 0xb32   :  { %v11333_v26 = vand.u32 4294901760, %v11332_v43  ;;  %v11340_v54 = vand.u32 4294901760, %v11339_v62  ;;  %v22814_v62 = vld [vmem:[#allocation20_spill] sm:$0xff] }
 0xb33   :  { %16193 = vmatpush3.bf16.msra.mxu1 %v21011_v46  ;;  %v21039_v11 = vpack.c.bf16 %v11298_v47, %v11291_v48  ;;  %v21060_v32 = vpack.c.bf16 %v11326_v61, %v11319_v16  ;;  %v11353_v57 = vsub.f32 %v20987_v18, %v22240_v31  ;;  %v11347_v50 = vand.u32 4294901760, %v11346_v37  ;;  %v22818_v31 = vld [vmem:[#allocation21_spill] sm:$0xff]  ;;  %v22830_v46 = vld [vmem:[#allocation11_spill] sm:$0xff] }
 0xb34   :  { %16194 = vmatprep.subr.bf16.mxu1 %v22782_v17  ;;  %v21072_v6 = vpack.c.bf16 %v11340_v54, %v11333_v26  ;;  %v22239_v48 = vand.u32 4294901760, %v20990_v21  ;;  %v22238_v47 = vand.u32 4294901760, %v20996_v24 }
 0xb35   :  { %v11354_v34 = vand.u32 4294901760, %v11353_v57  ;;  %v22815_v57 = vld [vmem:[#allocation15_spill] sm:$0xff] }
 0xb36   :  { %v11360_v30 = vsub.f32 %v20990_v21, %v22239_v48  ;;  %v11367_v45 = vsub.f32 %v20996_v24, %v22238_v47 }
 0xb37   :  { %16196 = vmatpush3.bf16.msra.mxu1 %v21028_v7  ;;  %v21083_v19 = vpack.c.bf16 %v11354_v34, %v11347_v50  ;;  %v22816_v34 = vld [vmem:[#allocation16_spill] sm:$0xff] }
 0xb38   :  { %16197 = vmatprep.subr.bf16.mxu1 %v22782_v17  ;;  %v11361_v51 = vand.u32 4294901760, %v11360_v30  ;;  %v11368_v49 = vand.u32 4294901760, %v11367_v45 }
 0xb3a   :  { %v21091_v55 = vpack.c.bf16 %v11368_v49, %v11361_v51  ;;  %v22817_v51 = vld [vmem:[#allocation26_spill] sm:$0xff] }
 0xb3b   :  { %16199 = vmatpush3.bf16.msra.mxu1 %v21044_v39 }
 0xb3c   :  { %16200 = vmatprep.subr.bf16.mxu1 %v22782_v17 }
 0xb3f   :  { %16202 = vmatpush3.bf16.msra.mxu1 %v21058_v8  ;;  %v22829_v8 = vld [vmem:[#allocation39_spill] sm:$0xff] }
 0xb40   :  { %16203 = vmatprep.subr.bf16.mxu1 %v22782_v17 }
 0xbe4   :  { %v15179_v43 = vpop.f32.mrb[78].mxu1 }
 0xbe5   :  { %v21098_v26 = vmul.f32 %v15179_v43, %v22814_v62  ;;  %v15335_v54 = vpop.f32.mrb[56].mxu0  ;;  %v9559_v37 = vpop.f32.mrb[79].mxu1 }
 0xbe6   :  { %v21101_v50 = vmul.f32 %v15335_v54, %v22815_v57  ;;  %v21104_v30 = vmul.f32 %v9559_v37, %v22816_v34  ;;  %v10889_v45 = vpop.f32.mrb[57].mxu0  ;;  %v22819_v34 = vld [vmem:[#allocation27_spill] sm:$0xff] }
 0xbe7   :  { %v21107_v49 = vmul.f32 %v10889_v45, %v22817_v51  ;;  %v22820_v45 = vld [vmem:[#allocation14_spill] sm:$0xff] }
 0xbe8   :  { %v9657_v48 = vmax.f32 %v21104_v30, %v21098_v26  ;;  %v15182_v43 = vpop.f32.mrb[80].mxu1 }
 0xbe9   :  { %v10987_v62 = vmax.f32 %v21107_v49, %v21101_v50  ;;  %v21116_v54 = vmul.f32 %v15182_v43, %v22818_v31  ;;  %v15338_v57 = vpop.f32.mrb[58].mxu0  ;;  %v9571_v37 = vpop.f32.mrb[81].mxu1 }
 0xbea   :  { %v21119_v53 = vmul.f32 %v15338_v57, %v22819_v34  ;;  %v21122_v51 = vmul.f32 %v9571_v37, %v22820_v45  ;;  %v10901_v23 = vpop.f32.mrb[59].mxu0 }
 0xbeb   :  { %v21125_v59 = vmul.f32 %v10901_v23, %v22821_v5  ;;  %v22824_v5 = vld [vmem:[#allocation23_spill] sm:$0xff] }
 0xbec   :  { %v9658_v63 = vmax.f32 %v21122_v51, %v21116_v54  ;;  %v15185_v31 = vpop.f32.mrb[82].mxu1 }
 0xbed   :  { %v10988_v43 = vmax.f32 %v21125_v59, %v21119_v53  ;;  %v21134_v57 = vmul.f32 %v15185_v31, %v22822_v42  ;;  %v15341_v34 = vpop.f32.mrb[60].mxu0  ;;  %v9583_v37 = vpop.f32.mrb[83].mxu1 }
 0xbee   :  { %v9659_v45 = vmax.f32 %v9657_v48, %v9658_v63  ;;  %v21137_v29 = vmul.f32 %v15341_v34, %v22823_v13  ;;  %v21140_v23 = vmul.f32 %v9583_v37, %v22824_v5  ;;  %v10913_v28 = vpop.f32.mrb[61].mxu0  ;;  %v22826_v48 = vld [vmem:[#allocation24_spill] sm:$0xff]  ;;  %v22828_v5 = vld [vmem:[#allocation25_spill] sm:$0xff] }
 0xbef   :  { %v10989_v38 = vmax.f32 %v10987_v62, %v10988_v43  ;;  %v21143_v56 = vmul.f32 %v10913_v28, %v22825_v12  ;;  %v22827_v12 = vld [vmem:[#allocation34_spill] sm:$0xff] }
 0xbf0   :  { %v9660_v47 = vrot.slane %v9659_v45, 4  ;;  %v9696_v42 = vmax.f32 %v21140_v23, %v21134_v57  ;;  %v15188_v31 = vpop.f32.mrb[84].mxu1 }
 0xbf1   :  { %v10990_v63 = vrot.slane %v10989_v38, 4  ;;  %v11026_v13 = vmax.f32 %v21143_v56, %v21137_v29  ;;  %v21152_v34 = vmul.f32 %v15188_v31, %v22826_v48  ;;  %v15344_v37 = vpop.f32.mrb[62].mxu0  ;;  %v9595_v62 = vpop.f32.mrb[85].mxu1  ;;  %v21166_v31 = vadd.s32 8, %v22830_v46 }
 0xbf2   :  { %v9661_v43 = vmax.f32 %v9659_v45, %v9660_v47  ;;  %v21155_v28 = vmul.f32 %v15344_v37, %v22827_v12  ;;  %v21158_v1 = vmul.f32 %v9595_v62, %v22828_v5  ;;  %v10925_v61 = vpop.f32.mrb[63].mxu0  ;;  %v21171_v37 = vadd.s32 16, %v22830_v46 }
 0xbf3   :  { %v10991_v16 = vmax.f32 %v10989_v38, %v10990_v63  ;;  %v21161_v39 = vmul.f32 %v10925_v61, %v22829_v8  ;;  %v22831_v8 = vld [vmem:[#allocation29_spill] sm:$0xff] }
 0xbf4   :  { %v9662_v48 = vrot.slane %v9661_v43, 2  ;;  %v9697_v47 = vmax.f32 %v21158_v1, %v21152_v34  ;;  %v15191_v45 = vpop.f32.mrb[86].mxu1 }
 0xbf5   :  { %v10992_v62 = vrot.slane %v10991_v16, 2  ;;  %v11027_v38 = vmax.f32 %v21161_v39, %v21155_v28  ;;  %v21176_v61 = vmul.f32 %v15191_v45, %v22831_v8  ;;  %v15347_v63 = vpop.f32.mrb[64].mxu0  ;;  %v9607_v12 = vpop.f32.mrb[87].mxu1  ;;  %v21190_v8 = vadd.s32 24, %v22830_v46 }
 0xbf6   :  { %v9663_v5 = vmax.f32 %v9661_v43, %v9662_v48  ;;  %v9698_v7 = vmax.f32 %v9696_v42, %v9697_v47  ;;  %v21179_v33 = vmul.f32 %v15347_v63, %v22832_v4  ;;  %v21182_v14 = vmul.f32 %v9607_v12, %v22833_v15  ;;  %v10937_v60 = vpop.f32.mrb[65].mxu0  ;;  %v22836_v12 = vld [vmem:[#allocation47_spill] sm:$0xff] }
 0xbf7   :  { %v10993_v3 = vmax.f32 %v10991_v16, %v10992_v62  ;;  %v11028_v36 = vmax.f32 %v11026_v13, %v11027_v38  ;;  %v21185_v0 = vmul.f32 %v10937_v60, %v22834_v52  ;;  %v22835_v13 = vld [vmem:[#allocation33_spill] sm:$0xff] }
 0xbf8   :  { %v9664_v43 = vrot.slane %v9663_v5, 1  ;;  %v9699_v42 = vrot.slane %v9698_v7, 4  ;;  %v15194_v48 = vpop.f32.mrb[88].mxu1 }
 0xbf9   :  { %v10994_v15 = vrot.slane %v10993_v3, 1  ;;  %v11029_v47 = vrot.slane %v11028_v36, 4  ;;  %v21197_v52 = vmul.f32 %v15194_v48, %v22835_v13  ;;  %v15350_v60 = vpop.f32.mrb[66].mxu0  ;;  %v9619_v62 = vpop.f32.mrb[89].mxu1 }
 0xbfa   :  { %v21199_v38 = vmax.f32 %v9663_v5, %v9664_v43  ;;  %v9700_v63 = vmax.f32 %v9698_v7, %v9699_v42  ;;  %v21202_v45 = vmul.f32 %v15350_v60, %v22836_v12  ;;  %v21205_v18 = vmul.f32 %v9619_v62, %v22837_v9  ;;  %v10949_v4 = vpop.f32.mrb[67].mxu0 }
 0xbfb   :  { %v21207_v27 = vmax.f32 %v10993_v3, %v10994_v15  ;;  %v11030_v25 = vmax.f32 %v11028_v36, %v11029_v47  ;;  %v21210_v16 = vmul.f32 %v10949_v4, %v22838_v41 }
 0xbfc   :  { %vm9666_vm3 = vcmp.eq.f32.partialorder %v21104_v30, %v21199_v38  ;;  %vm9667_vm4 = vcmp.eq.f32.partialorder %v21098_v26, %v21199_v38  ;;  %vm9668_vm6 = vcmp.eq.f32.partialorder %v21122_v51, %v21199_v38  ;;  %vm9669_vm7 = vcmp.eq.f32.partialorder %v21116_v54, %v21199_v38  ;;  %v15197_v3 = vpop.f32.mrb[90].mxu1 }
 0xbfd   :  { %v9670_v36 = vsel %vm9666_vm3, %v22830_v46, 32  ;;  %v9671_v41 = vsel %vm9667_vm4, %v21166_v31, 32  ;;  %v9672_v9 = vsel %vm9668_vm6, %v21171_v37, 32  ;;  %v9673_v7 = vsel %vm9669_vm7, %v21190_v8, 32  ;;  %v15353_v5 = vpop.f32.mrb[68].mxu0  ;;  %v9631_v30 = vpop.f32.mrb[91].mxu1 }
 0xbfe   :  { %vm9674_vm8 = vcmp.lt.s32.totalorder %v9670_v36, %v9671_v41  ;;  %vm9676_vm9 = vcmp.lt.s32.totalorder %v9672_v9, %v9673_v7  ;;  %vm10996_vm10 = vcmp.eq.f32.partialorder %v21107_v49, %v21207_v27  ;;  %vm10997_vm11 = vcmp.eq.f32.partialorder %v21101_v50, %v21207_v27  ;;  %v21230_v26 = vpop.f32.mrb[69].mxu0 }
 0xbff   :  { %v9675_v54 = vsel %vm9674_vm8, %v9670_v36, %v9671_v41  ;;  %v9677_v51 = vsel %vm9676_vm9, %v9672_v9, %v9673_v7  ;;  %vm10998_vm12 = vcmp.eq.f32.partialorder %v21125_v59, %v21207_v27  ;;  %vm10999_vm13 = vcmp.eq.f32.partialorder %v21119_v53, %v21207_v27 }
 0xc00   :  { %vm9678_vm14 = vcmp.lt.s32.totalorder %v9675_v54, %v9677_v51  ;;  %v11000_v43 = vsel %vm10996_vm10, %v22830_v46, 32  ;;  %v11001_v42 = vsel %vm10997_vm11, %v21166_v31, 32  ;;  %v11002_v49 = vsel %vm10998_vm12, %v21171_v37, 32  ;;  %v21239_v4 = vpop.f32.mrb[92].mxu1 }
 0xc01   :  { %v9679_v50 = vsel %vm9678_vm14, %v9675_v54, %v9677_v51  ;;  %v11003_v15 = vsel %vm10999_vm13, %v21190_v8, 32  ;;  %vm11004_vm15 = vcmp.lt.s32.totalorder %v11000_v43, %v11001_v42  ;;  %v9701_v47 = vrot.slane %v9700_v63, 2  ;;  %v21242_v13 = vpop.f32.mrb[70].mxu0  ;;  %v21244_v59 = vpop.f32.mrb[93].mxu1 }
 0xc02   :  { %v9680_v60 = vrot.slane %v9679_v50, 4  ;;  %v11005_v53 = vsel %vm11004_vm15, %v11000_v43, %v11001_v42  ;;  %vm11006_vm1 = vcmp.lt.s32.totalorder %v11002_v49, %v11003_v15  ;;  %v11031_v62 = vrot.slane %v11030_v25, 2  ;;  %v21246_v12 = vpop.f32.mrb[71].mxu0 }
 0xc03   :  { %v11007_v36 = vsel %vm11006_vm1, %v11002_v49, %v11003_v15  ;;  %v9702_v41 = vmax.f32 %v9700_v63, %v9701_v47  ;;  %v9737_v9 = vmax.f32 %v21205_v18, %v21197_v52  ;;  %v11067_v7 = vmax.f32 %v21210_v16, %v21202_v45 }
 0xc04   :  { %vm9681_vm2 = vcmp.lt.s32.totalorder %v9679_v50, %v9680_v60  ;;  %vm11008_vm3 = vcmp.lt.s32.totalorder %v11005_v53, %v11007_v36  ;;  %v11032_v54 = vmax.f32 %v11030_v25, %v11031_v62  ;;  %v22839_v43 = vmax.f32 %v21182_v14, %v21176_v61  ;;  %v22845_v62 = vld [vmem:[#allocation40_spill] sm:$0xff] }
 0xc05   :  { %v9682_v51 = vsel %vm9681_vm2, %v9679_v50, %v9680_v60  ;;  %v11009_v48 = vsel %vm11008_vm3, %v11005_v53, %v11007_v36  ;;  %v9703_v21 = vrot.slane %v9702_v41, 1  ;;  %v22840_v63 = vmax.f32 %v21185_v0, %v21179_v33 }
 0xc06   :  { %v9738_v42 = vmax.f32 %v22839_v43, %v9737_v9  ;;  %v9683_v24 = vrot.slane %v9682_v51, 2  ;;  %v11010_v44 = vrot.slane %v11009_v48, 4  ;;  %v11033_v49 = vrot.slane %v11032_v54, 1 }
 0xc07   :  { %v11068_v15 = vmax.f32 %v22840_v63, %v11067_v7  ;;  %v21258_v47 = vmax.f32 %v9702_v41, %v9703_v21  ;;  %v21261_v25 = vmul.f32 %v15197_v3, %v22841_v35  ;;  %v22844_v35 = vld [vmem:[#allocation49_spill] sm:$0xff]  ;;  %v21285_v36 = vmul.f32 %v9631_v30, %v22845_v62 }
 0xc08   :  { %vm11011_vm4 = vcmp.lt.s32.totalorder %v11009_v48, %v11010_v44  ;;  %v9739_v2 = vrot.slane %v9738_v42, 4  ;;  %v21267_v60 = vmax.f32 %v11032_v54, %v11033_v49  ;;  %vm21269_vm8 = vcmp.lt.s32.totalorder %v9682_v51, %v9683_v24  ;;  %v22849_v62 = vld [vmem:[#allocation45_spill] sm:$0xff] }
 0xc09   :  { %v11012_v50 = vsel %vm11011_vm4, %v11009_v48, %v11010_v44  ;;  %vm9705_vm6 = vcmp.eq.f32.partialorder %v21140_v23, %v21258_v47  ;;  %vm9706_vm7 = vcmp.eq.f32.partialorder %v21134_v57, %v21258_v47  ;;  %vm9707_vm9 = vcmp.eq.f32.partialorder %v21158_v1, %v21258_v47 }
 0xc0a   :  { %vm9708_vm10 = vcmp.eq.f32.partialorder %v21152_v34, %v21258_v47  ;;  %v21278_v44 = vmul.f32 %v15353_v5, %v22844_v35  ;;  %v9709_v21 = vsel %vm9705_vm6, %v22830_v46, 32  ;;  %v9710_v23 = vsel %vm9706_vm7, %v21166_v31, 32 }
 0xc0b   :  { %v9711_v57 = vsel %vm9707_vm9, %v21171_v37, 32  ;;  %v9712_v48 = vsel %vm9708_vm10, %v21190_v8, 32  ;;  %v11013_v3 = vrot.slane %v11012_v50, 2  ;;  %vm9713_vm11 = vcmp.lt.s32.totalorder %v9709_v21, %v9710_v23 }
 0xc0c   :  { %vm9715_vm12 = vcmp.lt.s32.totalorder %v9711_v57, %v9712_v48  ;;  %v9714_v1 = vsel %vm9713_vm11, %v9709_v21, %v9710_v23  ;;  %vm11035_vm13 = vcmp.eq.f32.partialorder %v21143_v56, %v21267_v60  ;;  %v11069_v34 = vrot.slane %v11068_v15, 4 }
 0xc0d   :  { %v9716_v41 = vsel %vm9715_vm12, %v9711_v57, %v9712_v48  ;;  %v21291_v5 = vsel %vm21269_vm8, %v9682_v51, %v9683_v24  ;;  %vm11036_vm15 = vcmp.eq.f32.partialorder %v21137_v29, %v21267_v60  ;;  %vm11037_vm1 = vcmp.eq.f32.partialorder %v21161_v39, %v21267_v60  ;;  %v22848_v57 = vld [vmem:[#allocation53_spill] sm:$0xff] }
 0xc0e   :  { %vm9717_vm14 = vcmp.lt.s32.totalorder %v9714_v1, %v9716_v41  ;;  %vm11038_vm2 = vcmp.eq.f32.partialorder %v21155_v28, %v21267_v60  ;;  %v11039_v30 = vsel %vm11035_vm13, %v22830_v46, 32  ;;  %v11040_v56 = vsel %vm11036_vm15, %v21166_v31, 32 }
 0xc0f   :  { %v9718_v9 = vsel %vm9717_vm14, %v9714_v1, %v9716_v41  ;;  %vm21301_vm3 = vcmp.lt.s32.totalorder %v11012_v50, %v11013_v3  ;;  %v11041_v54 = vsel %vm11037_vm1, %v21171_v37, 32  ;;  %v11042_v29 = vsel %vm11038_vm2, %v21190_v8, 32  ;;  %v22850_v41 = vld [vmem:[#allocation52_spill] sm:$0xff] }
 0xc10   :  { %v9719_v24 = vrot.slane %v9718_v9, 4  ;;  %vm11043_vm4 = vcmp.lt.s32.totalorder %v11039_v30, %v11040_v56  ;;  %vm11045_vm6 = vcmp.lt.s32.totalorder %v11041_v54, %v11042_v29  ;;  %v9740_v39 = vmax.f32 %v9738_v42, %v9739_v2 }
 0xc11   :  { %v11070_v51 = vmax.f32 %v11068_v15, %v11069_v34  ;;  %v11044_v43 = vsel %vm11043_vm4, %v11039_v30, %v11040_v56  ;;  %v11046_v28 = vsel %vm11045_vm6, %v11041_v54, %v11042_v29  ;;  %v9776_v49 = vmax.f32 %v21285_v36, %v21261_v25 }
 0xc12   :  { %vm9720_vm7 = vcmp.lt.s32.totalorder %v9718_v9, %v9719_v24  ;;  %vm11047_vm8 = vcmp.lt.s32.totalorder %v11044_v43, %v11046_v28  ;;  %v9741_v53 = vrot.slane %v9740_v39, 2  ;;  %v21311_v48 = vmul.f32 %v21230_v26, %v22848_v57  ;;  %v22851_v26 = vld [vmem:[#allocation54_spill] sm:$0xff] }
 0xc13   :  { %v9721_v63 = vsel %vm9720_vm7, %v9718_v9, %v9719_v24  ;;  %v11071_v35 = vrot.slane %v11070_v51, 2  ;;  %v11048_v23 = vsel %vm11047_vm8, %v11044_v43, %v11046_v28  ;;  %v21315_v2 = vmul.f32 %v21239_v4, %v22849_v62  ;;  %v22852_v4 = vld [vmem:[#allocation56_spill] sm:$0xff] }
 0xc14   :  { %v9722_v21 = vrot.slane %v9721_v63, 2  ;;  %v11049_v42 = vrot.slane %v11048_v23, 4  ;;  %v9742_v15 = vmax.f32 %v9740_v39, %v9741_v53  ;;  %v21319_v34 = vmul.f32 %v21242_v13, %v22850_v41 }
 0xc15   :  { %v11072_v1 = vmax.f32 %v11070_v51, %v11071_v35  ;;  %v21323_v9 = vsel %vm21301_vm3, %v11012_v50, %v11013_v3  ;;  %v11106_v30 = vmax.f32 %v21311_v48, %v21278_v44  ;;  %v21329_v56 = vmul.f32 %v21244_v59, %v22851_v26 }
 0xc16   :  { %v21333_v24 = vmul.f32 %v21246_v12, %v22852_v4  ;;  %vm11050_vm9 = vcmp.lt.s32.totalorder %v11048_v23, %v11049_v42  ;;  %v9743_v54 = vrot.slane %v9742_v15, 1  ;;  %v9686_v3 = vrot.slane %v21291_v5, 1 }
 0xc17   :  { %v11073_v29 = vrot.slane %v11072_v1, 1  ;;  %v11051_v13 = vsel %vm11050_vm9, %v11048_v23, %v11049_v42  ;;  %v9777_v7 = vmax.f32 %v21329_v56, %v21315_v2  ;;  %v11016_v39 = vrot.slane %v21323_v9, 1 }
 0xc18   :  { %v11107_v50 = vmax.f32 %v21333_v24, %v21319_v34  ;;  %vm9723_vm10 = vcmp.lt.s32.totalorder %v9721_v63, %v9722_v21  ;;  %v21341_v59 = vmax.f32 %v9742_v15, %v9743_v54  ;;  %vm9689_vm11 = vcmp.gt.f32.partialorder %v21199_v38, -inf }
 0xc19   :  { %v21343_v51 = vmax.f32 %v11072_v1, %v11073_v29  ;;  %v9778_v12 = vmax.f32 %v9776_v49, %v9777_v7  ;;  %v11052_v28 = vrot.slane %v11051_v13, 2  ;;  %v21352_v53 = vsel %vm9723_vm10, %v9721_v63, %v9722_v21 }
 0xc1a   :  { %v11108_v43 = vmax.f32 %v11106_v30, %v11107_v50  ;;  %vm9745_vm12 = vcmp.eq.f32.partialorder %v21182_v14, %v21341_v59  ;;  %vm9746_vm13 = vcmp.eq.f32.partialorder %v21176_v61, %v21341_v59  ;;  %vm9747_vm14 = vcmp.eq.f32.partialorder %v21205_v18, %v21341_v59 }
 0xc1b   :  { %vm9748_vm15 = vcmp.eq.f32.partialorder %v21197_v52, %v21341_v59  ;;  %v9749_v49 = vsel %vm9745_vm12, %v22830_v46, 32  ;;  %v9750_v35 = vsel %vm9746_vm13, %v21166_v31, 32  ;;  %v9751_v23 = vsel %vm9747_vm14, %v21171_v37, 32 }
 0xc1c   :  { %v9752_v57 = vsel %vm9748_vm15, %v21190_v8, 32  ;;  %vm9753_vm1 = vcmp.lt.s32.totalorder %v9749_v49, %v9750_v35  ;;  %v21363_v14 = vsel %vm9689_vm11, %v21199_v38, -inf  ;;  %vm11075_vm3 = vcmp.eq.f32.partialorder %v21185_v0, %v21343_v51 }
 0xc1d   :  { %v9754_v18 = vsel %vm9753_vm1, %v9749_v49, %v9750_v35  ;;  %vm9755_vm2 = vcmp.lt.s32.totalorder %v9751_v23, %v9752_v57  ;;  %vm11076_vm4 = vcmp.eq.f32.partialorder %v21179_v33, %v21343_v51  ;;  %vm21369_vm6 = vcmp.lt.s32.totalorder %v11051_v13, %v11052_v28 }
 0xc1e   :  { %v9756_v52 = vsel %vm9755_vm2, %v9751_v23, %v9752_v57  ;;  %vm11077_vm7 = vcmp.eq.f32.partialorder %v21210_v16, %v21343_v51  ;;  %vm11078_vm8 = vcmp.eq.f32.partialorder %v21202_v45, %v21343_v51  ;;  %v11079_v63 = vsel %vm11075_vm3, %v22830_v46, 32 }
 0xc1f   :  { %vm9757_vm9 = vcmp.lt.s32.totalorder %v9754_v18, %v9756_v52  ;;  %v11080_v21 = vsel %vm11076_vm4, %v21166_v31, 32  ;;  %v11081_v0 = vsel %vm11077_vm7, %v21171_v37, 32  ;;  %v11082_v33 = vsel %vm11078_vm8, %v21190_v8, 32 }
 0xc20   :  { %v9758_v62 = vsel %vm9757_vm9, %v9754_v18, %v9756_v52  ;;  %vm11083_vm10 = vcmp.lt.s32.totalorder %v11079_v63, %v11080_v21  ;;  %v9779_v42 = vrot.slane %v9778_v12, 4  ;;  %vm11085_vm12 = vcmp.lt.s32.totalorder %v11081_v0, %v11082_v33 }
 0xc21   :  { %v9759_v15 = vrot.slane %v9758_v62, 4  ;;  %v11084_v1 = vsel %vm11083_vm10, %v11079_v63, %v11080_v21  ;;  %v11109_v41 = vrot.slane %v11108_v43, 4  ;;  %v11086_v16 = vsel %vm11085_vm12, %v11081_v0, %v11082_v33 }
 0xc22   :  { %v9780_v30 = vmax.f32 %v9778_v12, %v9779_v42  ;;  %vm9729_vm13 = vcmp.gt.f32.partialorder %v21258_v47, %v21363_v14  ;;  %vm11019_vm14 = vcmp.gt.f32.partialorder %v21207_v27, -inf  ;;  %vm11087_vm1 = vcmp.lt.s32.totalorder %v11084_v1, %v11086_v16 }
 0xc23   :  { %vm9760_vm15 = vcmp.lt.s32.totalorder %v9758_v62, %v9759_v15  ;;  %v11110_v45 = vmax.f32 %v11108_v43, %v11109_v41  ;;  %v21389_v26 = vsel %vm9729_vm13, %v21258_v47, %v21363_v14  ;;  %v11088_v54 = vsel %vm11087_vm1, %v11084_v1, %v11086_v16 }
 0xc24   :  { %v9761_v4 = vsel %vm9760_vm15, %v9758_v62, %v9759_v15  ;;  %v9781_v29 = vrot.slane %v9780_v30, 2  ;;  %vm9769_vm2 = vcmp.gt.f32.partialorder %v21341_v59, %v21389_v26  ;;  %v11089_v50 = vrot.slane %v11088_v54, 4 }
 0xc25   :  { %v9762_v7 = vrot.slane %v9761_v4, 2  ;;  %v11111_v12 = vrot.slane %v11110_v45, 2  ;;  %v21398_v43 = vsel %vm9769_vm2, %v21341_v59, %v21389_v26  ;;  %v9725_v49 = vrot.slane %v21352_v53, 1 }
 0xc26   :  { %v21403_v35 = vsel %vm21369_vm6, %v11051_v13, %v11052_v28  ;;  %v9782_v23 = vmax.f32 %v9780_v30, %v9781_v29  ;;  %v21408_v57 = vsel %vm11019_vm14, %v21207_v27, -inf  ;;  %vm11090_vm4 = vcmp.lt.s32.totalorder %v11088_v54, %v11089_v50 }
 0xc27   :  { %vm9763_vm3 = vcmp.lt.s32.totalorder %v9761_v4, %v9762_v7  ;;  %v11112_v18 = vmax.f32 %v11110_v45, %v11111_v12  ;;  %vm22304_vm7 = vcmp.gt.f32.partialorder %v21267_v60, %v21408_v57  ;;  %v11091_v63 = vsel %vm11090_vm4, %v11088_v54, %v11089_v50 }
 0xc28   :  { %v21412_v52 = vsel %vm9763_vm3, %v9761_v4, %v9762_v7  ;;  %v9783_v21 = vrot.slane %v9782_v23, 1  ;;  %v21419_v13 = vsel %vm22304_vm7, %v21267_v60, %v21408_v57  ;;  %vm21424_vm6 = vcmp.lt.s32.totalorder %v21291_v5, %v9686_v3 }
 0xc29   :  { %v11092_v61 = vrot.slane %v11091_v63, 2  ;;  %v11113_v0 = vrot.slane %v11112_v18, 1  ;;  %vm22303_vm8 = vcmp.gt.f32.partialorder %v21343_v51, %v21419_v13  ;;  %vm21431_vm9 = vcmp.lt.s32.totalorder %v21352_v53, %v9725_v49 }
 0xc2a   :  { %v21435_v33 = vmax.f32 %v9782_v23, %v9783_v21  ;;  %v21442_v42 = vsel %vm22303_vm8, %v21343_v51, %v21419_v13  ;;  %vm11142_vm10 = vcmask 1040384   ;;  %v11055_v15 = vrot.slane %v21403_v35, 1 }
 0xc2b   :  { %v9765_v1 = vrot.slane %v21412_v52, 1  ;;  %vm11093_vm12 = vcmp.lt.s32.totalorder %v11091_v63, %v11092_v61  ;;  %v21446_v41 = vmax.f32 %v11112_v18, %v11113_v0  ;;  %vm21451_vm15 = vcmp.lt.s32.totalorder %v21323_v9, %v11016_v39 }
 0xc2c   :  { %vm9785_vm1 = vcmp.eq.f32.partialorder %v21285_v36, %v21435_v33  ;;  %vm9786_vm3 = vcmp.eq.f32.partialorder %v21261_v25, %v21435_v33  ;;  %vm9787_vm4 = vcmp.eq.f32.partialorder %v21329_v56, %v21435_v33  ;;  %v9688_v30 = vsel %vm21424_vm6, %v21291_v5, %v9686_v3 }
 0xc2d   :  { %v21466_v45 = vsel %vm11093_vm12, %v11091_v63, %v11092_v61  ;;  %vm9788_vm5 = vcmp.eq.f32.partialorder %v21315_v2, %v21435_v33  ;;  %v9789_v4 = vsel %vm9785_vm1, %v22830_v46, 32  ;;  %v9790_v36 = vsel %vm9786_vm3, %v21166_v31, 32 }
 0xc2e   :  { %v9791_v25 = vsel %vm9787_vm4, %v21171_v37, 32  ;;  %v9792_v54 = vsel %vm9788_vm5, %v21190_v8, 32  ;;  %vm9793_vm0 = vcmp.lt.s32.totalorder %v9789_v4, %v9790_v36  ;;  %vm11115_vm8 = vcmp.eq.f32.partialorder %v21311_v48, %v21446_v41 }
 0xc2f   :  { %v9794_v56 = vsel %vm9793_vm0, %v9789_v4, %v9790_v36  ;;  %vm9795_vm7 = vcmp.lt.s32.totalorder %v9791_v25, %v9792_v54  ;;  %vm11116_vm6 = vcmp.eq.f32.partialorder %v21278_v44, %v21446_v41  ;;  %vm11117_vm12 = vcmp.eq.f32.partialorder %v21333_v24, %v21446_v41 }
 0xc30   :  { %v9796_v5 = vsel %vm9795_vm7, %v9791_v25, %v9792_v54  ;;  %vm11118_vm1 = vcmp.eq.f32.partialorder %v21319_v34, %v21446_v41  ;;  %v11119_v2 = vsel %vm11115_vm8, %v22830_v46, 32  ;;  %v11120_v3 = vsel %vm11116_vm6, %v21166_v31, 32  ;;  %v22886_v31 = vld [vmem:[#allocation61_spill] sm:$0xff] }
 0xc31   :  { %vm9797_vm5 = vcmp.lt.s32.totalorder %v9794_v56, %v9796_v5  ;;  %v11121_v29 = vsel %vm11117_vm12, %v21171_v37, 32  ;;  %v11122_v48 = vsel %vm11118_vm1, %v21190_v8, 32  ;;  %vm11123_vm0 = vcmp.lt.s32.totalorder %v11119_v2, %v11120_v3 }
 0xc32   :  { %v9798_v7 = vsel %vm9797_vm5, %v9794_v56, %v9796_v5  ;;  %v11124_v50 = vsel %vm11123_vm0, %v11119_v2, %v11120_v3  ;;  %vm11125_vm3 = vcmp.lt.s32.totalorder %v11121_v29, %v11122_v48  ;;  %vm9809_vm4 = vcmp.gt.f32.partialorder %v21435_v33, %v21398_v43 }
 0xc33   :  { %v9799_v44 = vrot.slane %v9798_v7, 4  ;;  %v11126_v24 = vsel %vm11125_vm3, %v11121_v29, %v11122_v48  ;;  %v9811_v46 = vsel %vm9809_vm4, %v21435_v33, %v21398_v43  ;;  %vm11139_vm7 = vcmp.gt.f32.partialorder %v21446_v41, %v21442_v42  ;;  %v22874_v43 = vld [vmem:[#allocation22_spill] sm:$0xff]  ;;  %v22880_v48 = vld [vmem:[#allocation19_spill] sm:$0xff] }
 0xc34   :  { %vm21498_vm8 = vcmp.lt.s32.totalorder %v21403_v35, %v11055_v15  ;;  %vm11127_vm6 = vcmp.lt.s32.totalorder %v11124_v50, %v11126_v24  ;;  %v11141_v37 = vsel %vm11139_vm7, %v21446_v41, %v21442_v42  ;;  %v9727_v8 = vsel %vm21431_vm9, %v21352_v53, %v9725_v49  ;;  %v22877_v42 = vld [vmem:[#allocation51_spill] sm:$0xff]  ;;  %v22878_v41 = vld [vmem:[#allocation50_spill] sm:$0xff] }
 0xc35   :  { %vm9800_vm12 = vcmp.lt.s32.totalorder %v9798_v7, %v9799_v44  ;;  %v11128_v34 = vsel %vm11127_vm6, %v11124_v50, %v11126_v24  ;;  %v11143_v12 = vsel %vm11142_vm10, %v9811_v46, %v11141_v37  ;;  %v9690_v23 = vsel %vm9689_vm11, %v9688_v30, 0  ;;  %v22884_v24 = vld [vmem:[#allocation17_spill] sm:$0xff]  ;;  %v22887_v37 = vld [vmem:[#allocation60_spill] sm:$0xff] }
 0xc36   :  { %v11095_v18 = vrot.slane %v21466_v45, 1  ;;  %v9801_v63 = vsel %vm9800_vm12, %v9798_v7, %v9799_v44  ;;  %v11129_v21 = vrot.slane %v11128_v34, 4  ;;  %v21514_v28 = vand.u32 4294901760, %v11143_v12  ;;  %v22881_v7 = vld [vmem:[#allocation13_spill] sm:$0xff]  ;;  %v22883_v44 = vld [vmem:[#allocation59_spill] sm:$0xff] }
 0xc37   :  { %v9802_v61 = vrot.slane %v9801_v63, 2  ;;  %v9728_v0 = vadd.s32 32, %v9727_v8  ;;  %vm9766_vm1 = vcmp.lt.s32.totalorder %v21412_v52, %v9765_v1  ;;  %v11018_v53 = vsel %vm21451_vm15, %v21323_v9, %v11016_v39 }
 0xc38   :  { %vm11130_vm9 = vcmp.lt.s32.totalorder %v11128_v34, %v11129_v21  ;;  %v21523_v38 = vsub.f32 %v11143_v12, %v21514_v28  ;;  %v9767_v49 = vsel %vm9766_vm1, %v21412_v52, %v9765_v1  ;;  %v11020_v62 = vsel %vm11019_vm14, %v11018_v53, 0  ;;  %v22890_v12 = vld [vmem:[#allocation57_spill] sm:$0xff] }
 0xc39   :  { %vm9803_vm11 = vcmp.lt.s32.totalorder %v9801_v63, %v9802_v61  ;;  %v11131_v30 = vsel %vm11130_vm9, %v11128_v34, %v11129_v21  ;;  %v9730_v4 = vsel %vm9729_vm13, %v9728_v0, %v9690_v23  ;;  %v9768_v36 = vadd.s32 64, %v9767_v49  ;;  %v22889_v34 = vld [vmem:[#allocation58_spill] sm:$0xff]  ;;  %v22891_v23 = vld [vmem:[#allocation44_spill] sm:$0xff] }
 0xc3a   :  { %v11132_v25 = vrot.slane %v11131_v30, 2  ;;  %v11250_v16 = vand.u32 4294901760, %v21523_v38  ;;  %v9804_v9 = vsel %vm9803_vm11, %v9801_v63, %v9802_v61  ;;  %v11057_v27 = vsel %vm21498_vm8, %v21403_v35, %v11055_v15  ;;  %v22893_v63 = vld [vmem:[#allocation62_spill] sm:$0xff]  ;;  %v22894_v21 = vld [vmem:[#allocation64_spill] sm:$0xff]  ;;  %v22895_v61 = vld [vmem:[#allocation65_spill] sm:$0xff] }
 0xc3b   :  { %v9770_v39 = vsel %vm9769_vm2, %v9768_v36, %v9730_v4  ;;  %v9805_v54 = vrot.slane %v9804_v9, 1  ;;  %vm11096_vm14 = vcmp.lt.s32.totalorder %v21466_v45, %v11095_v18  ;;  %v11058_v14 = vadd.s32 32, %v11057_v27  ;;  %v22896_v0 = vld [vmem:[#allocation66_spill] sm:$0xff] }
 0xc3c   :  { %vm11133_vm15 = vcmp.lt.s32.totalorder %v11131_v30, %v11132_v25  ;;  %v11251_v47 = vsub.f32 %v21523_v38, %v11250_v16  ;;  %v11097_v52 = vsel %vm11096_vm14, %v21466_v45, %v11095_v18  ;;  %vm22863_vm2 = vcmp.gt.f32.partialorder %v21267_v60, %v21408_v57  ;;  %v22892_v18 = vld [vmem:[#allocation48_spill] sm:$0xff] }
 0xc3d   :  { %vm9806_vm13 = vcmp.lt.s32.totalorder %v9804_v9, %v9805_v54  ;;  %v11098_v59 = vadd.s32 64, %v11097_v52  ;;  %v11134_v26 = vsel %vm11133_vm15, %v11131_v30, %v11132_v25  ;;  %v11060_v5 = vsel %vm22863_vm2, %v11058_v14, %v11020_v62 }
 0xc3e   :  { %v11252_v1 = vand.u32 4294901760, %v11251_v47  ;;  %v9807_v56 = vsel %vm9806_vm13, %v9804_v9, %v9805_v54  ;;  %v11135_v35 = vrot.slane %v11134_v26, 1  ;;  %vm22864_vm5 = vcmp.gt.f32.partialorder %v21343_v51, %v21419_v13  ;;  %v22875_v13 = vld [vmem:[#allocation37_spill] sm:$0xff] }
 0xc3f   :  { %v9808_v15 = vadd.s32 96, %v9807_v56  ;;  %v11100_v2 = vsel %vm22864_vm5, %v11098_v59, %v11060_v5  ;;  %vm22865_vm3 = vmmov 0   ;;  %v22876_v33 = vpack.c.bf16 %v22874_v43, %v22875_v13 }
 0xc40   :  { %15390 = vmatmul.mubr.f32.vlgmr.msra.gmra.mrb[94].mxu1 %v11252_v1  ;;  %vm11136_vm0 = vcmp.lt.s32.totalorder %v11134_v26, %v11135_v35  ;;  %v22879_v29 = vpack.c.bf16 %v22877_v42, %v22878_v41  ;;  %v22882_v50 = vpack.c.bf16 %v22880_v48, %v22881_v7  ;;  %v22885_v46 = vpack.c.bf16 %v22883_v44, %v22884_v24 }
 0xc41   :  { %16205 = vmatpush3.bf16.msra.mxu1 %v21025_v20  ;;  %15424 = vmatprep.mubr.msk.f32.mxu1 %vm22865_vm3, %v22790_v10  ;;  %v9810_v45 = vsel %vm9809_vm4, %v9808_v15, %v9770_v39  ;;  %v11137_v3 = vsel %vm11136_vm0, %v11134_v26, %v11135_v35  ;;  %v22866_v20 = vld [vmem:[#allocation55_spill] sm:$0xff]  ;;  %v22888_v8 = vpack.c.bf16 %v22886_v31, %v22887_v37  ;;  %v22898_v49 = vand.u32 4294901760, %v20942_v22 }
 0xc42   :  { %16206 = vmatprep.subr.bf16.mxu1 %v22782_v17  ;;  %v11138_v60 = vadd.s32 96, %v11137_v3  ;;  %v22897_v53 = vand.u32 4294901760, %v22866_v20  ;;  %v22905_v54 = vand.u32 4294901760, %v22878_v41  ;;  %v22906_v27 = vand.u32 4294901760, %v22877_v42  ;;  %v11811_v3 = vld [vmem:[#allocation2 + $0x1b8] sm:$0xff] }
 0xc43   :  { %v22907_v14 = vand.u32 4294901760, %v22881_v7  ;;  %v22908_v52 = vand.u32 4294901760, %v22880_v48  ;;  %v22909_v26 = vand.u32 4294901760, %v22884_v24  ;;  %v22910_v1 = vand.u32 4294901760, %v22883_v44 }
 0xc44   :  { %v11140_v51 = vsel %vm11139_vm7, %v11138_v60, %v11100_v2  ;;  %v16276_v62 = vpack.c.bf16 %v22898_v49, %v22897_v53  ;;  %v16288_v47 = vpack.c.bf16 %v22906_v27, %v22905_v54  ;;  %v22911_v5 = vand.u32 4294901760, %v22887_v37  ;;  %v11809_v2 = vld [vmem:[#allocation2 + $0x1a8] sm:$0xff] }
 0xc45   :  { %16208 = vmatpush3.bf16.msra.mxu1 %v21030_v58  ;;  %v11144_v57 = vsel %vm11142_vm10, %v9810_v45, %v11140_v51  ;;  %v22867_v58 = vpack.c.bf16 %v20942_v22, %v22866_v20  ;;  %v16291_v59 = vpack.c.bf16 %v22908_v52, %v22907_v14  ;;  %v16294_v56 = vpack.c.bf16 %v22910_v1, %v22909_v26  ;;  %v11810_v45 = vld [vmem:[#allocation2 + $0x1b0] sm:$0xff] }
 0xc46   :  { %16209 = vmatprep.subr.bf16.mxu1 %v22782_v17  ;;  %11145 = vst [vmem:[#allocation6] sm:$0x3] %v11144_v57  ;;  %v22912_v35 = vand.u32 4294901760, %v22886_v31  ;;  %v11826_v60 = vand.u32 4294901760, %v11809_v2  ;;  %v11829_v51 = vand.u32 4294901760, %v11810_v45  ;;  %v11812_v57 = vld [vmem:[#allocation2 + $0x1c0] sm:$0xff] }
 0xc47   :  { %v11832_v20 = vand.u32 4294901760, %v11811_v3  ;;  %vm22913_vm10 = vcmask 523264  }
 0xc48   :  { %v16297_v15 = vpack.c.bf16 %v22912_v35, %v22911_v5 }
 0xc49   :  { %16211 = vmatpush3.bf16.msra.mxu1 %v21039_v11  ;;  %v22868_v11 = vld [vmem:[#allocation42_spill] sm:$0xff] }
 0xc4a   :  { %16212 = vmatprep.subr.bf16.mxu1 %v22782_v17  ;;  %v22900_v4 = vand.u32 4294901760, %v22868_v11 }
 0xc4d   :  { %16214 = vmatpush3.bf16.msra.mxu1 %v21046_v40  ;;  %v22869_v40 = vld [vmem:[#allocation12_spill] sm:$0xff] }
 0xc4e   :  { %16215 = vmatprep.subr.bf16.mxu1 %v22782_v17  ;;  %v22899_v30 = vand.u32 4294901760, %v22869_v40 }
 0xc50   :  { %v16279_v36 = vpack.c.bf16 %v22900_v4, %v22899_v30 }
 0xc51   :  { %16217 = vmatpush3.bf16.msra.mxu1 %v21060_v32  ;;  %v22870_v32 = vpack.c.bf16 %v22868_v11, %v22869_v40  ;;  %v11814_v11 = vld [vmem:[#allocation2 + $0x1d0] sm:$0xff]  ;;  %v11835_v40 = vand.u32 4294901760, %v11812_v57 }
 0xc52   :  { %16218 = vmatprep.subr.bf16.mxu1 %v22782_v17 }
 0xc53   :  { %v21701_v42 = vpack.c.bf16 %v11835_v40, %v11832_v20  ;;  %v21703_v41 = vsub.f32 %v11812_v57, %v11835_v40 }
 0xc55   :  { %16220 = vmatpush3.bf16.msra.mxu1 %v21072_v6  ;;  %v22871_v6 = vld [vmem:[#allocation41_spill] sm:$0xff]  ;;  %v11932_v31 = vand.u32 4294901760, %v21703_v41 }
 0xc56   :  { %16221 = vmatprep.subr.bf16.mxu1 %v22782_v17  ;;  %v22902_v25 = vand.u32 4294901760, %v22871_v6 }
 0xc59   :  { %16223 = vmatpush3.bf16.msra.mxu1 %v21083_v19  ;;  %v22872_v19 = vld [vmem:[#allocation63_spill] sm:$0xff] }
 0xc5a   :  { %16224 = vmatprep.subr.bf16.mxu1 %v22782_v17  ;;  %v22901_v22 = vand.u32 4294901760, %v22872_v19 }
 0xc5c   :  { %v16282_v9 = vpack.c.bf16 %v22902_v25, %v22901_v22 }
 0xc5d   :  { %16226 = vmatpush3.bf16.msra.mxu1 %v21091_v55  ;;  %v22873_v55 = vpack.c.bf16 %v22871_v6, %v22872_v19  ;;  %v11841_v6 = vand.u32 4294901760, %v11814_v11  ;;  %v11815_v19 = vld [vmem:[#allocation2 + $0x1d8] sm:$0xff] }
 0xc5e   :  { %16227 = vmatprep.subr.bf16.mxu1 %v22782_v17  ;;  %v11844_v7 = vand.u32 4294901760, %v11815_v19 }
 0xc5f   :  { %v21708_v48 = vsub.f32 %v11814_v11, %v11841_v6 }
 0xc60   :  { %15425 = vmatmul.mubr.f32.vlgmr.msra.gmra.mrb[94].mxu1 %v21514_v28  ;;  %v21715_v37 = vsub.f32 %v11815_v19, %v11844_v7 }
 0xc61   :  { %16229 = vmatpush3.bf16.msra.mxu1 %v22867_v58  ;;  %15459 = vmatprep.mubr.msk.f32.mxu1 %vm22865_vm3, %v22790_v10  ;;  %v11813_v58 = vld [vmem:[#allocation2 + $0x1c8] sm:$0xff] }
 0xc62   :  { %16230 = vmatprep.subr.bf16.mxu1 %v22782_v17 }
 0xc65   :  { %16232 = vmatpush3.bf16.msra.mxu1 %v22870_v32  ;;  %v11838_v32 = vand.u32 4294901760, %v11813_v58 }
 0xc66   :  { %16233 = vmatprep.subr.bf16.mxu1 %v22782_v17 }
 0xc69   :  { %16235 = vmatpush3.bf16.msra.mxu1 %v22873_v55  ;;  %v11816_v55 = vld [vmem:[#allocation2 + $0x1e0] sm:$0xff] }
 0xc6a   :  { %16236 = vmatprep.subr.bf16.mxu1 %v22782_v17 }
 0xc6d   :  { %16238 = vmatpush3.bf16.msra.mxu1 %v22876_v33  ;;  %v21697_v33 = vsub.f32 %v11810_v45, %v11829_v51 }
 0xc6e   :  { %16239 = vmatprep.subr.bf16.mxu1 %v22782_v17 }
 0xc6f   :  { %v11918_v24 = vand.u32 4294901760, %v21697_v33 }
 0xc71   :  { %16241 = vmatpush3.bf16.msra.mxu1 %v22879_v29  ;;  %v21705_v29 = vsub.f32 %v11813_v58, %v11838_v32 }
 0xc72   :  { %16242 = vmatprep.subr.bf16.mxu1 %v22782_v17 }
 0xc75   :  { %16244 = vmatpush3.bf16.msra.mxu1 %v22882_v50  ;;  %v11847_v50 = vand.u32 4294901760, %v11816_v55 }
 0xc76   :  { %16245 = vmatprep.subr.bf16.mxu1 %v22782_v17 }
 0xc79   :  { %16247 = vmatpush3.bf16.msra.mxu1 %v22885_v46 }
 0xc7a   :  { %16248 = vmatprep.subr.bf16.mxu1 %v22782_v17 }
 0xc7d   :  { %16250 = vmatpush3.bf16.msra.mxu1 %v22888_v8  ;;  %v21717_v8 = vsub.f32 %v11816_v55, %v11847_v50 }
 0xc7e   :  { %16251 = vmatprep.subr.bf16.mxu1 %v22782_v17 }
 0xc7f   :  { %v16357_v5 = vpack.c.bf16 %v21717_v8, %v21715_v37 }
 0xc80   :  { %15460 = vmatmul.mubr.f32.vlgmr.msra.gmra.mrb[94].mxu1 %v21523_v38  ;;  %v22903_v38 = vand.u32 4294901760, %v22875_v13  ;;  %v21695_v13 = vsub.f32 %v11809_v2, %v11826_v60 }
 0xc81   :  { %16253 = vmatpush3.bf16.msra.mxu1 %v22889_v34  ;;  %15494 = vmatprep.mubr.msk.f32.mxu1 %vm22865_vm3, %v22790_v10 }
 0xc82   :  { %16254 = vmatprep.subr.bf16.mxu1 %v22782_v17  ;;  %v11911_v44 = vand.u32 4294901760, %v21695_v13 }
 0xc84   :  { %v16372_v35 = vpack.c.bf16 %v11918_v24, %v11911_v44 }
 0xc85   :  { %16256 = vmatpush3.bf16.msra.mxu1 %v22890_v12 }
 0xc86   :  { %16257 = vmatprep.subr.bf16.mxu1 %v22782_v17 }
 0xc89   :  { %16259 = vmatpush3.bf16.msra.mxu1 %v22891_v23 }
 0xc8a   :  { %16260 = vmatprep.subr.bf16.mxu1 %v22782_v17 }
 0xc8d   :  { %16262 = vmatpush3.bf16.msra.mxu1 %v22892_v18 }
 0xc8e   :  { %16263 = vmatprep.subr.bf16.mxu1 %v22782_v17 }
 0xc91   :  { %16265 = vmatpush3.bf16.msra.mxu1 %v22893_v63 }
 0xc92   :  { %16266 = vmatprep.subr.bf16.mxu1 %v22782_v17 }
 0xc95   :  { %16268 = vmatpush3.bf16.msra.mxu1 %v22894_v21 }
 0xc96   :  { %16269 = vmatprep.subr.bf16.mxu1 %v22782_v17 }
 0xc99   :  { %16271 = vmatpush3.bf16.msra.mxu1 %v22895_v61 }
 0xc9a   :  { %16272 = vmatprep.subr.bf16.mxu1 %v22782_v17 }
 0xc9d   :  { %16274 = vmatpush3.bf16.msra.mxu1 %v22896_v0 }
 0xc9e   :  { %16275 = vmatprep.subr.bf16.mxu1 %v22782_v17 }
 0xca0   :  { %15495 = vmatmul.mubr.f32.vlgmr.msra.gmra.mrb[94].mxu1 %v11250_v16  ;;  %v22904_v16 = vand.u32 4294901760, %v22874_v43  ;;  %v21693_v43 = vpack.c.bf16 %v11829_v51, %v11826_v60 }
 0xca1   :  { %16277 = vmatpush3.bf16.msra.mxu1 %v16276_v62  ;;  %15529 = vmatprep.mubr.msk.f32.mxu1 %vm22865_vm3, %v22790_v10 }
 0xca2   :  { %16278 = vmatprep.subr.bf16.mxu1 %v22782_v17  ;;  %v16285_v39 = vpack.c.bf16 %v22904_v16, %v22903_v38  ;;  %16325 = vmatpush3.bf16.msra.mxu0 %v21693_v43  ;;  %v21733_v38 = vpack.c.bf16 %v11847_v50, %v11844_v7 }
 0xca3   :  { %16326 = vmatprep.subr.bf16.mxu0 %v22782_v17 }
 0xca5   :  { %16280 = vmatpush3.bf16.msra.mxu1 %v16279_v36 }
 0xca6   :  { %16281 = vmatprep.subr.bf16.mxu1 %v22782_v17  ;;  %16328 = vmatpush3.bf16.msra.mxu0 %v21701_v42 }
 0xca7   :  { %16329 = vmatprep.subr.bf16.mxu0 %v22782_v17 }
 0xca9   :  { %16283 = vmatpush3.bf16.msra.mxu1 %v16282_v9  ;;  %v11953_v9 = vand.u32 4294901760, %v21715_v37 }
 0xcaa   :  { %16284 = vmatprep.subr.bf16.mxu1 %v22782_v17 }
 0xcab   :  { %v11954_v54 = vsub.f32 %v21715_v37, %v11953_v9 }
 0xcad   :  { %16286 = vmatpush3.bf16.msra.mxu1 %v16285_v39  ;;  %v11960_v39 = vand.u32 4294901760, %v21717_v8  ;;  %v11955_v14 = vand.u32 4294901760, %v11954_v54 }
 0xcae   :  { %16287 = vmatprep.subr.bf16.mxu1 %v22782_v17 }
 0xcaf   :  { %v16381_v45 = vpack.c.bf16 %v11960_v39, %v11953_v9 }
 0xcb1   :  { %16289 = vmatpush3.bf16.msra.mxu1 %v16288_v47  ;;  %v11961_v47 = vsub.f32 %v21717_v8, %v11960_v39 }
 0xcb2   :  { %16290 = vmatprep.subr.bf16.mxu1 %v22782_v17 }
 0xcb3   :  { %v11962_v52 = vand.u32 4294901760, %v11961_v47 }
 0xcb5   :  { %16292 = vmatpush3.bf16.msra.mxu1 %v16291_v59  ;;  %v16348_v59 = vpack.c.bf16 %v21697_v33, %v21695_v13  ;;  %v16345_v26 = vpack.c.bf16 %v11962_v52, %v11955_v14 }
 0xcb6   :  { %16293 = vmatprep.subr.bf16.mxu1 %v22782_v17 }
 0xcb9   :  { %16295 = vmatpush3.bf16.msra.mxu1 %v16294_v56  ;;  %v16354_v56 = vpack.c.bf16 %v21708_v48, %v21705_v29 }
 0xcba   :  { %16296 = vmatprep.subr.bf16.mxu1 %v22782_v17 }
 0xcbd   :  { %16298 = vmatpush3.bf16.msra.mxu1 %v16297_v15 }
 0xcbe   :  { %16299 = vmatprep.subr.bf16.mxu1 %v22782_v17 }
 0xcc0   :  { %15530 = vmatmul.mubr.f32.vlgmr.msra.gmra.mrb[94].mxu1 %v21514_v28 }
 0xcc1   :  { %16301 = vmatpush3.bf16.msra.mxu1 %v22889_v34  ;;  %15564 = vmatprep.mubr.msk.f32.mxu1 %vm22865_vm3, %v22790_v10  ;;  %v11912_v34 = vsub.f32 %v21695_v13, %v11911_v44 }
 0xcc2   :  { %16302 = vmatprep.subr.bf16.mxu1 %v22782_v17 }
 0xcc5   :  { %16304 = vmatpush3.bf16.msra.mxu1 %v22890_v12  ;;  %v11919_v12 = vsub.f32 %v21697_v33, %v11918_v24 }
 0xcc6   :  { %16305 = vmatprep.subr.bf16.mxu1 %v22782_v17 }
 0xcc7   :  { %v11920_v53 = vand.u32 4294901760, %v11919_v12 }
 0xcc9   :  { %16307 = vmatpush3.bf16.msra.mxu1 %v22891_v23 }
 0xcca   :  { %16308 = vmatprep.subr.bf16.mxu1 %v22782_v17 }
 0xccd   :  { %16310 = vmatpush3.bf16.msra.mxu1 %v22892_v18  ;;  %v11933_v18 = vsub.f32 %v21703_v41, %v11932_v31 }
 0xcce   :  { %16311 = vmatprep.subr.bf16.mxu1 %v22782_v17 }
 0xccf   :  { %v11934_v62 = vand.u32 4294901760, %v11933_v18 }
 0xcd1   :  { %16313 = vmatpush3.bf16.msra.mxu1 %v22893_v63  ;;  %v11939_v63 = vand.u32 4294901760, %v21705_v29 }
 0xcd2   :  { %16314 = vmatprep.subr.bf16.mxu1 %v22782_v17 }
 0xcd3   :  { %v11940_v30 = vsub.f32 %v21705_v29, %v11939_v63 }
 0xcd5   :  { %16316 = vmatpush3.bf16.msra.mxu1 %v22894_v21  ;;  %v21725_v21 = vpack.c.bf16 %v11841_v6, %v11838_v32  ;;  %v11941_v25 = vand.u32 4294901760, %v11940_v30 }
 0xcd6   :  { %16317 = vmatprep.subr.bf16.mxu1 %v22782_v17 }
 0xcd7   :  { %16331 = vmatpush3.bf16.msra.mxu0 %v21725_v21 }
 0xcd8   :  { %16332 = vmatprep.subr.bf16.mxu0 %v22782_v17 }
 0xcd9   :  { %16319 = vmatpush3.bf16.msra.mxu1 %v22895_v61  ;;  %v11913_v61 = vand.u32 4294901760, %v11912_v34 }
 0xcda   :  { %16320 = vmatprep.subr.bf16.mxu1 %v22782_v17 }
 0xcdb   :  { %v16336_v36 = vpack.c.bf16 %v11920_v53, %v11913_v61  ;;  %16334 = vmatpush3.bf16.msra.mxu0 %v21733_v38 }
 0xcdc   :  { %16335 = vmatprep.subr.bf16.mxu0 %v22782_v17 }
 0xcdd   :  { %16322 = vmatpush3.bf16.msra.mxu1 %v22896_v0  ;;  %v11946_v0 = vand.u32 4294901760, %v21708_v48 }
 0xcdf   :  { %v11947_v4 = vsub.f32 %v21708_v48, %v11946_v0  ;;  %v16378_v2 = vpack.c.bf16 %v11946_v0, %v11939_v63 }
 0xce0   :  { %15565 = vmatmul.mubr.f32.vlgmr.msra.gmra.mrb[94].mxu1 %v21514_v28  ;;  %v21699_v28 = vsub.f32 %v11811_v3, %v11832_v20  ;;  %v12409_v3 = vld [vmem:[#allocation2 + $0x1a0] ss:$0 sm:$0xff] }
 0xce1   :  { %v11948_v16 = vand.u32 4294901760, %v11947_v4 }
 0xce2   :  { %v11925_v46 = vand.u32 4294901760, %v21699_v28  ;;  %v16351_v1 = vpack.c.bf16 %v21703_v41, %v21699_v28 }
 0xce3   :  { %v16342_v27 = vpack.c.bf16 %v11948_v16, %v11941_v25 }
 0xce4   :  { %v11926_v23 = vsub.f32 %v21699_v28, %v11925_v46  ;;  %v16375_v15 = vpack.c.bf16 %v11932_v31, %v11925_v46 }
 0xce6   :  { %v11927_v49 = vand.u32 4294901760, %v11926_v23 }
 0xce8   :  { %v16339_v22 = vpack.c.bf16 %v11934_v62, %v11927_v49 }
 0xdb3   :  { %v11804_v60 = vpop.f32.mrb[94].mxu1 }
 0xdb4   :  { %v16487_v51 = vadd.f32 %v12409_v3, %v11804_v60  ;;  %v15566_v57 = vpop.f32.mrb[95].mxu1 }
 0xdb6   :  { %v11808_v20 = vmax.f32 %v16487_v51, 0.0 }
 0xdb8   :  { %v11823_v58 = vsel %vm22913_vm10, %v11808_v20, 0 }
 0xdb9   :  { %v11898_v11 = vand.u32 4294901760, %v11823_v58 }
 0xdbb   :  { %v11899_v40 = vsub.f32 %v11823_v58, %v11898_v11 }
 0xdbd   :  { %v11900_v32 = vand.u32 4294901760, %v11899_v40 }
 0xdbf   :  { %v11901_v6 = vsub.f32 %v11899_v40, %v11900_v32 }
 0xdc1   :  { %v11902_v19 = vand.u32 4294901760, %v11901_v6 }
 0xdc3   :  { %15584 = vmatmul.mubr.f32.vlgmr.msra.gmra.mrb[72].mxu0 %v11902_v19 }
 0xdc4   :  { %16337 = vmatpush3.bf16.msra.mxu0 %v16336_v36  ;;  %15602 = vmatprep.mubr.msk.f32.mxu0 %vm22865_vm3, %v22790_v10 }
 0xdc5   :  { %16338 = vmatprep.subr.bf16.mxu0 %v22782_v17 }
 0xdc8   :  { %16340 = vmatpush3.bf16.msra.mxu0 %v16339_v22 }
 0xdc9   :  { %16341 = vmatprep.subr.bf16.mxu0 %v22782_v17 }
 0xdcc   :  { %16343 = vmatpush3.bf16.msra.mxu0 %v16342_v27 }
 0xdcd   :  { %16344 = vmatprep.subr.bf16.mxu0 %v22782_v17 }
 0xdd0   :  { %16346 = vmatpush3.bf16.msra.mxu0 %v16345_v26 }
 0xdd1   :  { %16347 = vmatprep.subr.bf16.mxu0 %v22782_v17 }
 0xdd3   :  { %15603 = vmatmul.mubr.f32.vlgmr.msra.gmra.mrb[72].mxu0 %v11898_v11 }
 0xdd4   :  { %16349 = vmatpush3.bf16.msra.mxu0 %v16348_v59  ;;  %15621 = vmatprep.mubr.msk.f32.mxu0 %vm22865_vm3, %v22790_v10 }
 0xdd5   :  { %16350 = vmatprep.subr.bf16.mxu0 %v22782_v17 }
 0xdd8   :  { %16352 = vmatpush3.bf16.msra.mxu0 %v16351_v1 }
 0xdd9   :  { %16353 = vmatprep.subr.bf16.mxu0 %v22782_v17 }
 0xddc   :  { %16355 = vmatpush3.bf16.msra.mxu0 %v16354_v56 }
 0xddd   :  { %16356 = vmatprep.subr.bf16.mxu0 %v22782_v17 }
 0xde0   :  { %16358 = vmatpush3.bf16.msra.mxu0 %v16357_v5 }
 0xde1   :  { %16359 = vmatprep.subr.bf16.mxu0 %v22782_v17 }
 0xde3   :  { %15622 = vmatmul.mubr.f32.vlgmr.msra.gmra.mrb[72].mxu0 %v11899_v40 }
 0xde4   :  { %16361 = vmatpush3.bf16.msra.mxu0 %v21693_v43  ;;  %15640 = vmatprep.mubr.msk.f32.mxu0 %vm22865_vm3, %v22790_v10 }
 0xde5   :  { %16362 = vmatprep.subr.bf16.mxu0 %v22782_v17 }
 0xde8   :  { %16364 = vmatpush3.bf16.msra.mxu0 %v21701_v42 }
 0xde9   :  { %16365 = vmatprep.subr.bf16.mxu0 %v22782_v17 }
 0xdec   :  { %16367 = vmatpush3.bf16.msra.mxu0 %v21725_v21 }
 0xded   :  { %16368 = vmatprep.subr.bf16.mxu0 %v22782_v17 }
 0xdf0   :  { %16370 = vmatpush3.bf16.msra.mxu0 %v21733_v38 }
 0xdf1   :  { %16371 = vmatprep.subr.bf16.mxu0 %v22782_v17 }
 0xdf3   :  { %15641 = vmatmul.mubr.f32.vlgmr.msra.gmra.mrb[72].mxu0 %v11900_v32 }
 0xdf4   :  { %16373 = vmatpush3.bf16.msra.mxu0 %v16372_v35  ;;  %15659 = vmatprep.mubr.msk.f32.mxu0 %vm22865_vm3, %v22790_v10 }
 0xdf5   :  { %16374 = vmatprep.subr.bf16.mxu0 %v22782_v17 }
 0xdf8   :  { %16376 = vmatpush3.bf16.msra.mxu0 %v16375_v15 }
 0xdf9   :  { %16377 = vmatprep.subr.bf16.mxu0 %v22782_v17 }
 0xdfc   :  { %16379 = vmatpush3.bf16.msra.mxu0 %v16378_v2 }
 0xdfd   :  { %16380 = vmatprep.subr.bf16.mxu0 %v22782_v17 }
 0xe00   :  { %16382 = vmatpush3.bf16.msra.mxu0 %v16381_v45 }
 0xe01   :  { %16383 = vmatprep.subr.bf16.mxu0 %v22782_v17 }
 0xe03   :  { %15660 = vmatmul.mubr.f32.vlgmr.msra.gmra.mrb[72].mxu0 %v11898_v11 }
 0xe04   :  { %16385 = vmatpush3.bf16.msra.mxu0 %v21693_v43  ;;  %15678 = vmatprep.mubr.msk.f32.mxu0 %vm22865_vm3, %v22790_v10 }
 0xe05   :  { %16386 = vmatprep.subr.bf16.mxu0 %v22782_v17 }
 0xe08   :  { %16388 = vmatpush3.bf16.msra.mxu0 %v21701_v42 }
 0xe09   :  { %16389 = vmatprep.subr.bf16.mxu0 %v22782_v17 }
 0xe0c   :  { %16391 = vmatpush3.bf16.msra.mxu0 %v21725_v21 }
 0xe0d   :  { %16392 = vmatprep.subr.bf16.mxu0 %v22782_v17 }
 0xe10   :  { %16394 = vmatpush3.bf16.msra.mxu0 %v21733_v38 }
 0xe13   :  { %15679 = vmatmul.mubr.f32.vlgmr.msra.gmra.mrb[72].mxu0 %v11898_v11 }
 0xe14   :  { %17278 = shalt.err (!%p17275_p12)
}
 0xe15   :  { %s17279_s8 = scalar_lea.hbm %s21814_s3, 32 }
 0xe16   :  { %p17280_p13 = scmp.ne.s32.totalorder %s21814_s3, %s17279_s8  ;;  %p17283_p0 = scmp.lt.u32.totalorder %s17279_s8, %s21814_s3 }
 0xe18   :  { %p17285_p1 = pnand %p17283_p0, %p17280_p13 }
 0xe1a   :  { %17288 = shalt.err (!%p17285_p1)
}
 0xe1b   :  { %12384 = dma.vmem_to_hbm [thread:$0]  %s12382_s4, 32, %s21814_s3, [#allocation7]   ;;  %v12410_v17 = vld [vmem:[#allocation2 + $0x1e8] ss:$0 sm:$0xff]  ;;  %vm12363_vm4 = vcmask 254976  }
 0xe1c   :  { %s17325_s15 = smov [#allocation5]  }
 0xe1d   :  { %s12371_s16 = sshll.u32 %s17325_s15, 4  ;;  %s12372_s16 = int_to_ptr.vmem [resolvable:$true] %s12371_s16 }
 0xe1e   :  { %s17289_s17 = scalar_lea.vmem %s12372_s16, 32  ;;  %p17294_p3 = scmp.lt.s32.totalorder %s12372_s16, %s12372_s16 }
 0xe1f   :  { %p17290_p2 = scmp.ne.s32.totalorder %s12372_s16, %s17289_s17  ;;  %p17295_p4 = scmp.lt.s32.totalorder %s17289_s17, %s17289_s17 }
 0xe21   :  { %p17296_p5 = por %p17295_p4, %p17294_p3 }
 0xe23   :  { %p17297_p6 = pnand %p17296_p5, %p17290_p2 }
 0xee6   :  { %v12358_v10 = vpop.f32.mrb[72].mxu0 }
 0xee7   :  { %v16488_v55 = vadd.f32 %v12410_v17, %v12358_v10  ;;  %v15680_v43 = vpop.f32.mrb[73].mxu0 }
 0xee9   :  { %v12362_v13 = vmax.f32 %v16488_v55, 0.0 }
 0xeeb   :  { %12364 = vst.msk [vmem:[#allocation5] sm:$0x3] %vm12363_vm4, %v12362_v13 }
 0xeec   :  { %17300 = shalt.err (!%p17297_p6)
}
 0xeed   :  { %s17301_s3 = scalar_lea.hbm %s21813_s2, 32 }
 0xeee   :  { %p17302_p7 = scmp.ne.s32.totalorder %s21813_s2, %s17301_s3  ;;  %p17305_p8 = scmp.lt.u32.totalorder %s17301_s3, %s21813_s2 }
 0xef0   :  { %p17307_p9 = pnand %p17305_p8, %p17302_p7 }
 0xef2   :  { %17310 = shalt.err (!%p17307_p9)
}
 0xef3   :  { %12374 = dma.vmem_to_hbm [thread:$0]  %s12372_s16, 32, %s21813_s2, [#allocation4]  }
 0xef4   :  { %17313 = dma.done.wait [#allocation4], 32  }
 0xef5   :  { %17314 = vsyncadd [#allocation4], 4294967264 }
 0xef6   :  { %17315 = dma.done.wait [#allocation7], 32  }
 0xef7   :  { %17316 = vsyncadd [#allocation7], 4294967264 }
 0xef8   :  { %12391 = vsyncpa [#allocation3], 1 }
 0xef9   :  { %12392 = vsyncpa [#allocation4], 1 }
 0xefa   :  { %12393 = vsyncpa [#allocation7], 1 }

</bundles_post_ra>
